<compile_context>
chip_gen: v7x
topology: tpu7x:2x2x1
jax: 0.10.0
libtpu: 0.0.40
codegen_flags: <defaults>
</compile_context>

<pallas_src>
import jax
import jax.numpy as jnp
from jax import lax
from jax.experimental import pallas as pl
from jax.experimental.pallas import tpu as pltpu

LANE = 128
SUBLANE = 8
MAX_BLOCK_ROWS = 2048        # 2048 x 128 f32 = 1 MiB per input block
ACC_ROWS = 64                # (64,128) f32 carry accumulator (8 vreg chains)
SOLO_MIN_ELEMS = 128 * 1024  # >= 512 KiB f32: own pallas_call (no slab copy)
NUM_CORES = 2                # v7x has 2 TCs; extra slot is harmless on v5e/v6e
SLAB_MAX_WASTE = 0.25        # max padding overhead allowed in the small-pair slab


def _round_up(x: int, m: int) -> int:
    return ((x + m - 1) // m) * m


def _cdiv(a: int, b: int) -> int:
    return (a + b - 1) // b


def _stream_dtype(a, b):
    dt = jnp.result_type(a.dtype, b.dtype)
    return dt if jnp.issubdtype(dt, jnp.floating) else jnp.float32


# --------------------------------------------------------------------------
# Solo path: one large pair, zero-copy (rows, 128) view, optional core split.
# --------------------------------------------------------------------------
def _make_pair_kernel(block_rows, rows_total, steps_per_core, nblocks, acc_rows):
    nslices = block_rows // acc_rows
    ragged = (rows_total % block_rows) != 0

    def _accumulate(a_ref, b_ref, out_ref, step, masked):
        if masked:
            # Hoisted: row index of each element of a slice at offset 0.
            base = step * block_rows + lax.broadcasted_iota(
                jnp.int32, (acc_rows, LANE), 0)

        def body(s, acc):
            r0 = pl.multiple_of(s * acc_rows, acc_rows)
            # bf16-native sub/abs; single cast to f32 for accumulation.
            d = jnp.abs(a_ref[pl.ds(r0, acc_rows), :]
                        - b_ref[pl.ds(r0, acc_rows), :]).astype(jnp.float32)
            if masked:
                d = jnp.where((base + r0) < rows_total, d, 0.0)
            return acc + d

        partial = lax.fori_loop(0, nslices, body,
                                jnp.zeros((acc_rows, LANE), jnp.float32),
                                unroll=True)
        out_ref[...] += partial

    def kernel(a_ref, b_ref, out_ref):
        c = pl.program_id(0)
        k = pl.program_id(1)

        @pl.when(k == 0)
        def _init():
            out_ref[...] = jnp.zeros_like(out_ref)

        step = c * steps_per_core + k

        if ragged:
            @pl.when(step < nblocks - 1)      # full interior blocks: no mask
            def _full():
                _accumulate(a_ref, b_ref, out_ref, step, masked=False)

            @pl.when(step == nblocks - 1)     # ragged tail block: masked
            def _tail():
                _accumulate(a_ref, b_ref, out_ref, step, masked=True)
        else:
            @pl.when(step < nblocks)          # skip clamped duplicate steps
            def _full():
                _accumulate(a_ref, b_ref, out_ref, step, masked=False)

    return kernel


def _pair_loss_sum(a2d, b2d):
    """sum(|a - b|) for one lane-dense (rows, 128) pair via one pallas_call."""
    rows = a2d.shape[0]
    block_rows = min(MAX_BLOCK_ROWS, _round_up(rows, ACC_ROWS))
    acc_rows = min(ACC_ROWS, block_rows)
    nblocks = _cdiv(rows, block_rows)
    cores = min(NUM_CORES, nblocks)
    steps_per_core = _cdiv(nblocks, cores)

    kernel = _make_pair_kernel(block_rows, rows, steps_per_core, nblocks,
                               acc_rows)

    def in_map(c, k):
        # Clamp so padded (duplicate) steps never DMA out of bounds; the
        # kernel gates their contribution off with pl.when.
        return (jnp.minimum(c * steps_per_core + k, nblocks - 1), 0)

    itemsize = jnp.dtype(a2d.dtype).itemsize
    cost = pl.CostEstimate(
        flops=3 * a2d.size, transcendentals=0,
        bytes_accessed=2 * a2d.size * itemsize + cores * acc_rows * LANE * 4)

    out = pl.pallas_call(
        kernel,
        out_shape=jax.ShapeDtypeStruct((cores, acc_rows, LANE), jnp.float32),
        grid_spec=pltpu.PrefetchScalarGridSpec(
            num_scalar_prefetch=0,
            grid=(cores, steps_per_core),
            in_specs=[pl.BlockSpec((block_rows, LANE), in_map),
                      pl.BlockSpec((block_rows, LANE), in_map)],
            out_specs=pl.BlockSpec((None, acc_rows, LANE),
                                   lambda c, k: (c, 0, 0)),
        ),
        compiler_params=pltpu.CompilerParams(
            dimension_semantics=("parallel", "arbitrary")),
        cost_estimate=cost,
    )(a2d, b2d)
    return jnp.sum(out)


# --------------------------------------------------------------------------
# Slab path: many small pairs of one dtype fused into a single pallas_call.
# --------------------------------------------------------------------------
def _pick_slab_rows(sizes):
    """Largest chunk (rows) whose total padding stays below SLAB_MAX_WASTE."""
    total = sum(sizes)
    for rows in (512, 256, 128, 64, 32, 16, 8):
        chunk = rows * LANE
        padded = sum(_round_up(s, chunk) for s in sizes)
        if padded <= (1.0 + SLAB_MAX_WASTE) * total:
            return rows
    return SUBLANE


def _make_slab_kernel(slab_rows, acc_rows):
    nslices = slab_rows // acc_rows

    def kernel(inv_n_ref, a_ref, b_ref, out_ref):
        i = pl.program_id(0)

        @pl.when(i == 0)
        def _init():
            out_ref[...] = jnp.zeros_like(out_ref)

        def body(s, acc):
            r0 = pl.multiple_of(s * acc_rows, acc_rows)
            d = jnp.abs(a_ref[pl.ds(r0, acc_rows), :]
                        - b_ref[pl.ds(r0, acc_rows), :]).astype(jnp.float32)
            return acc + d

        partial = lax.fori_loop(0, nslices, body,
                                jnp.zeros((acc_rows, LANE), jnp.float32),
                                unroll=True)
        # Precomputed f32 reciprocal (mean weight) from SMEM.
        out_ref[...] += partial * inv_n_ref[i]

    return kernel


def _slab_loss(pairs, dtype):
    sizes = [int(a.size) for a, _ in pairs]
    slab_rows = _pick_slab_rows(sizes)
    chunk = slab_rows * LANE
    acc_rows = min(ACC_ROWS, slab_rows)

    a_segs, b_segs, inv_n = [], [], []
    for (a, b), n in zip(pairs, sizes):
        padded = _round_up(n, chunk)
        af = a.reshape(-1).astype(dtype)
        bf = b.reshape(-1).astype(dtype)
        if padded != n:  # zero padding contributes |0 - 0| = 0 to the sum
            af = jnp.pad(af, (0, padded - n))
            bf = jnp.pad(bf, (0, padded - n))
        a_segs.append(af)
        b_segs.append(bf)
        inv_n.extend([1.0 / n] * (padded // chunk))

    A = jnp.concatenate(a_segs).reshape(-1, LANE)
    B = jnp.concatenate(b_segs).reshape(-1, LANE)
    inv_n = jnp.asarray(inv_n, dtype=jnp.float32)   # host-side reciprocal table
    num_chunks = int(inv_n.shape[0])

    itemsize = jnp.dtype(dtype).itemsize
    cost = pl.CostEstimate(
        flops=3 * A.size, transcendentals=0,
        bytes_accessed=2 * A.size * itemsize + acc_rows * LANE * 4)

    out = pl.pallas_call(
        _make_slab_kernel(slab_rows, acc_rows),
        out_shape=jax.ShapeDtypeStruct((acc_rows, LANE), jnp.float32),
        grid_spec=pltpu.PrefetchScalarGridSpec(
            num_scalar_prefetch=1,
            grid=(num_chunks,),
            in_specs=[pl.BlockSpec((slab_rows, LANE), lambda i, w: (i, 0)),
                      pl.BlockSpec((slab_rows, LANE), lambda i, w: (i, 0))],
            out_specs=pl.BlockSpec((acc_rows, LANE), lambda i, w: (0, 0)),
        ),
        compiler_params=pltpu.CompilerParams(
            dimension_semantics=("arbitrary",)),
        cost_estimate=cost,
    )(inv_n, A, B)
    return jnp.sum(out)


# --------------------------------------------------------------------------
# Public entry point: JAX/Pallas equivalent of FeatureLoss.forward.
# --------------------------------------------------------------------------
def feature_loss(inputs_list, targets_list):
    pairs = []
    for inputs, targets in zip(inputs_list, targets_list):
        for inp, tgt in zip(inputs, targets):
            assert inp.shape == tgt.shape, (inp.shape, tgt.shape)
            pairs.append((inp, tgt))

    loss = jnp.float32(0.0)
    slabs = {}  # streaming dtype -> list of small pairs
    for a, b in pairs:
        n = int(a.size)
        if n == 0:
            # torch.mean() of an empty tensor is NaN; preserve that behavior.
            loss = loss + jnp.float32(jnp.nan)
            continue
        dt = _stream_dtype(a, b)
        if n >= SOLO_MIN_ELEMS:
            # Large pair: no pad/concat slab copy; reshape to a lane-dense
            # (rows, 128) view and stream it directly.
            af = a.reshape(-1).astype(dt)
            bf = b.reshape(-1).astype(dt)
            if n % LANE:
                p = _round_up(n, LANE) - n
                af = jnp.pad(af, (0, p))
                bf = jnp.pad(bf, (0, p))
            af = af.reshape(-1, LANE)
            bf = bf.reshape(-1, LANE)
            # Mean weight applied once on the scalar in JAX (no per-step mul).
            loss = loss + _pair_loss_sum(af, bf) / jnp.float32(n)
        else:
            slabs.setdefault(jnp.dtype(dt), []).append((a, b))

    for dt, group in slabs.items():
        loss = loss + _slab_loss(group, dt)

    return loss


if __name__ == "__main__":
    key = jax.random.PRNGKey(0)

    # Feature-pyramid-style inputs (NCHW).  The first pair is large and
    # 128-aligned, exercising the zero-copy solo path (ragged last block +
    # 2-slot core-split accumulator); the rest exercise the per-dtype
    # small-pair slabs, including a bf16 pair and a non-128-multiple size.
    specs = [
        [((2, 8, 144, 144), jnp.float32),   # 331,776 elems -> solo path
         ((2, 4, 16, 16), jnp.float32)],
        [((2, 8, 8, 8), jnp.bfloat16),      # bf16 slab
         ((2, 3, 5, 7), jnp.float32),       # 210 elems (not 128-aligned)
         ((2, 4, 4, 4), jnp.float32)],
    ]

    inputs_list, targets_list = [], []
    for level in specs:
        ins, tgts = [], []
        for shape, dt in level:
            key, k1, k2 = jax.random.split(key, 3)
            ins.append(jax.random.normal(k1, shape, dtype=jnp.float32).astype(dt))
            tgts.append(jax.random.normal(k2, shape, dtype=jnp.float32).astype(dt))
        inputs_list.append(ins)
        targets_list.append(tgts)

    loss = feature_loss(inputs_list, targets_list)
    loss = jax.block_until_ready(loss)

    # Pure-JAX reference matching the kernel numerics: diff/abs in each pair's
    # streaming dtype, accumulation/mean in f32.
    ref = jnp.float32(0.0)
    for ins, tgts in zip(inputs_list, targets_list):
        for a, b in zip(ins, tgts):
            ref = ref + jnp.mean(jnp.abs(a - b).astype(jnp.float32))
    assert jnp.allclose(loss, ref, rtol=1e-4, atol=1e-4), (loss, ref)

    print("KERNEL_OK")
</pallas_src>

<mosaic_0001>
module attributes {stable_mosaic.version = 11 : i64} {
  func.func @kernel(%arg0: i32, %arg1: i32, %arg2: memref<2048x128xf32, #tpu.memory_space<vmem>>, %arg3: memref<2048x128xf32, #tpu.memory_space<vmem>>, %arg4: memref<1x64x128xf32, #tpu.memory_space<vmem>>) attributes {dimension_semantics = [#tpu.dimension_semantics<parallel>, #tpu.dimension_semantics<arbitrary>], iteration_bounds = array<i64: 2, 1>, scalar_prefetch = 0 : i64, scratch_operands = 0 : i64, tpu.core_type = #tpu.core_type<tc>, window_params = [{transform_indices = @transform_0, window_bounds = array<i64: 2048, 128>}, {transform_indices = @transform_1, window_bounds = array<i64: 2048, 128>}, {transform_indices = @transform_2, window_bounds = array<i64: 1, 64, 128>}]} {
    %c0_i32 = arith.constant 0 : i32
    %0 = arith.cmpi eq, %arg1, %c0_i32 : i32
    %1 = arith.extui %0 : i1 to i32
    %c0_i32_0 = arith.constant 0 : i32
    %2 = arith.cmpi ne, %1, %c0_i32_0 : i32
    scf.if %2 {
      %cst = arith.constant 0.000000e+00 : f32
      %11 = vector.broadcast %cst : f32 to vector<64x128xf32>
      %c0 = arith.constant 0 : index
      %c0_5 = arith.constant 0 : index
      %c0_6 = arith.constant 0 : index
      %12 = vector.load %arg4[%c0, %c0_5, %c0_6] : memref<1x64x128xf32, #tpu.memory_space<vmem>>, vector<1x64x128xf32>
      %13 = vector.shape_cast %12 : vector<1x64x128xf32> to vector<64x128xf32>
      %14 = vector.shape_cast %11 : vector<64x128xf32> to vector<1x64x128xf32>
      tpu.vector_store %arg4[%c0, %c0_5, %c0_6], %14 {strides = array<i32>} : memref<1x64x128xf32, #tpu.memory_space<vmem>>, vector<1x64x128xf32>,
    } else {
    }
    %c1_i32 = arith.constant 1 : i32
    %3 = arith.muli %arg0, %c1_i32 : i32
    %4 = arith.addi %3, %arg1 : i32
    %c1_i32_1 = arith.constant 1 : i32
    %5 = arith.cmpi slt, %4, %c1_i32_1 : i32
    %6 = arith.extui %5 : i1 to i32
    %c0_i32_2 = arith.constant 0 : i32
    %7 = arith.cmpi ne, %6, %c0_i32_2 : i32
    scf.if %7 {
      %cst = arith.constant 0.000000e+00 : f32
      %11 = vector.broadcast %cst : f32 to vector<64x128xf32>
      %c0_i32_5 = arith.constant 0 : i32
      %c64_i32 = arith.constant 64 : i32
      %12 = arith.muli %c0_i32_5, %c64_i32 : i32
      %13 = tpu.assume_multiple %12, 64 : i32
      %14 = arith.index_cast %13 : i32 to index
      %c0 = arith.constant 0 : index
      %15 = vector.load %arg2[%14, %c0] : memref<2048x128xf32, #tpu.memory_space<vmem>>, vector<64x128xf32>
      %16 = arith.index_cast %13 : i32 to index
      %c0_6 = arith.constant 0 : index
      %17 = vector.load %arg3[%16, %c0_6] : memref<2048x128xf32, #tpu.memory_space<vmem>>, vector<64x128xf32>
      %18 = arith.subf %15, %17 : vector<64x128xf32>
      %19 = math.absf %18 : vector<64x128xf32>
      %20 = arith.addf %11, %19 : vector<64x128xf32>
      %c1_i32_7 = arith.constant 1 : i32
      %c64_i32_8 = arith.constant 64 : i32
      %21 = arith.muli %c1_i32_7, %c64_i32_8 : i32
      %22 = tpu.assume_multiple %21, 64 : i32
      %23 = arith.index_cast %22 : i32 to index
      %c0_9 = arith.constant 0 : index
      %24 = vector.load %arg2[%23, %c0_9] : memref<2048x128xf32, #tpu.memory_space<vmem>>, vector<64x128xf32>
      %25 = arith.index_cast %22 : i32 to index
      %c0_10 = arith.constant 0 : index
      %26 = vector.load %arg3[%25, %c0_10] : memref<2048x128xf32, #tpu.memory_space<vmem>>, vector<64x128xf32>
      %27 = arith.subf %24, %26 : vector<64x128xf32>
      %28 = math.absf %27 : vector<64x128xf32>
      %29 = arith.addf %20, %28 : vector<64x128xf32>
      %c2_i32 = arith.constant 2 : i32
      %c64_i32_11 = arith.constant 64 : i32
      %30 = arith.muli %c2_i32, %c64_i32_11 : i32
      %31 = tpu.assume_multiple %30, 64 : i32
      %32 = arith.index_cast %31 : i32 to index
      %c0_12 = arith.constant 0 : index
      %33 = vector.load %arg2[%32, %c0_12] : memref<2048x128xf32, #tpu.memory_space<vmem>>, vector<64x128xf32>
      %34 = arith.index_cast %31 : i32 to index
      %c0_13 = arith.constant 0 : index
      %35 = vector.load %arg3[%34, %c0_13] : memref<2048x128xf32, #tpu.memory_space<vmem>>, vector<64x128xf32>
      %36 = arith.subf %33, %35 : vector<64x128xf32>
      %37 = math.absf %36 : vector<64x128xf32>
      %38 = arith.addf %29, %37 : vector<64x128xf32>
      %c3_i32 = arith.constant 3 : i32
      %c64_i32_14 = arith.constant 64 : i32
      %39 = arith.muli %c3_i32, %c64_i32_14 : i32
      %40 = tpu.assume_multiple %39, 64 : i32
      %41 = arith.index_cast %40 : i32 to index
      %c0_15 = arith.constant 0 : index
      %42 = vector.load %arg2[%41, %c0_15] : memref<2048x128xf32, #tpu.memory_space<vmem>>, vector<64x128xf32>
      %43 = arith.index_cast %40 : i32 to index
      %c0_16 = arith.constant 0 : index
      %44 = vector.load %arg3[%43, %c0_16] : memref<2048x128xf32, #tpu.memory_space<vmem>>, vector<64x128xf32>
      %45 = arith.subf %42, %44 : vector<64x128xf32>
      %46 = math.absf %45 : vector<64x128xf32>
      %47 = arith.addf %38, %46 : vector<64x128xf32>
      %c4_i32 = arith.constant 4 : i32
      %c64_i32_17 = arith.constant 64 : i32
      %48 = arith.muli %c4_i32, %c64_i32_17 : i32
      %49 = tpu.assume_multiple %48, 64 : i32
      %50 = arith.index_cast %49 : i32 to index
      %c0_18 = arith.constant 0 : index
      %51 = vector.load %arg2[%50, %c0_18] : memref<2048x128xf32, #tpu.memory_space<vmem>>, vector<64x128xf32>
      %52 = arith.index_cast %49 : i32 to index
      %c0_19 = arith.constant 0 : index
      %53 = vector.load %arg3[%52, %c0_19] : memref<2048x128xf32, #tpu.memory_space<vmem>>, vector<64x128xf32>
      %54 = arith.subf %51, %53 : vector<64x128xf32>
      %55 = math.absf %54 : vector<64x128xf32>
      %56 = arith.addf %47, %55 : vector<64x128xf32>
      %c5_i32 = arith.constant 5 : i32
      %c64_i32_20 = arith.constant 64 : i32
      %57 = arith.muli %c5_i32, %c64_i32_20 : i32
      %58 = tpu.assume_multiple %57, 64 : i32
      %59 = arith.index_cast %58 : i32 to index
      %c0_21 = arith.constant 0 : index
      %60 = vector.load %arg2[%59, %c0_21] : memref<2048x128xf32, #tpu.memory_space<vmem>>, vector<64x128xf32>
      %61 = arith.index_cast %58 : i32 to index
      %c0_22 = arith.constant 0 : index
      %62 = vector.load %arg3[%61, %c0_22] : memref<2048x128xf32, #tpu.memory_space<vmem>>, vector<64x128xf32>
      %63 = arith.subf %60, %62 : vector<64x128xf32>
      %64 = math.absf %63 : vector<64x128xf32>
      %65 = arith.addf %56, %64 : vector<64x128xf32>
      %c6_i32 = arith.constant 6 : i32
      %c64_i32_23 = arith.constant 64 : i32
      %66 = arith.muli %c6_i32, %c64_i32_23 : i32
      %67 = tpu.assume_multiple %66, 64 : i32
      %68 = arith.index_cast %67 : i32 to index
      %c0_24 = arith.constant 0 : index
      %69 = vector.load %arg2[%68, %c0_24] : memref<2048x128xf32, #tpu.memory_space<vmem>>, vector<64x128xf32>
      %70 = arith.index_cast %67 : i32 to index
      %c0_25 = arith.constant 0 : index
      %71 = vector.load %arg3[%70, %c0_25] : memref<2048x128xf32, #tpu.memory_space<vmem>>, vector<64x128xf32>
      %72 = arith.subf %69, %71 : vector<64x128xf32>
      %73 = math.absf %72 : vector<64x128xf32>
      %74 = arith.addf %65, %73 : vector<64x128xf32>
      %c7_i32 = arith.constant 7 : i32
      %c64_i32_26 = arith.constant 64 : i32
      %75 = arith.muli %c7_i32, %c64_i32_26 : i32
      %76 = tpu.assume_multiple %75, 64 : i32
      %77 = arith.index_cast %76 : i32 to index
      %c0_27 = arith.constant 0 : index
      %78 = vector.load %arg2[%77, %c0_27] : memref<2048x128xf32, #tpu.memory_space<vmem>>, vector<64x128xf32>
      %79 = arith.index_cast %76 : i32 to index
      %c0_28 = arith.constant 0 : index
      %80 = vector.load %arg3[%79, %c0_28] : memref<2048x128xf32, #tpu.memory_space<vmem>>, vector<64x128xf32>
      %81 = arith.subf %78, %80 : vector<64x128xf32>
      %82 = math.absf %81 : vector<64x128xf32>
      %83 = arith.addf %74, %82 : vector<64x128xf32>
      %c8_i32 = arith.constant 8 : i32
      %c64_i32_29 = arith.constant 64 : i32
      %84 = arith.muli %c8_i32, %c64_i32_29 : i32
      %85 = tpu.assume_multiple %84, 64 : i32
      %86 = arith.index_cast %85 : i32 to index
      %c0_30 = arith.constant 0 : index
      %87 = vector.load %arg2[%86, %c0_30] : memref<2048x128xf32, #tpu.memory_space<vmem>>, vector<64x128xf32>
      %88 = arith.index_cast %85 : i32 to index
      %c0_31 = arith.constant 0 : index
      %89 = vector.load %arg3[%88, %c0_31] : memref<2048x128xf32, #tpu.memory_space<vmem>>, vector<64x128xf32>
      %90 = arith.subf %87, %89 : vector<64x128xf32>
      %91 = math.absf %90 : vector<64x128xf32>
      %92 = arith.addf %83, %91 : vector<64x128xf32>
      %c9_i32 = arith.constant 9 : i32
      %c64_i32_32 = arith.constant 64 : i32
      %93 = arith.muli %c9_i32, %c64_i32_32 : i32
      %94 = tpu.assume_multiple %93, 64 : i32
      %95 = arith.index_cast %94 : i32 to index
      %c0_33 = arith.constant 0 : index
      %96 = vector.load %arg2[%95, %c0_33] : memref<2048x128xf32, #tpu.memory_space<vmem>>, vector<64x128xf32>
      %97 = arith.index_cast %94 : i32 to index
      %c0_34 = arith.constant 0 : index
      %98 = vector.load %arg3[%97, %c0_34] : memref<2048x128xf32, #tpu.memory_space<vmem>>, vector<64x128xf32>
      %99 = arith.subf %96, %98 : vector<64x128xf32>
      %100 = math.absf %99 : vector<64x128xf32>
      %101 = arith.addf %92, %100 : vector<64x128xf32>
      %c10_i32 = arith.constant 10 : i32
      %c64_i32_35 = arith.constant 64 : i32
      %102 = arith.muli %c10_i32, %c64_i32_35 : i32
      %103 = tpu.assume_multiple %102, 64 : i32
      %104 = arith.index_cast %103 : i32 to index
      %c0_36 = arith.constant 0 : index
      %105 = vector.load %arg2[%104, %c0_36] : memref<2048x128xf32, #tpu.memory_space<vmem>>, vector<64x128xf32>
      %106 = arith.index_cast %103 : i32 to index
      %c0_37 = arith.constant 0 : index
      %107 = vector.load %arg3[%106, %c0_37] : memref<2048x128xf32, #tpu.memory_space<vmem>>, vector<64x128xf32>
      %108 = arith.subf %105, %107 : vector<64x128xf32>
      %109 = math.absf %108 : vector<64x128xf32>
      %110 = arith.addf %101, %109 : vector<64x128xf32>
      %c11_i32 = arith.constant 11 : i32
      %c64_i32_38 = arith.constant 64 : i32
      %111 = arith.muli %c11_i32, %c64_i32_38 : i32
      %112 = tpu.assume_multiple %111, 64 : i32
      %113 = arith.index_cast %112 : i32 to index
      %c0_39 = arith.constant 0 : index
      %114 = vector.load %arg2[%113, %c0_39] : memref<2048x128xf32, #tpu.memory_space<vmem>>, vector<64x128xf32>
      %115 = arith.index_cast %112 : i32 to index
      %c0_40 = arith.constant 0 : index
      %116 = vector.load %arg3[%115, %c0_40] : memref<2048x128xf32, #tpu.memory_space<vmem>>, vector<64x128xf32>
      %117 = arith.subf %114, %116 : vector<64x128xf32>
      %118 = math.absf %117 : vector<64x128xf32>
      %119 = arith.addf %110, %118 : vector<64x128xf32>
      %c12_i32 = arith.constant 12 : i32
      %c64_i32_41 = arith.constant 64 : i32
      %120 = arith.muli %c12_i32, %c64_i32_41 : i32
      %121 = tpu.assume_multiple %120, 64 : i32
      %122 = arith.index_cast %121 : i32 to index
      %c0_42 = arith.constant 0 : index
      %123 = vector.load %arg2[%122, %c0_42] : memref<2048x128xf32, #tpu.memory_space<vmem>>, vector<64x128xf32>
      %124 = arith.index_cast %121 : i32 to index
      %c0_43 = arith.constant 0 : index
      %125 = vector.load %arg3[%124, %c0_43] : memref<2048x128xf32, #tpu.memory_space<vmem>>, vector<64x128xf32>
      %126 = arith.subf %123, %125 : vector<64x128xf32>
      %127 = math.absf %126 : vector<64x128xf32>
      %128 = arith.addf %119, %127 : vector<64x128xf32>
      %c13_i32 = arith.constant 13 : i32
      %c64_i32_44 = arith.constant 64 : i32
      %129 = arith.muli %c13_i32, %c64_i32_44 : i32
      %130 = tpu.assume_multiple %129, 64 : i32
      %131 = arith.index_cast %130 : i32 to index
      %c0_45 = arith.constant 0 : index
      %132 = vector.load %arg2[%131, %c0_45] : memref<2048x128xf32, #tpu.memory_space<vmem>>, vector<64x128xf32>
      %133 = arith.index_cast %130 : i32 to index
      %c0_46 = arith.constant 0 : index
      %134 = vector.load %arg3[%133, %c0_46] : memref<2048x128xf32, #tpu.memory_space<vmem>>, vector<64x128xf32>
      %135 = arith.subf %132, %134 : vector<64x128xf32>
      %136 = math.absf %135 : vector<64x128xf32>
      %137 = arith.addf %128, %136 : vector<64x128xf32>
      %c14_i32 = arith.constant 14 : i32
      %c64_i32_47 = arith.constant 64 : i32
      %138 = arith.muli %c14_i32, %c64_i32_47 : i32
      %139 = tpu.assume_multiple %138, 64 : i32
      %140 = arith.index_cast %139 : i32 to index
      %c0_48 = arith.constant 0 : index
      %141 = vector.load %arg2[%140, %c0_48] : memref<2048x128xf32, #tpu.memory_space<vmem>>, vector<64x128xf32>
      %142 = arith.index_cast %139 : i32 to index
      %c0_49 = arith.constant 0 : index
      %143 = vector.load %arg3[%142, %c0_49] : memref<2048x128xf32, #tpu.memory_space<vmem>>, vector<64x128xf32>
      %144 = arith.subf %141, %143 : vector<64x128xf32>
      %145 = math.absf %144 : vector<64x128xf32>
      %146 = arith.addf %137, %145 : vector<64x128xf32>
      %c15_i32 = arith.constant 15 : i32
      %c64_i32_50 = arith.constant 64 : i32
      %147 = arith.muli %c15_i32, %c64_i32_50 : i32
      %148 = tpu.assume_multiple %147, 64 : i32
      %149 = arith.index_cast %148 : i32 to index
      %c0_51 = arith.constant 0 : index
      %150 = vector.load %arg2[%149, %c0_51] : memref<2048x128xf32, #tpu.memory_space<vmem>>, vector<64x128xf32>
      %151 = arith.index_cast %148 : i32 to index
      %c0_52 = arith.constant 0 : index
      %152 = vector.load %arg3[%151, %c0_52] : memref<2048x128xf32, #tpu.memory_space<vmem>>, vector<64x128xf32>
      %153 = arith.subf %150, %152 : vector<64x128xf32>
      %154 = math.absf %153 : vector<64x128xf32>
      %155 = arith.addf %146, %154 : vector<64x128xf32>
      %c16_i32 = arith.constant 16 : i32
      %c64_i32_53 = arith.constant 64 : i32
      %156 = arith.muli %c16_i32, %c64_i32_53 : i32
      %157 = tpu.assume_multiple %156, 64 : i32
      %158 = arith.index_cast %157 : i32 to index
      %c0_54 = arith.constant 0 : index
      %159 = vector.load %arg2[%158, %c0_54] : memref<2048x128xf32, #tpu.memory_space<vmem>>, vector<64x128xf32>
      %160 = arith.index_cast %157 : i32 to index
      %c0_55 = arith.constant 0 : index
      %161 = vector.load %arg3[%160, %c0_55] : memref<2048x128xf32, #tpu.memory_space<vmem>>, vector<64x128xf32>
      %162 = arith.subf %159, %161 : vector<64x128xf32>
      %163 = math.absf %162 : vector<64x128xf32>
      %164 = arith.addf %155, %163 : vector<64x128xf32>
      %c17_i32 = arith.constant 17 : i32
      %c64_i32_56 = arith.constant 64 : i32
      %165 = arith.muli %c17_i32, %c64_i32_56 : i32
      %166 = tpu.assume_multiple %165, 64 : i32
      %167 = arith.index_cast %166 : i32 to index
      %c0_57 = arith.constant 0 : index
      %168 = vector.load %arg2[%167, %c0_57] : memref<2048x128xf32, #tpu.memory_space<vmem>>, vector<64x128xf32>
      %169 = arith.index_cast %166 : i32 to index
      %c0_58 = arith.constant 0 : index
      %170 = vector.load %arg3[%169, %c0_58] : memref<2048x128xf32, #tpu.memory_space<vmem>>, vector<64x128xf32>
      %171 = arith.subf %168, %170 : vector<64x128xf32>
      %172 = math.absf %171 : vector<64x128xf32>
      %173 = arith.addf %164, %172 : vector<64x128xf32>
      %c18_i32 = arith.constant 18 : i32
      %c64_i32_59 = arith.constant 64 : i32
      %174 = arith.muli %c18_i32, %c64_i32_59 : i32
      %175 = tpu.assume_multiple %174, 64 : i32
      %176 = arith.index_cast %175 : i32 to index
      %c0_60 = arith.constant 0 : index
      %177 = vector.load %arg2[%176, %c0_60] : memref<2048x128xf32, #tpu.memory_space<vmem>>, vector<64x128xf32>
      %178 = arith.index_cast %175 : i32 to index
      %c0_61 = arith.constant 0 : index
      %179 = vector.load %arg3[%178, %c0_61] : memref<2048x128xf32, #tpu.memory_space<vmem>>, vector<64x128xf32>
      %180 = arith.subf %177, %179 : vector<64x128xf32>
      %181 = math.absf %180 : vector<64x128xf32>
      %182 = arith.addf %173, %181 : vector<64x128xf32>
      %c19_i32 = arith.constant 19 : i32
      %c64_i32_62 = arith.constant 64 : i32
      %183 = arith.muli %c19_i32, %c64_i32_62 : i32
      %184 = tpu.assume_multiple %183, 64 : i32
      %185 = arith.index_cast %184 : i32 to index
      %c0_63 = arith.constant 0 : index
      %186 = vector.load %arg2[%185, %c0_63] : memref<2048x128xf32, #tpu.memory_space<vmem>>, vector<64x128xf32>
      %187 = arith.index_cast %184 : i32 to index
      %c0_64 = arith.constant 0 : index
      %188 = vector.load %arg3[%187, %c0_64] : memref<2048x128xf32, #tpu.memory_space<vmem>>, vector<64x128xf32>
      %189 = arith.subf %186, %188 : vector<64x128xf32>
      %190 = math.absf %189 : vector<64x128xf32>
      %191 = arith.addf %182, %190 : vector<64x128xf32>
      %c20_i32 = arith.constant 20 : i32
      %c64_i32_65 = arith.constant 64 : i32
      %192 = arith.muli %c20_i32, %c64_i32_65 : i32
      %193 = tpu.assume_multiple %192, 64 : i32
      %194 = arith.index_cast %193 : i32 to index
      %c0_66 = arith.constant 0 : index
      %195 = vector.load %arg2[%194, %c0_66] : memref<2048x128xf32, #tpu.memory_space<vmem>>, vector<64x128xf32>
      %196 = arith.index_cast %193 : i32 to index
      %c0_67 = arith.constant 0 : index
      %197 = vector.load %arg3[%196, %c0_67] : memref<2048x128xf32, #tpu.memory_space<vmem>>, vector<64x128xf32>
      %198 = arith.subf %195, %197 : vector<64x128xf32>
      %199 = math.absf %198 : vector<64x128xf32>
      %200 = arith.addf %191, %199 : vector<64x128xf32>
      %c21_i32 = arith.constant 21 : i32
      %c64_i32_68 = arith.constant 64 : i32
      %201 = arith.muli %c21_i32, %c64_i32_68 : i32
      %202 = tpu.assume_multiple %201, 64 : i32
      %203 = arith.index_cast %202 : i32 to index
      %c0_69 = arith.constant 0 : index
      %204 = vector.load %arg2[%203, %c0_69] : memref<2048x128xf32, #tpu.memory_space<vmem>>, vector<64x128xf32>
      %205 = arith.index_cast %202 : i32 to index
      %c0_70 = arith.constant 0 : index
      %206 = vector.load %arg3[%205, %c0_70] : memref<2048x128xf32, #tpu.memory_space<vmem>>, vector<64x128xf32>
      %207 = arith.subf %204, %206 : vector<64x128xf32>
      %208 = math.absf %207 : vector<64x128xf32>
      %209 = arith.addf %200, %208 : vector<64x128xf32>
      %c22_i32 = arith.constant 22 : i32
      %c64_i32_71 = arith.constant 64 : i32
      %210 = arith.muli %c22_i32, %c64_i32_71 : i32
      %211 = tpu.assume_multiple %210, 64 : i32
      %212 = arith.index_cast %211 : i32 to index
      %c0_72 = arith.constant 0 : index
      %213 = vector.load %arg2[%212, %c0_72] : memref<2048x128xf32, #tpu.memory_space<vmem>>, vector<64x128xf32>
      %214 = arith.index_cast %211 : i32 to index
      %c0_73 = arith.constant 0 : index
      %215 = vector.load %arg3[%214, %c0_73] : memref<2048x128xf32, #tpu.memory_space<vmem>>, vector<64x128xf32>
      %216 = arith.subf %213, %215 : vector<64x128xf32>
      %217 = math.absf %216 : vector<64x128xf32>
      %218 = arith.addf %209, %217 : vector<64x128xf32>
      %c23_i32 = arith.constant 23 : i32
      %c64_i32_74 = arith.constant 64 : i32
      %219 = arith.muli %c23_i32, %c64_i32_74 : i32
      %220 = tpu.assume_multiple %219, 64 : i32
      %221 = arith.index_cast %220 : i32 to index
      %c0_75 = arith.constant 0 : index
      %222 = vector.load %arg2[%221, %c0_75] : memref<2048x128xf32, #tpu.memory_space<vmem>>, vector<64x128xf32>
      %223 = arith.index_cast %220 : i32 to index
      %c0_76 = arith.constant 0 : index
      %224 = vector.load %arg3[%223, %c0_76] : memref<2048x128xf32, #tpu.memory_space<vmem>>, vector<64x128xf32>
      %225 = arith.subf %222, %224 : vector<64x128xf32>
      %226 = math.absf %225 : vector<64x128xf32>
      %227 = arith.addf %218, %226 : vector<64x128xf32>
      %c24_i32 = arith.constant 24 : i32
      %c64_i32_77 = arith.constant 64 : i32
      %228 = arith.muli %c24_i32, %c64_i32_77 : i32
      %229 = tpu.assume_multiple %228, 64 : i32
      %230 = arith.index_cast %229 : i32 to index
      %c0_78 = arith.constant 0 : index
      %231 = vector.load %arg2[%230, %c0_78] : memref<2048x128xf32, #tpu.memory_space<vmem>>, vector<64x128xf32>
      %232 = arith.index_cast %229 : i32 to index
      %c0_79 = arith.constant 0 : index
      %233 = vector.load %arg3[%232, %c0_79] : memref<2048x128xf32, #tpu.memory_space<vmem>>, vector<64x128xf32>
      %234 = arith.subf %231, %233 : vector<64x128xf32>
      %235 = math.absf %234 : vector<64x128xf32>
      %236 = arith.addf %227, %235 : vector<64x128xf32>
      %c25_i32 = arith.constant 25 : i32
      %c64_i32_80 = arith.constant 64 : i32
      %237 = arith.muli %c25_i32, %c64_i32_80 : i32
      %238 = tpu.assume_multiple %237, 64 : i32
      %239 = arith.index_cast %238 : i32 to index
      %c0_81 = arith.constant 0 : index
      %240 = vector.load %arg2[%239, %c0_81] : memref<2048x128xf32, #tpu.memory_space<vmem>>, vector<64x128xf32>
      %241 = arith.index_cast %238 : i32 to index
      %c0_82 = arith.constant 0 : index
      %242 = vector.load %arg3[%241, %c0_82] : memref<2048x128xf32, #tpu.memory_space<vmem>>, vector<64x128xf32>
      %243 = arith.subf %240, %242 : vector<64x128xf32>
      %244 = math.absf %243 : vector<64x128xf32>
      %245 = arith.addf %236, %244 : vector<64x128xf32>
      %c26_i32 = arith.constant 26 : i32
      %c64_i32_83 = arith.constant 64 : i32
      %246 = arith.muli %c26_i32, %c64_i32_83 : i32
      %247 = tpu.assume_multiple %246, 64 : i32
      %248 = arith.index_cast %247 : i32 to index
      %c0_84 = arith.constant 0 : index
      %249 = vector.load %arg2[%248, %c0_84] : memref<2048x128xf32, #tpu.memory_space<vmem>>, vector<64x128xf32>
      %250 = arith.index_cast %247 : i32 to index
      %c0_85 = arith.constant 0 : index
      %251 = vector.load %arg3[%250, %c0_85] : memref<2048x128xf32, #tpu.memory_space<vmem>>, vector<64x128xf32>
      %252 = arith.subf %249, %251 : vector<64x128xf32>
      %253 = math.absf %252 : vector<64x128xf32>
      %254 = arith.addf %245, %253 : vector<64x128xf32>
      %c27_i32 = arith.constant 27 : i32
      %c64_i32_86 = arith.constant 64 : i32
      %255 = arith.muli %c27_i32, %c64_i32_86 : i32
      %256 = tpu.assume_multiple %255, 64 : i32
      %257 = arith.index_cast %256 : i32 to index
      %c0_87 = arith.constant 0 : index
      %258 = vector.load %arg2[%257, %c0_87] : memref<2048x128xf32, #tpu.memory_space<vmem>>, vector<64x128xf32>
      %259 = arith.index_cast %256 : i32 to index
      %c0_88 = arith.constant 0 : index
      %260 = vector.load %arg3[%259, %c0_88] : memref<2048x128xf32, #tpu.memory_space<vmem>>, vector<64x128xf32>
      %261 = arith.subf %258, %260 : vector<64x128xf32>
      %262 = math.absf %261 : vector<64x128xf32>
      %263 = arith.addf %254, %262 : vector<64x128xf32>
      %c28_i32 = arith.constant 28 : i32
      %c64_i32_89 = arith.constant 64 : i32
      %264 = arith.muli %c28_i32, %c64_i32_89 : i32
      %265 = tpu.assume_multiple %264, 64 : i32
      %266 = arith.index_cast %265 : i32 to index
      %c0_90 = arith.constant 0 : index
      %267 = vector.load %arg2[%266, %c0_90] : memref<2048x128xf32, #tpu.memory_space<vmem>>, vector<64x128xf32>
      %268 = arith.index_cast %265 : i32 to index
      %c0_91 = arith.constant 0 : index
      %269 = vector.load %arg3[%268, %c0_91] : memref<2048x128xf32, #tpu.memory_space<vmem>>, vector<64x128xf32>
      %270 = arith.subf %267, %269 : vector<64x128xf32>
      %271 = math.absf %270 : vector<64x128xf32>
      %272 = arith.addf %263, %271 : vector<64x128xf32>
      %c29_i32 = arith.constant 29 : i32
      %c64_i32_92 = arith.constant 64 : i32
      %273 = arith.muli %c29_i32, %c64_i32_92 : i32
      %274 = tpu.assume_multiple %273, 64 : i32
      %275 = arith.index_cast %274 : i32 to index
      %c0_93 = arith.constant 0 : index
      %276 = vector.load %arg2[%275, %c0_93] : memref<2048x128xf32, #tpu.memory_space<vmem>>, vector<64x128xf32>
      %277 = arith.index_cast %274 : i32 to index
      %c0_94 = arith.constant 0 : index
      %278 = vector.load %arg3[%277, %c0_94] : memref<2048x128xf32, #tpu.memory_space<vmem>>, vector<64x128xf32>
      %279 = arith.subf %276, %278 : vector<64x128xf32>
      %280 = math.absf %279 : vector<64x128xf32>
      %281 = arith.addf %272, %280 : vector<64x128xf32>
      %c30_i32 = arith.constant 30 : i32
      %c64_i32_95 = arith.constant 64 : i32
      %282 = arith.muli %c30_i32, %c64_i32_95 : i32
      %283 = tpu.assume_multiple %282, 64 : i32
      %284 = arith.index_cast %283 : i32 to index
      %c0_96 = arith.constant 0 : index
      %285 = vector.load %arg2[%284, %c0_96] : memref<2048x128xf32, #tpu.memory_space<vmem>>, vector<64x128xf32>
      %286 = arith.index_cast %283 : i32 to index
      %c0_97 = arith.constant 0 : index
      %287 = vector.load %arg3[%286, %c0_97] : memref<2048x128xf32, #tpu.memory_space<vmem>>, vector<64x128xf32>
      %288 = arith.subf %285, %287 : vector<64x128xf32>
      %289 = math.absf %288 : vector<64x128xf32>
      %290 = arith.addf %281, %289 : vector<64x128xf32>
      %c31_i32 = arith.constant 31 : i32
      %c64_i32_98 = arith.constant 64 : i32
      %291 = arith.muli %c31_i32, %c64_i32_98 : i32
      %292 = tpu.assume_multiple %291, 64 : i32
      %293 = arith.index_cast %292 : i32 to index
      %c0_99 = arith.constant 0 : index
      %294 = vector.load %arg2[%293, %c0_99] : memref<2048x128xf32, #tpu.memory_space<vmem>>, vector<64x128xf32>
      %295 = arith.index_cast %292 : i32 to index
      %c0_100 = arith.constant 0 : index
      %296 = vector.load %arg3[%295, %c0_100] : memref<2048x128xf32, #tpu.memory_space<vmem>>, vector<64x128xf32>
      %297 = arith.subf %294, %296 : vector<64x128xf32>
      %298 = math.absf %297 : vector<64x128xf32>
      %299 = arith.addf %290, %298 : vector<64x128xf32>
      %c32_i32 = arith.constant 32 : i32
      %c0_101 = arith.constant 0 : index
      %c0_102 = arith.constant 0 : index
      %c0_103 = arith.constant 0 : index
      %300 = vector.load %arg4[%c0_101, %c0_102, %c0_103] : memref<1x64x128xf32, #tpu.memory_space<vmem>>, vector<1x64x128xf32>
      %301 = vector.shape_cast %300 : vector<1x64x128xf32> to vector<64x128xf32>
      %302 = arith.addf %301, %299 : vector<64x128xf32>
      %c0_104 = arith.constant 0 : index
      %c0_105 = arith.constant 0 : index
      %c0_106 = arith.constant 0 : index
      %303 = vector.load %arg4[%c0_104, %c0_105, %c0_106] : memref<1x64x128xf32, #tpu.memory_space<vmem>>, vector<1x64x128xf32>
      %304 = vector.shape_cast %303 : vector<1x64x128xf32> to vector<64x128xf32>
      %305 = vector.shape_cast %302 : vector<64x128xf32> to vector<1x64x128xf32>
      tpu.vector_store %arg4[%c0_104, %c0_105, %c0_106], %305 {strides = array<i32>} : memref<1x64x128xf32, #tpu.memory_space<vmem>>, vector<1x64x128xf32>,
    } else {
    }
    %c1_i32_3 = arith.constant 1 : i32
    %8 = arith.cmpi eq, %4, %c1_i32_3 : i32
    %9 = arith.extui %8 : i1 to i32
    %c0_i32_4 = arith.constant 0 : i32
    %10 = arith.cmpi ne, %9, %c0_i32_4 : i32
    scf.if %10 {
      %c2048_i32 = arith.constant 2048 : i32
      %11 = arith.muli %4, %c2048_i32 : i32
      %12 = tpu.iota {dimensions = array<i32: 0>} : vector<64x128xi32>
      %13 = vector.broadcast %11 : i32 to vector<64x128xi32>
      %14 = arith.addi %13, %12 : vector<64x128xi32>
      %cst = arith.constant 0.000000e+00 : f32
      %15 = vector.broadcast %cst : f32 to vector<64x128xf32>
      %c0_i32_5 = arith.constant 0 : i32
      %c64_i32 = arith.constant 64 : i32
      %16 = arith.muli %c0_i32_5, %c64_i32 : i32
      %17 = tpu.assume_multiple %16, 64 : i32
      %18 = arith.index_cast %17 : i32 to index
      %c0 = arith.constant 0 : index
      %19 = vector.load %arg2[%18, %c0] : memref<2048x128xf32, #tpu.memory_space<vmem>>, vector<64x128xf32>
      %20 = arith.index_cast %17 : i32 to index
      %c0_6 = arith.constant 0 : index
      %21 = vector.load %arg3[%20, %c0_6] : memref<2048x128xf32, #tpu.memory_space<vmem>>, vector<64x128xf32>
      %22 = arith.subf %19, %21 : vector<64x128xf32>
      %23 = math.absf %22 : vector<64x128xf32>
      %24 = vector.broadcast %17 : i32 to vector<64x128xi32>
      %25 = arith.addi %14, %24 : vector<64x128xi32>
      %c2592_i32 = arith.constant 2592 : i32
      %26 = vector.broadcast %c2592_i32 : i32 to vector<64x128xi32>
      %27 = arith.cmpi slt, %25, %26 : vector<64x128xi32>
      %cst_7 = arith.constant 0.000000e+00 : f32
      %28 = vector.broadcast %cst_7 : f32 to vector<64x128xf32>
      %29 = arith.select %27, %23, %28 : vector<64x128xi1>, vector<64x128xf32>
      %30 = arith.addf %15, %29 : vector<64x128xf32>
      %c1_i32_8 = arith.constant 1 : i32
      %c64_i32_9 = arith.constant 64 : i32
      %31 = arith.muli %c1_i32_8, %c64_i32_9 : i32
      %32 = tpu.assume_multiple %31, 64 : i32
      %33 = arith.index_cast %32 : i32 to index
      %c0_10 = arith.constant 0 : index
      %34 = vector.load %arg2[%33, %c0_10] : memref<2048x128xf32, #tpu.memory_space<vmem>>, vector<64x128xf32>
      %35 = arith.index_cast %32 : i32 to index
      %c0_11 = arith.constant 0 : index
      %36 = vector.load %arg3[%35, %c0_11] : memref<2048x128xf32, #tpu.memory_space<vmem>>, vector<64x128xf32>
      %37 = arith.subf %34, %36 : vector<64x128xf32>
      %38 = math.absf %37 : vector<64x128xf32>
      %39 = vector.broadcast %32 : i32 to vector<64x128xi32>
      %40 = arith.addi %14, %39 : vector<64x128xi32>
      %c2592_i32_12 = arith.constant 2592 : i32
      %41 = vector.broadcast %c2592_i32_12 : i32 to vector<64x128xi32>
      %42 = arith.cmpi slt, %40, %41 : vector<64x128xi32>
      %cst_13 = arith.constant 0.000000e+00 : f32
      %43 = vector.broadcast %cst_13 : f32 to vector<64x128xf32>
      %44 = arith.select %42, %38, %43 : vector<64x128xi1>, vector<64x128xf32>
      %45 = arith.addf %30, %44 : vector<64x128xf32>
      %c2_i32 = arith.constant 2 : i32
      %c64_i32_14 = arith.constant 64 : i32
      %46 = arith.muli %c2_i32, %c64_i32_14 : i32
      %47 = tpu.assume_multiple %46, 64 : i32
      %48 = arith.index_cast %47 : i32 to index
      %c0_15 = arith.constant 0 : index
      %49 = vector.load %arg2[%48, %c0_15] : memref<2048x128xf32, #tpu.memory_space<vmem>>, vector<64x128xf32>
      %50 = arith.index_cast %47 : i32 to index
      %c0_16 = arith.constant 0 : index
      %51 = vector.load %arg3[%50, %c0_16] : memref<2048x128xf32, #tpu.memory_space<vmem>>, vector<64x128xf32>
      %52 = arith.subf %49, %51 : vector<64x128xf32>
      %53 = math.absf %52 : vector<64x128xf32>
      %54 = vector.broadcast %47 : i32 to vector<64x128xi32>
      %55 = arith.addi %14, %54 : vector<64x128xi32>
      %c2592_i32_17 = arith.constant 2592 : i32
      %56 = vector.broadcast %c2592_i32_17 : i32 to vector<64x128xi32>
      %57 = arith.cmpi slt, %55, %56 : vector<64x128xi32>
      %cst_18 = arith.constant 0.000000e+00 : f32
      %58 = vector.broadcast %cst_18 : f32 to vector<64x128xf32>
      %59 = arith.select %57, %53, %58 : vector<64x128xi1>, vector<64x128xf32>
      %60 = arith.addf %45, %59 : vector<64x128xf32>
      %c3_i32 = arith.constant 3 : i32
      %c64_i32_19 = arith.constant 64 : i32
      %61 = arith.muli %c3_i32, %c64_i32_19 : i32
      %62 = tpu.assume_multiple %61, 64 : i32
      %63 = arith.index_cast %62 : i32 to index
      %c0_20 = arith.constant 0 : index
      %64 = vector.load %arg2[%63, %c0_20] : memref<2048x128xf32, #tpu.memory_space<vmem>>, vector<64x128xf32>
      %65 = arith.index_cast %62 : i32 to index
      %c0_21 = arith.constant 0 : index
      %66 = vector.load %arg3[%65, %c0_21] : memref<2048x128xf32, #tpu.memory_space<vmem>>, vector<64x128xf32>
      %67 = arith.subf %64, %66 : vector<64x128xf32>
      %68 = math.absf %67 : vector<64x128xf32>
      %69 = vector.broadcast %62 : i32 to vector<64x128xi32>
      %70 = arith.addi %14, %69 : vector<64x128xi32>
      %c2592_i32_22 = arith.constant 2592 : i32
      %71 = vector.broadcast %c2592_i32_22 : i32 to vector<64x128xi32>
      %72 = arith.cmpi slt, %70, %71 : vector<64x128xi32>
      %cst_23 = arith.constant 0.000000e+00 : f32
      %73 = vector.broadcast %cst_23 : f32 to vector<64x128xf32>
      %74 = arith.select %72, %68, %73 : vector<64x128xi1>, vector<64x128xf32>
      %75 = arith.addf %60, %74 : vector<64x128xf32>
      %c4_i32 = arith.constant 4 : i32
      %c64_i32_24 = arith.constant 64 : i32
      %76 = arith.muli %c4_i32, %c64_i32_24 : i32
      %77 = tpu.assume_multiple %76, 64 : i32
      %78 = arith.index_cast %77 : i32 to index
      %c0_25 = arith.constant 0 : index
      %79 = vector.load %arg2[%78, %c0_25] : memref<2048x128xf32, #tpu.memory_space<vmem>>, vector<64x128xf32>
      %80 = arith.index_cast %77 : i32 to index
      %c0_26 = arith.constant 0 : index
      %81 = vector.load %arg3[%80, %c0_26] : memref<2048x128xf32, #tpu.memory_space<vmem>>, vector<64x128xf32>
      %82 = arith.subf %79, %81 : vector<64x128xf32>
      %83 = math.absf %82 : vector<64x128xf32>
      %84 = vector.broadcast %77 : i32 to vector<64x128xi32>
      %85 = arith.addi %14, %84 : vector<64x128xi32>
      %c2592_i32_27 = arith.constant 2592 : i32
      %86 = vector.broadcast %c2592_i32_27 : i32 to vector<64x128xi32>
      %87 = arith.cmpi slt, %85, %86 : vector<64x128xi32>
      %cst_28 = arith.constant 0.000000e+00 : f32
      %88 = vector.broadcast %cst_28 : f32 to vector<64x128xf32>
      %89 = arith.select %87, %83, %88 : vector<64x128xi1>, vector<64x128xf32>
      %90 = arith.addf %75, %89 : vector<64x128xf32>
      %c5_i32 = arith.constant 5 : i32
      %c64_i32_29 = arith.constant 64 : i32
      %91 = arith.muli %c5_i32, %c64_i32_29 : i32
      %92 = tpu.assume_multiple %91, 64 : i32
      %93 = arith.index_cast %92 : i32 to index
      %c0_30 = arith.constant 0 : index
      %94 = vector.load %arg2[%93, %c0_30] : memref<2048x128xf32, #tpu.memory_space<vmem>>, vector<64x128xf32>
      %95 = arith.index_cast %92 : i32 to index
      %c0_31 = arith.constant 0 : index
      %96 = vector.load %arg3[%95, %c0_31] : memref<2048x128xf32, #tpu.memory_space<vmem>>, vector<64x128xf32>
      %97 = arith.subf %94, %96 : vector<64x128xf32>
      %98 = math.absf %97 : vector<64x128xf32>
      %99 = vector.broadcast %92 : i32 to vector<64x128xi32>
      %100 = arith.addi %14, %99 : vector<64x128xi32>
      %c2592_i32_32 = arith.constant 2592 : i32
      %101 = vector.broadcast %c2592_i32_32 : i32 to vector<64x128xi32>
      %102 = arith.cmpi slt, %100, %101 : vector<64x128xi32>
      %cst_33 = arith.constant 0.000000e+00 : f32
      %103 = vector.broadcast %cst_33 : f32 to vector<64x128xf32>
      %104 = arith.select %102, %98, %103 : vector<64x128xi1>, vector<64x128xf32>
      %105 = arith.addf %90, %104 : vector<64x128xf32>
      %c6_i32 = arith.constant 6 : i32
      %c64_i32_34 = arith.constant 64 : i32
      %106 = arith.muli %c6_i32, %c64_i32_34 : i32
      %107 = tpu.assume_multiple %106, 64 : i32
      %108 = arith.index_cast %107 : i32 to index
      %c0_35 = arith.constant 0 : index
      %109 = vector.load %arg2[%108, %c0_35] : memref<2048x128xf32, #tpu.memory_space<vmem>>, vector<64x128xf32>
      %110 = arith.index_cast %107 : i32 to index
      %c0_36 = arith.constant 0 : index
      %111 = vector.load %arg3[%110, %c0_36] : memref<2048x128xf32, #tpu.memory_space<vmem>>, vector<64x128xf32>
      %112 = arith.subf %109, %111 : vector<64x128xf32>
      %113 = math.absf %112 : vector<64x128xf32>
      %114 = vector.broadcast %107 : i32 to vector<64x128xi32>
      %115 = arith.addi %14, %114 : vector<64x128xi32>
      %c2592_i32_37 = arith.constant 2592 : i32
      %116 = vector.broadcast %c2592_i32_37 : i32 to vector<64x128xi32>
      %117 = arith.cmpi slt, %115, %116 : vector<64x128xi32>
      %cst_38 = arith.constant 0.000000e+00 : f32
      %118 = vector.broadcast %cst_38 : f32 to vector<64x128xf32>
      %119 = arith.select %117, %113, %118 : vector<64x128xi1>, vector<64x128xf32>
      %120 = arith.addf %105, %119 : vector<64x128xf32>
      %c7_i32 = arith.constant 7 : i32
      %c64_i32_39 = arith.constant 64 : i32
      %121 = arith.muli %c7_i32, %c64_i32_39 : i32
      %122 = tpu.assume_multiple %121, 64 : i32
      %123 = arith.index_cast %122 : i32 to index
      %c0_40 = arith.constant 0 : index
      %124 = vector.load %arg2[%123, %c0_40] : memref<2048x128xf32, #tpu.memory_space<vmem>>, vector<64x128xf32>
      %125 = arith.index_cast %122 : i32 to index
      %c0_41 = arith.constant 0 : index
      %126 = vector.load %arg3[%125, %c0_41] : memref<2048x128xf32, #tpu.memory_space<vmem>>, vector<64x128xf32>
      %127 = arith.subf %124, %126 : vector<64x128xf32>
      %128 = math.absf %127 : vector<64x128xf32>
      %129 = vector.broadcast %122 : i32 to vector<64x128xi32>
      %130 = arith.addi %14, %129 : vector<64x128xi32>
      %c2592_i32_42 = arith.constant 2592 : i32
      %131 = vector.broadcast %c2592_i32_42 : i32 to vector<64x128xi32>
      %132 = arith.cmpi slt, %130, %131 : vector<64x128xi32>
      %cst_43 = arith.constant 0.000000e+00 : f32
      %133 = vector.broadcast %cst_43 : f32 to vector<64x128xf32>
      %134 = arith.select %132, %128, %133 : vector<64x128xi1>, vector<64x128xf32>
      %135 = arith.addf %120, %134 : vector<64x128xf32>
      %c8_i32 = arith.constant 8 : i32
      %c64_i32_44 = arith.constant 64 : i32
      %136 = arith.muli %c8_i32, %c64_i32_44 : i32
      %137 = tpu.assume_multiple %136, 64 : i32
      %138 = arith.index_cast %137 : i32 to index
      %c0_45 = arith.constant 0 : index
      %139 = vector.load %arg2[%138, %c0_45] : memref<2048x128xf32, #tpu.memory_space<vmem>>, vector<64x128xf32>
      %140 = arith.index_cast %137 : i32 to index
      %c0_46 = arith.constant 0 : index
      %141 = vector.load %arg3[%140, %c0_46] : memref<2048x128xf32, #tpu.memory_space<vmem>>, vector<64x128xf32>
      %142 = arith.subf %139, %141 : vector<64x128xf32>
      %143 = math.absf %142 : vector<64x128xf32>
      %144 = vector.broadcast %137 : i32 to vector<64x128xi32>
      %145 = arith.addi %14, %144 : vector<64x128xi32>
      %c2592_i32_47 = arith.constant 2592 : i32
      %146 = vector.broadcast %c2592_i32_47 : i32 to vector<64x128xi32>
      %147 = arith.cmpi slt, %145, %146 : vector<64x128xi32>
      %cst_48 = arith.constant 0.000000e+00 : f32
      %148 = vector.broadcast %cst_48 : f32 to vector<64x128xf32>
      %149 = arith.select %147, %143, %148 : vector<64x128xi1>, vector<64x128xf32>
      %150 = arith.addf %135, %149 : vector<64x128xf32>
      %c9_i32 = arith.constant 9 : i32
      %c64_i32_49 = arith.constant 64 : i32
      %151 = arith.muli %c9_i32, %c64_i32_49 : i32
      %152 = tpu.assume_multiple %151, 64 : i32
      %153 = arith.index_cast %152 : i32 to index
      %c0_50 = arith.constant 0 : index
      %154 = vector.load %arg2[%153, %c0_50] : memref<2048x128xf32, #tpu.memory_space<vmem>>, vector<64x128xf32>
      %155 = arith.index_cast %152 : i32 to index
      %c0_51 = arith.constant 0 : index
      %156 = vector.load %arg3[%155, %c0_51] : memref<2048x128xf32, #tpu.memory_space<vmem>>, vector<64x128xf32>
      %157 = arith.subf %154, %156 : vector<64x128xf32>
      %158 = math.absf %157 : vector<64x128xf32>
      %159 = vector.broadcast %152 : i32 to vector<64x128xi32>
      %160 = arith.addi %14, %159 : vector<64x128xi32>
      %c2592_i32_52 = arith.constant 2592 : i32
      %161 = vector.broadcast %c2592_i32_52 : i32 to vector<64x128xi32>
      %162 = arith.cmpi slt, %160, %161 : vector<64x128xi32>
      %cst_53 = arith.constant 0.000000e+00 : f32
      %163 = vector.broadcast %cst_53 : f32 to vector<64x128xf32>
      %164 = arith.select %162, %158, %163 : vector<64x128xi1>, vector<64x128xf32>
      %165 = arith.addf %150, %164 : vector<64x128xf32>
      %c10_i32 = arith.constant 10 : i32
      %c64_i32_54 = arith.constant 64 : i32
      %166 = arith.muli %c10_i32, %c64_i32_54 : i32
      %167 = tpu.assume_multiple %166, 64 : i32
      %168 = arith.index_cast %167 : i32 to index
      %c0_55 = arith.constant 0 : index
      %169 = vector.load %arg2[%168, %c0_55] : memref<2048x128xf32, #tpu.memory_space<vmem>>, vector<64x128xf32>
      %170 = arith.index_cast %167 : i32 to index
      %c0_56 = arith.constant 0 : index
      %171 = vector.load %arg3[%170, %c0_56] : memref<2048x128xf32, #tpu.memory_space<vmem>>, vector<64x128xf32>
      %172 = arith.subf %169, %171 : vector<64x128xf32>
      %173 = math.absf %172 : vector<64x128xf32>
      %174 = vector.broadcast %167 : i32 to vector<64x128xi32>
      %175 = arith.addi %14, %174 : vector<64x128xi32>
      %c2592_i32_57 = arith.constant 2592 : i32
      %176 = vector.broadcast %c2592_i32_57 : i32 to vector<64x128xi32>
      %177 = arith.cmpi slt, %175, %176 : vector<64x128xi32>
      %cst_58 = arith.constant 0.000000e+00 : f32
      %178 = vector.broadcast %cst_58 : f32 to vector<64x128xf32>
      %179 = arith.select %177, %173, %178 : vector<64x128xi1>, vector<64x128xf32>
      %180 = arith.addf %165, %179 : vector<64x128xf32>
      %c11_i32 = arith.constant 11 : i32
      %c64_i32_59 = arith.constant 64 : i32
      %181 = arith.muli %c11_i32, %c64_i32_59 : i32
      %182 = tpu.assume_multiple %181, 64 : i32
      %183 = arith.index_cast %182 : i32 to index
      %c0_60 = arith.constant 0 : index
      %184 = vector.load %arg2[%183, %c0_60] : memref<2048x128xf32, #tpu.memory_space<vmem>>, vector<64x128xf32>
      %185 = arith.index_cast %182 : i32 to index
      %c0_61 = arith.constant 0 : index
      %186 = vector.load %arg3[%185, %c0_61] : memref<2048x128xf32, #tpu.memory_space<vmem>>, vector<64x128xf32>
      %187 = arith.subf %184, %186 : vector<64x128xf32>
      %188 = math.absf %187 : vector<64x128xf32>
      %189 = vector.broadcast %182 : i32 to vector<64x128xi32>
      %190 = arith.addi %14, %189 : vector<64x128xi32>
      %c2592_i32_62 = arith.constant 2592 : i32
      %191 = vector.broadcast %c2592_i32_62 : i32 to vector<64x128xi32>
      %192 = arith.cmpi slt, %190, %191 : vector<64x128xi32>
      %cst_63 = arith.constant 0.000000e+00 : f32
      %193 = vector.broadcast %cst_63 : f32 to vector<64x128xf32>
      %194 = arith.select %192, %188, %193 : vector<64x128xi1>, vector<64x128xf32>
      %195 = arith.addf %180, %194 : vector<64x128xf32>
      %c12_i32 = arith.constant 12 : i32
      %c64_i32_64 = arith.constant 64 : i32
      %196 = arith.muli %c12_i32, %c64_i32_64 : i32
      %197 = tpu.assume_multiple %196, 64 : i32
      %198 = arith.index_cast %197 : i32 to index
      %c0_65 = arith.constant 0 : index
      %199 = vector.load %arg2[%198, %c0_65] : memref<2048x128xf32, #tpu.memory_space<vmem>>, vector<64x128xf32>
      %200 = arith.index_cast %197 : i32 to index
      %c0_66 = arith.constant 0 : index
      %201 = vector.load %arg3[%200, %c0_66] : memref<2048x128xf32, #tpu.memory_space<vmem>>, vector<64x128xf32>
      %202 = arith.subf %199, %201 : vector<64x128xf32>
      %203 = math.absf %202 : vector<64x128xf32>
      %204 = vector.broadcast %197 : i32 to vector<64x128xi32>
      %205 = arith.addi %14, %204 : vector<64x128xi32>
      %c2592_i32_67 = arith.constant 2592 : i32
      %206 = vector.broadcast %c2592_i32_67 : i32 to vector<64x128xi32>
      %207 = arith.cmpi slt, %205, %206 : vector<64x128xi32>
      %cst_68 = arith.constant 0.000000e+00 : f32
      %208 = vector.broadcast %cst_68 : f32 to vector<64x128xf32>
      %209 = arith.select %207, %203, %208 : vector<64x128xi1>, vector<64x128xf32>
      %210 = arith.addf %195, %209 : vector<64x128xf32>
      %c13_i32 = arith.constant 13 : i32
      %c64_i32_69 = arith.constant 64 : i32
      %211 = arith.muli %c13_i32, %c64_i32_69 : i32
      %212 = tpu.assume_multiple %211, 64 : i32
      %213 = arith.index_cast %212 : i32 to index
      %c0_70 = arith.constant 0 : index
      %214 = vector.load %arg2[%213, %c0_70] : memref<2048x128xf32, #tpu.memory_space<vmem>>, vector<64x128xf32>
      %215 = arith.index_cast %212 : i32 to index
      %c0_71 = arith.constant 0 : index
      %216 = vector.load %arg3[%215, %c0_71] : memref<2048x128xf32, #tpu.memory_space<vmem>>, vector<64x128xf32>
      %217 = arith.subf %214, %216 : vector<64x128xf32>
      %218 = math.absf %217 : vector<64x128xf32>
      %219 = vector.broadcast %212 : i32 to vector<64x128xi32>
      %220 = arith.addi %14, %219 : vector<64x128xi32>
      %c2592_i32_72 = arith.constant 2592 : i32
      %221 = vector.broadcast %c2592_i32_72 : i32 to vector<64x128xi32>
      %222 = arith.cmpi slt, %220, %221 : vector<64x128xi32>
      %cst_73 = arith.constant 0.000000e+00 : f32
      %223 = vector.broadcast %cst_73 : f32 to vector<64x128xf32>
      %224 = arith.select %222, %218, %223 : vector<64x128xi1>, vector<64x128xf32>
      %225 = arith.addf %210, %224 : vector<64x128xf32>
      %c14_i32 = arith.constant 14 : i32
      %c64_i32_74 = arith.constant 64 : i32
      %226 = arith.muli %c14_i32, %c64_i32_74 : i32
      %227 = tpu.assume_multiple %226, 64 : i32
      %228 = arith.index_cast %227 : i32 to index
      %c0_75 = arith.constant 0 : index
      %229 = vector.load %arg2[%228, %c0_75] : memref<2048x128xf32, #tpu.memory_space<vmem>>, vector<64x128xf32>
      %230 = arith.index_cast %227 : i32 to index
      %c0_76 = arith.constant 0 : index
      %231 = vector.load %arg3[%230, %c0_76] : memref<2048x128xf32, #tpu.memory_space<vmem>>, vector<64x128xf32>
      %232 = arith.subf %229, %231 : vector<64x128xf32>
      %233 = math.absf %232 : vector<64x128xf32>
      %234 = vector.broadcast %227 : i32 to vector<64x128xi32>
      %235 = arith.addi %14, %234 : vector<64x128xi32>
      %c2592_i32_77 = arith.constant 2592 : i32
      %236 = vector.broadcast %c2592_i32_77 : i32 to vector<64x128xi32>
      %237 = arith.cmpi slt, %235, %236 : vector<64x128xi32>
      %cst_78 = arith.constant 0.000000e+00 : f32
      %238 = vector.broadcast %cst_78 : f32 to vector<64x128xf32>
      %239 = arith.select %237, %233, %238 : vector<64x128xi1>, vector<64x128xf32>
      %240 = arith.addf %225, %239 : vector<64x128xf32>
      %c15_i32 = arith.constant 15 : i32
      %c64_i32_79 = arith.constant 64 : i32
      %241 = arith.muli %c15_i32, %c64_i32_79 : i32
      %242 = tpu.assume_multiple %241, 64 : i32
      %243 = arith.index_cast %242 : i32 to index
      %c0_80 = arith.constant 0 : index
      %244 = vector.load %arg2[%243, %c0_80] : memref<2048x128xf32, #tpu.memory_space<vmem>>, vector<64x128xf32>
      %245 = arith.index_cast %242 : i32 to index
      %c0_81 = arith.constant 0 : index
      %246 = vector.load %arg3[%245, %c0_81] : memref<2048x128xf32, #tpu.memory_space<vmem>>, vector<64x128xf32>
      %247 = arith.subf %244, %246 : vector<64x128xf32>
      %248 = math.absf %247 : vector<64x128xf32>
      %249 = vector.broadcast %242 : i32 to vector<64x128xi32>
      %250 = arith.addi %14, %249 : vector<64x128xi32>
      %c2592_i32_82 = arith.constant 2592 : i32
      %251 = vector.broadcast %c2592_i32_82 : i32 to vector<64x128xi32>
      %252 = arith.cmpi slt, %250, %251 : vector<64x128xi32>
      %cst_83 = arith.constant 0.000000e+00 : f32
      %253 = vector.broadcast %cst_83 : f32 to vector<64x128xf32>
      %254 = arith.select %252, %248, %253 : vector<64x128xi1>, vector<64x128xf32>
      %255 = arith.addf %240, %254 : vector<64x128xf32>
      %c16_i32 = arith.constant 16 : i32
      %c64_i32_84 = arith.constant 64 : i32
      %256 = arith.muli %c16_i32, %c64_i32_84 : i32
      %257 = tpu.assume_multiple %256, 64 : i32
      %258 = arith.index_cast %257 : i32 to index
      %c0_85 = arith.constant 0 : index
      %259 = vector.load %arg2[%258, %c0_85] : memref<2048x128xf32, #tpu.memory_space<vmem>>, vector<64x128xf32>
      %260 = arith.index_cast %257 : i32 to index
      %c0_86 = arith.constant 0 : index
      %261 = vector.load %arg3[%260, %c0_86] : memref<2048x128xf32, #tpu.memory_space<vmem>>, vector<64x128xf32>
      %262 = arith.subf %259, %261 : vector<64x128xf32>
      %263 = math.absf %262 : vector<64x128xf32>
      %264 = vector.broadcast %257 : i32 to vector<64x128xi32>
      %265 = arith.addi %14, %264 : vector<64x128xi32>
      %c2592_i32_87 = arith.constant 2592 : i32
      %266 = vector.broadcast %c2592_i32_87 : i32 to vector<64x128xi32>
      %267 = arith.cmpi slt, %265, %266 : vector<64x128xi32>
      %cst_88 = arith.constant 0.000000e+00 : f32
      %268 = vector.broadcast %cst_88 : f32 to vector<64x128xf32>
      %269 = arith.select %267, %263, %268 : vector<64x128xi1>, vector<64x128xf32>
      %270 = arith.addf %255, %269 : vector<64x128xf32>
      %c17_i32 = arith.constant 17 : i32
      %c64_i32_89 = arith.constant 64 : i32
      %271 = arith.muli %c17_i32, %c64_i32_89 : i32
      %272 = tpu.assume_multiple %271, 64 : i32
      %273 = arith.index_cast %272 : i32 to index
      %c0_90 = arith.constant 0 : index
      %274 = vector.load %arg2[%273, %c0_90] : memref<2048x128xf32, #tpu.memory_space<vmem>>, vector<64x128xf32>
      %275 = arith.index_cast %272 : i32 to index
      %c0_91 = arith.constant 0 : index
      %276 = vector.load %arg3[%275, %c0_91] : memref<2048x128xf32, #tpu.memory_space<vmem>>, vector<64x128xf32>
      %277 = arith.subf %274, %276 : vector<64x128xf32>
      %278 = math.absf %277 : vector<64x128xf32>
      %279 = vector.broadcast %272 : i32 to vector<64x128xi32>
      %280 = arith.addi %14, %279 : vector<64x128xi32>
      %c2592_i32_92 = arith.constant 2592 : i32
      %281 = vector.broadcast %c2592_i32_92 : i32 to vector<64x128xi32>
      %282 = arith.cmpi slt, %280, %281 : vector<64x128xi32>
      %cst_93 = arith.constant 0.000000e+00 : f32
      %283 = vector.broadcast %cst_93 : f32 to vector<64x128xf32>
      %284 = arith.select %282, %278, %283 : vector<64x128xi1>, vector<64x128xf32>
      %285 = arith.addf %270, %284 : vector<64x128xf32>
      %c18_i32 = arith.constant 18 : i32
      %c64_i32_94 = arith.constant 64 : i32
      %286 = arith.muli %c18_i32, %c64_i32_94 : i32
      %287 = tpu.assume_multiple %286, 64 : i32
      %288 = arith.index_cast %287 : i32 to index
      %c0_95 = arith.constant 0 : index
      %289 = vector.load %arg2[%288, %c0_95] : memref<2048x128xf32, #tpu.memory_space<vmem>>, vector<64x128xf32>
      %290 = arith.index_cast %287 : i32 to index
      %c0_96 = arith.constant 0 : index
      %291 = vector.load %arg3[%290, %c0_96] : memref<2048x128xf32, #tpu.memory_space<vmem>>, vector<64x128xf32>
      %292 = arith.subf %289, %291 : vector<64x128xf32>
      %293 = math.absf %292 : vector<64x128xf32>
      %294 = vector.broadcast %287 : i32 to vector<64x128xi32>
      %295 = arith.addi %14, %294 : vector<64x128xi32>
      %c2592_i32_97 = arith.constant 2592 : i32
      %296 = vector.broadcast %c2592_i32_97 : i32 to vector<64x128xi32>
      %297 = arith.cmpi slt, %295, %296 : vector<64x128xi32>
      %cst_98 = arith.constant 0.000000e+00 : f32
      %298 = vector.broadcast %cst_98 : f32 to vector<64x128xf32>
      %299 = arith.select %297, %293, %298 : vector<64x128xi1>, vector<64x128xf32>
      %300 = arith.addf %285, %299 : vector<64x128xf32>
      %c19_i32 = arith.constant 19 : i32
      %c64_i32_99 = arith.constant 64 : i32
      %301 = arith.muli %c19_i32, %c64_i32_99 : i32
      %302 = tpu.assume_multiple %301, 64 : i32
      %303 = arith.index_cast %302 : i32 to index
      %c0_100 = arith.constant 0 : index
      %304 = vector.load %arg2[%303, %c0_100] : memref<2048x128xf32, #tpu.memory_space<vmem>>, vector<64x128xf32>
      %305 = arith.index_cast %302 : i32 to index
      %c0_101 = arith.constant 0 : index
      %306 = vector.load %arg3[%305, %c0_101] : memref<2048x128xf32, #tpu.memory_space<vmem>>, vector<64x128xf32>
      %307 = arith.subf %304, %306 : vector<64x128xf32>
      %308 = math.absf %307 : vector<64x128xf32>
      %309 = vector.broadcast %302 : i32 to vector<64x128xi32>
      %310 = arith.addi %14, %309 : vector<64x128xi32>
      %c2592_i32_102 = arith.constant 2592 : i32
      %311 = vector.broadcast %c2592_i32_102 : i32 to vector<64x128xi32>
      %312 = arith.cmpi slt, %310, %311 : vector<64x128xi32>
      %cst_103 = arith.constant 0.000000e+00 : f32
      %313 = vector.broadcast %cst_103 : f32 to vector<64x128xf32>
      %314 = arith.select %312, %308, %313 : vector<64x128xi1>, vector<64x128xf32>
      %315 = arith.addf %300, %314 : vector<64x128xf32>
      %c20_i32 = arith.constant 20 : i32
      %c64_i32_104 = arith.constant 64 : i32
      %316 = arith.muli %c20_i32, %c64_i32_104 : i32
      %317 = tpu.assume_multiple %316, 64 : i32
      %318 = arith.index_cast %317 : i32 to index
      %c0_105 = arith.constant 0 : index
      %319 = vector.load %arg2[%318, %c0_105] : memref<2048x128xf32, #tpu.memory_space<vmem>>, vector<64x128xf32>
      %320 = arith.index_cast %317 : i32 to index
      %c0_106 = arith.constant 0 : index
      %321 = vector.load %arg3[%320, %c0_106] : memref<2048x128xf32, #tpu.memory_space<vmem>>, vector<64x128xf32>
      %322 = arith.subf %319, %321 : vector<64x128xf32>
      %323 = math.absf %322 : vector<64x128xf32>
      %324 = vector.broadcast %317 : i32 to vector<64x128xi32>
      %325 = arith.addi %14, %324 : vector<64x128xi32>
      %c2592_i32_107 = arith.constant 2592 : i32
      %326 = vector.broadcast %c2592_i32_107 : i32 to vector<64x128xi32>
      %327 = arith.cmpi slt, %325, %326 : vector<64x128xi32>
      %cst_108 = arith.constant 0.000000e+00 : f32
      %328 = vector.broadcast %cst_108 : f32 to vector<64x128xf32>
      %329 = arith.select %327, %323, %328 : vector<64x128xi1>, vector<64x128xf32>
      %330 = arith.addf %315, %329 : vector<64x128xf32>
      %c21_i32 = arith.constant 21 : i32
      %c64_i32_109 = arith.constant 64 : i32
      %331 = arith.muli %c21_i32, %c64_i32_109 : i32
      %332 = tpu.assume_multiple %331, 64 : i32
      %333 = arith.index_cast %332 : i32 to index
      %c0_110 = arith.constant 0 : index
      %334 = vector.load %arg2[%333, %c0_110] : memref<2048x128xf32, #tpu.memory_space<vmem>>, vector<64x128xf32>
      %335 = arith.index_cast %332 : i32 to index
      %c0_111 = arith.constant 0 : index
      %336 = vector.load %arg3[%335, %c0_111] : memref<2048x128xf32, #tpu.memory_space<vmem>>, vector<64x128xf32>
      %337 = arith.subf %334, %336 : vector<64x128xf32>
      %338 = math.absf %337 : vector<64x128xf32>
      %339 = vector.broadcast %332 : i32 to vector<64x128xi32>
      %340 = arith.addi %14, %339 : vector<64x128xi32>
      %c2592_i32_112 = arith.constant 2592 : i32
      %341 = vector.broadcast %c2592_i32_112 : i32 to vector<64x128xi32>
      %342 = arith.cmpi slt, %340, %341 : vector<64x128xi32>
      %cst_113 = arith.constant 0.000000e+00 : f32
      %343 = vector.broadcast %cst_113 : f32 to vector<64x128xf32>
      %344 = arith.select %342, %338, %343 : vector<64x128xi1>, vector<64x128xf32>
      %345 = arith.addf %330, %344 : vector<64x128xf32>
      %c22_i32 = arith.constant 22 : i32
      %c64_i32_114 = arith.constant 64 : i32
      %346 = arith.muli %c22_i32, %c64_i32_114 : i32
      %347 = tpu.assume_multiple %346, 64 : i32
      %348 = arith.index_cast %347 : i32 to index
      %c0_115 = arith.constant 0 : index
      %349 = vector.load %arg2[%348, %c0_115] : memref<2048x128xf32, #tpu.memory_space<vmem>>, vector<64x128xf32>
      %350 = arith.index_cast %347 : i32 to index
      %c0_116 = arith.constant 0 : index
      %351 = vector.load %arg3[%350, %c0_116] : memref<2048x128xf32, #tpu.memory_space<vmem>>, vector<64x128xf32>
      %352 = arith.subf %349, %351 : vector<64x128xf32>
      %353 = math.absf %352 : vector<64x128xf32>
      %354 = vector.broadcast %347 : i32 to vector<64x128xi32>
      %355 = arith.addi %14, %354 : vector<64x128xi32>
      %c2592_i32_117 = arith.constant 2592 : i32
      %356 = vector.broadcast %c2592_i32_117 : i32 to vector<64x128xi32>
      %357 = arith.cmpi slt, %355, %356 : vector<64x128xi32>
      %cst_118 = arith.constant 0.000000e+00 : f32
      %358 = vector.broadcast %cst_118 : f32 to vector<64x128xf32>
      %359 = arith.select %357, %353, %358 : vector<64x128xi1>, vector<64x128xf32>
      %360 = arith.addf %345, %359 : vector<64x128xf32>
      %c23_i32 = arith.constant 23 : i32
      %c64_i32_119 = arith.constant 64 : i32
      %361 = arith.muli %c23_i32, %c64_i32_119 : i32
      %362 = tpu.assume_multiple %361, 64 : i32
      %363 = arith.index_cast %362 : i32 to index
      %c0_120 = arith.constant 0 : index
      %364 = vector.load %arg2[%363, %c0_120] : memref<2048x128xf32, #tpu.memory_space<vmem>>, vector<64x128xf32>
      %365 = arith.index_cast %362 : i32 to index
      %c0_121 = arith.constant 0 : index
      %366 = vector.load %arg3[%365, %c0_121] : memref<2048x128xf32, #tpu.memory_space<vmem>>, vector<64x128xf32>
      %367 = arith.subf %364, %366 : vector<64x128xf32>
      %368 = math.absf %367 : vector<64x128xf32>
      %369 = vector.broadcast %362 : i32 to vector<64x128xi32>
      %370 = arith.addi %14, %369 : vector<64x128xi32>
      %c2592_i32_122 = arith.constant 2592 : i32
      %371 = vector.broadcast %c2592_i32_122 : i32 to vector<64x128xi32>
      %372 = arith.cmpi slt, %370, %371 : vector<64x128xi32>
      %cst_123 = arith.constant 0.000000e+00 : f32
      %373 = vector.broadcast %cst_123 : f32 to vector<64x128xf32>
      %374 = arith.select %372, %368, %373 : vector<64x128xi1>, vector<64x128xf32>
      %375 = arith.addf %360, %374 : vector<64x128xf32>
      %c24_i32 = arith.constant 24 : i32
      %c64_i32_124 = arith.constant 64 : i32
      %376 = arith.muli %c24_i32, %c64_i32_124 : i32
      %377 = tpu.assume_multiple %376, 64 : i32
      %378 = arith.index_cast %377 : i32 to index
      %c0_125 = arith.constant 0 : index
      %379 = vector.load %arg2[%378, %c0_125] : memref<2048x128xf32, #tpu.memory_space<vmem>>, vector<64x128xf32>
      %380 = arith.index_cast %377 : i32 to index
      %c0_126 = arith.constant 0 : index
      %381 = vector.load %arg3[%380, %c0_126] : memref<2048x128xf32, #tpu.memory_space<vmem>>, vector<64x128xf32>
      %382 = arith.subf %379, %381 : vector<64x128xf32>
      %383 = math.absf %382 : vector<64x128xf32>
      %384 = vector.broadcast %377 : i32 to vector<64x128xi32>
      %385 = arith.addi %14, %384 : vector<64x128xi32>
      %c2592_i32_127 = arith.constant 2592 : i32
      %386 = vector.broadcast %c2592_i32_127 : i32 to vector<64x128xi32>
      %387 = arith.cmpi slt, %385, %386 : vector<64x128xi32>
      %cst_128 = arith.constant 0.000000e+00 : f32
      %388 = vector.broadcast %cst_128 : f32 to vector<64x128xf32>
      %389 = arith.select %387, %383, %388 : vector<64x128xi1>, vector<64x128xf32>
      %390 = arith.addf %375, %389 : vector<64x128xf32>
      %c25_i32 = arith.constant 25 : i32
      %c64_i32_129 = arith.constant 64 : i32
      %391 = arith.muli %c25_i32, %c64_i32_129 : i32
      %392 = tpu.assume_multiple %391, 64 : i32
      %393 = arith.index_cast %392 : i32 to index
      %c0_130 = arith.constant 0 : index
      %394 = vector.load %arg2[%393, %c0_130] : memref<2048x128xf32, #tpu.memory_space<vmem>>, vector<64x128xf32>
      %395 = arith.index_cast %392 : i32 to index
      %c0_131 = arith.constant 0 : index
      %396 = vector.load %arg3[%395, %c0_131] : memref<2048x128xf32, #tpu.memory_space<vmem>>, vector<64x128xf32>
      %397 = arith.subf %394, %396 : vector<64x128xf32>
      %398 = math.absf %397 : vector<64x128xf32>
      %399 = vector.broadcast %392 : i32 to vector<64x128xi32>
      %400 = arith.addi %14, %399 : vector<64x128xi32>
      %c2592_i32_132 = arith.constant 2592 : i32
      %401 = vector.broadcast %c2592_i32_132 : i32 to vector<64x128xi32>
      %402 = arith.cmpi slt, %400, %401 : vector<64x128xi32>
      %cst_133 = arith.constant 0.000000e+00 : f32
      %403 = vector.broadcast %cst_133 : f32 to vector<64x128xf32>
      %404 = arith.select %402, %398, %403 : vector<64x128xi1>, vector<64x128xf32>
      %405 = arith.addf %390, %404 : vector<64x128xf32>
      %c26_i32 = arith.constant 26 : i32
      %c64_i32_134 = arith.constant 64 : i32
      %406 = arith.muli %c26_i32, %c64_i32_134 : i32
      %407 = tpu.assume_multiple %406, 64 : i32
      %408 = arith.index_cast %407 : i32 to index
      %c0_135 = arith.constant 0 : index
      %409 = vector.load %arg2[%408, %c0_135] : memref<2048x128xf32, #tpu.memory_space<vmem>>, vector<64x128xf32>
      %410 = arith.index_cast %407 : i32 to index
      %c0_136 = arith.constant 0 : index
      %411 = vector.load %arg3[%410, %c0_136] : memref<2048x128xf32, #tpu.memory_space<vmem>>, vector<64x128xf32>
      %412 = arith.subf %409, %411 : vector<64x128xf32>
      %413 = math.absf %412 : vector<64x128xf32>
      %414 = vector.broadcast %407 : i32 to vector<64x128xi32>
      %415 = arith.addi %14, %414 : vector<64x128xi32>
      %c2592_i32_137 = arith.constant 2592 : i32
      %416 = vector.broadcast %c2592_i32_137 : i32 to vector<64x128xi32>
      %417 = arith.cmpi slt, %415, %416 : vector<64x128xi32>
      %cst_138 = arith.constant 0.000000e+00 : f32
      %418 = vector.broadcast %cst_138 : f32 to vector<64x128xf32>
      %419 = arith.select %417, %413, %418 : vector<64x128xi1>, vector<64x128xf32>
      %420 = arith.addf %405, %419 : vector<64x128xf32>
      %c27_i32 = arith.constant 27 : i32
      %c64_i32_139 = arith.constant 64 : i32
      %421 = arith.muli %c27_i32, %c64_i32_139 : i32
      %422 = tpu.assume_multiple %421, 64 : i32
      %423 = arith.index_cast %422 : i32 to index
      %c0_140 = arith.constant 0 : index
      %424 = vector.load %arg2[%423, %c0_140] : memref<2048x128xf32, #tpu.memory_space<vmem>>, vector<64x128xf32>
      %425 = arith.index_cast %422 : i32 to index
      %c0_141 = arith.constant 0 : index
      %426 = vector.load %arg3[%425, %c0_141] : memref<2048x128xf32, #tpu.memory_space<vmem>>, vector<64x128xf32>
      %427 = arith.subf %424, %426 : vector<64x128xf32>
      %428 = math.absf %427 : vector<64x128xf32>
      %429 = vector.broadcast %422 : i32 to vector<64x128xi32>
      %430 = arith.addi %14, %429 : vector<64x128xi32>
      %c2592_i32_142 = arith.constant 2592 : i32
      %431 = vector.broadcast %c2592_i32_142 : i32 to vector<64x128xi32>
      %432 = arith.cmpi slt, %430, %431 : vector<64x128xi32>
      %cst_143 = arith.constant 0.000000e+00 : f32
      %433 = vector.broadcast %cst_143 : f32 to vector<64x128xf32>
      %434 = arith.select %432, %428, %433 : vector<64x128xi1>, vector<64x128xf32>
      %435 = arith.addf %420, %434 : vector<64x128xf32>
      %c28_i32 = arith.constant 28 : i32
      %c64_i32_144 = arith.constant 64 : i32
      %436 = arith.muli %c28_i32, %c64_i32_144 : i32
      %437 = tpu.assume_multiple %436, 64 : i32
      %438 = arith.index_cast %437 : i32 to index
      %c0_145 = arith.constant 0 : index
      %439 = vector.load %arg2[%438, %c0_145] : memref<2048x128xf32, #tpu.memory_space<vmem>>, vector<64x128xf32>
      %440 = arith.index_cast %437 : i32 to index
      %c0_146 = arith.constant 0 : index
      %441 = vector.load %arg3[%440, %c0_146] : memref<2048x128xf32, #tpu.memory_space<vmem>>, vector<64x128xf32>
      %442 = arith.subf %439, %441 : vector<64x128xf32>
      %443 = math.absf %442 : vector<64x128xf32>
      %444 = vector.broadcast %437 : i32 to vector<64x128xi32>
      %445 = arith.addi %14, %444 : vector<64x128xi32>
      %c2592_i32_147 = arith.constant 2592 : i32
      %446 = vector.broadcast %c2592_i32_147 : i32 to vector<64x128xi32>
      %447 = arith.cmpi slt, %445, %446 : vector<64x128xi32>
      %cst_148 = arith.constant 0.000000e+00 : f32
      %448 = vector.broadcast %cst_148 : f32 to vector<64x128xf32>
      %449 = arith.select %447, %443, %448 : vector<64x128xi1>, vector<64x128xf32>
      %450 = arith.addf %435, %449 : vector<64x128xf32>
      %c29_i32 = arith.constant 29 : i32
      %c64_i32_149 = arith.constant 64 : i32
      %451 = arith.muli %c29_i32, %c64_i32_149 : i32
      %452 = tpu.assume_multiple %451, 64 : i32
      %453 = arith.index_cast %452 : i32 to index
      %c0_150 = arith.constant 0 : index
      %454 = vector.load %arg2[%453, %c0_150] : memref<2048x128xf32, #tpu.memory_space<vmem>>, vector<64x128xf32>
      %455 = arith.index_cast %452 : i32 to index
      %c0_151 = arith.constant 0 : index
      %456 = vector.load %arg3[%455, %c0_151] : memref<2048x128xf32, #tpu.memory_space<vmem>>, vector<64x128xf32>
      %457 = arith.subf %454, %456 : vector<64x128xf32>
      %458 = math.absf %457 : vector<64x128xf32>
      %459 = vector.broadcast %452 : i32 to vector<64x128xi32>
      %460 = arith.addi %14, %459 : vector<64x128xi32>
      %c2592_i32_152 = arith.constant 2592 : i32
      %461 = vector.broadcast %c2592_i32_152 : i32 to vector<64x128xi32>
      %462 = arith.cmpi slt, %460, %461 : vector<64x128xi32>
      %cst_153 = arith.constant 0.000000e+00 : f32
      %463 = vector.broadcast %cst_153 : f32 to vector<64x128xf32>
      %464 = arith.select %462, %458, %463 : vector<64x128xi1>, vector<64x128xf32>
      %465 = arith.addf %450, %464 : vector<64x128xf32>
      %c30_i32 = arith.constant 30 : i32
      %c64_i32_154 = arith.constant 64 : i32
      %466 = arith.muli %c30_i32, %c64_i32_154 : i32
      %467 = tpu.assume_multiple %466, 64 : i32
      %468 = arith.index_cast %467 : i32 to index
      %c0_155 = arith.constant 0 : index
      %469 = vector.load %arg2[%468, %c0_155] : memref<2048x128xf32, #tpu.memory_space<vmem>>, vector<64x128xf32>
      %470 = arith.index_cast %467 : i32 to index
      %c0_156 = arith.constant 0 : index
      %471 = vector.load %arg3[%470, %c0_156] : memref<2048x128xf32, #tpu.memory_space<vmem>>, vector<64x128xf32>
      %472 = arith.subf %469, %471 : vector<64x128xf32>
      %473 = math.absf %472 : vector<64x128xf32>
      %474 = vector.broadcast %467 : i32 to vector<64x128xi32>
      %475 = arith.addi %14, %474 : vector<64x128xi32>
      %c2592_i32_157 = arith.constant 2592 : i32
      %476 = vector.broadcast %c2592_i32_157 : i32 to vector<64x128xi32>
      %477 = arith.cmpi slt, %475, %476 : vector<64x128xi32>
      %cst_158 = arith.constant 0.000000e+00 : f32
      %478 = vector.broadcast %cst_158 : f32 to vector<64x128xf32>
      %479 = arith.select %477, %473, %478 : vector<64x128xi1>, vector<64x128xf32>
      %480 = arith.addf %465, %479 : vector<64x128xf32>
      %c31_i32 = arith.constant 31 : i32
      %c64_i32_159 = arith.constant 64 : i32
      %481 = arith.muli %c31_i32, %c64_i32_159 : i32
      %482 = tpu.assume_multiple %481, 64 : i32
      %483 = arith.index_cast %482 : i32 to index
      %c0_160 = arith.constant 0 : index
      %484 = vector.load %arg2[%483, %c0_160] : memref<2048x128xf32, #tpu.memory_space<vmem>>, vector<64x128xf32>
      %485 = arith.index_cast %482 : i32 to index
      %c0_161 = arith.constant 0 : index
      %486 = vector.load %arg3[%485, %c0_161] : memref<2048x128xf32, #tpu.memory_space<vmem>>, vector<64x128xf32>
      %487 = arith.subf %484, %486 : vector<64x128xf32>
      %488 = math.absf %487 : vector<64x128xf32>
      %489 = vector.broadcast %482 : i32 to vector<64x128xi32>
      %490 = arith.addi %14, %489 : vector<64x128xi32>
      %c2592_i32_162 = arith.constant 2592 : i32
      %491 = vector.broadcast %c2592_i32_162 : i32 to vector<64x128xi32>
      %492 = arith.cmpi slt, %490, %491 : vector<64x128xi32>
      %cst_163 = arith.constant 0.000000e+00 : f32
      %493 = vector.broadcast %cst_163 : f32 to vector<64x128xf32>
      %494 = arith.select %492, %488, %493 : vector<64x128xi1>, vector<64x128xf32>
      %495 = arith.addf %480, %494 : vector<64x128xf32>
      %c32_i32 = arith.constant 32 : i32
      %c0_164 = arith.constant 0 : index
      %c0_165 = arith.constant 0 : index
      %c0_166 = arith.constant 0 : index
      %496 = vector.load %arg4[%c0_164, %c0_165, %c0_166] : memref<1x64x128xf32, #tpu.memory_space<vmem>>, vector<1x64x128xf32>
      %497 = vector.shape_cast %496 : vector<1x64x128xf32> to vector<64x128xf32>
      %498 = arith.addf %497, %495 : vector<64x128xf32>
      %c0_167 = arith.constant 0 : index
      %c0_168 = arith.constant 0 : index
      %c0_169 = arith.constant 0 : index
      %499 = vector.load %arg4[%c0_167, %c0_168, %c0_169] : memref<1x64x128xf32, #tpu.memory_space<vmem>>, vector<1x64x128xf32>
      %500 = vector.shape_cast %499 : vector<1x64x128xf32> to vector<64x128xf32>
      %501 = vector.shape_cast %498 : vector<64x128xf32> to vector<1x64x128xf32>
      tpu.vector_store %arg4[%c0_167, %c0_168, %c0_169], %501 {strides = array<i32>} : memref<1x64x128xf32, #tpu.memory_space<vmem>>, vector<1x64x128xf32>,
    } else {
    }
    return
  }
  func.func @transform_0(%arg0: i32, %arg1: i32) -> (i32, i32) {
    %c1_i32 = arith.constant 1 : i32
    %0 = arith.muli %arg0, %c1_i32 : i32
    %1 = arith.addi %0, %arg1 : i32
    %c1_i32_0 = arith.constant 1 : i32
    %2 = arith.minsi %1, %c1_i32_0 : i32
    %c0_i32 = arith.constant 0 : i32
    %c0_i32_1 = arith.constant 0 : i32
    return %2, %c0_i32 : i32, i32
  }
  func.func @transform_1(%arg0: i32, %arg1: i32) -> (i32, i32) {
    %c1_i32 = arith.constant 1 : i32
    %0 = arith.muli %arg0, %c1_i32 : i32
    %1 = arith.addi %0, %arg1 : i32
    %c1_i32_0 = arith.constant 1 : i32
    %2 = arith.minsi %1, %c1_i32_0 : i32
    %c0_i32 = arith.constant 0 : i32
    %c0_i32_1 = arith.constant 0 : i32
    return %2, %c0_i32 : i32, i32
  }
  func.func @transform_2(%arg0: i32, %arg1: i32) -> (i32, i32, i32) {
    %c0_i32 = arith.constant 0 : i32
    %c0_i32_0 = arith.constant 0 : i32
    %c0_i32_1 = arith.constant 0 : i32
    return %arg0, %c0_i32, %c0_i32_0 : i32, i32, i32
  }
}

</mosaic_0001>

<bundles_post_ra>
// kernel: tpu_custom_call.1
= control target key start
LH: loop header
LB: loop body
LE: loop exit
PB: predicated region body
PF: predicated region fallthrough
CT: control target
= control target key end

     0   :  { %7 = vsyncpa [#allocation3], 0  ;;  %s7634_s0 = inlined_call_operand.hbm [shape: f32[2592,128], index: 0, kind: input, shape index: {}]   ;;  %s7635_s1 = inlined_call_operand.hbm [shape: f32[2592,128], index: 1, kind: input, shape index: {}]   ;;  %s7636_s2 = inlined_call_operand.hbm [shape: f32[2,64,128], index: 2, kind: output, shape index: {}]  }
   0x1   :  { %9 = vsyncpa [#allocation3 + $0x1], 0 }
   0x2   :  { %10 = vsyncpa [#allocation6], 0 }
   0x3   :  { %12 = vsyncpa [#allocation6 + $0x1], 0 }
   0x4   :  { %13 = vsyncpa [#allocation4], 0 }
   0x5   :  { %15 = vsyncpa [#allocation4 + $0x1], 0  ;;  %s5256_s9 = smov 0   ;;  %s5258_s10 = smov 0  }
   0x6   :  { %s5260_s11 = smov 0   ;;  %s5262_s12 = smov 0  }
   0x7   :  { %s5264_s13 = smov 0   ;;  %s5266_s14 = smov 0  }
   0x8   :  { %s5268_s15 = smov 0   ;;  %s5270_s16 = smov 0  }
   0x9   :  { %s5272_s17 = smov 0  }
   0xa LB: > { %s3950_s18 = sadd.s32 4294967295, %s5229_s17   ;;  %s3951_s19 = sadd.s32 4294967294, %s5229_s17   ;;  %s5229_s17 = sphi %s5272_s17, %s21_s17   ;;  %s5225_s16 = sphi %s5270_s16, %s7656_s16   ;;  %s5221_s15 = sphi %s5268_s15, %s7655_s15   ;;  %s5217_s14 = sphi %s5266_s14, %s7654_s14   ;;  %s5213_s13 = sphi %s5264_s13, %s7653_s13   ;;  %s5209_s12 = sphi %s5262_s12, %s7652_s12   ;;  %s5205_s11 = sphi %s5260_s11, %s7651_s11   ;;  %s5201_s10 = sphi %s5258_s10, %s7650_s10   ;;  %s5197_s9 = sphi %s5256_s9, %s7649_s9  }
   0xb   : > { %s33_s20 = sadd.s32 1, %s5225_s16  ;;  %p38_p0 = scmp.lt.s32.totalorder %s5225_s16, 1 }
   0xc   : > { %p35_p1 = scmp.ge.s32.totalorder %s33_s20, 2  ;;  %s46_s21 = sadd.s32 1, %s5217_s14 }
   0xd   : > { %s5305_s22 = scalar_select %p38_p0, %s5225_s16, 1 }
   0xe   : > { %s7658_s20 = smov (%p35_p1, %s33_s20), 0  ;;  %p53_p2 = scmp.ne.s32.totalorder %s5217_s14, %s5213_s13 }
   0xf   : > { %7640 = sst [smem:[#allocation11_spill]] %s7658_s20  ;;  %p54_p3 = scmp.eq.s32.totalorder %s5229_s17, 0 }
  0x10   : > { %p41_p4 = scmp.lt.s32.totalorder %s7658_s20, 1  ;;  %p59_p5 = scmp.ne.s32.totalorder %s5213_s13, %s5209_s12 }
  0x11   : > { %p5314_p6 = por %p54_p3, %p53_p2  ;;  %p60_p7 = scmp.eq.s32.totalorder %s3950_s18, 0 }
  0x12   : > { %s42_s24 = scalar_select %p41_p4, %s7658_s20, 1 }
  0x13   : > { %p5319_p8 = por %p60_p7, %p59_p5  ;;  %s101_s26 = ssub.s32 %s5225_s16, %s7658_s20 }
  0x14   : > { %s43_s27 = ssub.s32 %s5305_s22, %s42_s24  ;;  %p102_p9 = scmp.eq.s32.totalorder %s101_s26, 0 }
  0x15   : > { %p44_p10 = scmp.eq.s32.totalorder %s43_s27, 0  ;;  %s104_s28 = sadd.s32 1, %s5205_s11 }
  0x16   : > { %s5328_s29 = scalar_select %p102_p9, %s5205_s11, %s104_s28  }
  0x17   : > { %s5331_s30 = scalar_select %p44_p10, %s5217_s14, %s46_s21  }
  0x18   : > { %p114_p11 = scmp.ne.s32.totalorder %s5205_s11, %s5201_s10  ;;  %p115_p12 = scmp.eq.s32.totalorder %s3950_s18, 1 }
  0x19   : > { %p120_p13 = scmp.ne.s32.totalorder %s5201_s10, %s5197_s9  ;;  %p121_p0 = scmp.eq.s32.totalorder %s3951_s19, 1 }
  0x1a   : > { %p5337_p1 = por %p115_p12, %p114_p11  ;;  %p7638_p3 = scmp.ge.s32.totalorder %s5229_s17, 2 }
  0x1b   : > { %p5341_p2 = por %p121_p0, %p120_p13 }
  0x1c   : > { %s7643_s3 = scalar_select %p5337_p1, 1, 0 }
  0x1d   : > { %s7644_s4 = scalar_select %p5341_p2, 1, 0 }
  0x1e   : > { %137 = sbr.rel (%p7638_p3) target bundleno = 107 (0x6b), region = 16 }
  0x25   : > { %140 = sbr.rel (!%p5314_p6) target bundleno = 72 (0x48), region = 20  ;;  %s141_s5 = sand.u32 (%p5314_p6), 1, %s5217_s14  }
  0x26   : > { %s3955_s6 = sshll.u32 (%p5314_p6), %s5305_s22, 8  ;;  %s3954_s7 = sshll.u32 (%p5314_p6), %s141_s5, 11 }
  0x27   : > { %s150_s8 = ssub.s32 (%p5314_p6), 324, %s3955_s6  ;;  %s5355_s19 = scalar_lea.sflag (%p5314_p6), [#allocation3], %s141_s5 }
  0x28   : > { %p151_p4 = scmp.lt.s32.totalorder (%p5314_p6), %s150_s8, 256  ;;  %s145_s21 = scalar_lea.vmem (%p5314_p6), [#allocation2], %s3954_s7 }
  0x2c   : > { %s7660_s8 = smov (!%p151_p4, %s150_s8), 256 }
  0x2d   : > { %s5352_s12 = sshll.u32 %s7660_s8, 7 }
  0x2e   : > { %s155_s18 = ssub.s32 32768, %s5352_s12 }
  0x2f   : > { %156 = vsyncadd %s5355_s19, %s155_s18  ;;  %p3957_p5 = scmp.ne.s32.totalorder %s5352_s12, 0  ;;  %s4972_s24 = sshll.u32 %s5305_s22, 15 }
  0x30   : > { %s5363_s28 = scalar_lea.hbm %s7634_s0, %s4972_s24  ;;  %s161_s5 = sshll.u32 %s145_s21, 4  ;;  %s5365_s5 = int_to_ptr.vmem [resolvable:$true] %s161_s5 }
  0x31   : > { %s5063_s6 = scalar_lea.hbm %s5363_s28, %s5352_s12  ;;  %s5067_s18 = scalar_lea.hbm %s7634_s0, 41472 }
  0x32   : > { %p5064_p7 = scmp.ne.s32.totalorder %s5363_s28, %s5063_s6  ;;  %p5068_p11 = scmp.lt.u32.totalorder %s5363_s28, %s7634_s0 }
  0x33   : > { %p5069_p12 = scmp.lt.u32.totalorder %s5067_s18, %s5063_s6  ;;  %p5071_p0 = scmp.lt.u32.totalorder %s5063_s6, %s5363_s28 }
  0x34   : > { %p5065_p9 = pnand %p5064_p7, %p3957_p5 }
  0x35   : > { %p5070_p13 = por %p5069_p12, %p5068_p11 }
  0x36   : > { %p5066_p10 = pneg %p5065_p9 }
  0x37   : > { %p5072_p4 = por %p5071_p0, %p5070_p13 }
  0x39   : > { %p5073_p3 = pnand %p5072_p4, %p5066_p10 }
  0x3b   : > { %5076 = shalt.err (!%p5073_p3)
}
  0x3c   : > { %s5077_s21 = scalar_lea.vmem %s5365_s5, %s5352_s12  ;;  %s5231_s24 = smov [#allocation2]  }
  0x3d   : > { %p5078_p7 = scmp.ne.s32.totalorder %s5365_s5, %s5077_s21  ;;  %s5081_s27 = sshll.u32 %s5231_s24, 4  ;;  %s5082_s27 = int_to_ptr.vmem [resolvable:$false] %s5081_s27 }
  0x3e   : > { %s5083_s20 = scalar_lea.vmem %s5082_s27, 65536  ;;  %p5084_p1 = scmp.lt.s32.totalorder %s5365_s5, %s5082_s27 }
  0x3f   : > { %p5079_p9 = pnand %p5078_p7, %p3957_p5  ;;  %p5085_p11 = scmp.lt.s32.totalorder %s5083_s20, %s5077_s21 }
  0x41   : > { %p5080_p2 = pneg %p5079_p9  ;;  %p5086_p12 = por %p5085_p11, %p5084_p1 }
  0x43   : > { %p5087_p13 = pnand %p5086_p12, %p5080_p2 }
  0x45   : > { %5090 = shalt.err (!%p5087_p13)
}
  0x46   : > { %s5232_s6 = smov 128   ;;  %s5233_s7 = smov 8  }
  0x47   : > { %167 = dma.hbm_to_vmem [thread:$0]  (%p3957_p5), %s5363_s28, %s5352_s12, %s5365_s5, %s5355_s19, %s5232_s6, %s5232_s6, %s5233_s7  }
  0x48 PF: > { %170 = sbr.rel (!%p5314_p6) target bundleno = 107 (0x6b), region = 24  ;;  %s171_s8 = sand.u32 (%p5314_p6), 1, %s5217_s14  }
  0x49   : > { %s3962_s18 = sshll.u32 (%p5314_p6), %s5305_s22, 8  ;;  %s3961_s26 = sshll.u32 (%p5314_p6), %s171_s8, 11 }
  0x4a   : > { %s180_s21 = ssub.s32 (%p5314_p6), 324, %s3962_s18  ;;  %s5399_s20 = scalar_lea.sflag (%p5314_p6), [#allocation6], %s171_s8 }
  0x4b   : > { %p181_p1 = scmp.lt.s32.totalorder (%p5314_p6), %s180_s21, 256  ;;  %s175_s12 = scalar_lea.vmem (%p5314_p6), [#allocation5], %s3961_s26 }
  0x4f   : > { %s7662_s21 = smov (!%p181_p1, %s180_s21), 256 }
  0x50   : > { %s5396_s24 = sshll.u32 %s7662_s21, 7 }
  0x51   : > { %s185_s27 = ssub.s32 32768, %s5396_s24 }
  0x52   : > { %186 = vsyncadd %s5399_s20, %s185_s27  ;;  %p3964_p6 = scmp.ne.s32.totalorder %s5396_s24, 0  ;;  %s4973_s23 = sshll.u32 %s5305_s22, 15 }
  0x53   : > { %s5407_s5 = scalar_lea.hbm %s7635_s1, %s4973_s23  ;;  %s191_s6 = sshll.u32 %s175_s12, 4  ;;  %s5409_s6 = int_to_ptr.vmem [resolvable:$true] %s191_s6 }
  0x54   : > { %s5091_s7 = scalar_lea.hbm %s5407_s5, %s5396_s24  ;;  %s5095_s22 = scalar_lea.hbm %s7635_s1, 41472 }
  0x55   : > { %p5092_p2 = scmp.ne.s32.totalorder %s5407_s5, %s5091_s7  ;;  %p5096_p10 = scmp.lt.u32.totalorder %s5407_s5, %s7635_s1 }
  0x56   : > { %p5097_p0 = scmp.lt.u32.totalorder %s5095_s22, %s5091_s7  ;;  %p5099_p7 = scmp.lt.u32.totalorder %s5091_s7, %s5407_s5 }
  0x57   : > { %p5093_p3 = pnand %p5092_p2, %p3964_p6 }
  0x58   : > { %p5098_p4 = por %p5097_p0, %p5096_p10 }
  0x59   : > { %p5094_p5 = pneg %p5093_p3 }
  0x5a   : > { %p5100_p9 = por %p5099_p7, %p5098_p4 }
  0x5c   : > { %p5101_p11 = pnand %p5100_p9, %p5094_p5 }
  0x5e   : > { %5104 = shalt.err (!%p5101_p11)
}
  0x5f   : > { %s5105_s27 = scalar_lea.vmem %s5409_s6, %s5396_s24  ;;  %s5234_s12 = smov [#allocation5]  }
  0x60   : > { %p5106_p12 = scmp.ne.s32.totalorder %s5409_s6, %s5105_s27  ;;  %s5109_s23 = sshll.u32 %s5234_s12, 4  ;;  %s5110_s23 = int_to_ptr.vmem [resolvable:$false] %s5109_s23 }
  0x61   : > { %s5111_s19 = scalar_lea.vmem %s5110_s23, 65536  ;;  %p5112_p2 = scmp.lt.s32.totalorder %s5409_s6, %s5110_s23 }
  0x62   : > { %p5107_p13 = pnand %p5106_p12, %p3964_p6  ;;  %p5113_p3 = scmp.lt.s32.totalorder %s5111_s19, %s5105_s27 }
  0x64   : > { %p5108_p1 = pneg %p5107_p13  ;;  %p5114_p10 = por %p5113_p3, %p5112_p2 }
  0x66   : > { %p5115_p0 = pnand %p5114_p10, %p5108_p1 }
  0x68   : > { %5118 = shalt.err (!%p5115_p0)
}
  0x69   : > { %s5235_s28 = smov 128   ;;  %s5236_s7 = smov 8  }
  0x6a   : > { %197 = dma.hbm_to_vmem [thread:$0]  (%p3964_p6), %s5407_s5, %s5396_s24, %s5409_s6, %s5399_s20, %s5235_s28, %s5235_s28, %s5236_s7  }
  0x6b PF: > { %p3968_p5 = scmp.ge.s32.totalorder %s5229_s17, 1  ;;  %p199_p4 = scmp.lt.s32.totalorder %s5229_s17, 3 }
  0x6d   : > { %p200_p7 = pnand %p3968_p5, %p199_p4 }
  0x6e   : > { %s205_s8 = sand.u32 (!%p200_p7), 1, %s5213_s13  }
  0x6f   : > { %203 = sbr.rel (%p200_p7) target bundleno = 751 (0x2ef), region = 28  ;;  %s3969_s18 = sshll.u32 (!%p200_p7), %s205_s8, 11 }
  0x70   : > { %s206_s22 = scalar_lea.sflag (!%p200_p7), [#allocation3], %s205_s8  ;;  %s5439_s26 = scalar_lea.vmem (!%p200_p7), [#allocation2], %s3969_s18 }
  0x76   : > { %5184 = dma.done.wait (%p5319_p8), %s206_s22, 32768  }
  0x77   : > { %5186 = vsyncadd (%p5319_p8), %s206_s22, 4294934528  ;;  %s215_s24 = scalar_lea.sflag [#allocation6], %s205_s8  ;;  %s5445_s20 = scalar_lea.vmem [#allocation5], %s3969_s18 }
  0x78   : > { %5188 = dma.done.wait (%p5319_p8), %s215_s24, 32768  }
  0x79   : > { %5190 = vsyncadd (%p5319_p8), %s215_s24, 4294934528  ;;  %s241_s5 = sand.u32 1, %s5201_s10   ;;  %v5237_v0 = vmov 0.0   ;;  %p3972_p8 = scmp.ge.s32.totalorder %s5221_s15, 1 }
  0x7a   : > { %s3971_s6 = sshll.u32 %s241_s5, 6  ;;  %v277_v1 = vld [vmem:[%s5439_s26] sm:$0xff] (!%p3972_p8)  ;;  %v278_v2 = vld [vmem:[%s5439_s26 + $0x8] sm:$0xff] (!%p3972_p8)  ;;  %v279_v3 = vld [vmem:[%s5439_s26 + $0x10] sm:$0xff] (!%p3972_p8) }
  0x7b   : > { %s5454_s21 = scalar_lea.vmem [#allocation7], %s3971_s6  ;;  %276 = sbr.rel (%p3972_p8) target bundleno = 331 (0x14b), region = 44  ;;  %v280_v4 = vld [vmem:[%s5439_s26 + $0x18] sm:$0xff] (!%p3972_p8)  ;;  %v281_v5 = vld [vmem:[%s5439_s26 + $0x20] sm:$0xff] (!%p3972_p8)  ;;  %v282_v7 = vld [vmem:[%s5439_s26 + $0x28] sm:$0xff] (!%p3972_p8) }
  0x7c   : > { %264 = vst [vmem:[%s5454_s21] sm:$0xff] %v5237_v0  ;;  %265 = vst [vmem:[%s5454_s21 + $0x8] sm:$0xff] %v5237_v0  ;;  %v285_v6 = vld [vmem:[%s5445_s20] sm:$0xff] (!%p3972_p8)  ;;  %v283_v8 = vld [vmem:[%s5439_s26 + $0x30] sm:$0xff] (!%p3972_p8) }
  0x7d   : > { %266 = vst [vmem:[%s5454_s21 + $0x10] sm:$0xff] %v5237_v0  ;;  %267 = vst [vmem:[%s5454_s21 + $0x18] sm:$0xff] %v5237_v0  ;;  %v286_v9 = vld [vmem:[%s5445_s20 + $0x8] sm:$0xff] (!%p3972_p8)  ;;  %v287_v10 = vld [vmem:[%s5445_s20 + $0x10] sm:$0xff] (!%p3972_p8)  ;;  %v293_v17 = vsub.f32 (!%p3972_p8), %v277_v1, %v285_v6 }
  0x7e   : > { %268 = vst [vmem:[%s5454_s21 + $0x20] sm:$0xff] %v5237_v0  ;;  %269 = vst [vmem:[%s5454_s21 + $0x28] sm:$0xff] %v5237_v0  ;;  %v284_v11 = vld [vmem:[%s5439_s26 + $0x38] sm:$0xff] (!%p3972_p8)  ;;  %v289_v13 = vld [vmem:[%s5445_s20 + $0x20] sm:$0xff] (!%p3972_p8)  ;;  %v294_v18 = vsub.f32 (!%p3972_p8), %v278_v2, %v286_v9  ;;  %v295_v19 = vsub.f32 (!%p3972_p8), %v279_v3, %v287_v10 }
  0x7f   : > { %270 = vst [vmem:[%s5454_s21 + $0x30] sm:$0xff] %v5237_v0  ;;  %271 = vst [vmem:[%s5454_s21 + $0x38] sm:$0xff] %v5237_v0  ;;  %v288_v12 = vld [vmem:[%s5445_s20 + $0x18] sm:$0xff] (!%p3972_p8)  ;;  %v290_v14 = vld [vmem:[%s5445_s20 + $0x28] sm:$0xff] (!%p3972_p8)  ;;  %v297_v24 = vsub.f32 (!%p3972_p8), %v281_v5, %v289_v13  ;;  %v301_v33 = vand.u32 (!%p3972_p8), 2147483647, %v293_v17 }
  0x80   : > { %v291_v15 = vld [vmem:[%s5445_s20 + $0x30] sm:$0xff] (!%p3972_p8)  ;;  %v292_v16 = vld [vmem:[%s5445_s20 + $0x38] sm:$0xff] (!%p3972_p8)  ;;  %v3973_v20 = vld [vmem:[%s5439_s26 + $0x40] sm:$0xff] (!%p3972_p8)  ;;  %v296_v23 = vsub.f32 (!%p3972_p8), %v280_v4, %v288_v12  ;;  %v298_v28 = vsub.f32 (!%p3972_p8), %v282_v7, %v290_v14  ;;  %v302_v37 = vand.u32 (!%p3972_p8), 2147483647, %v294_v18 }
  0x81   : > { %v3974_v21 = vld [vmem:[%s5439_s26 + $0x48] sm:$0xff] (!%p3972_p8)  ;;  %v3981_v22 = vld [vmem:[%s5445_s20 + $0x40] sm:$0xff] (!%p3972_p8)  ;;  %v3975_v25 = vld [vmem:[%s5439_s26 + $0x50] sm:$0xff] (!%p3972_p8)  ;;  %v299_v29 = vsub.f32 (!%p3972_p8), %v283_v8, %v291_v15  ;;  %v300_v32 = vsub.f32 (!%p3972_p8), %v284_v11, %v292_v16  ;;  %v303_v38 = vand.u32 (!%p3972_p8), 2147483647, %v295_v19 }
  0x82   : > { %v3982_v26 = vld [vmem:[%s5445_s20 + $0x48] sm:$0xff]  ;;  %v3983_v27 = vld [vmem:[%s5445_s20 + $0x50] sm:$0xff]  ;;  %v3976_v30 = vld [vmem:[%s5439_s26 + $0x58] sm:$0xff]  ;;  %v335_v36 = vsub.f32 %v3973_v20, %v3981_v22  ;;  %v304_v43 = vand.u32 2147483647, %v296_v23 }
  0x83   : > { %v3984_v31 = vld [vmem:[%s5445_s20 + $0x58] sm:$0xff]  ;;  %v3977_v34 = vld [vmem:[%s5439_s26 + $0x60] sm:$0xff]  ;;  %v3978_v39 = vld [vmem:[%s5439_s26 + $0x68] sm:$0xff]  ;;  %v336_v41 = vsub.f32 %v3974_v21, %v3982_v26  ;;  %v337_v42 = vsub.f32 %v3975_v25, %v3983_v27  ;;  %v305_v44 = vand.u32 2147483647, %v297_v24 }
  0x84   : > { %v3985_v35 = vld [vmem:[%s5445_s20 + $0x60] sm:$0xff]  ;;  %v3986_v40 = vld [vmem:[%s5445_s20 + $0x68] sm:$0xff]  ;;  %v3979_v45 = vld [vmem:[%s5439_s26 + $0x70] sm:$0xff]  ;;  %v338_v47 = vsub.f32 %v3976_v30, %v3984_v31  ;;  %v5495_v48 = vand.u32 2147483647, %v298_v28 }
  0x85   : > { %v3987_v46 = vld [vmem:[%s5445_s20 + $0x70] sm:$0xff]  ;;  %v5497_v49 = vand.u32 2147483647, %v299_v29  ;;  %v3980_v50 = vld [vmem:[%s5439_s26 + $0x78] sm:$0xff]  ;;  %v339_v52 = vsub.f32 %v3977_v34, %v3985_v35  ;;  %v5501_v53 = vand.u32 2147483647, %v300_v32  ;;  %v340_v54 = vsub.f32 %v3978_v39, %v3986_v40 }
  0x86   : > { %v3988_v51 = vld [vmem:[%s5445_s20 + $0x78] sm:$0xff]  ;;  %v343_v55 = vand.u32 2147483647, %v335_v36  ;;  %v3989_v56 = vld [vmem:[%s5439_s26 + $0x80] sm:$0xff]  ;;  %v341_v57 = vsub.f32 %v3979_v45, %v3987_v46  ;;  %v344_v58 = vand.u32 2147483647, %v336_v41 }
  0x87   : > { %v345_v59 = vand.u32 2147483647, %v337_v42  ;;  %v3990_v60 = vld [vmem:[%s5439_s26 + $0x88] sm:$0xff]  ;;  %v3991_v61 = vld [vmem:[%s5439_s26 + $0x90] sm:$0xff]  ;;  %v342_v62 = vsub.f32 %v3980_v50, %v3988_v51  ;;  %v346_v63 = vand.u32 2147483647, %v338_v47 }
  0x88   : > { %v3992_v0 = vld [vmem:[%s5439_s26 + $0x98] sm:$0xff]  ;;  %v3993_v1 = vld [vmem:[%s5439_s26 + $0xa0] sm:$0xff]  ;;  %v347_v3 = vand.u32 2147483647, %v339_v52  ;;  %v3994_v4 = vld [vmem:[%s5439_s26 + $0xa8] sm:$0xff]  ;;  %v351_v20 = vadd.f32 %v343_v55, %v301_v33  ;;  %v352_v26 = vadd.f32 %v344_v58, %v302_v37 }
  0x89   : > { %v3997_v2 = vld [vmem:[%s5445_s20 + $0x80] sm:$0xff]  ;;  %v3995_v5 = vld [vmem:[%s5439_s26 + $0xb0] sm:$0xff]  ;;  %v3996_v6 = vld [vmem:[%s5439_s26 + $0xb8] sm:$0xff]  ;;  %v348_v10 = vand.u32 2147483647, %v340_v54  ;;  %v353_v27 = vadd.f32 %v345_v59, %v303_v38  ;;  %v354_v34 = vadd.f32 %v346_v63, %v304_v43 }
  0x8a   : > { %v3998_v7 = vld [vmem:[%s5445_s20 + $0x88] sm:$0xff]  ;;  %v3999_v8 = vld [vmem:[%s5445_s20 + $0x90] sm:$0xff]  ;;  %v4000_v9 = vld [vmem:[%s5445_s20 + $0x98] sm:$0xff]  ;;  %v349_v14 = vand.u32 2147483647, %v341_v57  ;;  %v377_v16 = vsub.f32 %v3989_v56, %v3997_v2  ;;  %v355_v41 = vadd.f32 %v347_v3, %v305_v44 }
  0x8b   : > { %v4001_v11 = vld [vmem:[%s5445_s20 + $0xa0] sm:$0xff]  ;;  %v4002_v12 = vld [vmem:[%s5445_s20 + $0xa8] sm:$0xff]  ;;  %v4003_v13 = vld [vmem:[%s5445_s20 + $0xb0] sm:$0xff]  ;;  %v350_v19 = vand.u32 2147483647, %v342_v62  ;;  %v378_v21 = vsub.f32 %v3990_v60, %v3998_v7  ;;  %v379_v22 = vsub.f32 %v3991_v61, %v3999_v8  ;;  %v380_v28 = vsub.f32 %v3992_v0, %v4000_v9 }
  0x8c   : > { %v4004_v15 = vld [vmem:[%s5445_s20 + $0xb8] sm:$0xff]  ;;  %v4005_v17 = vld [vmem:[%s5439_s26 + $0xc0] sm:$0xff]  ;;  %v4006_v18 = vld [vmem:[%s5439_s26 + $0xc8] sm:$0xff]  ;;  %v381_v29 = vsub.f32 %v3993_v1, %v4001_v11  ;;  %v382_v33 = vsub.f32 %v3994_v4, %v4002_v12  ;;  %v383_v35 = vsub.f32 %v3995_v5, %v4003_v13  ;;  %v385_v42 = vand.u32 2147483647, %v377_v16 }
  0x8d   : > { %v4007_v23 = vld [vmem:[%s5439_s26 + $0xd0] sm:$0xff]  ;;  %v4013_v24 = vld [vmem:[%s5445_s20 + $0xc0] sm:$0xff]  ;;  %v4014_v25 = vld [vmem:[%s5445_s20 + $0xc8] sm:$0xff]  ;;  %v384_v36 = vsub.f32 %v3996_v6, %v4004_v15  ;;  %v386_v47 = vand.u32 2147483647, %v378_v21  ;;  %v356_v55 = vadd.f32 %v348_v10, %v5495_v48  ;;  %v357_v0 = vadd.f32 %v349_v14, %v5497_v49 }
  0x8e   : > { %v4008_v30 = vld [vmem:[%s5439_s26 + $0xd8] sm:$0xff]  ;;  %v4015_v31 = vld [vmem:[%s5445_s20 + $0xd0] sm:$0xff]  ;;  %v4009_v39 = vld [vmem:[%s5439_s26 + $0xe0] sm:$0xff]  ;;  %v419_v38 = vsub.f32 %v4005_v17, %v4013_v24  ;;  %v420_v46 = vsub.f32 %v4006_v18, %v4014_v25  ;;  %v387_v50 = vand.u32 2147483647, %v379_v22  ;;  %v358_v4 = vadd.f32 %v350_v19, %v5501_v53 }
  0x8f   : > { %v4016_v32 = vld [vmem:[%s5445_s20 + $0xd8] sm:$0xff]  ;;  %v4017_v40 = vld [vmem:[%s5445_s20 + $0xe0] sm:$0xff]  ;;  %v4010_v37 = vld [vmem:[%s5439_s26 + $0xe8] sm:$0xff]  ;;  %v421_v54 = vsub.f32 %v4007_v23, %v4015_v31  ;;  %v388_v56 = vand.u32 2147483647, %v380_v28  ;;  %v393_v10 = vadd.f32 %v385_v42, %v351_v20  ;;  %v394_v49 = vadd.f32 %v386_v47, %v352_v26 }
  0x90   : > { %v4018_v45 = vld [vmem:[%s5445_s20 + $0xe8] sm:$0xff]  ;;  %v4011_v51 = vld [vmem:[%s5439_s26 + $0xf0] sm:$0xff]  ;;  %v422_v43 = vsub.f32 %v4008_v30, %v4016_v32  ;;  %v389_v57 = vand.u32 2147483647, %v381_v29  ;;  %v4012_v58 = vld [vmem:[%s5439_s26 + $0xf8] sm:$0xff]  ;;  %v423_v59 = vsub.f32 %v4009_v39, %v4017_v40  ;;  %v395_v53 = vadd.f32 %v387_v50, %v353_v27 }
  0x91   : > { %v4019_v52 = vld [vmem:[%s5445_s20 + $0xf0] sm:$0xff]  ;;  %v4020_v44 = vld [vmem:[%s5445_s20 + $0xf8] sm:$0xff]  ;;  %v390_v60 = vand.u32 2147483647, %v382_v33  ;;  %v391_v61 = vand.u32 2147483647, %v383_v35  ;;  %v424_v63 = vsub.f32 %v4010_v37, %v4018_v45  ;;  %v396_v15 = vadd.f32 %v388_v56, %v354_v34 }
  0x92   : > { %v392_v62 = vand.u32 2147483647, %v384_v36  ;;  %v425_v1 = vsub.f32 %v4011_v51, %v4019_v52  ;;  %v427_v2 = vand.u32 2147483647, %v419_v38  ;;  %v428_v3 = vand.u32 2147483647, %v420_v46 }
  0x93   : > { %v4021_v48 = vld [vmem:[%s5439_s26 + $0x100] sm:$0xff]  ;;  %v426_v5 = vsub.f32 %v4012_v58, %v4020_v44  ;;  %v429_v6 = vand.u32 2147483647, %v421_v54  ;;  %v430_v7 = vand.u32 2147483647, %v422_v43  ;;  %v4022_v8 = vld [vmem:[%s5439_s26 + $0x108] sm:$0xff]  ;;  %v397_v23 = vadd.f32 %v389_v57, %v355_v41 }
  0x94   : > { %v4023_v9 = vld [vmem:[%s5439_s26 + $0x110] sm:$0xff]  ;;  %v431_v11 = vand.u32 2147483647, %v423_v59  ;;  %v4024_v12 = vld [vmem:[%s5439_s26 + $0x118] sm:$0xff]  ;;  %v4025_v13 = vld [vmem:[%s5439_s26 + $0x120] sm:$0xff]  ;;  %v398_v24 = vadd.f32 %v390_v60, %v356_v55  ;;  %v399_v29 = vadd.f32 %v391_v61, %v357_v0  ;;  %v400_v30 = vadd.f32 %v392_v62, %v358_v4 }
  0x95   : > { %v4029_v14 = vld [vmem:[%s5445_s20 + $0x100] sm:$0xff]  ;;  %v432_v16 = vand.u32 2147483647, %v424_v63  ;;  %v4026_v17 = vld [vmem:[%s5439_s26 + $0x128] sm:$0xff]  ;;  %v4027_v18 = vld [vmem:[%s5439_s26 + $0x130] sm:$0xff]  ;;  %v435_v36 = vadd.f32 %v427_v2, %v393_v10  ;;  %v436_v39 = vadd.f32 %v428_v3, %v394_v49  ;;  %v437_v38 = vadd.f32 %v429_v6, %v395_v53 }
  0x96   : > { %v4028_v19 = vld [vmem:[%s5439_s26 + $0x138] sm:$0xff]  ;;  %v4030_v21 = vld [vmem:[%s5445_s20 + $0x108] sm:$0xff]  ;;  %v4031_v22 = vld [vmem:[%s5445_s20 + $0x110] sm:$0xff]  ;;  %v433_v25 = vand.u32 2147483647, %v425_v1  ;;  %v461_v34 = vsub.f32 %v4021_v48, %v4029_v14  ;;  %v438_v46 = vadd.f32 %v430_v7, %v396_v15  ;;  %v439_v43 = vadd.f32 %v431_v11, %v397_v23 }
  0x97   : > { %v4032_v20 = vld [vmem:[%s5445_s20 + $0x118] sm:$0xff]  ;;  %v4033_v26 = vld [vmem:[%s5445_s20 + $0x120] sm:$0xff]  ;;  %v4034_v28 = vld [vmem:[%s5445_s20 + $0x128] sm:$0xff]  ;;  %v434_v31 = vand.u32 2147483647, %v426_v5  ;;  %v462_v40 = vsub.f32 %v4022_v8, %v4030_v21  ;;  %v463_v41 = vsub.f32 %v4023_v9, %v4031_v22  ;;  %v440_v59 = vadd.f32 %v432_v16, %v398_v24 }
  0x98   : > { %v4035_v27 = vld [vmem:[%s5445_s20 + $0x130] sm:$0xff]  ;;  %v4036_v32 = vld [vmem:[%s5445_s20 + $0x138] sm:$0xff]  ;;  %v4037_v33 = vld [vmem:[%s5439_s26 + $0x140] sm:$0xff]  ;;  %v464_v47 = vsub.f32 %v4024_v12, %v4032_v20  ;;  %v465_v50 = vsub.f32 %v4025_v13, %v4033_v26  ;;  %v466_v55 = vsub.f32 %v4026_v17, %v4034_v28  ;;  %v469_v60 = vand.u32 2147483647, %v461_v34 }
  0x99   : > { %v4038_v35 = vld [vmem:[%s5439_s26 + $0x148] sm:$0xff]  ;;  %v4039_v42 = vld [vmem:[%s5439_s26 + $0x150] sm:$0xff]  ;;  %v4045_v37 = vld [vmem:[%s5445_s20 + $0x140] sm:$0xff]  ;;  %v467_v56 = vsub.f32 %v4027_v18, %v4035_v27  ;;  %v468_v57 = vsub.f32 %v4028_v19, %v4036_v32  ;;  %v470_v1 = vand.u32 2147483647, %v462_v40  ;;  %v441_v6 = vadd.f32 %v433_v25, %v399_v29 }
  0x9a   : > { %v4046_v45 = vld [vmem:[%s5445_s20 + $0x148] sm:$0xff]  ;;  %v4040_v51 = vld [vmem:[%s5439_s26 + $0x158] sm:$0xff]  ;;  %v4047_v52 = vld [vmem:[%s5445_s20 + $0x150] sm:$0xff]  ;;  %v503_v63 = vsub.f32 %v4037_v33, %v4045_v37  ;;  %v471_v2 = vand.u32 2147483647, %v463_v41  ;;  %v442_v53 = vadd.f32 %v434_v31, %v400_v30  ;;  %v477_v19 = vadd.f32 %v469_v60, %v435_v36 }
  0x9b   : > { %v4048_v54 = vld [vmem:[%s5445_s20 + $0x158] sm:$0xff]  ;;  %v4041_v58 = vld [vmem:[%s5439_s26 + $0x160] sm:$0xff]  ;;  %v4042_v61 = vld [vmem:[%s5439_s26 + $0x168] sm:$0xff]  ;;  %v504_v0 = vsub.f32 %v4038_v35, %v4046_v45  ;;  %v505_v4 = vsub.f32 %v4039_v42, %v4047_v52  ;;  %v472_v7 = vand.u32 2147483647, %v464_v47  ;;  %v478_v25 = vadd.f32 %v470_v1, %v436_v39 }
  0x9c   : > { %v4049_v44 = vld [vmem:[%s5445_s20 + $0x160] sm:$0xff]  ;;  %v4050_v62 = vld [vmem:[%s5445_s20 + $0x168] sm:$0xff]  ;;  %v4043_v3 = vld [vmem:[%s5439_s26 + $0x170] sm:$0xff]  ;;  %v506_v5 = vsub.f32 %v4040_v51, %v4048_v54  ;;  %v473_v8 = vand.u32 2147483647, %v465_v50  ;;  %v479_v26 = vadd.f32 %v471_v2, %v437_v38 }
  0x9d   : > { %v4051_v48 = vld [vmem:[%s5445_s20 + $0x170] sm:$0xff]  ;;  %v4044_v9 = vld [vmem:[%s5439_s26 + $0x178] sm:$0xff]  ;;  %v507_v49 = vsub.f32 %v4041_v58, %v4049_v44  ;;  %v474_v11 = vand.u32 2147483647, %v466_v55  ;;  %v475_v12 = vand.u32 2147483647, %v467_v56  ;;  %v508_v14 = vsub.f32 %v4042_v61, %v4050_v62 }
  0x9e   : > { %v4052_v10 = vld [vmem:[%s5445_s20 + $0x178] sm:$0xff]  ;;  %v476_v13 = vand.u32 2147483647, %v468_v57  ;;  %v509_v15 = vsub.f32 %v4043_v3, %v4051_v48  ;;  %v511_v16 = vand.u32 2147483647, %v503_v63  ;;  %v4053_v18 = vld [vmem:[%s5439_s26 + $0x180] sm:$0xff]  ;;  %v480_v31 = vadd.f32 %v472_v7, %v438_v46 }
  0x9f   : > { %v512_v17 = vand.u32 2147483647, %v504_v0  ;;  %v510_v21 = vsub.f32 %v4044_v9, %v4052_v10  ;;  %v513_v22 = vand.u32 2147483647, %v505_v4  ;;  %v514_v20 = vand.u32 2147483647, %v506_v5 }
  0xa0   : > { %v4054_v23 = vld [vmem:[%s5439_s26 + $0x188] sm:$0xff]  ;;  %v4055_v24 = vld [vmem:[%s5439_s26 + $0x190] sm:$0xff]  ;;  %v515_v28 = vand.u32 2147483647, %v507_v49  ;;  %v4056_v27 = vld [vmem:[%s5439_s26 + $0x198] sm:$0xff]  ;;  %v481_v32 = vadd.f32 %v473_v8, %v439_v43  ;;  %v482_v42 = vadd.f32 %v474_v11, %v440_v59  ;;  %v483_v37 = vadd.f32 %v475_v12, %v441_v6 }
  0xa1   : > { %v4057_v29 = vld [vmem:[%s5439_s26 + $0x1a0] sm:$0xff]  ;;  %v516_v34 = vand.u32 2147483647, %v508_v14  ;;  %v4058_v33 = vld [vmem:[%s5439_s26 + $0x1a8] sm:$0xff]  ;;  %v4059_v35 = vld [vmem:[%s5439_s26 + $0x1b0] sm:$0xff]  ;;  %v484_v50 = vadd.f32 %v476_v13, %v442_v53  ;;  %v519_v52 = vadd.f32 %v511_v16, %v477_v19  ;;  %v520_v57 = vadd.f32 %v512_v17, %v478_v25 }
  0xa2   : > { %v4061_v30 = vld [vmem:[%s5445_s20 + $0x180] sm:$0xff]  ;;  %v4060_v36 = vld [vmem:[%s5439_s26 + $0x1b8] sm:$0xff]  ;;  %v4062_v40 = vld [vmem:[%s5445_s20 + $0x188] sm:$0xff]  ;;  %v517_v45 = vand.u32 2147483647, %v509_v15  ;;  %v521_v58 = vadd.f32 %v513_v22, %v479_v26  ;;  %v522_v63 = vadd.f32 %v514_v20, %v480_v31  ;;  %v523_v0 = vadd.f32 %v515_v28, %v481_v32 }
  0xa3   : > { %v4063_v41 = vld [vmem:[%s5445_s20 + $0x190] sm:$0xff]  ;;  %v4064_v39 = vld [vmem:[%s5445_s20 + $0x198] sm:$0xff]  ;;  %v4065_v38 = vld [vmem:[%s5445_s20 + $0x1a0] sm:$0xff]  ;;  %v518_v51 = vand.u32 2147483647, %v510_v21  ;;  %v545_v43 = vsub.f32 %v4053_v18, %v4061_v30  ;;  %v546_v44 = vsub.f32 %v4054_v23, %v4062_v40  ;;  %v524_v5 = vadd.f32 %v516_v34, %v482_v42 }
  0xa4   : > { %v4066_v47 = vld [vmem:[%s5445_s20 + $0x1a8] sm:$0xff]  ;;  %v4067_v46 = vld [vmem:[%s5445_s20 + $0x1b0] sm:$0xff]  ;;  %v4068_v54 = vld [vmem:[%s5445_s20 + $0x1b8] sm:$0xff]  ;;  %v547_v59 = vsub.f32 %v4055_v24, %v4063_v41  ;;  %v548_v1 = vsub.f32 %v4056_v27, %v4064_v39  ;;  %v549_v2 = vsub.f32 %v4057_v29, %v4065_v38  ;;  %v525_v49 = vadd.f32 %v517_v45, %v483_v37 }
  0xa5   : > { %v4069_v55 = vld [vmem:[%s5439_s26 + $0x1c0] sm:$0xff]  ;;  %v4070_v56 = vld [vmem:[%s5439_s26 + $0x1c8] sm:$0xff]  ;;  %v4071_v60 = vld [vmem:[%s5439_s26 + $0x1d0] sm:$0xff]  ;;  %v550_v6 = vsub.f32 %v4058_v33, %v4066_v47  ;;  %v551_v7 = vsub.f32 %v4059_v35, %v4067_v46  ;;  %v552_v8 = vsub.f32 %v4060_v36, %v4068_v54  ;;  %v553_v11 = vand.u32 2147483647, %v545_v43 }
  0xa6   : > { %v4077_v61 = vld [vmem:[%s5445_s20 + $0x1c0] sm:$0xff]  ;;  %v4078_v62 = vld [vmem:[%s5445_s20 + $0x1c8] sm:$0xff]  ;;  %v4072_v3 = vld [vmem:[%s5439_s26 + $0x1d8] sm:$0xff]  ;;  %v554_v15 = vand.u32 2147483647, %v546_v44  ;;  %v526_v22 = vadd.f32 %v518_v51, %v484_v50 }
  0xa7   : > { %v4079_v48 = vld [vmem:[%s5445_s20 + $0x1d0] sm:$0xff]  ;;  %v4080_v4 = vld [vmem:[%s5445_s20 + $0x1d8] sm:$0xff]  ;;  %v4073_v9 = vld [vmem:[%s5439_s26 + $0x1e0] sm:$0xff]  ;;  %v587_v14 = vsub.f32 %v4069_v55, %v4077_v61  ;;  %v588_v53 = vsub.f32 %v4070_v56, %v4078_v62  ;;  %v555_v16 = vand.u32 2147483647, %v547_v59  ;;  %v561_v31 = vadd.f32 %v553_v11, %v519_v52 }
  0xa8   : > { %v4081_v10 = vld [vmem:[%s5445_s20 + $0x1e0] sm:$0xff]  ;;  %v4074_v12 = vld [vmem:[%s5439_s26 + $0x1e8] sm:$0xff]  ;;  %v4075_v17 = vld [vmem:[%s5439_s26 + $0x1f0] sm:$0xff]  ;;  %v589_v19 = vsub.f32 %v4071_v60, %v4079_v48  ;;  %v590_v21 = vsub.f32 %v4072_v3, %v4080_v4  ;;  %v556_v20 = vand.u32 2147483647, %v548_v1  ;;  %v562_v40 = vadd.f32 %v554_v15, %v520_v57 }
  0xa9   : > { %v4082_v13 = vld [vmem:[%s5445_s20 + $0x1e8] sm:$0xff]  ;;  %v4083_v18 = vld [vmem:[%s5445_s20 + $0x1f0] sm:$0xff]  ;;  %v557_v23 = vand.u32 2147483647, %v549_v2  ;;  %v4076_v24 = vld [vmem:[%s5439_s26 + $0x1f8] sm:$0xff]  ;;  %v591_v26 = vsub.f32 %v4073_v9, %v4081_v10  ;;  %v563_v47 = vadd.f32 %v555_v16, %v521_v58 }
  0xaa   : > { %v4084_v25 = vld [vmem:[%s5445_s20 + $0x1f8] sm:$0xff]  ;;  %v558_v28 = vand.u32 2147483647, %v550_v6  ;;  %v559_v27 = vand.u32 2147483647, %v551_v7  ;;  %v592_v30 = vsub.f32 %v4074_v12, %v4082_v13  ;;  %v593_v32 = vsub.f32 %v4075_v17, %v4083_v18  ;;  %v4085_v35 = vld [vmem:[%s5439_s26 + $0x200] sm:$0xff] }
  0xab   : > { %v560_v29 = vand.u32 2147483647, %v552_v8  ;;  %v595_v34 = vand.u32 2147483647, %v587_v14  ;;  %v596_v33 = vand.u32 2147483647, %v588_v53  ;;  %v594_v41 = vsub.f32 %v4076_v24, %v4084_v25 }
  0xac   : > { %v4086_v36 = vld [vmem:[%s5439_s26 + $0x208] sm:$0xff]  ;;  %v597_v39 = vand.u32 2147483647, %v589_v19  ;;  %v598_v42 = vand.u32 2147483647, %v590_v21  ;;  %v4087_v37 = vld [vmem:[%s5439_s26 + $0x210] sm:$0xff]  ;;  %v564_v46 = vadd.f32 %v556_v20, %v522_v63  ;;  %v565_v55 = vadd.f32 %v557_v23, %v523_v0 }
  0xad   : > { %v4088_v45 = vld [vmem:[%s5439_s26 + $0x218] sm:$0xff]  ;;  %v4093_v38 = vld [vmem:[%s5445_s20 + $0x200] sm:$0xff]  ;;  %v599_v50 = vand.u32 2147483647, %v591_v26  ;;  %v4090_v52 = vld [vmem:[%s5439_s26 + $0x228] sm:$0xff]  ;;  %v566_v56 = vadd.f32 %v558_v28, %v524_v5  ;;  %v567_v62 = vadd.f32 %v559_v27, %v525_v49  ;;  %v568_v63 = vadd.f32 %v560_v29, %v526_v22 }
  0xae   : > { %v4089_v51 = vld [vmem:[%s5439_s26 + $0x220] sm:$0xff]  ;;  %v4094_v54 = vld [vmem:[%s5445_s20 + $0x208] sm:$0xff]  ;;  %v4095_v43 = vld [vmem:[%s5445_s20 + $0x210] sm:$0xff]  ;;  %v600_v57 = vand.u32 2147483647, %v592_v30  ;;  %v629_v48 = vsub.f32 %v4085_v35, %v4093_v38  ;;  %v603_v5 = vadd.f32 %v595_v34, %v561_v31  ;;  %v604_v6 = vadd.f32 %v596_v33, %v562_v40 }
  0xaf   : > { %v4091_v44 = vld [vmem:[%s5439_s26 + $0x230] sm:$0xff]  ;;  %v4092_v59 = vld [vmem:[%s5439_s26 + $0x238] sm:$0xff]  ;;  %v4097_v61 = vld [vmem:[%s5445_s20 + $0x220] sm:$0xff]  ;;  %v601_v1 = vand.u32 2147483647, %v593_v32  ;;  %v630_v7 = vsub.f32 %v4086_v36, %v4094_v54  ;;  %v605_v49 = vadd.f32 %v597_v39, %v563_v47  ;;  %v5622_v11 = vadd.f32 %v598_v42, %v564_v46 }
  0xb0   : > { %v4096_v60 = vld [vmem:[%s5445_s20 + $0x218] sm:$0xff]  ;;  %v4098_v58 = vld [vmem:[%s5445_s20 + $0x228] sm:$0xff]  ;;  %v4099_v2 = vld [vmem:[%s5445_s20 + $0x230] sm:$0xff]  ;;  %v602_v4 = vand.u32 2147483647, %v594_v41  ;;  %v631_v12 = vsub.f32 %v4087_v37, %v4095_v43  ;;  %v5627_v16 = vadd.f32 %v599_v50, %v565_v55  ;;  %v5629_v17 = vadd.f32 %v600_v57, %v566_v56 }
  0xb1   : > { %v4100_v3 = vld [vmem:[%s5445_s20 + $0x238] sm:$0xff]  ;;  %v4101_v0 = vld [vmem:[%s5439_s26 + $0x240] sm:$0xff]  ;;  %v4102_v8 = vld [vmem:[%s5439_s26 + $0x248] sm:$0xff]  ;;  %v632_v13 = vsub.f32 %v4088_v45, %v4096_v60  ;;  %v633_v18 = vsub.f32 %v4089_v51, %v4097_v61  ;;  %v634_v19 = vsub.f32 %v4090_v52, %v4098_v58  ;;  %v5634_v23 = vadd.f32 %v601_v1, %v567_v62 }
  0xb2   : > { %v4103_v9 = vld [vmem:[%s5439_s26 + $0x250] sm:$0xff]  ;;  %v4104_v10 = vld [vmem:[%s5439_s26 + $0x258] sm:$0xff]  ;;  %v4105_v14 = vld [vmem:[%s5439_s26 + $0x260] sm:$0xff]  ;;  %v635_v24 = vsub.f32 %v4091_v44, %v4099_v2  ;;  %v636_v25 = vsub.f32 %v4092_v59, %v4100_v3  ;;  %v637_v26 = vand.u32 2147483647, %v629_v48  ;;  %v610_v30 = vadd.f32 %v602_v4, %v568_v63 }
  0xb3   : > { %v4109_v53 = vld [vmem:[%s5445_s20 + $0x240] sm:$0xff]  ;;  %v4110_v15 = vld [vmem:[%s5445_s20 + $0x248] sm:$0xff]  ;;  %v4111_v22 = vld [vmem:[%s5445_s20 + $0x250] sm:$0xff]  ;;  %v638_v31 = vand.u32 2147483647, %v630_v7 }
  0xb4   : > { %v4106_v21 = vld [vmem:[%s5439_s26 + $0x268] sm:$0xff]  ;;  %v4112_v20 = vld [vmem:[%s5445_s20 + $0x258] sm:$0xff]  ;;  %v4107_v28 = vld [vmem:[%s5439_s26 + $0x270] sm:$0xff]  ;;  %v671_v35 = vsub.f32 %v4101_v0, %v4109_v53  ;;  %v672_v36 = vsub.f32 %v4102_v8, %v4110_v15  ;;  %v639_v40 = vand.u32 2147483647, %v631_v12  ;;  %v673_v39 = vsub.f32 %v4103_v9, %v4111_v22 }
  0xb5   : > { %v4113_v27 = vld [vmem:[%s5445_s20 + $0x260] sm:$0xff]  ;;  %v4114_v29 = vld [vmem:[%s5445_s20 + $0x268] sm:$0xff]  ;;  %v4108_v32 = vld [vmem:[%s5439_s26 + $0x278] sm:$0xff]  ;;  %v640_v41 = vand.u32 2147483647, %v632_v13  ;;  %v674_v42 = vsub.f32 %v4104_v10, %v4112_v20  ;;  %v645_v59 = vadd.f32 %v637_v26, %v603_v5  ;;  %v646_v1 = vadd.f32 %v638_v31, %v604_v6 }
  0xb6   : > { %v4115_v34 = vld [vmem:[%s5445_s20 + $0x270] sm:$0xff]  ;;  %v4116_v33 = vld [vmem:[%s5445_s20 + $0x278] sm:$0xff]  ;;  %v4117_v37 = vld [vmem:[%s5439_s26 + $0x280] sm:$0xff]  ;;  %v641_v38 = vand.u32 2147483647, %v633_v18  ;;  %v675_v46 = vsub.f32 %v4105_v14, %v4113_v27  ;;  %v676_v50 = vsub.f32 %v4106_v21, %v4114_v29  ;;  %v647_v7 = vadd.f32 %v639_v40, %v605_v49 }
  0xb7   : > { %v4125_v45 = vld [vmem:[%s5445_s20 + $0x280] sm:$0xff]  ;;  %v642_v47 = vand.u32 2147483647, %v634_v19  ;;  %v4118_v51 = vld [vmem:[%s5439_s26 + $0x288] sm:$0xff]  ;;  %v643_v54 = vand.u32 2147483647, %v635_v24  ;;  %v677_v55 = vsub.f32 %v4107_v28, %v4115_v34  ;;  %v678_v56 = vsub.f32 %v4108_v32, %v4116_v33 }
  0xb8   : > { %v4126_v52 = vld [vmem:[%s5445_s20 + $0x288] sm:$0xff]  ;;  %v644_v43 = vand.u32 2147483647, %v636_v25  ;;  %v4119_v57 = vld [vmem:[%s5439_s26 + $0x290] sm:$0xff]  ;;  %v679_v60 = vand.u32 2147483647, %v671_v35  ;;  %v713_v63 = vsub.f32 %v4117_v37, %v4125_v45  ;;  %v648_v13 = vadd.f32 %v640_v41, %v5622_v11 }
  0xb9   : > { %v4127_v44 = vld [vmem:[%s5445_s20 + $0x290] sm:$0xff]  ;;  %v680_v61 = vand.u32 2147483647, %v672_v36  ;;  %v4120_v58 = vld [vmem:[%s5439_s26 + $0x298] sm:$0xff]  ;;  %v681_v2 = vand.u32 2147483647, %v673_v39  ;;  %v714_v4 = vsub.f32 %v4118_v51, %v4126_v52  ;;  %v649_v19 = vadd.f32 %v641_v38, %v5627_v16 }
  0xba   : > { %v4128_v62 = vld [vmem:[%s5445_s20 + $0x298] sm:$0xff]  ;;  %v682_v3 = vand.u32 2147483647, %v674_v42  ;;  %v4121_v48 = vld [vmem:[%s5439_s26 + $0x2a0] sm:$0xff]  ;;  %v683_v8 = vand.u32 2147483647, %v675_v46  ;;  %v715_v12 = vsub.f32 %v4119_v57, %v4127_v44  ;;  %v650_v49 = vadd.f32 %v642_v47, %v5629_v17 }
  0xbb   : > { %v4129_v0 = vld [vmem:[%s5445_s20 + $0x2a0] sm:$0xff]  ;;  %v684_v9 = vand.u32 2147483647, %v676_v50  ;;  %v4122_v5 = vld [vmem:[%s5439_s26 + $0x2a8] sm:$0xff]  ;;  %v685_v14 = vand.u32 2147483647, %v677_v55  ;;  %v716_v18 = vsub.f32 %v4120_v58, %v4128_v62  ;;  %v651_v25 = vadd.f32 %v643_v54, %v5634_v23 }
  0xbc   : > { %v4130_v10 = vld [vmem:[%s5445_s20 + $0x2a8] sm:$0xff]  ;;  %v686_v6 = vand.u32 2147483647, %v678_v56  ;;  %v4123_v53 = vld [vmem:[%s5439_s26 + $0x2b0] sm:$0xff]  ;;  %v4124_v21 = vld [vmem:[%s5439_s26 + $0x2b8] sm:$0xff]  ;;  %v717_v20 = vsub.f32 %v4121_v48, %v4129_v0  ;;  %v652_v17 = vadd.f32 %v644_v43, %v610_v30  ;;  %v687_v31 = vadd.f32 %v679_v60, %v645_v59 }
  0xbd   : > { %v4131_v15 = vld [vmem:[%s5445_s20 + $0x2b0] sm:$0xff]  ;;  %v4132_v22 = vld [vmem:[%s5445_s20 + $0x2b8] sm:$0xff]  ;;  %v721_v11 = vand.u32 2147483647, %v713_v63  ;;  %v4133_v24 = vld [vmem:[%s5439_s26 + $0x2c0] sm:$0xff]  ;;  %v718_v26 = vsub.f32 %v4122_v5, %v4130_v10  ;;  %v688_v40 = vadd.f32 %v680_v61, %v646_v1  ;;  %v689_v41 = vadd.f32 %v681_v2, %v647_v7 }
  0xbe   : > { %v722_v28 = vand.u32 2147483647, %v714_v4  ;;  %v4134_v27 = vld [vmem:[%s5439_s26 + $0x2c8] sm:$0xff]  ;;  %v4135_v29 = vld [vmem:[%s5439_s26 + $0x2d0] sm:$0xff]  ;;  %v4136_v16 = vld [vmem:[%s5439_s26 + $0x2d8] sm:$0xff]  ;;  %v719_v32 = vsub.f32 %v4123_v53, %v4131_v15  ;;  %v720_v39 = vsub.f32 %v4124_v21, %v4132_v22  ;;  %v690_v47 = vadd.f32 %v682_v3, %v648_v13 }
  0xbf   : > { %v723_v34 = vand.u32 2147483647, %v715_v12  ;;  %v4137_v33 = vld [vmem:[%s5439_s26 + $0x2e0] sm:$0xff]  ;;  %v4138_v35 = vld [vmem:[%s5439_s26 + $0x2e8] sm:$0xff]  ;;  %v724_v42 = vand.u32 2147483647, %v716_v18  ;;  %v691_v46 = vadd.f32 %v683_v8, %v649_v19  ;;  %v692_v50 = vadd.f32 %v684_v9, %v650_v49 }
  0xc0   : > { %v4141_v36 = vld [vmem:[%s5445_s20 + $0x2c0] sm:$0xff]  ;;  %v4142_v23 = vld [vmem:[%s5445_s20 + $0x2c8] sm:$0xff]  ;;  %v4139_v37 = vld [vmem:[%s5439_s26 + $0x2f0] sm:$0xff]  ;;  %v725_v51 = vand.u32 2147483647, %v717_v20  ;;  %v693_v55 = vadd.f32 %v685_v14, %v651_v25  ;;  %v694_v58 = vadd.f32 %v686_v6, %v652_v17  ;;  %v729_v4 = vadd.f32 %v721_v11, %v687_v31 }
  0xc1   : > { %v4140_v45 = vld [vmem:[%s5439_s26 + $0x2f8] sm:$0xff]  ;;  %v4143_v30 = vld [vmem:[%s5445_s20 + $0x2d0] sm:$0xff]  ;;  %v4145_v52 = vld [vmem:[%s5445_s20 + $0x2e0] sm:$0xff]  ;;  %v726_v56 = vand.u32 2147483647, %v718_v26  ;;  %v755_v44 = vsub.f32 %v4133_v24, %v4141_v36  ;;  %v756_v59 = vsub.f32 %v4134_v27, %v4142_v23  ;;  %v730_v12 = vadd.f32 %v722_v28, %v688_v40 }
  0xc2   : > { %v4144_v38 = vld [vmem:[%s5445_s20 + $0x2d8] sm:$0xff]  ;;  %v4146_v54 = vld [vmem:[%s5445_s20 + $0x2e8] sm:$0xff]  ;;  %v4147_v43 = vld [vmem:[%s5445_s20 + $0x2f0] sm:$0xff]  ;;  %v727_v62 = vand.u32 2147483647, %v719_v32  ;;  %v757_v63 = vsub.f32 %v4135_v29, %v4143_v30  ;;  %v759_v7 = vsub.f32 %v4137_v33, %v4145_v52  ;;  %v731_v13 = vadd.f32 %v723_v34, %v689_v41 }
  0xc3   : > { %v4148_v57 = vld [vmem:[%s5445_s20 + $0x2f8] sm:$0xff]  ;;  %v4149_v60 = vld [vmem:[%s5439_s26 + $0x300] sm:$0xff]  ;;  %v4150_v61 = vld [vmem:[%s5439_s26 + $0x308] sm:$0xff]  ;;  %v758_v1 = vsub.f32 %v4136_v16, %v4144_v38  ;;  %v728_v0 = vand.u32 2147483647, %v720_v39  ;;  %v760_v8 = vsub.f32 %v4138_v35, %v4146_v54  ;;  %v761_v14 = vsub.f32 %v4139_v37, %v4147_v43 }
  0xc4   : > { %v4151_v2 = vld [vmem:[%s5439_s26 + $0x310] sm:$0xff]  ;;  %v4157_v3 = vld [vmem:[%s5445_s20 + $0x300] sm:$0xff]  ;;  %v4158_v48 = vld [vmem:[%s5445_s20 + $0x308] sm:$0xff]  ;;  %v762_v6 = vsub.f32 %v4140_v45, %v4148_v57  ;;  %v763_v18 = vand.u32 2147483647, %v755_v44  ;;  %v732_v29 = vadd.f32 %v724_v42, %v690_v47  ;;  %v733_v33 = vadd.f32 %v725_v51, %v691_v46 }
  0xc5   : > { %v4152_v9 = vld [vmem:[%s5439_s26 + $0x318] sm:$0xff]  ;;  %v4159_v5 = vld [vmem:[%s5445_s20 + $0x310] sm:$0xff]  ;;  %v4153_v53 = vld [vmem:[%s5439_s26 + $0x320] sm:$0xff]  ;;  %v764_v19 = vand.u32 2147483647, %v756_v59  ;;  %v797_v22 = vsub.f32 %v4149_v60, %v4157_v3  ;;  %v798_v20 = vsub.f32 %v4150_v61, %v4158_v48  ;;  %v734_v39 = vadd.f32 %v726_v56, %v692_v50 }
  0xc6   : > { %v4160_v10 = vld [vmem:[%s5445_s20 + $0x318] sm:$0xff]  ;;  %v4161_v15 = vld [vmem:[%s5445_s20 + $0x320] sm:$0xff]  ;;  %v4154_v49 = vld [vmem:[%s5439_s26 + $0x328] sm:$0xff]  ;;  %v765_v11 = vand.u32 2147483647, %v757_v63  ;;  %v799_v28 = vsub.f32 %v4151_v2, %v4159_v5  ;;  %v735_v47 = vadd.f32 %v727_v62, %v693_v55  ;;  %v736_v57 = vadd.f32 %v728_v0, %v694_v58 }
  0xc7   : > { %v4162_v21 = vld [vmem:[%s5445_s20 + $0x328] sm:$0xff]  ;;  %v766_v24 = vand.u32 2147483647, %v758_v1  ;;  %v4155_v25 = vld [vmem:[%s5439_s26 + $0x330] sm:$0xff]  ;;  %v800_v27 = vsub.f32 %v4152_v9, %v4160_v10  ;;  %v767_v16 = vand.u32 2147483647, %v759_v7  ;;  %v801_v34 = vsub.f32 %v4153_v53, %v4161_v15 }
  0xc8   : > { %v4163_v26 = vld [vmem:[%s5445_s20 + $0x330] sm:$0xff]  ;;  %v768_v17 = vand.u32 2147483647, %v760_v8  ;;  %v4156_v31 = vld [vmem:[%s5439_s26 + $0x338] sm:$0xff]  ;;  %v769_v35 = vand.u32 2147483647, %v761_v14  ;;  %v802_v23 = vsub.f32 %v4154_v49, %v4162_v21  ;;  %v771_v44 = vadd.f32 %v763_v18, %v729_v4 }
  0xc9   : > { %v4164_v32 = vld [vmem:[%s5445_s20 + $0x338] sm:$0xff]  ;;  %v770_v36 = vand.u32 2147483647, %v762_v6  ;;  %v4165_v40 = vld [vmem:[%s5439_s26 + $0x340] sm:$0xff]  ;;  %v803_v37 = vsub.f32 %v4155_v25, %v4163_v26  ;;  %v805_v42 = vand.u32 2147483647, %v797_v22  ;;  %v772_v63 = vadd.f32 %v764_v19, %v730_v12 }
  0xca   : > { %v4173_v41 = vld [vmem:[%s5445_s20 + $0x340] sm:$0xff]  ;;  %v806_v45 = vand.u32 2147483647, %v798_v20  ;;  %v4166_v30 = vld [vmem:[%s5439_s26 + $0x348] sm:$0xff]  ;;  %v804_v52 = vsub.f32 %v4156_v31, %v4164_v32  ;;  %v807_v46 = vand.u32 2147483647, %v799_v28  ;;  %v773_v55 = vadd.f32 %v765_v11, %v731_v13 }
  0xcb   : > { %v4174_v38 = vld [vmem:[%s5445_s20 + $0x348] sm:$0xff]  ;;  %v808_v51 = vand.u32 2147483647, %v800_v27  ;;  %v4167_v54 = vld [vmem:[%s5439_s26 + $0x350] sm:$0xff]  ;;  %v809_v50 = vand.u32 2147483647, %v801_v34  ;;  %v839_v61 = vsub.f32 %v4165_v40, %v4173_v41  ;;  %v774_v58 = vadd.f32 %v766_v24, %v732_v29 }
  0xcc   : > { %v4175_v43 = vld [vmem:[%s5445_s20 + $0x350] sm:$0xff]  ;;  %v4168_v56 = vld [vmem:[%s5439_s26 + $0x358] sm:$0xff]  ;;  %v4169_v59 = vld [vmem:[%s5439_s26 + $0x360] sm:$0xff]  ;;  %v810_v62 = vand.u32 2147483647, %v802_v23  ;;  %v840_v48 = vsub.f32 %v4166_v30, %v4174_v38  ;;  %v775_v0 = vadd.f32 %v767_v16, %v733_v33  ;;  %v776_v10 = vadd.f32 %v768_v17, %v734_v39 }
  0xcd   : > { %v4176_v60 = vld [vmem:[%s5445_s20 + $0x358] sm:$0xff]  ;;  %v4170_v1 = vld [vmem:[%s5439_s26 + $0x368] sm:$0xff]  ;;  %v4171_v2 = vld [vmem:[%s5439_s26 + $0x370] sm:$0xff]  ;;  %v811_v4 = vand.u32 2147483647, %v803_v37  ;;  %v841_v5 = vsub.f32 %v4167_v54, %v4175_v43  ;;  %v777_v12 = vadd.f32 %v769_v35, %v735_v47  ;;  %v778_v18 = vadd.f32 %v770_v36, %v736_v57 }
  0xce   : > { %v4177_v3 = vld [vmem:[%s5445_s20 + $0x360] sm:$0xff]  ;;  %v4172_v7 = vld [vmem:[%s5439_s26 + $0x378] sm:$0xff]  ;;  %v4178_v8 = vld [vmem:[%s5445_s20 + $0x368] sm:$0xff]  ;;  %v812_v13 = vand.u32 2147483647, %v804_v52  ;;  %v842_v6 = vsub.f32 %v4168_v56, %v4176_v60  ;;  %v813_v19 = vadd.f32 %v805_v42, %v771_v44  ;;  %v814_v24 = vadd.f32 %v806_v45, %v772_v63 }
  0xcf   : > { %v4179_v9 = vld [vmem:[%s5445_s20 + $0x370] sm:$0xff]  ;;  %v4180_v14 = vld [vmem:[%s5445_s20 + $0x378] sm:$0xff]  ;;  %v4181_v53 = vld [vmem:[%s5439_s26 + $0x380] sm:$0xff]  ;;  %v843_v49 = vsub.f32 %v4169_v59, %v4177_v3  ;;  %v847_v21 = vand.u32 2147483647, %v839_v61  ;;  %v815_v25 = vadd.f32 %v807_v46, %v773_v55  ;;  %v844_v26 = vsub.f32 %v4170_v1, %v4178_v8 }
  0xd0   : > { %v4182_v15 = vld [vmem:[%s5439_s26 + $0x388] sm:$0xff]  ;;  %v4183_v22 = vld [vmem:[%s5439_s26 + $0x390] sm:$0xff]  ;;  %v4184_v20 = vld [vmem:[%s5439_s26 + $0x398] sm:$0xff]  ;;  %v848_v28 = vand.u32 2147483647, %v840_v48  ;;  %v816_v17 = vadd.f32 %v808_v51, %v774_v58  ;;  %v845_v31 = vsub.f32 %v4171_v2, %v4179_v9  ;;  %v846_v32 = vsub.f32 %v4172_v7, %v4180_v14 }
  0xd1   : > { %v4189_v11 = vld [vmem:[%s5445_s20 + $0x380] sm:$0xff]  ;;  %v4190_v29 = vld [vmem:[%s5445_s20 + $0x388] sm:$0xff]  ;;  %v4191_v16 = vld [vmem:[%s5445_s20 + $0x390] sm:$0xff]  ;;  %v849_v34 = vand.u32 2147483647, %v841_v5  ;;  %v817_v23 = vadd.f32 %v809_v50, %v775_v0  ;;  %v818_v40 = vadd.f32 %v810_v62, %v776_v10  ;;  %v819_v30 = vadd.f32 %v811_v4, %v777_v12 }
  0xd2   : > { %v4185_v27 = vld [vmem:[%s5439_s26 + $0x3a0] sm:$0xff]  ;;  %v4186_v33 = vld [vmem:[%s5439_s26 + $0x3a8] sm:$0xff]  ;;  %v4192_v35 = vld [vmem:[%s5445_s20 + $0x398] sm:$0xff]  ;;  %v850_v41 = vand.u32 2147483647, %v842_v6  ;;  %v881_v45 = vsub.f32 %v4181_v53, %v4189_v11  ;;  %v882_v46 = vsub.f32 %v4182_v15, %v4190_v29  ;;  %v883_v51 = vsub.f32 %v4183_v22, %v4191_v16 }
  0xd3   : > { %v4193_v36 = vld [vmem:[%s5445_s20 + $0x3a0] sm:$0xff]  ;;  %v4187_v39 = vld [vmem:[%s5439_s26 + $0x3b0] sm:$0xff]  ;;  %v4194_v37 = vld [vmem:[%s5445_s20 + $0x3a8] sm:$0xff]  ;;  %v851_v38 = vand.u32 2147483647, %v843_v49  ;;  %v820_v43 = vadd.f32 %v812_v13, %v778_v18  ;;  %v884_v44 = vsub.f32 %v4184_v20, %v4192_v35  ;;  %v855_v3 = vadd.f32 %v847_v21, %v813_v19 }
  0xd4   : > { %v4195_v42 = vld [vmem:[%s5445_s20 + $0x3b0] sm:$0xff]  ;;  %v4188_v47 = vld [vmem:[%s5439_s26 + $0x3b8] sm:$0xff]  ;;  %v4197_v54 = vld [vmem:[%s5439_s26 + $0x3c0] sm:$0xff]  ;;  %v852_v57 = vand.u32 2147483647, %v844_v26  ;;  %v885_v50 = vsub.f32 %v4185_v27, %v4193_v36  ;;  %v886_v55 = vsub.f32 %v4186_v33, %v4194_v37  ;;  %v856_v48 = vadd.f32 %v848_v28, %v814_v24 }
  0xd5   : > { %v4196_v52 = vld [vmem:[%s5445_s20 + $0x3b8] sm:$0xff]  ;;  %v4198_v56 = vld [vmem:[%s5439_s26 + $0x3c8] sm:$0xff]  ;;  %v4205_v59 = vld [vmem:[%s5445_s20 + $0x3c0] sm:$0xff]  ;;  %v853_v61 = vand.u32 2147483647, %v845_v31  ;;  %v887_v62 = vsub.f32 %v4187_v39, %v4195_v42  ;;  %v857_v14 = vadd.f32 %v849_v34, %v815_v25  ;;  %v858_v49 = vadd.f32 %v850_v41, %v816_v17 }
  0xd6   : > { %v4206_v60 = vld [vmem:[%s5445_s20 + $0x3c8] sm:$0xff]  ;;  %v854_v63 = vand.u32 2147483647, %v846_v32  ;;  %v4199_v1 = vld [vmem:[%s5439_s26 + $0x3d0] sm:$0xff]  ;;  %v888_v58 = vsub.f32 %v4188_v47, %v4196_v52  ;;  %v889_v0 = vand.u32 2147483647, %v881_v45  ;;  %v923_v12 = vsub.f32 %v4197_v54, %v4205_v59 }
  0xd7   : > { %v4207_v2 = vld [vmem:[%s5445_s20 + $0x3d0] sm:$0xff]  ;;  %v4200_v4 = vld [vmem:[%s5439_s26 + $0x3d8] sm:$0xff]  ;;  %v890_v8 = vand.u32 2147483647, %v882_v46  ;;  %v891_v9 = vand.u32 2147483647, %v883_v51  ;;  %v924_v13 = vsub.f32 %v4198_v56, %v4206_v60  ;;  %v859_v26 = vadd.f32 %v851_v38, %v817_v23 }
  0xd8   : > { %v4208_v7 = vld [vmem:[%s5445_s20 + $0x3d8] sm:$0xff]  ;;  %v4201_v5 = vld [vmem:[%s5439_s26 + $0x3e0] sm:$0xff]  ;;  %v892_v6 = vand.u32 2147483647, %v884_v44  ;;  %v893_v53 = vand.u32 2147483647, %v885_v50  ;;  %v925_v19 = vsub.f32 %v4199_v1, %v4207_v2  ;;  %v860_v28 = vadd.f32 %v852_v57, %v818_v40 }
  0xd9   : > { %v4209_v10 = vld [vmem:[%s5445_s20 + $0x3e0] sm:$0xff]  ;;  %v4202_v15 = vld [vmem:[%s5439_s26 + $0x3e8] sm:$0xff]  ;;  %v894_v21 = vand.u32 2147483647, %v886_v55  ;;  %v895_v22 = vand.u32 2147483647, %v887_v62  ;;  %v926_v24 = vsub.f32 %v4200_v4, %v4208_v7  ;;  %v861_v32 = vadd.f32 %v853_v61, %v819_v30 }
  0xda   : > { %v4210_v18 = vld [vmem:[%s5445_s20 + $0x3e8] sm:$0xff]  ;;  %v4203_v20 = vld [vmem:[%s5439_s26 + $0x3f0] sm:$0xff]  ;;  %v896_v25 = vand.u32 2147483647, %v888_v58  ;;  %v4204_v27 = vld [vmem:[%s5439_s26 + $0x3f8] sm:$0xff]  ;;  %v927_v16 = vsub.f32 %v4201_v5, %v4209_v10  ;;  %v862_v23 = vadd.f32 %v854_v63, %v820_v43  ;;  %v897_v45 = vadd.f32 %v889_v0, %v855_v3 }
  0xdb   : > { %v4211_v11 = vld [vmem:[%s5445_s20 + $0x3f0] sm:$0xff]  ;;  %v4212_v29 = vld [vmem:[%s5445_s20 + $0x3f8] sm:$0xff]  ;;  %v4213_v31 = vld [vmem:[%s5439_s26 + $0x400] sm:$0xff]  ;;  %v928_v17 = vsub.f32 %v4202_v15, %v4210_v18  ;;  %v931_v34 = vand.u32 2147483647, %v923_v12  ;;  %v898_v30 = vadd.f32 %v890_v8, %v856_v48  ;;  %v899_v43 = vadd.f32 %v891_v9, %v857_v14 }
  0xdc   : > { %v932_v33 = vand.u32 2147483647, %v924_v13  ;;  %v4214_v35 = vld [vmem:[%s5439_s26 + $0x408] sm:$0xff]  ;;  %v4215_v36 = vld [vmem:[%s5439_s26 + $0x410] sm:$0xff]  ;;  %v929_v41 = vsub.f32 %v4203_v20, %v4211_v11  ;;  %v933_v40 = vand.u32 2147483647, %v925_v19  ;;  %v930_v38 = vsub.f32 %v4204_v27, %v4212_v29 }
  0xdd   : > { %v4216_v39 = vld [vmem:[%s5439_s26 + $0x418] sm:$0xff]  ;;  %v4217_v37 = vld [vmem:[%s5439_s26 + $0x420] sm:$0xff]  ;;  %v934_v47 = vand.u32 2147483647, %v926_v24  ;;  %v4218_v52 = vld [vmem:[%s5439_s26 + $0x428] sm:$0xff]  ;;  %v900_v57 = vadd.f32 %v892_v6, %v858_v49  ;;  %v901_v44 = vadd.f32 %v893_v53, %v859_v26  ;;  %v902_v61 = vadd.f32 %v894_v21, %v860_v28 }
  0xde   : > { %v4221_v42 = vld [vmem:[%s5445_s20 + $0x400] sm:$0xff]  ;;  %v4219_v46 = vld [vmem:[%s5439_s26 + $0x430] sm:$0xff]  ;;  %v4222_v51 = vld [vmem:[%s5445_s20 + $0x408] sm:$0xff]  ;;  %v935_v50 = vand.u32 2147483647, %v927_v16  ;;  %v903_v63 = vadd.f32 %v895_v22, %v861_v32  ;;  %v904_v48 = vadd.f32 %v896_v25, %v862_v23  ;;  %v939_v10 = vadd.f32 %v931_v34, %v897_v45 }
  0xdf   : > { %v4223_v54 = vld [vmem:[%s5445_s20 + $0x410] sm:$0xff]  ;;  %v4220_v56 = vld [vmem:[%s5439_s26 + $0x438] sm:$0xff]  ;;  %v4225_v60 = vld [vmem:[%s5445_s20 + $0x420] sm:$0xff]  ;;  %v936_v55 = vand.u32 2147483647, %v928_v17  ;;  %v965_v3 = vsub.f32 %v4213_v31, %v4221_v42  ;;  %v966_v0 = vsub.f32 %v4214_v35, %v4222_v51  ;;  %v940_v15 = vadd.f32 %v932_v33, %v898_v30 }
  0xe0   : > { %v4224_v59 = vld [vmem:[%s5445_s20 + $0x418] sm:$0xff]  ;;  %v4226_v62 = vld [vmem:[%s5445_s20 + $0x428] sm:$0xff]  ;;  %v4227_v1 = vld [vmem:[%s5445_s20 + $0x430] sm:$0xff]  ;;  %v937_v58 = vand.u32 2147483647, %v929_v41  ;;  %v967_v4 = vsub.f32 %v4215_v36, %v4223_v54  ;;  %v969_v13 = vsub.f32 %v4217_v37, %v4225_v60  ;;  %v941_v18 = vadd.f32 %v933_v40, %v899_v43 }
  0xe1   : > { %v4228_v2 = vld [vmem:[%s5445_s20 + $0x438] sm:$0xff]  ;;  %v4229_v7 = vld [vmem:[%s5439_s26 + $0x440] sm:$0xff]  ;;  %v4230_v8 = vld [vmem:[%s5439_s26 + $0x448] sm:$0xff]  ;;  %v938_v5 = vand.u32 2147483647, %v930_v38  ;;  %v968_v12 = vsub.f32 %v4216_v39, %v4224_v59  ;;  %v970_v19 = vsub.f32 %v4218_v52, %v4226_v62  ;;  %v971_v49 = vsub.f32 %v4219_v46, %v4227_v1 }
  0xe2   : > { %v4237_v9 = vld [vmem:[%s5445_s20 + $0x440] sm:$0xff]  ;;  %v4231_v14 = vld [vmem:[%s5439_s26 + $0x450] sm:$0xff]  ;;  %v4238_v6 = vld [vmem:[%s5445_s20 + $0x448] sm:$0xff]  ;;  %v942_v20 = vadd.f32 %v934_v47, %v900_v57  ;;  %v972_v11 = vsub.f32 %v4220_v56, %v4228_v2  ;;  %v973_v24 = vand.u32 2147483647, %v965_v3  ;;  %v943_v34 = vadd.f32 %v935_v50, %v901_v44 }
  0xe3   : > { %v4239_v53 = vld [vmem:[%s5445_s20 + $0x450] sm:$0xff]  ;;  %v4232_v21 = vld [vmem:[%s5439_s26 + $0x458] sm:$0xff]  ;;  %v4233_v26 = vld [vmem:[%s5439_s26 + $0x460] sm:$0xff]  ;;  %v1007_v25 = vsub.f32 %v4229_v7, %v4237_v9  ;;  %v974_v27 = vand.u32 2147483647, %v966_v0  ;;  %v1008_v32 = vsub.f32 %v4230_v8, %v4238_v6  ;;  %v944_v40 = vadd.f32 %v936_v55, %v902_v61 }
  0xe4   : > { %v4240_v22 = vld [vmem:[%s5445_s20 + $0x458] sm:$0xff]  ;;  %v4241_v28 = vld [vmem:[%s5445_s20 + $0x460] sm:$0xff]  ;;  %v975_v29 = vand.u32 2147483647, %v967_v4  ;;  %v4234_v16 = vld [vmem:[%s5439_s26 + $0x468] sm:$0xff]  ;;  %v1009_v17 = vsub.f32 %v4231_v14, %v4239_v53  ;;  %v945_v38 = vadd.f32 %v937_v58, %v903_v63  ;;  %v946_v54 = vadd.f32 %v938_v5, %v904_v48 }
  0xe5   : > { %v4242_v31 = vld [vmem:[%s5445_s20 + $0x468] sm:$0xff]  ;;  %v976_v33 = vand.u32 2147483647, %v968_v12  ;;  %v977_v35 = vand.u32 2147483647, %v969_v13  ;;  %v4235_v36 = vld [vmem:[%s5439_s26 + $0x470] sm:$0xff]  ;;  %v1010_v41 = vsub.f32 %v4232_v21, %v4240_v22  ;;  %v1011_v30 = vsub.f32 %v4233_v26, %v4241_v28 }
  0xe6   : > { %v4243_v23 = vld [vmem:[%s5445_s20 + $0x470] sm:$0xff]  ;;  %v978_v39 = vand.u32 2147483647, %v970_v19  ;;  %v979_v37 = vand.u32 2147483647, %v971_v49  ;;  %v4236_v42 = vld [vmem:[%s5439_s26 + $0x478] sm:$0xff]  ;;  %v1012_v52 = vsub.f32 %v4234_v16, %v4242_v31  ;;  %v981_v59 = vadd.f32 %v973_v24, %v939_v10 }
  0xe7   : > { %v4244_v45 = vld [vmem:[%s5445_s20 + $0x478] sm:$0xff]  ;;  %v980_v47 = vand.u32 2147483647, %v972_v11  ;;  %v1015_v46 = vand.u32 2147483647, %v1007_v25  ;;  %v4245_v51 = vld [vmem:[%s5439_s26 + $0x480] sm:$0xff]  ;;  %v1013_v43 = vsub.f32 %v4235_v36, %v4243_v23  ;;  %v982_v1 = vadd.f32 %v974_v27, %v940_v15 }
  0xe8   : > { %v1016_v57 = vand.u32 2147483647, %v1008_v32  ;;  %v1017_v44 = vand.u32 2147483647, %v1009_v17  ;;  %v4246_v50 = vld [vmem:[%s5439_s26 + $0x488] sm:$0xff]  ;;  %v4247_v56 = vld [vmem:[%s5439_s26 + $0x490] sm:$0xff]  ;;  %v1014_v60 = vsub.f32 %v4236_v42, %v4244_v45  ;;  %v983_v2 = vadd.f32 %v975_v29, %v941_v18 }
  0xe9   : > { %v1018_v61 = vand.u32 2147483647, %v1010_v41  ;;  %v4248_v63 = vld [vmem:[%s5439_s26 + $0x498] sm:$0xff]  ;;  %v4249_v55 = vld [vmem:[%s5439_s26 + $0x4a0] sm:$0xff]  ;;  %v1019_v3 = vand.u32 2147483647, %v1011_v30  ;;  %v984_v9 = vadd.f32 %v976_v33, %v942_v20  ;;  %v985_v5 = vadd.f32 %v977_v35, %v943_v34 }
  0xea   : > { %v4253_v62 = vld [vmem:[%s5445_s20 + $0x480] sm:$0xff]  ;;  %v4250_v48 = vld [vmem:[%s5439_s26 + $0x4a8] sm:$0xff]  ;;  %v4251_v58 = vld [vmem:[%s5439_s26 + $0x4b0] sm:$0xff]  ;;  %v986_v10 = vadd.f32 %v978_v39, %v944_v40  ;;  %v1020_v12 = vand.u32 2147483647, %v1012_v52  ;;  %v987_v53 = vadd.f32 %v979_v37, %v945_v38  ;;  %v988_v15 = vadd.f32 %v980_v47, %v946_v54 }
  0xeb   : > { %v4252_v0 = vld [vmem:[%s5439_s26 + $0x4b8] sm:$0xff]  ;;  %v4254_v4 = vld [vmem:[%s5445_s20 + $0x488] sm:$0xff]  ;;  %v4255_v7 = vld [vmem:[%s5445_s20 + $0x490] sm:$0xff]  ;;  %v1021_v18 = vand.u32 2147483647, %v1013_v43  ;;  %v1049_v49 = vsub.f32 %v4245_v51, %v4253_v62  ;;  %v1023_v11 = vadd.f32 %v1015_v46, %v981_v59  ;;  %v1024_v29 = vadd.f32 %v1016_v57, %v982_v1 }
  0xec   : > { %v4256_v8 = vld [vmem:[%s5445_s20 + $0x498] sm:$0xff]  ;;  %v4257_v13 = vld [vmem:[%s5445_s20 + $0x4a0] sm:$0xff]  ;;  %v4258_v14 = vld [vmem:[%s5445_s20 + $0x4a8] sm:$0xff]  ;;  %v1022_v20 = vand.u32 2147483647, %v1014_v60  ;;  %v1050_v24 = vsub.f32 %v4246_v50, %v4254_v4  ;;  %v1051_v26 = vsub.f32 %v4247_v56, %v4255_v7  ;;  %v1025_v16 = vadd.f32 %v1017_v44, %v983_v2 }
  0xed   : > { %v4259_v6 = vld [vmem:[%s5445_s20 + $0x4b0] sm:$0xff]  ;;  %v4260_v19 = vld [vmem:[%s5445_s20 + $0x4b8] sm:$0xff]  ;;  %v4261_v21 = vld [vmem:[%s5439_s26 + $0x4c0] sm:$0xff]  ;;  %v1052_v31 = vsub.f32 %v4248_v63, %v4256_v8  ;;  %v1053_v32 = vsub.f32 %v4249_v55, %v4257_v13  ;;  %v1026_v35 = vadd.f32 %v1018_v61, %v984_v9  ;;  %v1054_v36 = vsub.f32 %v4250_v48, %v4258_v14 }
  0xee   : > { %v4262_v22 = vld [vmem:[%s5439_s26 + $0x4c8] sm:$0xff]  ;;  %v4263_v28 = vld [vmem:[%s5439_s26 + $0x4d0] sm:$0xff]  ;;  %v4269_v25 = vld [vmem:[%s5445_s20 + $0x4c0] sm:$0xff]  ;;  %v1055_v23 = vsub.f32 %v4251_v58, %v4259_v6  ;;  %v1056_v41 = vsub.f32 %v4252_v0, %v4260_v19  ;;  %v1027_v37 = vadd.f32 %v1019_v3, %v985_v5  ;;  %v1057_v42 = vand.u32 2147483647, %v1049_v49 }
  0xef   : > { %v4270_v27 = vld [vmem:[%s5445_s20 + $0x4c8] sm:$0xff]  ;;  %v4264_v17 = vld [vmem:[%s5439_s26 + $0x4d8] sm:$0xff]  ;;  %v4271_v34 = vld [vmem:[%s5445_s20 + $0x4d0] sm:$0xff]  ;;  %v1091_v38 = vsub.f32 %v4261_v21, %v4269_v25  ;;  %v1058_v52 = vand.u32 2147483647, %v1050_v24  ;;  %v1028_v44 = vadd.f32 %v1020_v12, %v986_v10  ;;  %v1029_v2 = vadd.f32 %v1021_v18, %v987_v53 }
  0xf0   : > { %v4272_v33 = vld [vmem:[%s5445_s20 + $0x4d8] sm:$0xff]  ;;  %v4265_v40 = vld [vmem:[%s5439_s26 + $0x4e0] sm:$0xff]  ;;  %v4266_v45 = vld [vmem:[%s5439_s26 + $0x4e8] sm:$0xff]  ;;  %v1092_v47 = vsub.f32 %v4262_v22, %v4270_v27  ;;  %v1059_v46 = vand.u32 2147483647, %v1051_v26  ;;  %v1093_v43 = vsub.f32 %v4263_v28, %v4271_v34  ;;  %v1030_v4 = vadd.f32 %v1022_v20, %v988_v15 }
  0xf1   : > { %v4273_v39 = vld [vmem:[%s5445_s20 + $0x4e0] sm:$0xff]  ;;  %v4274_v30 = vld [vmem:[%s5445_s20 + $0x4e8] sm:$0xff]  ;;  %v4267_v51 = vld [vmem:[%s5439_s26 + $0x4f0] sm:$0xff]  ;;  %v1094_v57 = vsub.f32 %v4264_v17, %v4272_v33  ;;  %v1060_v50 = vand.u32 2147483647, %v1052_v31  ;;  %v1065_v12 = vadd.f32 %v1057_v42, %v1023_v11  ;;  %v1066_v13 = vadd.f32 %v1058_v52, %v1024_v29 }
  0xf2   : > { %v4275_v54 = vld [vmem:[%s5445_s20 + $0x4f0] sm:$0xff]  ;;  %v1061_v56 = vand.u32 2147483647, %v1053_v32  ;;  %v4268_v59 = vld [vmem:[%s5439_s26 + $0x4f8] sm:$0xff]  ;;  %v1095_v61 = vsub.f32 %v4265_v40, %v4273_v39  ;;  %v1062_v63 = vand.u32 2147483647, %v1054_v36  ;;  %v1096_v1 = vsub.f32 %v4266_v45, %v4274_v30 }
  0xf3   : > { %v4276_v60 = vld [vmem:[%s5445_s20 + $0x4f8] sm:$0xff]  ;;  %v1063_v55 = vand.u32 2147483647, %v1055_v23  ;;  %v1064_v62 = vand.u32 2147483647, %v1056_v41  ;;  %v1097_v3 = vsub.f32 %v4267_v51, %v4275_v54  ;;  %v4277_v0 = vld [vmem:[%s5439_s26 + $0x500] sm:$0xff]  ;;  %v1067_v15 = vadd.f32 %v1059_v46, %v1025_v16 }
  0xf4   : > { %v1099_v48 = vand.u32 2147483647, %v1091_v38  ;;  %v1100_v58 = vand.u32 2147483647, %v1092_v47  ;;  %v1098_v7 = vsub.f32 %v4268_v59, %v4276_v60  ;;  %v1101_v8 = vand.u32 2147483647, %v1093_v43 }
  0xf5   : > { %v1102_v9 = vand.u32 2147483647, %v1094_v57  ;;  %v4278_v5 = vld [vmem:[%s5439_s26 + $0x508] sm:$0xff]  ;;  %v4279_v10 = vld [vmem:[%s5439_s26 + $0x510] sm:$0xff]  ;;  %v1103_v14 = vand.u32 2147483647, %v1095_v61  ;;  %v1068_v19 = vadd.f32 %v1060_v50, %v1026_v35  ;;  %v1069_v26 = vadd.f32 %v1061_v56, %v1027_v37 }
  0xf6   : > { %v4280_v6 = vld [vmem:[%s5439_s26 + $0x518] sm:$0xff]  ;;  %v4281_v53 = vld [vmem:[%s5439_s26 + $0x520] sm:$0xff]  ;;  %v1104_v49 = vand.u32 2147483647, %v1096_v1  ;;  %v4282_v21 = vld [vmem:[%s5439_s26 + $0x528] sm:$0xff]  ;;  %v1070_v28 = vadd.f32 %v1062_v63, %v1028_v44  ;;  %v1071_v32 = vadd.f32 %v1063_v55, %v1029_v2  ;;  %v1072_v17 = vadd.f32 %v1064_v62, %v1030_v4 }
  0xf7   : > { %v4285_v18 = vld [vmem:[%s5445_s20 + $0x500] sm:$0xff]  ;;  %v4283_v22 = vld [vmem:[%s5439_s26 + $0x530] sm:$0xff]  ;;  %v4286_v20 = vld [vmem:[%s5445_s20 + $0x508] sm:$0xff]  ;;  %v1105_v25 = vand.u32 2147483647, %v1097_v3  ;;  %v1107_v41 = vadd.f32 %v1099_v48, %v1065_v12  ;;  %v1108_v40 = vadd.f32 %v1100_v58, %v1066_v13  ;;  %v1109_v38 = vadd.f32 %v1101_v8, %v1067_v15 }
  0xf8   : > { %v4287_v24 = vld [vmem:[%s5445_s20 + $0x510] sm:$0xff]  ;;  %v4288_v11 = vld [vmem:[%s5445_s20 + $0x518] sm:$0xff]  ;;  %v4289_v29 = vld [vmem:[%s5445_s20 + $0x520] sm:$0xff]  ;;  %v1106_v34 = vand.u32 2147483647, %v1098_v7  ;;  %v1133_v35 = vsub.f32 %v4277_v0, %v4285_v18  ;;  %v1134_v39 = vsub.f32 %v4278_v5, %v4286_v20  ;;  %v1110_v47 = vadd.f32 %v1102_v9, %v1068_v19 }
  0xf9   : > { %v4284_v27 = vld [vmem:[%s5439_s26 + $0x538] sm:$0xff]  ;;  %v4290_v31 = vld [vmem:[%s5445_s20 + $0x528] sm:$0xff]  ;;  %v4291_v16 = vld [vmem:[%s5445_s20 + $0x530] sm:$0xff]  ;;  %v1135_v37 = vsub.f32 %v4279_v10, %v4287_v24  ;;  %v1136_v52 = vsub.f32 %v4280_v6, %v4288_v11  ;;  %v1137_v46 = vsub.f32 %v4281_v53, %v4289_v29  ;;  %v1111_v57 = vadd.f32 %v1103_v14, %v1069_v26 }
  0xfa   : > { %v4292_v33 = vld [vmem:[%s5445_s20 + $0x538] sm:$0xff]  ;;  %v4293_v36 = vld [vmem:[%s5439_s26 + $0x540] sm:$0xff]  ;;  %v4294_v23 = vld [vmem:[%s5439_s26 + $0x548] sm:$0xff]  ;;  %v1112_v44 = vadd.f32 %v1104_v49, %v1070_v28  ;;  %v1138_v50 = vsub.f32 %v4282_v21, %v4290_v31  ;;  %v1139_v56 = vsub.f32 %v4283_v22, %v4291_v16  ;;  %v1113_v63 = vadd.f32 %v1105_v25, %v1071_v32 }
  0xfb   : > { %v4295_v42 = vld [vmem:[%s5439_s26 + $0x550] sm:$0xff]  ;;  %v4296_v45 = vld [vmem:[%s5439_s26 + $0x558] sm:$0xff]  ;;  %v4301_v30 = vld [vmem:[%s5445_s20 + $0x540] sm:$0xff]  ;;  %v1140_v55 = vsub.f32 %v4284_v27, %v4292_v33  ;;  %v1141_v62 = vand.u32 2147483647, %v1133_v35  ;;  %v1114_v22 = vadd.f32 %v1106_v34, %v1072_v17 }
  0xfc   : > { %v4297_v51 = vld [vmem:[%s5439_s26 + $0x560] sm:$0xff]  ;;  %v4302_v54 = vld [vmem:[%s5445_s20 + $0x548] sm:$0xff]  ;;  %v4303_v43 = vld [vmem:[%s5445_s20 + $0x550] sm:$0xff]  ;;  %v1175_v48 = vsub.f32 %v4293_v36, %v4301_v30  ;;  %v1142_v58 = vand.u32 2147483647, %v1134_v39 }
  0xfd   : > { %v4298_v59 = vld [vmem:[%s5439_s26 + $0x568] sm:$0xff]  ;;  %v4304_v60 = vld [vmem:[%s5445_s20 + $0x558] sm:$0xff]  ;;  %v4305_v61 = vld [vmem:[%s5445_s20 + $0x560] sm:$0xff]  ;;  %v1143_v0 = vand.u32 2147483647, %v1135_v37  ;;  %v1176_v8 = vsub.f32 %v4294_v23, %v4302_v54  ;;  %v1177_v9 = vsub.f32 %v4295_v42, %v4303_v43  ;;  %v1149_v25 = vadd.f32 %v1141_v62, %v1107_v41 }
  0xfe   : > { %v4299_v1 = vld [vmem:[%s5439_s26 + $0x570] sm:$0xff]  ;;  %v4306_v2 = vld [vmem:[%s5445_s20 + $0x568] sm:$0xff]  ;;  %v4300_v4 = vld [vmem:[%s5439_s26 + $0x578] sm:$0xff]  ;;  %v1144_v5 = vand.u32 2147483647, %v1136_v52  ;;  %v1178_v12 = vsub.f32 %v4296_v45, %v4304_v60  ;;  %v1179_v13 = vsub.f32 %v4297_v51, %v4305_v61  ;;  %v1150_v33 = vadd.f32 %v1142_v58, %v1108_v40 }
  0xff   : > { %v4307_v3 = vld [vmem:[%s5445_s20 + $0x570] sm:$0xff]  ;;  %v4308_v7 = vld [vmem:[%s5445_s20 + $0x578] sm:$0xff]  ;;  %v1145_v10 = vand.u32 2147483647, %v1137_v46  ;;  %v4309_v14 = vld [vmem:[%s5439_s26 + $0x580] sm:$0xff]  ;;  %v1180_v15 = vsub.f32 %v4298_v59, %v4306_v2  ;;  %v1151_v39 = vadd.f32 %v1143_v0, %v1109_v38 }
 0x100   : > { %v4317_v6 = vld [vmem:[%s5445_s20 + $0x580] sm:$0xff]  ;;  %v1146_v53 = vand.u32 2147483647, %v1138_v50  ;;  %v1147_v18 = vand.u32 2147483647, %v1139_v56  ;;  %v1181_v19 = vsub.f32 %v4299_v1, %v4307_v3  ;;  %v4310_v49 = vld [vmem:[%s5439_s26 + $0x588] sm:$0xff]  ;;  %v1182_v24 = vsub.f32 %v4300_v4, %v4308_v7 }
 0x101   : > { %v4318_v21 = vld [vmem:[%s5445_s20 + $0x588] sm:$0xff]  ;;  %v1148_v20 = vand.u32 2147483647, %v1140_v55  ;;  %v1183_v11 = vand.u32 2147483647, %v1175_v48  ;;  %v4311_v26 = vld [vmem:[%s5439_s26 + $0x590] sm:$0xff]  ;;  %v1217_v32 = vsub.f32 %v4309_v14, %v4317_v6  ;;  %v1152_v52 = vadd.f32 %v1144_v5, %v1110_v47 }
 0x102   : > { %v4319_v28 = vld [vmem:[%s5445_s20 + $0x590] sm:$0xff]  ;;  %v1184_v27 = vand.u32 2147483647, %v1176_v8  ;;  %v1185_v29 = vand.u32 2147483647, %v1177_v9  ;;  %v4312_v31 = vld [vmem:[%s5439_s26 + $0x598] sm:$0xff]  ;;  %v1218_v23 = vsub.f32 %v4310_v49, %v4318_v21  ;;  %v1153_v46 = vadd.f32 %v1145_v10, %v1111_v57 }
 0x103   : > { %v4320_v16 = vld [vmem:[%s5445_s20 + $0x598] sm:$0xff]  ;;  %v1186_v35 = vand.u32 2147483647, %v1178_v12  ;;  %v1187_v17 = vand.u32 2147483647, %v1179_v13  ;;  %v4313_v34 = vld [vmem:[%s5439_s26 + $0x5a0] sm:$0xff]  ;;  %v1219_v30 = vsub.f32 %v4311_v26, %v4319_v28  ;;  %v1154_v56 = vadd.f32 %v1146_v53, %v1112_v44 }
 0x104   : > { %v4321_v36 = vld [vmem:[%s5445_s20 + $0x5a0] sm:$0xff]  ;;  %v1188_v37 = vand.u32 2147483647, %v1180_v15  ;;  %v1189_v42 = vand.u32 2147483647, %v1181_v19  ;;  %v4314_v41 = vld [vmem:[%s5439_s26 + $0x5a8] sm:$0xff]  ;;  %v1220_v50 = vsub.f32 %v4312_v31, %v4320_v16  ;;  %v1155_v59 = vadd.f32 %v1147_v18, %v1113_v63 }
 0x105   : > { %v4322_v45 = vld [vmem:[%s5445_s20 + $0x5a8] sm:$0xff]  ;;  %v1190_v51 = vand.u32 2147483647, %v1182_v24  ;;  %v4315_v40 = vld [vmem:[%s5439_s26 + $0x5b0] sm:$0xff]  ;;  %v4316_v54 = vld [vmem:[%s5439_s26 + $0x5b8] sm:$0xff]  ;;  %v1221_v60 = vsub.f32 %v4313_v34, %v4321_v36  ;;  %v1156_v47 = vadd.f32 %v1148_v20, %v1114_v22  ;;  %v1191_v57 = vadd.f32 %v1183_v11, %v1149_v25 }
 0x106   : > { %v4323_v43 = vld [vmem:[%s5445_s20 + $0x5b0] sm:$0xff]  ;;  %v4324_v38 = vld [vmem:[%s5445_s20 + $0x5b8] sm:$0xff]  ;;  %v1225_v61 = vand.u32 2147483647, %v1217_v32  ;;  %v4325_v55 = vld [vmem:[%s5439_s26 + $0x5c0] sm:$0xff]  ;;  %v1222_v1 = vsub.f32 %v4314_v41, %v4322_v45  ;;  %v1192_v44 = vadd.f32 %v1184_v27, %v1150_v33  ;;  %v1193_v63 = vadd.f32 %v1185_v29, %v1151_v39 }
 0x107   : > { %v4326_v62 = vld [vmem:[%s5439_s26 + $0x5c8] sm:$0xff]  ;;  %v1226_v2 = vand.u32 2147483647, %v1218_v23  ;;  %v4327_v3 = vld [vmem:[%s5439_s26 + $0x5d0] sm:$0xff]  ;;  %v4328_v48 = vld [vmem:[%s5439_s26 + $0x5d8] sm:$0xff]  ;;  %v1223_v0 = vsub.f32 %v4315_v40, %v4323_v43  ;;  %v1194_v5 = vadd.f32 %v1186_v35, %v1152_v52  ;;  %v1195_v10 = vadd.f32 %v1187_v17, %v1153_v46 }
 0x108   : > { %v4333_v58 = vld [vmem:[%s5445_s20 + $0x5c0] sm:$0xff]  ;;  %v1227_v4 = vand.u32 2147483647, %v1219_v30  ;;  %v4334_v8 = vld [vmem:[%s5445_s20 + $0x5c8] sm:$0xff]  ;;  %v4335_v9 = vld [vmem:[%s5445_s20 + $0x5d0] sm:$0xff]  ;;  %v1224_v12 = vsub.f32 %v4316_v54, %v4324_v38  ;;  %v1196_v18 = vadd.f32 %v1188_v37, %v1154_v56  ;;  %v1197_v15 = vadd.f32 %v1189_v42, %v1155_v59 }
 0x109   : > { %v4329_v7 = vld [vmem:[%s5439_s26 + $0x5e0] sm:$0xff]  ;;  %v1228_v13 = vand.u32 2147483647, %v1220_v50  ;;  %v4330_v14 = vld [vmem:[%s5439_s26 + $0x5e8] sm:$0xff]  ;;  %v4336_v6 = vld [vmem:[%s5445_s20 + $0x5d8] sm:$0xff]  ;;  %v1259_v20 = vsub.f32 %v4325_v55, %v4333_v58  ;;  %v1198_v24 = vadd.f32 %v1190_v51, %v1156_v47  ;;  %v1260_v25 = vsub.f32 %v4326_v62, %v4334_v8 }
 0x10a   : > { %v4337_v53 = vld [vmem:[%s5445_s20 + $0x5e0] sm:$0xff]  ;;  %v1229_v19 = vand.u32 2147483647, %v1221_v60  ;;  %v4331_v49 = vld [vmem:[%s5439_s26 + $0x5f0] sm:$0xff]  ;;  %v4332_v21 = vld [vmem:[%s5439_s26 + $0x5f8] sm:$0xff]  ;;  %v1261_v27 = vsub.f32 %v4327_v3, %v4335_v9  ;;  %v1233_v16 = vadd.f32 %v1225_v61, %v1191_v57  ;;  %v1262_v32 = vsub.f32 %v4328_v48, %v4336_v6 }
 0x10b   : > { %v4338_v22 = vld [vmem:[%s5445_s20 + $0x5e8] sm:$0xff]  ;;  %v1230_v11 = vand.u32 2147483647, %v1222_v1  ;;  %v4339_v26 = vld [vmem:[%s5445_s20 + $0x5f0] sm:$0xff]  ;;  %v4340_v28 = vld [vmem:[%s5445_s20 + $0x5f8] sm:$0xff]  ;;  %v1263_v33 = vsub.f32 %v4329_v7, %v4337_v53  ;;  %v1234_v23 = vadd.f32 %v1226_v2, %v1192_v44  ;;  %v1235_v39 = vadd.f32 %v1227_v4, %v1193_v63 }
 0x10c   : > { %v4341_v29 = vld [vmem:[%s5439_s26 + $0x600] sm:$0xff]  ;;  %v1231_v31 = vand.u32 2147483647, %v1223_v0  ;;  %v4342_v35 = vld [vmem:[%s5439_s26 + $0x608] sm:$0xff]  ;;  %v4343_v17 = vld [vmem:[%s5439_s26 + $0x610] sm:$0xff]  ;;  %v1264_v37 = vsub.f32 %v4330_v14, %v4338_v22  ;;  %v1236_v30 = vadd.f32 %v1228_v13, %v1194_v5  ;;  %v1237_v52 = vadd.f32 %v1229_v19, %v1195_v10 }
 0x10d   : > { %v4349_v34 = vld [vmem:[%s5445_s20 + $0x600] sm:$0xff]  ;;  %v1232_v36 = vand.u32 2147483647, %v1224_v12  ;;  %v4344_v42 = vld [vmem:[%s5439_s26 + $0x618] sm:$0xff]  ;;  %v4350_v41 = vld [vmem:[%s5445_s20 + $0x608] sm:$0xff]  ;;  %v1265_v46 = vsub.f32 %v4331_v49, %v4339_v26  ;;  %v1266_v50 = vsub.f32 %v4332_v21, %v4340_v28  ;;  %v1238_v3 = vadd.f32 %v1230_v11, %v1196_v18 }
 0x10e   : > { %v4351_v45 = vld [vmem:[%s5445_s20 + $0x610] sm:$0xff]  ;;  %v1267_v51 = vand.u32 2147483647, %v1259_v20  ;;  %v4345_v40 = vld [vmem:[%s5439_s26 + $0x620] sm:$0xff]  ;;  %v4352_v54 = vld [vmem:[%s5445_s20 + $0x618] sm:$0xff]  ;;  %v1301_v61 = vsub.f32 %v4341_v29, %v4349_v34  ;;  %v1302_v1 = vsub.f32 %v4342_v35, %v4350_v41  ;;  %v1239_v7 = vadd.f32 %v1231_v31, %v1197_v15 }
 0x10f   : > { %v4353_v43 = vld [vmem:[%s5445_s20 + $0x620] sm:$0xff]  ;;  %v1268_v56 = vand.u32 2147483647, %v1260_v25  ;;  %v1269_v59 = vand.u32 2147483647, %v1261_v27  ;;  %v4346_v38 = vld [vmem:[%s5439_s26 + $0x628] sm:$0xff]  ;;  %v1303_v2 = vsub.f32 %v4343_v17, %v4351_v45  ;;  %v1304_v63 = vsub.f32 %v4344_v42, %v4352_v54 }
 0x110   : > { %v4354_v60 = vld [vmem:[%s5445_s20 + $0x628] sm:$0xff]  ;;  %v1270_v55 = vand.u32 2147483647, %v1262_v32  ;;  %v1271_v62 = vand.u32 2147483647, %v1263_v33  ;;  %v4347_v47 = vld [vmem:[%s5439_s26 + $0x630] sm:$0xff]  ;;  %v1305_v0 = vsub.f32 %v4345_v40, %v4353_v43  ;;  %v1240_v8 = vadd.f32 %v1232_v36, %v1198_v24 }
 0x111   : > { %v4355_v57 = vld [vmem:[%s5445_s20 + $0x630] sm:$0xff]  ;;  %v1272_v48 = vand.u32 2147483647, %v1264_v37  ;;  %v4348_v58 = vld [vmem:[%s5439_s26 + $0x638] sm:$0xff]  ;;  %v4357_v4 = vld [vmem:[%s5439_s26 + $0x640] sm:$0xff]  ;;  %v1306_v5 = vsub.f32 %v4346_v38, %v4354_v60  ;;  %v1275_v6 = vadd.f32 %v1267_v51, %v1233_v16  ;;  %v1276_v26 = vadd.f32 %v1268_v56, %v1234_v23 }
 0x112   : > { %v4356_v44 = vld [vmem:[%s5445_s20 + $0x638] sm:$0xff]  ;;  %v1273_v9 = vand.u32 2147483647, %v1265_v46  ;;  %v4358_v10 = vld [vmem:[%s5439_s26 + $0x648] sm:$0xff]  ;;  %v4365_v12 = vld [vmem:[%s5445_s20 + $0x640] sm:$0xff]  ;;  %v1307_v53 = vsub.f32 %v4347_v47, %v4355_v57  ;;  %v1277_v16 = vadd.f32 %v1269_v59, %v1235_v39  ;;  %v1278_v32 = vadd.f32 %v1270_v55, %v1236_v30 }
 0x113   : > { %v4366_v13 = vld [vmem:[%s5445_s20 + $0x648] sm:$0xff]  ;;  %v1274_v14 = vand.u32 2147483647, %v1266_v50  ;;  %v1309_v18 = vand.u32 2147483647, %v1301_v61  ;;  %v4359_v19 = vld [vmem:[%s5439_s26 + $0x650] sm:$0xff]  ;;  %v1308_v21 = vsub.f32 %v4348_v58, %v4356_v44  ;;  %v1343_v11 = vsub.f32 %v4357_v4, %v4365_v12 }
 0x114   : > { %v4367_v49 = vld [vmem:[%s5445_s20 + $0x650] sm:$0xff]  ;;  %v1310_v15 = vand.u32 2147483647, %v1302_v1  ;;  %v1311_v22 = vand.u32 2147483647, %v1303_v2  ;;  %v4360_v20 = vld [vmem:[%s5439_s26 + $0x658] sm:$0xff]  ;;  %v1344_v31 = vsub.f32 %v4358_v10, %v4366_v13  ;;  %v1279_v37 = vadd.f32 %v1271_v62, %v1237_v52 }
 0x115   : > { %v4368_v24 = vld [vmem:[%s5445_s20 + $0x658] sm:$0xff]  ;;  %v1312_v28 = vand.u32 2147483647, %v1304_v63  ;;  %v1313_v25 = vand.u32 2147483647, %v1305_v0  ;;  %v4361_v27 = vld [vmem:[%s5439_s26 + $0x660] sm:$0xff]  ;;  %v1345_v36 = vsub.f32 %v4359_v19, %v4367_v49  ;;  %v1280_v42 = vadd.f32 %v1272_v48, %v1238_v3 }
 0x116   : > { %v4369_v29 = vld [vmem:[%s5445_s20 + $0x660] sm:$0xff]  ;;  %v1314_v33 = vand.u32 2147483647, %v1306_v5  ;;  %v4362_v35 = vld [vmem:[%s5439_s26 + $0x668] sm:$0xff]  ;;  %v4363_v17 = vld [vmem:[%s5439_s26 + $0x670] sm:$0xff]  ;;  %v1346_v51 = vsub.f32 %v4360_v20, %v4368_v24  ;;  %v1281_v40 = vadd.f32 %v1273_v9, %v1239_v7  ;;  %v1282_v50 = vadd.f32 %v1274_v14, %v1240_v8 }
 0x117   : > { %v4370_v34 = vld [vmem:[%s5445_s20 + $0x668] sm:$0xff]  ;;  %v1315_v23 = vand.u32 2147483647, %v1307_v53  ;;  %v4364_v41 = vld [vmem:[%s5439_s26 + $0x678] sm:$0xff]  ;;  %v4371_v45 = vld [vmem:[%s5445_s20 + $0x670] sm:$0xff]  ;;  %v1347_v30 = vsub.f32 %v4361_v27, %v4369_v29  ;;  %v1317_v56 = vadd.f32 %v1309_v18, %v1275_v6  ;;  %v1318_v55 = vadd.f32 %v1310_v15, %v1276_v26 }
 0x118   : > { %v4372_v46 = vld [vmem:[%s5445_s20 + $0x678] sm:$0xff]  ;;  %v1316_v39 = vand.u32 2147483647, %v1308_v21  ;;  %v1351_v54 = vand.u32 2147483647, %v1343_v11  ;;  %v4373_v43 = vld [vmem:[%s5439_s26 + $0x680] sm:$0xff]  ;;  %v1348_v52 = vsub.f32 %v4362_v35, %v4370_v34  ;;  %v1349_v62 = vsub.f32 %v4363_v17, %v4371_v45 }
 0x119   : > { %v1352_v59 = vand.u32 2147483647, %v1344_v31  ;;  %v4374_v38 = vld [vmem:[%s5439_s26 + $0x688] sm:$0xff]  ;;  %v4375_v60 = vld [vmem:[%s5439_s26 + $0x690] sm:$0xff]  ;;  %v4381_v61 = vld [vmem:[%s5445_s20 + $0x680] sm:$0xff]  ;;  %v1350_v47 = vsub.f32 %v4364_v41, %v4372_v46  ;;  %v1319_v48 = vadd.f32 %v1311_v22, %v1277_v16  ;;  %v1320_v58 = vadd.f32 %v1312_v28, %v1278_v32 }
 0x11a   : > { %v1353_v57 = vand.u32 2147483647, %v1345_v36  ;;  %v4376_v1 = vld [vmem:[%s5439_s26 + $0x698] sm:$0xff]  ;;  %v4382_v2 = vld [vmem:[%s5445_s20 + $0x688] sm:$0xff]  ;;  %v4383_v3 = vld [vmem:[%s5445_s20 + $0x690] sm:$0xff]  ;;  %v1385_v7 = vsub.f32 %v4373_v43, %v4381_v61  ;;  %v1321_v8 = vadd.f32 %v1313_v25, %v1279_v37  ;;  %v1322_v9 = vadd.f32 %v1314_v33, %v1280_v42 }
 0x11b   : > { %v1354_v44 = vand.u32 2147483647, %v1346_v51  ;;  %v4377_v63 = vld [vmem:[%s5439_s26 + $0x6a0] sm:$0xff]  ;;  %v4378_v0 = vld [vmem:[%s5439_s26 + $0x6a8] sm:$0xff]  ;;  %v4384_v4 = vld [vmem:[%s5445_s20 + $0x698] sm:$0xff]  ;;  %v1386_v14 = vsub.f32 %v4374_v38, %v4382_v2  ;;  %v1323_v6 = vadd.f32 %v1315_v23, %v1281_v40  ;;  %v1324_v53 = vadd.f32 %v1316_v39, %v1282_v50 }
 0x11c   : > { %v1355_v5 = vand.u32 2147483647, %v1347_v30  ;;  %v4379_v10 = vld [vmem:[%s5439_s26 + $0x6b0] sm:$0xff]  ;;  %v4380_v12 = vld [vmem:[%s5439_s26 + $0x6b8] sm:$0xff]  ;;  %v4385_v13 = vld [vmem:[%s5445_s20 + $0x6a0] sm:$0xff]  ;;  %v1387_v15 = vsub.f32 %v4375_v60, %v4383_v3  ;;  %v1359_v24 = vadd.f32 %v1351_v54, %v1317_v56  ;;  %v1388_v11 = vsub.f32 %v4376_v1, %v4384_v4 }
 0x11d   : > { %v1356_v18 = vand.u32 2147483647, %v1348_v52  ;;  %v4386_v19 = vld [vmem:[%s5445_s20 + $0x6a8] sm:$0xff]  ;;  %v4387_v49 = vld [vmem:[%s5445_s20 + $0x6b0] sm:$0xff]  ;;  %v4388_v21 = vld [vmem:[%s5445_s20 + $0x6b8] sm:$0xff]  ;;  %v1360_v28 = vadd.f32 %v1352_v59, %v1318_v55  ;;  %v1361_v25 = vadd.f32 %v1353_v57, %v1319_v48  ;;  %v1389_v27 = vsub.f32 %v4377_v63, %v4385_v13 }
 0x11e   : > { %v1357_v22 = vand.u32 2147483647, %v1349_v62  ;;  %v1358_v20 = vand.u32 2147483647, %v1350_v47  ;;  %v4389_v26 = vld [vmem:[%s5439_s26 + $0x6c0] sm:$0xff]  ;;  %v4390_v31 = vld [vmem:[%s5439_s26 + $0x6c8] sm:$0xff]  ;;  %v1390_v33 = vsub.f32 %v4378_v0, %v4386_v19  ;;  %v1391_v35 = vsub.f32 %v4379_v10, %v4387_v49 }
 0x11f   : > { %v1393_v29 = vand.u32 2147483647, %v1385_v7  ;;  %v4391_v16 = vld [vmem:[%s5439_s26 + $0x6d0] sm:$0xff]  ;;  %v4392_v32 = vld [vmem:[%s5439_s26 + $0x6d8] sm:$0xff]  ;;  %v1392_v17 = vsub.f32 %v4380_v12, %v4388_v21  ;;  %v1394_v34 = vand.u32 2147483647, %v1386_v14  ;;  %v1362_v23 = vadd.f32 %v1354_v44, %v1320_v58 }
 0x120   : > { %v4393_v36 = vld [vmem:[%s5439_s26 + $0x6e0] sm:$0xff]  ;;  %v4394_v37 = vld [vmem:[%s5439_s26 + $0x6e8] sm:$0xff]  ;;  %v4395_v42 = vld [vmem:[%s5439_s26 + $0x6f0] sm:$0xff]  ;;  %v1363_v41 = vadd.f32 %v1355_v5, %v1321_v8  ;;  %v1364_v45 = vadd.f32 %v1356_v18, %v1322_v9  ;;  %v1395_v46 = vand.u32 2147483647, %v1387_v15  ;;  %v1365_v38 = vadd.f32 %v1357_v22, %v1323_v6 }
 0x121   : > { %v4397_v51 = vld [vmem:[%s5445_s20 + $0x6c0] sm:$0xff]  ;;  %v4398_v40 = vld [vmem:[%s5445_s20 + $0x6c8] sm:$0xff]  ;;  %v4399_v39 = vld [vmem:[%s5445_s20 + $0x6d0] sm:$0xff]  ;;  %v1396_v30 = vand.u32 2147483647, %v1388_v11  ;;  %v1366_v58 = vadd.f32 %v1358_v20, %v1324_v53  ;;  %v1401_v12 = vadd.f32 %v1393_v29, %v1359_v24  ;;  %v1402_v13 = vadd.f32 %v1394_v34, %v1360_v28 }
 0x122   : > { %v4400_v54 = vld [vmem:[%s5445_s20 + $0x6d8] sm:$0xff]  ;;  %v4401_v43 = vld [vmem:[%s5445_s20 + $0x6e0] sm:$0xff]  ;;  %v4402_v50 = vld [vmem:[%s5445_s20 + $0x6e8] sm:$0xff]  ;;  %v1427_v56 = vsub.f32 %v4389_v26, %v4397_v51  ;;  %v1428_v52 = vsub.f32 %v4390_v31, %v4398_v40  ;;  %v1429_v59 = vsub.f32 %v4391_v16, %v4399_v39  ;;  %v1397_v60 = vand.u32 2147483647, %v1389_v27 }
 0x123   : > { %v4396_v61 = vld [vmem:[%s5439_s26 + $0x6f8] sm:$0xff]  ;;  %v4403_v55 = vld [vmem:[%s5445_s20 + $0x6f0] sm:$0xff]  ;;  %v1430_v47 = vsub.f32 %v4392_v32, %v4400_v54  ;;  %v1431_v57 = vsub.f32 %v4393_v36, %v4401_v43  ;;  %v1398_v1 = vand.u32 2147483647, %v1390_v33  ;;  %v1399_v2 = vand.u32 2147483647, %v1391_v35 }
 0x124   : > { %v4404_v62 = vld [vmem:[%s5445_s20 + $0x6f8] sm:$0xff]  ;;  %v1400_v3 = vand.u32 2147483647, %v1392_v17  ;;  %v1432_v48 = vsub.f32 %v4394_v37, %v4402_v50  ;;  %v1433_v44 = vsub.f32 %v4395_v42, %v4403_v55  ;;  %v1435_v63 = vand.u32 2147483647, %v1427_v56  ;;  %v4405_v4 = vld [vmem:[%s5439_s26 + $0x700] sm:$0xff] }
 0x125   : > { %v1436_v0 = vand.u32 2147483647, %v1428_v52  ;;  %v1434_v7 = vsub.f32 %v4396_v61, %v4404_v62  ;;  %v1437_v8 = vand.u32 2147483647, %v1429_v59  ;;  %v1438_v9 = vand.u32 2147483647, %v1430_v47 }
 0x126   : > { %v4406_v5 = vld [vmem:[%s5439_s26 + $0x708] sm:$0xff]  ;;  %v4407_v10 = vld [vmem:[%s5439_s26 + $0x710] sm:$0xff]  ;;  %v1403_v14 = vadd.f32 %v1395_v46, %v1361_v25  ;;  %v1439_v6 = vand.u32 2147483647, %v1431_v57  ;;  %v4408_v53 = vld [vmem:[%s5439_s26 + $0x718] sm:$0xff]  ;;  %v1404_v49 = vadd.f32 %v1396_v30, %v1362_v23  ;;  %v1405_v21 = vadd.f32 %v1397_v60, %v1363_v41 }
 0x127   : > { %v4409_v18 = vld [vmem:[%s5439_s26 + $0x720] sm:$0xff]  ;;  %v4410_v19 = vld [vmem:[%s5439_s26 + $0x728] sm:$0xff]  ;;  %v1406_v15 = vadd.f32 %v1398_v1, %v1364_v45  ;;  %v1440_v22 = vand.u32 2147483647, %v1432_v48  ;;  %v4411_v20 = vld [vmem:[%s5439_s26 + $0x730] sm:$0xff]  ;;  %v1407_v24 = vadd.f32 %v1399_v2, %v1365_v38  ;;  %v1408_v28 = vadd.f32 %v1400_v3, %v1366_v58 }
 0x128   : > { %v4412_v11 = vld [vmem:[%s5439_s26 + $0x738] sm:$0xff]  ;;  %v4413_v26 = vld [vmem:[%s5445_s20 + $0x700] sm:$0xff]  ;;  %v1441_v25 = vand.u32 2147483647, %v1433_v44  ;;  %v4414_v27 = vld [vmem:[%s5445_s20 + $0x708] sm:$0xff]  ;;  %v1443_v42 = vadd.f32 %v1435_v63, %v1401_v12  ;;  %v1444_v51 = vadd.f32 %v1436_v0, %v1402_v13  ;;  %v1445_v50 = vadd.f32 %v1437_v8, %v1403_v14 }
 0x129   : > { %v4415_v29 = vld [vmem:[%s5445_s20 + $0x710] sm:$0xff]  ;;  %v4416_v31 = vld [vmem:[%s5445_s20 + $0x718] sm:$0xff]  ;;  %v1469_v16 = vsub.f32 %v4405_v4, %v4413_v26  ;;  %v1442_v32 = vand.u32 2147483647, %v1434_v7  ;;  %v4417_v33 = vld [vmem:[%s5445_s20 + $0x720] sm:$0xff]  ;;  %v1470_v34 = vsub.f32 %v4406_v5, %v4414_v27  ;;  %v1446_v38 = vadd.f32 %v1438_v9, %v1404_v49 }
 0x12a   : > { %v4418_v35 = vld [vmem:[%s5445_s20 + $0x728] sm:$0xff]  ;;  %v4419_v17 = vld [vmem:[%s5445_s20 + $0x730] sm:$0xff]  ;;  %v1471_v36 = vsub.f32 %v4407_v10, %v4415_v29  ;;  %v1472_v37 = vsub.f32 %v4408_v53, %v4416_v31  ;;  %v4420_v23 = vld [vmem:[%s5445_s20 + $0x738] sm:$0xff]  ;;  %v1473_v41 = vsub.f32 %v4409_v18, %v4417_v33  ;;  %v1447_v47 = vadd.f32 %v1439_v6, %v1405_v21 }
 0x12b   : > { %v1474_v45 = vsub.f32 %v4410_v19, %v4418_v35  ;;  %v1475_v46 = vsub.f32 %v4411_v20, %v4419_v17  ;;  %v1476_v40 = vsub.f32 %v4412_v11, %v4420_v23  ;;  %v1477_v39 = vand.u32 2147483647, %v1469_v16  ;;  %v4421_v54 = vld [vmem:[%s5439_s26 + $0x740] sm:$0xff]  ;;  %v4422_v43 = vld [vmem:[%s5439_s26 + $0x748] sm:$0xff]  ;;  %v4423_v61 = vld [vmem:[%s5439_s26 + $0x750] sm:$0xff] }
 0x12c   : > { %v1478_v30 = vand.u32 2147483647, %v1470_v34  ;;  %v1479_v56 = vand.u32 2147483647, %v1471_v36  ;;  %v1480_v52 = vand.u32 2147483647, %v1472_v37  ;;  %v1448_v57 = vadd.f32 %v1440_v22, %v1406_v15 }
 0x12d   : > { %v1481_v59 = vand.u32 2147483647, %v1473_v41  ;;  %v1482_v60 = vand.u32 2147483647, %v1474_v45  ;;  %v4424_v55 = vld [vmem:[%s5439_s26 + $0x758] sm:$0xff]  ;;  %v4425_v62 = vld [vmem:[%s5439_s26 + $0x760] sm:$0xff]  ;;  %v1449_v1 = vadd.f32 %v1441_v25, %v1407_v24  ;;  %v1450_v44 = vadd.f32 %v1442_v32, %v1408_v28 }
 0x12e   : > { %v1483_v2 = vand.u32 2147483647, %v1475_v46  ;;  %v4426_v3 = vld [vmem:[%s5439_s26 + $0x768] sm:$0xff]  ;;  %v4427_v48 = vld [vmem:[%s5439_s26 + $0x770] sm:$0xff]  ;;  %v4428_v58 = vld [vmem:[%s5439_s26 + $0x778] sm:$0xff]  ;;  %v1485_v0 = vadd.f32 %v1477_v39, %v1443_v42  ;;  %v1486_v4 = vadd.f32 %v1478_v30, %v1444_v51  ;;  %v1487_v5 = vadd.f32 %v1479_v56, %v1445_v50 }
 0x12f   : > { %v1484_v63 = vand.u32 2147483647, %v1476_v40  ;;  %v4429_v7 = vld [vmem:[%s5445_s20 + $0x740] sm:$0xff]  ;;  %v4430_v8 = vld [vmem:[%s5445_s20 + $0x748] sm:$0xff]  ;;  %v4431_v9 = vld [vmem:[%s5445_s20 + $0x750] sm:$0xff]  ;;  %v1488_v18 = vadd.f32 %v1480_v52, %v1446_v38  ;;  %v1489_v28 = vadd.f32 %v1481_v59, %v1447_v47  ;;  %v1490_v31 = vadd.f32 %v1482_v60, %v1448_v57 }
 0x130   : > { %v4432_v10 = vld [vmem:[%s5445_s20 + $0x758] sm:$0xff]  ;;  %v4433_v12 = vld [vmem:[%s5445_s20 + $0x760] sm:$0xff]  ;;  %v4434_v13 = vld [vmem:[%s5445_s20 + $0x768] sm:$0xff]  ;;  %v1511_v14 = vsub.f32 %v4421_v54, %v4429_v7  ;;  %v1512_v6 = vsub.f32 %v4422_v43, %v4430_v8  ;;  %v1513_v53 = vsub.f32 %v4423_v61, %v4431_v9  ;;  %v1491_v17 = vadd.f32 %v1483_v2, %v1449_v1 }
 0x131   : > { %v4435_v19 = vld [vmem:[%s5445_s20 + $0x770] sm:$0xff]  ;;  %v4436_v49 = vld [vmem:[%s5445_s20 + $0x778] sm:$0xff]  ;;  %v1514_v21 = vsub.f32 %v4424_v55, %v4432_v10  ;;  %v1515_v15 = vsub.f32 %v4425_v62, %v4433_v12  ;;  %v1516_v22 = vsub.f32 %v4426_v3, %v4434_v13  ;;  %v4437_v32 = vld [vmem:[%s5439_s26 + $0x780] sm:$0xff]  ;;  %v1492_v23 = vadd.f32 %v1484_v63, %v1450_v44 }
 0x132   : > { %v1517_v20 = vsub.f32 %v4427_v48, %v4435_v19  ;;  %v1518_v11 = vsub.f32 %v4428_v58, %v4436_v49  ;;  %v1519_v26 = vand.u32 2147483647, %v1511_v14  ;;  %v1520_v24 = vand.u32 2147483647, %v1512_v6  ;;  %v4438_v33 = vld [vmem:[%s5439_s26 + $0x788] sm:$0xff]  ;;  %v4439_v35 = vld [vmem:[%s5439_s26 + $0x790] sm:$0xff] }
 0x133   : > { %v1521_v25 = vand.u32 2147483647, %v1513_v53  ;;  %v1522_v27 = vand.u32 2147483647, %v1514_v21  ;;  %v1523_v29 = vand.u32 2147483647, %v1515_v15 }
 0x134   : > { %v1524_v16 = vand.u32 2147483647, %v1516_v22  ;;  %v1525_v34 = vand.u32 2147483647, %v1517_v20  ;;  %v4440_v36 = vld [vmem:[%s5439_s26 + $0x798] sm:$0xff]  ;;  %v4441_v37 = vld [vmem:[%s5439_s26 + $0x7a0] sm:$0xff]  ;;  %v1527_v45 = vadd.f32 %v1519_v26, %v1485_v0  ;;  %v1528_v46 = vadd.f32 %v1520_v24, %v1486_v4 }
 0x135   : > { %v4442_v42 = vld [vmem:[%s5439_s26 + $0x7a8] sm:$0xff]  ;;  %v1526_v41 = vand.u32 2147483647, %v1518_v11  ;;  %v4443_v51 = vld [vmem:[%s5439_s26 + $0x7b0] sm:$0xff]  ;;  %v4444_v40 = vld [vmem:[%s5439_s26 + $0x7b8] sm:$0xff]  ;;  %v1529_v30 = vadd.f32 %v1521_v25, %v1487_v5  ;;  %v1530_v54 = vadd.f32 %v1522_v27, %v1488_v18  ;;  %v1531_v43 = vadd.f32 %v1523_v29, %v1489_v28 }
 0x136   : > { %v4445_v39 = vld [vmem:[%s5445_s20 + $0x780] sm:$0xff]  ;;  %v4446_v50 = vld [vmem:[%s5445_s20 + $0x788] sm:$0xff]  ;;  %v4447_v56 = vld [vmem:[%s5445_s20 + $0x790] sm:$0xff]  ;;  %v1532_v38 = vadd.f32 %v1524_v16, %v1490_v31  ;;  %v1533_v9 = vadd.f32 %v1525_v34, %v1491_v17 }
 0x137   : > { %v4448_v52 = vld [vmem:[%s5445_s20 + $0x798] sm:$0xff]  ;;  %v1553_v59 = vsub.f32 %v4437_v32, %v4445_v39  ;;  %v4449_v60 = vld [vmem:[%s5445_s20 + $0x7a0] sm:$0xff]  ;;  %v4450_v61 = vld [vmem:[%s5445_s20 + $0x7a8] sm:$0xff]  ;;  %v1554_v62 = vsub.f32 %v4438_v33, %v4446_v50  ;;  %v1555_v47 = vsub.f32 %v4439_v35, %v4447_v56  ;;  %v1534_v13 = vadd.f32 %v1526_v41, %v1492_v23 }
 0x138   : > { %v4451_v55 = vld [vmem:[%s5445_s20 + $0x7b0] sm:$0xff]  ;;  %v1556_v57 = vsub.f32 %v4440_v36, %v4448_v52  ;;  %v4452_v1 = vld [vmem:[%s5445_s20 + $0x7b8] sm:$0xff]  ;;  %v1557_v2 = vsub.f32 %v4441_v37, %v4449_v60  ;;  %v1558_v3 = vsub.f32 %v4442_v42, %v4450_v61  ;;  %v4453_v7 = vld [vmem:[%s5439_s26 + $0x7c0] sm:$0xff] }
 0x139   : > { %v1559_v48 = vsub.f32 %v4443_v51, %v4451_v55  ;;  %v1561_v58 = vand.u32 2147483647, %v1553_v59  ;;  %v1560_v44 = vsub.f32 %v4444_v40, %v4452_v1  ;;  %v1562_v63 = vand.u32 2147483647, %v1554_v62  ;;  %v4454_v8 = vld [vmem:[%s5439_s26 + $0x7c8] sm:$0xff]  ;;  %v4455_v6 = vld [vmem:[%s5439_s26 + $0x7d0] sm:$0xff] }
 0x13a   : > { %v1563_v0 = vand.u32 2147483647, %v1555_v47  ;;  %v1564_v4 = vand.u32 2147483647, %v1556_v57  ;;  %v1565_v5 = vand.u32 2147483647, %v1557_v2 }
 0x13b   : > { %v1566_v10 = vand.u32 2147483647, %v1558_v3  ;;  %v1567_v12 = vand.u32 2147483647, %v1559_v48  ;;  %v1568_v14 = vand.u32 2147483647, %v1560_v44  ;;  %v1569_v19 = vadd.f32 %v1561_v58, %v1527_v45 }
 0x13c   : > { %v4456_v53 = vld [vmem:[%s5439_s26 + $0x7d8] sm:$0xff]  ;;  %v4457_v18 = vld [vmem:[%s5439_s26 + $0x7e0] sm:$0xff]  ;;  %v1570_v49 = vadd.f32 %v1562_v63, %v1528_v46  ;;  %v4458_v21 = vld [vmem:[%s5439_s26 + $0x7e8] sm:$0xff]  ;;  %v1571_v20 = vadd.f32 %v1563_v0, %v1529_v30  ;;  %v1572_v11 = vadd.f32 %v1564_v4, %v1530_v54  ;;  %v1573_v26 = vadd.f32 %v1565_v5, %v1531_v43 }
 0x13d   : > { %v4459_v15 = vld [vmem:[%s5439_s26 + $0x7f0] sm:$0xff]  ;;  %v4460_v22 = vld [vmem:[%s5439_s26 + $0x7f8] sm:$0xff]  ;;  %v1574_v24 = vadd.f32 %v1566_v10, %v1532_v38  ;;  %v4461_v28 = vld [vmem:[%s5445_s20 + $0x7c0] sm:$0xff]  ;;  %v1575_v29 = vadd.f32 %v1567_v12, %v1533_v9  ;;  %v1576_v34 = vadd.f32 %v1568_v14, %v1534_v13 }
 0x13e   : > { %v4462_v25 = vld [vmem:[%s5445_s20 + $0x7c8] sm:$0xff]  ;;  %v4463_v27 = vld [vmem:[%s5445_s20 + $0x7d0] sm:$0xff]  ;;  %v4464_v31 = vld [vmem:[%s5445_s20 + $0x7d8] sm:$0xff]  ;;  %v1595_v33 = vsub.f32 %v4453_v7, %v4461_v28 }
 0x13f   : > { %v4465_v16 = vld [vmem:[%s5445_s20 + $0x7e0] sm:$0xff]  ;;  %v4466_v32 = vld [vmem:[%s5445_s20 + $0x7e8] sm:$0xff]  ;;  %v1596_v35 = vsub.f32 %v4454_v8, %v4462_v25  ;;  %v1597_v17 = vsub.f32 %v4455_v6, %v4463_v27  ;;  %v4467_v36 = vld [vmem:[%s5445_s20 + $0x7f0] sm:$0xff]  ;;  %v1598_v42 = vsub.f32 %v4456_v53, %v4464_v31 }
 0x140   : > { %v4468_v37 = vld [vmem:[%s5445_s20 + $0x7f8] sm:$0xff]  ;;  %v1599_v23 = vsub.f32 %v4457_v18, %v4465_v16  ;;  %v1600_v41 = vsub.f32 %v4458_v21, %v4466_v32  ;;  %v1619_v45 = vld [vmem:[%s5454_s21] sm:$0xff]  ;;  %v1601_v46 = vsub.f32 %v4459_v15, %v4467_v36  ;;  %v1603_v40 = vand.u32 2147483647, %v1595_v33  ;;  %v1620_v30 = vld [vmem:[%s5454_s21 + $0x8] sm:$0xff] }
 0x141   : > { %v1602_v51 = vsub.f32 %v4460_v22, %v4468_v37  ;;  %v1604_v39 = vand.u32 2147483647, %v1596_v35  ;;  %v1621_v54 = vld [vmem:[%s5454_s21 + $0x10] sm:$0xff]  ;;  %v1605_v43 = vand.u32 2147483647, %v1597_v17  ;;  %v1622_v57 = vld [vmem:[%s5454_s21 + $0x18] sm:$0xff] }
 0x142   : > { %v1606_v50 = vand.u32 2147483647, %v1598_v42  ;;  %v1607_v56 = vand.u32 2147483647, %v1599_v23  ;;  %v1608_v52 = vand.u32 2147483647, %v1600_v41  ;;  %v1611_v60 = vadd.f32 %v1603_v40, %v1569_v19 }
 0x143   : > { %v1609_v59 = vand.u32 2147483647, %v1601_v46  ;;  %v1610_v38 = vand.u32 2147483647, %v1602_v51  ;;  %v1612_v61 = vadd.f32 %v1604_v39, %v1570_v49  ;;  %v1613_v55 = vadd.f32 %v1605_v43, %v1571_v20  ;;  %v1623_v1 = vld [vmem:[%s5454_s21 + $0x20] sm:$0xff]  ;;  %v1624_v2 = vld [vmem:[%s5454_s21 + $0x28] sm:$0xff] }
 0x144   : > { %v1614_v62 = vadd.f32 %v1606_v50, %v1572_v11  ;;  %v1615_v47 = vadd.f32 %v1607_v56, %v1573_v26  ;;  %v1616_v3 = vadd.f32 %v1608_v52, %v1574_v24  ;;  %v1625_v44 = vld [vmem:[%s5454_s21 + $0x30] sm:$0xff]  ;;  %v1626_v63 = vld [vmem:[%s5454_s21 + $0x38] sm:$0xff]  ;;  %v1627_v0 = vadd.f32 %v1619_v45, %v1611_v60 }
 0x145   : > { %v1617_v48 = vadd.f32 %v1609_v59, %v1575_v29  ;;  %v1618_v58 = vadd.f32 %v1610_v38, %v1576_v34  ;;  %v1628_v4 = vadd.f32 %v1620_v30, %v1612_v61  ;;  %v1629_v7 = vadd.f32 %v1621_v54, %v1613_v55 }
 0x146   : > { %v1630_v8 = vadd.f32 %v1622_v57, %v1614_v62  ;;  %v1631_v9 = vadd.f32 %v1623_v1, %v1615_v47  ;;  %v1632_v5 = vadd.f32 %v1624_v2, %v1616_v3  ;;  %1635 = vst [vmem:[%s5454_s21] sm:$0xff] %v1627_v0 }
 0x147   : > { %v1633_v10 = vadd.f32 %v1625_v44, %v1617_v48  ;;  %v1634_v12 = vadd.f32 %v1626_v63, %v1618_v58  ;;  %1636 = vst [vmem:[%s5454_s21 + $0x8] sm:$0xff] %v1628_v4  ;;  %1637 = vst [vmem:[%s5454_s21 + $0x10] sm:$0xff] %v1629_v7 }
 0x148   : > { %1638 = vst [vmem:[%s5454_s21 + $0x18] sm:$0xff] %v1630_v8  ;;  %1639 = vst [vmem:[%s5454_s21 + $0x20] sm:$0xff] %v1631_v9 }
 0x149   : > { %1640 = vst [vmem:[%s5454_s21 + $0x28] sm:$0xff] %v1632_v5  ;;  %1641 = vst [vmem:[%s5454_s21 + $0x30] sm:$0xff] %v1633_v10 }
 0x14a   : > { %1642 = vst [vmem:[%s5454_s21 + $0x38] sm:$0xff] %v1634_v12 }
 0x14b PF: > { %p4469_p6 = scmp.ne.s32.totalorder %s5221_s15, 1 }
 0x14c   : > { %s4470_s25 = sshll.u32 (!%p4469_p6), %s5221_s15, 11  ;;  %v1648_v13 = vlaneseq (!%p4469_p6)  ;;  %v1666_v6 = vld [vmem:[%s5439_s26] sm:$0xff] (!%p4469_p6)  ;;  %v1667_v53 = vld [vmem:[%s5439_s26 + $0x8] sm:$0xff] (!%p4469_p6)  ;;  %v1668_v49 = vld [vmem:[%s5439_s26 + $0x10] sm:$0xff] (!%p4469_p6) }
 0x14d   : > { %1646 = sbr.rel (%p4469_p6) target bundleno = 725 (0x2d5), region = 48  ;;  %v1674_v18 = vld [vmem:[%s5445_s20] sm:$0xff] (!%p4469_p6)  ;;  %v1657_v19 = vstv (!%p4469_p6), %s4470_s25  ;;  %v1669_v21 = vld [vmem:[%s5439_s26 + $0x18] sm:$0xff] (!%p4469_p6)  ;;  %v1671_v22 = vld [vmem:[%s5439_s26 + $0x28] sm:$0xff] (!%p4469_p6) }
 0x14e   : > { %v1649_v14 = vshrl.u32 (!%p4469_p6), %v1648_v13, 7  ;;  %v1670_v15 = vld [vmem:[%s5439_s26 + $0x20] sm:$0xff] (!%p4469_p6)  ;;  %v1672_v28 = vld [vmem:[%s5439_s26 + $0x30] sm:$0xff] (!%p4469_p6)  ;;  %v1675_v25 = vld [vmem:[%s5445_s20 + $0x8] sm:$0xff] (!%p4469_p6)  ;;  %v1682_v17 = vsub.f32 (!%p4469_p6), %v1666_v6, %v1674_v18 }
 0x14f   : > { %v1676_v27 = vld [vmem:[%s5445_s20 + $0x10] sm:$0xff] (!%p4469_p6)  ;;  %v1677_v32 = vld [vmem:[%s5445_s20 + $0x18] sm:$0xff] (!%p4469_p6)  ;;  %v1678_v33 = vld [vmem:[%s5445_s20 + $0x20] sm:$0xff] (!%p4469_p6)  ;;  %v1683_v39 = vsub.f32 (!%p4469_p6), %v1667_v53, %v1675_v25 }
 0x150   : > { %v1650_v20 = vadd.s32 (!%p4469_p6), 8, %v1649_v14  ;;  %v1651_v11 = vadd.s32 (!%p4469_p6), 16, %v1649_v14  ;;  %v1652_v26 = vadd.s32 (!%p4469_p6), 24, %v1649_v14  ;;  %v1653_v24 = vadd.s32 (!%p4469_p6), 32, %v1649_v14  ;;  %v1679_v35 = vld [vmem:[%s5445_s20 + $0x28] sm:$0xff] (!%p4469_p6)  ;;  %v1673_v23 = vld [vmem:[%s5439_s26 + $0x38] sm:$0xff] (!%p4469_p6) }
 0x151   : > { %v1654_v29 = vadd.s32 (!%p4469_p6), 40, %v1649_v14  ;;  %v1655_v31 = vadd.s32 (!%p4469_p6), 48, %v1649_v14  ;;  %v1656_v16 = vadd.s32 (!%p4469_p6), 56, %v1649_v14  ;;  %v6029_v34 = vadd.s32 (!%p4469_p6), %v1657_v19, %v1649_v14  ;;  %v1680_v41 = vld [vmem:[%s5445_s20 + $0x30] sm:$0xff] (!%p4469_p6)  ;;  %v1681_v45 = vld [vmem:[%s5445_s20 + $0x38] sm:$0xff] (!%p4469_p6)  ;;  %v4471_v56 = vld [vmem:[%s5439_s26 + $0x40] sm:$0xff] (!%p4469_p6) }
 0x152   : > { %v6031_v36 = vadd.s32 (!%p4469_p6), %v1657_v19, %v1650_v20  ;;  %v6033_v37 = vadd.s32 (!%p4469_p6), %v1657_v19, %v1651_v11  ;;  %v6035_v42 = vadd.s32 (!%p4469_p6), %v1657_v19, %v1652_v26  ;;  %v6040_v46 = vadd.s32 (!%p4469_p6), %v1657_v19, %v1653_v24  ;;  %v4479_v52 = vld [vmem:[%s5445_s20 + $0x40] sm:$0xff] (!%p4469_p6)  ;;  %v4472_v55 = vld [vmem:[%s5439_s26 + $0x48] sm:$0xff] (!%p4469_p6)  ;;  %v4473_v44 = vld [vmem:[%s5439_s26 + $0x50] sm:$0xff] (!%p4469_p6) }
 0x153   : > { %v6042_v51 = vadd.s32 (!%p4469_p6), %v1657_v19, %v1654_v29  ;;  %v6044_v40 = vadd.s32 (!%p4469_p6), %v1657_v19, %v1655_v31  ;;  %v1684_v30 = vsub.f32 (!%p4469_p6), %v1668_v49, %v1676_v27  ;;  %v1685_v54 = vsub.f32 (!%p4469_p6), %v1669_v21, %v1677_v32  ;;  %v4480_v62 = vld [vmem:[%s5445_s20 + $0x48] sm:$0xff] (!%p4469_p6)  ;;  %v4474_v63 = vld [vmem:[%s5439_s26 + $0x58] sm:$0xff] (!%p4469_p6)  ;;  %v4475_v0 = vld [vmem:[%s5439_s26 + $0x60] sm:$0xff] (!%p4469_p6) }
 0x154   : > { %v1686_v43 = vsub.f32 %v1670_v15, %v1678_v33  ;;  %v1687_v50 = vsub.f32 %v1671_v22, %v1679_v35  ;;  %v1688_v59 = vsub.f32 %v1672_v28, %v1680_v41  ;;  %v1689_v38 = vsub.f32 %v1673_v23, %v1681_v45  ;;  %v4476_v4 = vld [vmem:[%s5439_s26 + $0x68] sm:$0xff]  ;;  %v4477_v8 = vld [vmem:[%s5439_s26 + $0x70] sm:$0xff]  ;;  %v4478_v9 = vld [vmem:[%s5439_s26 + $0x78] sm:$0xff] }
 0x155   : > { %v1690_v60 = vand.u32 2147483647, %v1682_v17  ;;  %v1691_v61 = vand.u32 2147483647, %v1683_v39  ;;  %v6050_v47 = vadd.s32 %v1657_v19, %v1656_v16  ;;  %v1692_v57 = vand.u32 2147483647, %v1684_v30 }
 0x156   : > { %v1693_v1 = vand.u32 2147483647, %v1685_v54  ;;  %v1694_v2 = vand.u32 2147483647, %v1686_v43  ;;  %v1695_v3 = vand.u32 2147483647, %v1687_v50  ;;  %v1749_v7 = vsub.f32 %v4471_v56, %v4479_v52 }
 0x157   : > { %v1696_v48 = vand.u32 2147483647, %v1688_v59  ;;  %v6052_v58 = vand.u32 2147483647, %v1689_v38  ;;  %vm1707_vm0 = vcmp.lt.s32.totalorder %v6029_v34, 2592  ;;  %vm1708_vm1 = vcmp.lt.s32.totalorder %v6031_v36, 2592 }
 0x158   : > { %vm1709_vm2 = vcmp.lt.s32.totalorder %v6033_v37, 2592  ;;  %vm1710_vm3 = vcmp.lt.s32.totalorder %v6035_v42, 2592  ;;  %v4481_v5 = vld [vmem:[%s5445_s20 + $0x50] sm:$0xff]  ;;  %vm1711_vm4 = vcmp.lt.s32.totalorder %v6040_v46, 2592  ;;  %vm1712_vm5 = vcmp.lt.s32.totalorder %v6042_v51, 2592  ;;  %v4482_v10 = vld [vmem:[%s5445_s20 + $0x58] sm:$0xff] }
 0x159   : > { %vm1713_vm6 = vcmp.lt.s32.totalorder %v6044_v40, 2592  ;;  %v4483_v12 = vld [vmem:[%s5445_s20 + $0x60] sm:$0xff]  ;;  %v4484_v13 = vld [vmem:[%s5445_s20 + $0x68] sm:$0xff]  ;;  %v1750_v14 = vsub.f32 %v4472_v55, %v4480_v62  ;;  %vm1714_vm7 = vcmp.lt.s32.totalorder %v6050_v47, 2592  ;;  %v1715_v6 = vsel %vm1707_vm0, %v1690_v60, 0.0  ;;  %v4485_v19 = vld [vmem:[%s5445_s20 + $0x70] sm:$0xff] }
 0x15a   : > { %v1716_v53 = vsel %vm1708_vm1, %v1691_v61, 0.0  ;;  %v6072_v18 = vsel %vm1709_vm2, %v1692_v57, 0.0  ;;  %v4486_v49 = vld [vmem:[%s5445_s20 + $0x78] sm:$0xff]  ;;  %v6078_v21 = vsel %vm1710_vm3, %v1693_v1, 0.0  ;;  %v6080_v15 = vsel %vm1711_vm4, %v1694_v2, 0.0  ;;  %v4487_v52 = vld [vmem:[%s5439_s26 + $0x80] sm:$0xff] }
 0x15b   : > { %v6082_v22 = vsel %vm1712_vm5, %v1695_v3, 0.0  ;;  %v6084_v20 = vsel %vm1713_vm6, %v1696_v48, 0.0  ;;  %v1751_v11 = vsub.f32 %v4473_v44, %v4481_v5  ;;  %v1752_v26 = vsub.f32 %v4474_v63, %v4482_v10  ;;  %v4495_v59 = vld [vmem:[%s5445_s20 + $0x80] sm:$0xff]  ;;  %v4488_v38 = vld [vmem:[%s5439_s26 + $0x88] sm:$0xff]  ;;  %v4489_v60 = vld [vmem:[%s5439_s26 + $0x90] sm:$0xff] }
 0x15c   : > { %v1753_v24 = vsub.f32 %v4475_v0, %v4483_v12  ;;  %v1754_v28 = vsub.f32 %v4476_v4, %v4484_v13  ;;  %v1755_v25 = vsub.f32 %v4477_v8, %v4485_v19  ;;  %v1756_v27 = vsub.f32 %v4478_v9, %v4486_v49  ;;  %v4490_v61 = vld [vmem:[%s5439_s26 + $0x98] sm:$0xff]  ;;  %v4491_v55 = vld [vmem:[%s5439_s26 + $0xa0] sm:$0xff]  ;;  %v4492_v3 = vld [vmem:[%s5439_s26 + $0xa8] sm:$0xff] }
 0x15d   : > { %v1757_v29 = vand.u32 2147483647, %v1749_v7  ;;  %v1758_v31 = vand.u32 2147483647, %v1750_v14  ;;  %v1759_v16 = vand.u32 2147483647, %v1751_v11  ;;  %v1816_v10 = vsub.f32 %v4487_v52, %v4495_v59 }
 0x15e   : > { %v1760_v32 = vand.u32 2147483647, %v1752_v26  ;;  %v1761_v33 = vand.u32 2147483647, %v1753_v24  ;;  %v1762_v35 = vand.u32 2147483647, %v1754_v28 }
 0x15f   : > { %v1763_v17 = vand.u32 2147483647, %v1755_v25  ;;  %v1764_v23 = vand.u32 2147483647, %v1756_v27  ;;  %v1766_v41 = vadd.s32 64, %v6029_v34  ;;  %v1767_v45 = vadd.s32 64, %v6031_v36 }
 0x160   : > { %v1768_v39 = vadd.s32 64, %v6033_v37  ;;  %v1769_v30 = vadd.s32 64, %v6035_v42  ;;  %v1770_v54 = vadd.s32 64, %v6040_v46  ;;  %v1771_v43 = vadd.s32 64, %v6042_v51  ;;  %v4493_v48 = vld [vmem:[%s5439_s26 + $0xb0] sm:$0xff]  ;;  %v4494_v44 = vld [vmem:[%s5439_s26 + $0xb8] sm:$0xff] }
 0x161   : > { %v1772_v50 = vadd.s32 64, %v6044_v40  ;;  %v1773_v56 = vadd.s32 64, %v6050_v47  ;;  %vm1774_vm8 = vcmp.lt.s32.totalorder %v1766_v41, 2592  ;;  %vm1775_vm9 = vcmp.lt.s32.totalorder %v1767_v45, 2592  ;;  %v4496_v63 = vld [vmem:[%s5445_s20 + $0x88] sm:$0xff]  ;;  %v4497_v8 = vld [vmem:[%s5445_s20 + $0x90] sm:$0xff] }
 0x162   : > { %vm1776_vm10 = vcmp.lt.s32.totalorder %v1768_v39, 2592  ;;  %vm1777_vm11 = vcmp.lt.s32.totalorder %v1769_v30, 2592  ;;  %vm1778_vm12 = vcmp.lt.s32.totalorder %v1770_v54, 2592  ;;  %vm1779_vm13 = vcmp.lt.s32.totalorder %v1771_v43, 2592  ;;  %v4498_v9 = vld [vmem:[%s5445_s20 + $0x98] sm:$0xff]  ;;  %v4499_v5 = vld [vmem:[%s5445_s20 + $0xa0] sm:$0xff] }
 0x163   : > { %vm1780_vm14 = vcmp.lt.s32.totalorder %v1772_v50, 2592  ;;  %vm1781_vm15 = vcmp.lt.s32.totalorder %v1773_v56, 2592  ;;  %v1782_v62 = vsel %vm1774_vm8, %v1757_v29, 0.0  ;;  %v1783_v57 = vsel %vm1775_vm9, %v1758_v31, 0.0  ;;  %v4500_v49 = vld [vmem:[%s5445_s20 + $0xa8] sm:$0xff]  ;;  %v4501_v11 = vld [vmem:[%s5445_s20 + $0xb0] sm:$0xff] }
 0x164   : > { %v1784_v1 = vsel %vm1776_vm10, %v1759_v16, 0.0  ;;  %v1785_v2 = vsel %vm1777_vm11, %v1760_v32, 0.0  ;;  %v1722_v0 = vsel %vm1714_vm7, %v6052_v58, 0.0  ;;  %v1786_v4 = vsel %vm1778_vm12, %v1761_v33, 0.0  ;;  %v4502_v26 = vld [vmem:[%s5445_s20 + $0xb8] sm:$0xff]  ;;  %v4503_v52 = vld [vmem:[%s5439_s26 + $0xc0] sm:$0xff] }
 0x165   : > { %v1787_v7 = vsel %vm1779_vm13, %v1762_v35, 0.0  ;;  %v1788_v12 = vsel %vm1780_vm14, %v1763_v17, 0.0  ;;  %v1789_v13 = vsel %vm1781_vm15, %v1764_v23, 0.0  ;;  %v6114_v14 = vadd.f32 %v1782_v62, %v1715_v6  ;;  %v4507_v62 = vld [vmem:[%s5439_s26 + $0xe0] sm:$0xff] }
 0x166   : > { %v6116_v19 = vadd.f32 %v1783_v57, %v1716_v53  ;;  %v6122_v58 = vadd.f32 %v1784_v1, %v6072_v18  ;;  %v6125_v24 = vadd.f32 %v1785_v2, %v6078_v21  ;;  %v6128_v28 = vadd.f32 %v1786_v4, %v6080_v15  ;;  %v4512_v57 = vld [vmem:[%s5445_s20 + $0xc8] sm:$0xff] }
 0x167   : > { %v6131_v25 = vadd.f32 %v1787_v7, %v6082_v22  ;;  %v1817_v27 = vsub.f32 %v4488_v38, %v4496_v63  ;;  %v1818_v6 = vsub.f32 %v4489_v60, %v4497_v8  ;;  %v1819_v29 = vsub.f32 %v4490_v61, %v4498_v9  ;;  %v4504_v38 = vld [vmem:[%s5439_s26 + $0xc8] sm:$0xff]  ;;  %v4511_v60 = vld [vmem:[%s5445_s20 + $0xc0] sm:$0xff]  ;;  %v4505_v61 = vld [vmem:[%s5439_s26 + $0xd0] sm:$0xff] }
 0x168   : > { %v1820_v53 = vsub.f32 %v4491_v55, %v4499_v5  ;;  %v1821_v31 = vsub.f32 %v4492_v3, %v4500_v49  ;;  %v1822_v16 = vsub.f32 %v4493_v48, %v4501_v11  ;;  %v1823_v32 = vsub.f32 %v4494_v44, %v4502_v26  ;;  %v4506_v55 = vld [vmem:[%s5439_s26 + $0xd8] sm:$0xff]  ;;  %v4508_v48 = vld [vmem:[%s5439_s26 + $0xe8] sm:$0xff]  ;;  %v4509_v44 = vld [vmem:[%s5439_s26 + $0xf0] sm:$0xff] }
 0x169   : > { %v1824_v33 = vand.u32 2147483647, %v1816_v10  ;;  %v6134_v18 = vadd.f32 %v1788_v12, %v6084_v20  ;;  %v1825_v21 = vand.u32 2147483647, %v1817_v27  ;;  %v1826_v35 = vand.u32 2147483647, %v1818_v6 }
 0x16a   : > { %v1827_v17 = vand.u32 2147483647, %v1819_v29  ;;  %v6136_v15 = vadd.f32 %v1789_v13, %v1722_v0  ;;  %v1828_v23 = vand.u32 2147483647, %v1820_v53  ;;  %v1829_v22 = vand.u32 2147483647, %v1821_v31 }
 0x16b   : > { %v1830_v41 = vand.u32 2147483647, %v1822_v16  ;;  %v1831_v45 = vand.u32 2147483647, %v1823_v32  ;;  %v1833_v39 = vadd.s32 128, %v6029_v34  ;;  %v1834_v30 = vadd.s32 128, %v6031_v36 }
 0x16c   : > { %v1835_v54 = vadd.s32 128, %v6033_v37  ;;  %v1836_v20 = vadd.s32 128, %v6035_v42  ;;  %v1837_v43 = vadd.s32 128, %v6040_v46  ;;  %v1838_v50 = vadd.s32 128, %v6042_v51  ;;  %v4510_v63 = vld [vmem:[%s5439_s26 + $0xf8] sm:$0xff]  ;;  %v4513_v8 = vld [vmem:[%s5445_s20 + $0xd0] sm:$0xff] }
 0x16d   : > { %v1839_v56 = vadd.s32 128, %v6044_v40  ;;  %v1840_v59 = vadd.s32 128, %v6050_v47  ;;  %vm1841_vm0 = vcmp.lt.s32.totalorder %v1833_v39, 2592  ;;  %vm1842_vm1 = vcmp.lt.s32.totalorder %v1834_v30, 2592  ;;  %v4514_v9 = vld [vmem:[%s5445_s20 + $0xd8] sm:$0xff]  ;;  %v4515_v5 = vld [vmem:[%s5445_s20 + $0xe0] sm:$0xff] }
 0x16e   : > { %vm1843_vm2 = vcmp.lt.s32.totalorder %v1835_v54, 2592  ;;  %vm1844_vm3 = vcmp.lt.s32.totalorder %v1836_v20, 2592  ;;  %vm1845_vm4 = vcmp.lt.s32.totalorder %v1837_v43, 2592  ;;  %vm1846_vm5 = vcmp.lt.s32.totalorder %v1838_v50, 2592  ;;  %v4516_v11 = vld [vmem:[%s5445_s20 + $0xe8] sm:$0xff]  ;;  %v4517_v26 = vld [vmem:[%s5445_s20 + $0xf0] sm:$0xff] }
 0x16f   : > { %vm1847_vm6 = vcmp.lt.s32.totalorder %v1839_v56, 2592  ;;  %vm1848_vm7 = vcmp.lt.s32.totalorder %v1840_v59, 2592  ;;  %v1849_v1 = vsel %vm1841_vm0, %v1824_v33, 0.0  ;;  %v1850_v2 = vsel %vm1842_vm1, %v1825_v21, 0.0  ;;  %v4518_v27 = vld [vmem:[%s5445_s20 + $0xf8] sm:$0xff] }
 0x170   : > { %v1851_v3 = vsel %vm1843_vm2, %v1826_v35, 0.0  ;;  %v1852_v0 = vsel %vm1844_vm3, %v1827_v17, 0.0  ;;  %v1853_v4 = vsel %vm1845_vm4, %v1828_v23, 0.0  ;;  %v1854_v7 = vsel %vm1846_vm5, %v1829_v22, 0.0 }
 0x171   : > { %v1883_v10 = vsub.f32 %v4503_v52, %v4511_v60  ;;  %v1855_v12 = vsel %vm1847_vm6, %v1830_v41, 0.0  ;;  %v1856_v13 = vsel %vm1848_vm7, %v1831_v45, 0.0  ;;  %v6161_v49 = vadd.f32 %v1849_v1, %v6114_v14  ;;  %v4519_v52 = vld [vmem:[%s5439_s26 + $0x100] sm:$0xff] }
 0x172   : > { %v1884_v6 = vsub.f32 %v4504_v38, %v4512_v57  ;;  %v6167_v29 = vadd.f32 %v1850_v2, %v6116_v19  ;;  %v6170_v53 = vadd.f32 %v1851_v3, %v6122_v58  ;;  %v6173_v31 = vadd.f32 %v1852_v0, %v6125_v24  ;;  %v4520_v38 = vld [vmem:[%s5439_s26 + $0x108] sm:$0xff]  ;;  %v4527_v60 = vld [vmem:[%s5445_s20 + $0x100] sm:$0xff] }
 0x173   : > { %v6176_v16 = vadd.f32 %v1853_v4, %v6128_v28  ;;  %v6179_v32 = vadd.f32 %v1854_v7, %v6131_v25  ;;  %v1885_v14 = vsub.f32 %v4505_v61, %v4513_v8  ;;  %v1886_v33 = vsub.f32 %v4506_v55, %v4514_v9  ;;  %v4521_v61 = vld [vmem:[%s5439_s26 + $0x110] sm:$0xff]  ;;  %v4522_v55 = vld [vmem:[%s5439_s26 + $0x118] sm:$0xff]  ;;  %v4528_v57 = vld [vmem:[%s5445_s20 + $0x108] sm:$0xff] }
 0x174   : > { %v1887_v21 = vsub.f32 %v4507_v62, %v4515_v5  ;;  %v1888_v35 = vsub.f32 %v4508_v48, %v4516_v11  ;;  %v1889_v17 = vsub.f32 %v4509_v44, %v4517_v26  ;;  %v1890_v23 = vsub.f32 %v4510_v63, %v4518_v27  ;;  %v4523_v62 = vld [vmem:[%s5439_s26 + $0x120] sm:$0xff]  ;;  %v4524_v48 = vld [vmem:[%s5439_s26 + $0x128] sm:$0xff]  ;;  %v4525_v44 = vld [vmem:[%s5439_s26 + $0x130] sm:$0xff] }
 0x175   : > { %v1891_v19 = vand.u32 2147483647, %v1883_v10  ;;  %v6182_v22 = vadd.f32 %v1855_v12, %v6134_v18  ;;  %v1892_v58 = vand.u32 2147483647, %v1884_v6  ;;  %v1893_v24 = vand.u32 2147483647, %v1885_v14 }
 0x176   : > { %v1894_v41 = vand.u32 2147483647, %v1886_v33  ;;  %v6185_v28 = vadd.f32 %v1856_v13, %v6136_v15  ;;  %v1895_v45 = vand.u32 2147483647, %v1887_v21  ;;  %v1896_v25 = vand.u32 2147483647, %v1888_v35 }
 0x177   : > { %v1897_v39 = vand.u32 2147483647, %v1889_v17  ;;  %v1898_v30 = vand.u32 2147483647, %v1890_v23  ;;  %v1900_v54 = vadd.s32 192, %v6029_v34  ;;  %v1901_v20 = vadd.s32 192, %v6031_v36 }
 0x178   : > { %v1902_v18 = vadd.s32 192, %v6033_v37  ;;  %v1903_v43 = vadd.s32 192, %v6035_v42  ;;  %v1904_v50 = vadd.s32 192, %v6040_v46  ;;  %v1905_v15 = vadd.s32 192, %v6042_v51  ;;  %v4526_v63 = vld [vmem:[%s5439_s26 + $0x138] sm:$0xff]  ;;  %v4529_v8 = vld [vmem:[%s5445_s20 + $0x110] sm:$0xff] }
 0x179   : > { %v1906_v56 = vadd.s32 192, %v6044_v40  ;;  %v1907_v59 = vadd.s32 192, %v6050_v47  ;;  %vm1908_vm8 = vcmp.lt.s32.totalorder %v1900_v54, 2592  ;;  %vm1909_vm9 = vcmp.lt.s32.totalorder %v1901_v20, 2592  ;;  %v4530_v9 = vld [vmem:[%s5445_s20 + $0x118] sm:$0xff]  ;;  %v4531_v5 = vld [vmem:[%s5445_s20 + $0x120] sm:$0xff] }
 0x17a   : > { %vm1910_vm10 = vcmp.lt.s32.totalorder %v1902_v18, 2592  ;;  %vm1911_vm11 = vcmp.lt.s32.totalorder %v1903_v43, 2592  ;;  %vm1912_vm12 = vcmp.lt.s32.totalorder %v1904_v50, 2592  ;;  %vm1913_vm13 = vcmp.lt.s32.totalorder %v1905_v15, 2592  ;;  %v4532_v26 = vld [vmem:[%s5445_s20 + $0x128] sm:$0xff]  ;;  %v4533_v27 = vld [vmem:[%s5445_s20 + $0x130] sm:$0xff] }
 0x17b   : > { %vm1914_vm14 = vcmp.lt.s32.totalorder %v1906_v56, 2592  ;;  %vm1915_vm15 = vcmp.lt.s32.totalorder %v1907_v59, 2592  ;;  %v1916_v1 = vsel %vm1908_vm8, %v1891_v19, 0.0  ;;  %v1917_v2 = vsel %vm1909_vm9, %v1892_v58, 0.0  ;;  %v4534_v6 = vld [vmem:[%s5445_s20 + $0x138] sm:$0xff] }
 0x17c   : > { %v1918_v3 = vsel %vm1910_vm10, %v1893_v24, 0.0  ;;  %v1919_v0 = vsel %vm1911_vm11, %v1894_v41, 0.0  ;;  %v1920_v4 = vsel %vm1912_vm12, %v1895_v45, 0.0  ;;  %v1921_v7 = vsel %vm1913_vm13, %v1896_v25, 0.0 }
 0x17d   : > { %v1950_v10 = vsub.f32 %v4519_v52, %v4527_v60  ;;  %v1922_v12 = vsel %vm1914_vm14, %v1897_v39, 0.0  ;;  %v1923_v13 = vsel %vm1915_vm15, %v1898_v30, 0.0  ;;  %v6210_v11 = vadd.f32 %v1916_v1, %v6161_v49  ;;  %v4535_v52 = vld [vmem:[%s5439_s26 + $0x140] sm:$0xff] }
 0x17e   : > { %v1951_v14 = vsub.f32 %v4520_v38, %v4528_v57  ;;  %v6216_v33 = vadd.f32 %v1917_v2, %v6167_v29  ;;  %v6219_v21 = vadd.f32 %v1918_v3, %v6170_v53  ;;  %v6222_v35 = vadd.f32 %v1919_v0, %v6173_v31  ;;  %v4536_v38 = vld [vmem:[%s5439_s26 + $0x148] sm:$0xff]  ;;  %v4543_v60 = vld [vmem:[%s5445_s20 + $0x140] sm:$0xff] }
 0x17f   : > { %v6225_v17 = vadd.f32 %v1920_v4, %v6176_v16  ;;  %v6228_v23 = vadd.f32 %v1921_v7, %v6179_v32  ;;  %v1952_v49 = vsub.f32 %v4521_v61, %v4529_v8  ;;  %v1953_v19 = vsub.f32 %v4522_v55, %v4530_v9  ;;  %v4537_v61 = vld [vmem:[%s5439_s26 + $0x150] sm:$0xff]  ;;  %v4538_v55 = vld [vmem:[%s5439_s26 + $0x158] sm:$0xff]  ;;  %v4544_v57 = vld [vmem:[%s5445_s20 + $0x148] sm:$0xff] }
 0x180   : > { %v1954_v58 = vsub.f32 %v4523_v62, %v4531_v5  ;;  %v1955_v24 = vsub.f32 %v4524_v48, %v4532_v26  ;;  %v1956_v41 = vsub.f32 %v4525_v44, %v4533_v27  ;;  %v1957_v45 = vsub.f32 %v4526_v63, %v4534_v6  ;;  %v4539_v62 = vld [vmem:[%s5439_s26 + $0x160] sm:$0xff]  ;;  %v4540_v48 = vld [vmem:[%s5439_s26 + $0x168] sm:$0xff]  ;;  %v4541_v44 = vld [vmem:[%s5439_s26 + $0x170] sm:$0xff] }
 0x181   : > { %v1958_v29 = vand.u32 2147483647, %v1950_v10  ;;  %v6231_v25 = vadd.f32 %v1922_v12, %v6182_v22  ;;  %v1959_v53 = vand.u32 2147483647, %v1951_v14  ;;  %v1960_v31 = vand.u32 2147483647, %v1952_v49 }
 0x182   : > { %v1961_v39 = vand.u32 2147483647, %v1953_v19  ;;  %v6234_v16 = vadd.f32 %v1923_v13, %v6185_v28  ;;  %v1962_v30 = vand.u32 2147483647, %v1954_v58  ;;  %v1963_v32 = vand.u32 2147483647, %v1955_v24 }
 0x183   : > { %v1964_v54 = vand.u32 2147483647, %v1956_v41  ;;  %v1965_v20 = vand.u32 2147483647, %v1957_v45  ;;  %v1967_v18 = vadd.s32 256, %v6029_v34  ;;  %v1968_v43 = vadd.s32 256, %v6031_v36 }
 0x184   : > { %v1969_v22 = vadd.s32 256, %v6033_v37  ;;  %v1970_v50 = vadd.s32 256, %v6035_v42  ;;  %v1971_v15 = vadd.s32 256, %v6040_v46  ;;  %v1972_v28 = vadd.s32 256, %v6042_v51  ;;  %v4542_v63 = vld [vmem:[%s5439_s26 + $0x178] sm:$0xff]  ;;  %v4545_v8 = vld [vmem:[%s5445_s20 + $0x150] sm:$0xff] }
 0x185   : > { %v1973_v56 = vadd.s32 256, %v6044_v40  ;;  %v1974_v59 = vadd.s32 256, %v6050_v47  ;;  %vm1975_vm0 = vcmp.lt.s32.totalorder %v1967_v18, 2592  ;;  %vm1976_vm1 = vcmp.lt.s32.totalorder %v1968_v43, 2592  ;;  %v4546_v9 = vld [vmem:[%s5445_s20 + $0x158] sm:$0xff]  ;;  %v4547_v5 = vld [vmem:[%s5445_s20 + $0x160] sm:$0xff] }
 0x186   : > { %vm1977_vm2 = vcmp.lt.s32.totalorder %v1969_v22, 2592  ;;  %vm1978_vm3 = vcmp.lt.s32.totalorder %v1970_v50, 2592  ;;  %vm1979_vm4 = vcmp.lt.s32.totalorder %v1971_v15, 2592  ;;  %vm1980_vm5 = vcmp.lt.s32.totalorder %v1972_v28, 2592  ;;  %v4548_v27 = vld [vmem:[%s5445_s20 + $0x168] sm:$0xff]  ;;  %v4549_v6 = vld [vmem:[%s5445_s20 + $0x170] sm:$0xff] }
 0x187   : > { %vm1981_vm6 = vcmp.lt.s32.totalorder %v1973_v56, 2592  ;;  %vm1982_vm7 = vcmp.lt.s32.totalorder %v1974_v59, 2592  ;;  %v1983_v1 = vsel %vm1975_vm0, %v1958_v29, 0.0  ;;  %v1984_v2 = vsel %vm1976_vm1, %v1959_v53, 0.0  ;;  %v4550_v14 = vld [vmem:[%s5445_s20 + $0x178] sm:$0xff] }
 0x188   : > { %v1985_v3 = vsel %vm1977_vm2, %v1960_v31, 0.0  ;;  %v1986_v0 = vsel %vm1978_vm3, %v1961_v39, 0.0  ;;  %v1987_v4 = vsel %vm1979_vm4, %v1962_v30, 0.0  ;;  %v1988_v7 = vsel %vm1980_vm5, %v1963_v32, 0.0 }
 0x189   : > { %v2017_v10 = vsub.f32 %v4535_v52, %v4543_v60  ;;  %v1989_v12 = vsel %vm1981_vm6, %v1964_v54, 0.0  ;;  %v1990_v13 = vsel %vm1982_vm7, %v1965_v20, 0.0  ;;  %v6259_v26 = vadd.f32 %v1983_v1, %v6210_v11  ;;  %v4551_v52 = vld [vmem:[%s5439_s26 + $0x180] sm:$0xff] }
 0x18a   : > { %v2018_v49 = vsub.f32 %v4536_v38, %v4544_v57  ;;  %v6265_v19 = vadd.f32 %v1984_v2, %v6216_v33  ;;  %v6268_v58 = vadd.f32 %v1985_v3, %v6219_v21  ;;  %v6271_v24 = vadd.f32 %v1986_v0, %v6222_v35  ;;  %v4552_v38 = vld [vmem:[%s5439_s26 + $0x188] sm:$0xff]  ;;  %v4559_v60 = vld [vmem:[%s5445_s20 + $0x180] sm:$0xff] }
 0x18b   : > { %v6274_v41 = vadd.f32 %v1987_v4, %v6225_v17  ;;  %v6277_v45 = vadd.f32 %v1988_v7, %v6228_v23  ;;  %v2019_v11 = vsub.f32 %v4537_v61, %v4545_v8  ;;  %v2020_v29 = vsub.f32 %v4538_v55, %v4546_v9  ;;  %v4553_v61 = vld [vmem:[%s5439_s26 + $0x190] sm:$0xff]  ;;  %v4554_v55 = vld [vmem:[%s5439_s26 + $0x198] sm:$0xff]  ;;  %v4560_v57 = vld [vmem:[%s5445_s20 + $0x188] sm:$0xff] }
 0x18c   : > { %v2021_v53 = vsub.f32 %v4539_v62, %v4547_v5  ;;  %v2022_v31 = vsub.f32 %v4540_v48, %v4548_v27  ;;  %v2023_v39 = vsub.f32 %v4541_v44, %v4549_v6  ;;  %v2024_v30 = vsub.f32 %v4542_v63, %v4550_v14  ;;  %v4555_v62 = vld [vmem:[%s5439_s26 + $0x1a0] sm:$0xff]  ;;  %v4556_v48 = vld [vmem:[%s5439_s26 + $0x1a8] sm:$0xff]  ;;  %v4557_v44 = vld [vmem:[%s5439_s26 + $0x1b0] sm:$0xff] }
 0x18d   : > { %v2025_v33 = vand.u32 2147483647, %v2017_v10  ;;  %v6280_v32 = vadd.f32 %v1989_v12, %v6231_v25  ;;  %v2026_v21 = vand.u32 2147483647, %v2018_v49  ;;  %v2027_v35 = vand.u32 2147483647, %v2019_v11 }
 0x18e   : > { %v2028_v54 = vand.u32 2147483647, %v2020_v29  ;;  %v6283_v17 = vadd.f32 %v1990_v13, %v6234_v16  ;;  %v2029_v20 = vand.u32 2147483647, %v2021_v53  ;;  %v2030_v23 = vand.u32 2147483647, %v2022_v31 }
 0x18f   : > { %v2031_v18 = vand.u32 2147483647, %v2023_v39  ;;  %v2032_v43 = vand.u32 2147483647, %v2024_v30  ;;  %v2034_v22 = vadd.s32 320, %v6029_v34  ;;  %v2035_v50 = vadd.s32 320, %v6031_v36 }
 0x190   : > { %v2036_v25 = vadd.s32 320, %v6033_v37  ;;  %v2037_v15 = vadd.s32 320, %v6035_v42  ;;  %v2038_v28 = vadd.s32 320, %v6040_v46  ;;  %v2039_v16 = vadd.s32 320, %v6042_v51  ;;  %v4558_v63 = vld [vmem:[%s5439_s26 + $0x1b8] sm:$0xff]  ;;  %v4561_v8 = vld [vmem:[%s5445_s20 + $0x190] sm:$0xff] }
 0x191   : > { %v2040_v56 = vadd.s32 320, %v6044_v40  ;;  %v2041_v59 = vadd.s32 320, %v6050_v47  ;;  %vm2042_vm8 = vcmp.lt.s32.totalorder %v2034_v22, 2592  ;;  %vm2043_vm9 = vcmp.lt.s32.totalorder %v2035_v50, 2592  ;;  %v4562_v9 = vld [vmem:[%s5445_s20 + $0x198] sm:$0xff]  ;;  %v4563_v5 = vld [vmem:[%s5445_s20 + $0x1a0] sm:$0xff] }
 0x192   : > { %vm2044_vm10 = vcmp.lt.s32.totalorder %v2036_v25, 2592  ;;  %vm2045_vm11 = vcmp.lt.s32.totalorder %v2037_v15, 2592  ;;  %vm2046_vm12 = vcmp.lt.s32.totalorder %v2038_v28, 2592  ;;  %vm2047_vm13 = vcmp.lt.s32.totalorder %v2039_v16, 2592  ;;  %v4564_v6 = vld [vmem:[%s5445_s20 + $0x1a8] sm:$0xff]  ;;  %v4565_v14 = vld [vmem:[%s5445_s20 + $0x1b0] sm:$0xff] }
 0x193   : > { %vm2048_vm14 = vcmp.lt.s32.totalorder %v2040_v56, 2592  ;;  %vm2049_vm15 = vcmp.lt.s32.totalorder %v2041_v59, 2592  ;;  %v2050_v1 = vsel %vm2042_vm8, %v2025_v33, 0.0  ;;  %v2051_v2 = vsel %vm2043_vm9, %v2026_v21, 0.0  ;;  %v4566_v49 = vld [vmem:[%s5445_s20 + $0x1b8] sm:$0xff] }
 0x194   : > { %v2052_v3 = vsel %vm2044_vm10, %v2027_v35, 0.0  ;;  %v2053_v0 = vsel %vm2045_vm11, %v2028_v54, 0.0  ;;  %v2054_v4 = vsel %vm2046_vm12, %v2029_v20, 0.0  ;;  %v2055_v7 = vsel %vm2047_vm13, %v2030_v23, 0.0 }
 0x195   : > { %v2084_v10 = vsub.f32 %v4551_v52, %v4559_v60  ;;  %v2056_v12 = vsel %vm2048_vm14, %v2031_v18, 0.0  ;;  %v2057_v13 = vsel %vm2049_vm15, %v2032_v43, 0.0  ;;  %v6308_v27 = vadd.f32 %v2050_v1, %v6259_v26  ;;  %v4567_v52 = vld [vmem:[%s5439_s26 + $0x1c0] sm:$0xff] }
 0x196   : > { %v2085_v11 = vsub.f32 %v4552_v38, %v4560_v57  ;;  %v6314_v29 = vadd.f32 %v2051_v2, %v6265_v19  ;;  %v6317_v53 = vadd.f32 %v2052_v3, %v6268_v58  ;;  %v6320_v31 = vadd.f32 %v2053_v0, %v6271_v24  ;;  %v4568_v38 = vld [vmem:[%s5439_s26 + $0x1c8] sm:$0xff]  ;;  %v4575_v60 = vld [vmem:[%s5445_s20 + $0x1c0] sm:$0xff] }
 0x197   : > { %v6323_v39 = vadd.f32 %v2054_v4, %v6274_v41  ;;  %v6326_v30 = vadd.f32 %v2055_v7, %v6277_v45  ;;  %v2086_v26 = vsub.f32 %v4553_v61, %v4561_v8  ;;  %v2087_v33 = vsub.f32 %v4554_v55, %v4562_v9  ;;  %v4569_v61 = vld [vmem:[%s5439_s26 + $0x1d0] sm:$0xff]  ;;  %v4570_v55 = vld [vmem:[%s5439_s26 + $0x1d8] sm:$0xff]  ;;  %v4576_v57 = vld [vmem:[%s5445_s20 + $0x1c8] sm:$0xff] }
 0x198   : > { %v2088_v21 = vsub.f32 %v4555_v62, %v4563_v5  ;;  %v2089_v35 = vsub.f32 %v4556_v48, %v4564_v6  ;;  %v2090_v54 = vsub.f32 %v4557_v44, %v4565_v14  ;;  %v2091_v20 = vsub.f32 %v4558_v63, %v4566_v49  ;;  %v4571_v62 = vld [vmem:[%s5439_s26 + $0x1e0] sm:$0xff]  ;;  %v4572_v48 = vld [vmem:[%s5439_s26 + $0x1e8] sm:$0xff]  ;;  %v4573_v44 = vld [vmem:[%s5439_s26 + $0x1f0] sm:$0xff] }
 0x199   : > { %v2092_v19 = vand.u32 2147483647, %v2084_v10  ;;  %v6329_v23 = vadd.f32 %v2056_v12, %v6280_v32  ;;  %v2093_v58 = vand.u32 2147483647, %v2085_v11  ;;  %v2094_v24 = vand.u32 2147483647, %v2086_v26 }
 0x19a   : > { %v2095_v18 = vand.u32 2147483647, %v2087_v33  ;;  %v6332_v41 = vadd.f32 %v2057_v13, %v6283_v17  ;;  %v2096_v43 = vand.u32 2147483647, %v2088_v21  ;;  %v2097_v45 = vand.u32 2147483647, %v2089_v35 }
 0x19b   : > { %v2098_v22 = vand.u32 2147483647, %v2090_v54  ;;  %v2099_v50 = vand.u32 2147483647, %v2091_v20  ;;  %v2101_v25 = vadd.s32 384, %v6029_v34  ;;  %v2102_v15 = vadd.s32 384, %v6031_v36 }
 0x19c   : > { %v2103_v32 = vadd.s32 384, %v6033_v37  ;;  %v2104_v28 = vadd.s32 384, %v6035_v42  ;;  %v2105_v16 = vadd.s32 384, %v6040_v46  ;;  %v2106_v17 = vadd.s32 384, %v6042_v51  ;;  %v4574_v63 = vld [vmem:[%s5439_s26 + $0x1f8] sm:$0xff]  ;;  %v4577_v8 = vld [vmem:[%s5445_s20 + $0x1d0] sm:$0xff] }
 0x19d   : > { %v2107_v56 = vadd.s32 384, %v6044_v40  ;;  %v2108_v59 = vadd.s32 384, %v6050_v47  ;;  %vm2109_vm0 = vcmp.lt.s32.totalorder %v2101_v25, 2592  ;;  %vm2110_vm1 = vcmp.lt.s32.totalorder %v2102_v15, 2592  ;;  %v4578_v9 = vld [vmem:[%s5445_s20 + $0x1d8] sm:$0xff]  ;;  %v4579_v5 = vld [vmem:[%s5445_s20 + $0x1e0] sm:$0xff] }
 0x19e   : > { %vm2111_vm2 = vcmp.lt.s32.totalorder %v2103_v32, 2592  ;;  %vm2112_vm3 = vcmp.lt.s32.totalorder %v2104_v28, 2592  ;;  %vm2113_vm4 = vcmp.lt.s32.totalorder %v2105_v16, 2592  ;;  %vm2114_vm5 = vcmp.lt.s32.totalorder %v2106_v17, 2592  ;;  %v4580_v14 = vld [vmem:[%s5445_s20 + $0x1e8] sm:$0xff]  ;;  %v4581_v49 = vld [vmem:[%s5445_s20 + $0x1f0] sm:$0xff] }
 0x19f   : > { %vm2115_vm6 = vcmp.lt.s32.totalorder %v2107_v56, 2592  ;;  %vm2116_vm7 = vcmp.lt.s32.totalorder %v2108_v59, 2592  ;;  %v2117_v1 = vsel %vm2109_vm0, %v2092_v19, 0.0  ;;  %v2118_v2 = vsel %vm2110_vm1, %v2093_v58, 0.0  ;;  %v4582_v11 = vld [vmem:[%s5445_s20 + $0x1f8] sm:$0xff] }
 0x1a0   : > { %v2119_v3 = vsel %vm2111_vm2, %v2094_v24, 0.0  ;;  %v2120_v0 = vsel %vm2112_vm3, %v2095_v18, 0.0  ;;  %v2121_v4 = vsel %vm2113_vm4, %v2096_v43, 0.0  ;;  %v2122_v7 = vsel %vm2114_vm5, %v2097_v45, 0.0 }
 0x1a1   : > { %v2151_v10 = vsub.f32 %v4567_v52, %v4575_v60  ;;  %v2123_v12 = vsel %vm2115_vm6, %v2098_v22, 0.0  ;;  %v2124_v13 = vsel %vm2116_vm7, %v2099_v50, 0.0  ;;  %v6357_v6 = vadd.f32 %v2117_v1, %v6308_v27  ;;  %v4583_v52 = vld [vmem:[%s5439_s26 + $0x200] sm:$0xff] }
 0x1a2   : > { %v2152_v26 = vsub.f32 %v4568_v38, %v4576_v57  ;;  %v6363_v33 = vadd.f32 %v2118_v2, %v6314_v29  ;;  %v6366_v21 = vadd.f32 %v2119_v3, %v6317_v53  ;;  %v6369_v35 = vadd.f32 %v2120_v0, %v6320_v31  ;;  %v4584_v38 = vld [vmem:[%s5439_s26 + $0x208] sm:$0xff]  ;;  %v4591_v60 = vld [vmem:[%s5445_s20 + $0x200] sm:$0xff] }
 0x1a3   : > { %v6372_v54 = vadd.f32 %v2121_v4, %v6323_v39  ;;  %v6375_v20 = vadd.f32 %v2122_v7, %v6326_v30  ;;  %v2153_v27 = vsub.f32 %v4569_v61, %v4577_v8  ;;  %v2154_v19 = vsub.f32 %v4570_v55, %v4578_v9  ;;  %v4585_v61 = vld [vmem:[%s5439_s26 + $0x210] sm:$0xff]  ;;  %v4586_v55 = vld [vmem:[%s5439_s26 + $0x218] sm:$0xff]  ;;  %v4592_v57 = vld [vmem:[%s5445_s20 + $0x208] sm:$0xff] }
 0x1a4   : > { %v2155_v58 = vsub.f32 %v4571_v62, %v4579_v5  ;;  %v2156_v24 = vsub.f32 %v4572_v48, %v4580_v14  ;;  %v2157_v18 = vsub.f32 %v4573_v44, %v4581_v49  ;;  %v2158_v43 = vsub.f32 %v4574_v63, %v4582_v11  ;;  %v4587_v62 = vld [vmem:[%s5439_s26 + $0x220] sm:$0xff]  ;;  %v4588_v48 = vld [vmem:[%s5439_s26 + $0x228] sm:$0xff]  ;;  %v4589_v44 = vld [vmem:[%s5439_s26 + $0x230] sm:$0xff] }
 0x1a5   : > { %v2159_v29 = vand.u32 2147483647, %v2151_v10  ;;  %v6378_v45 = vadd.f32 %v2123_v12, %v6329_v23  ;;  %v2160_v53 = vand.u32 2147483647, %v2152_v26  ;;  %v2161_v31 = vand.u32 2147483647, %v2153_v27 }
 0x1a6   : > { %v2162_v22 = vand.u32 2147483647, %v2154_v19  ;;  %v6381_v39 = vadd.f32 %v2124_v13, %v6332_v41  ;;  %v2163_v50 = vand.u32 2147483647, %v2155_v58  ;;  %v2164_v30 = vand.u32 2147483647, %v2156_v24 }
 0x1a7   : > { %v2165_v25 = vand.u32 2147483647, %v2157_v18  ;;  %v2166_v15 = vand.u32 2147483647, %v2158_v43  ;;  %v2168_v32 = vadd.s32 448, %v6029_v34  ;;  %v2169_v28 = vadd.s32 448, %v6031_v36 }
 0x1a8   : > { %v2170_v23 = vadd.s32 448, %v6033_v37  ;;  %v2171_v16 = vadd.s32 448, %v6035_v42  ;;  %v2172_v17 = vadd.s32 448, %v6040_v46  ;;  %v2173_v41 = vadd.s32 448, %v6042_v51  ;;  %v4590_v63 = vld [vmem:[%s5439_s26 + $0x238] sm:$0xff]  ;;  %v4593_v8 = vld [vmem:[%s5445_s20 + $0x210] sm:$0xff] }
 0x1a9   : > { %v2174_v56 = vadd.s32 448, %v6044_v40  ;;  %v2175_v59 = vadd.s32 448, %v6050_v47  ;;  %vm2176_vm8 = vcmp.lt.s32.totalorder %v2168_v32, 2592  ;;  %vm2177_vm9 = vcmp.lt.s32.totalorder %v2169_v28, 2592  ;;  %v4594_v9 = vld [vmem:[%s5445_s20 + $0x218] sm:$0xff]  ;;  %v4595_v5 = vld [vmem:[%s5445_s20 + $0x220] sm:$0xff] }
 0x1aa   : > { %vm2178_vm10 = vcmp.lt.s32.totalorder %v2170_v23, 2592  ;;  %vm2179_vm11 = vcmp.lt.s32.totalorder %v2171_v16, 2592  ;;  %vm2180_vm12 = vcmp.lt.s32.totalorder %v2172_v17, 2592  ;;  %vm2181_vm13 = vcmp.lt.s32.totalorder %v2173_v41, 2592  ;;  %v4596_v49 = vld [vmem:[%s5445_s20 + $0x228] sm:$0xff]  ;;  %v4597_v11 = vld [vmem:[%s5445_s20 + $0x230] sm:$0xff] }
 0x1ab   : > { %vm2182_vm14 = vcmp.lt.s32.totalorder %v2174_v56, 2592  ;;  %vm2183_vm15 = vcmp.lt.s32.totalorder %v2175_v59, 2592  ;;  %v2184_v1 = vsel %vm2176_vm8, %v2159_v29, 0.0  ;;  %v2185_v2 = vsel %vm2177_vm9, %v2160_v53, 0.0  ;;  %v4598_v26 = vld [vmem:[%s5445_s20 + $0x238] sm:$0xff] }
 0x1ac   : > { %v2186_v3 = vsel %vm2178_vm10, %v2161_v31, 0.0  ;;  %v2187_v0 = vsel %vm2179_vm11, %v2162_v22, 0.0  ;;  %v2188_v4 = vsel %vm2180_vm12, %v2163_v50, 0.0  ;;  %v2189_v7 = vsel %vm2181_vm13, %v2164_v30, 0.0 }
 0x1ad   : > { %v2218_v10 = vsub.f32 %v4583_v52, %v4591_v60  ;;  %v2190_v12 = vsel %vm2182_vm14, %v2165_v25, 0.0  ;;  %v2191_v13 = vsel %vm2183_vm15, %v2166_v15, 0.0  ;;  %v6406_v14 = vadd.f32 %v2184_v1, %v6357_v6  ;;  %v4599_v52 = vld [vmem:[%s5439_s26 + $0x240] sm:$0xff] }
 0x1ae   : > { %v2219_v27 = vsub.f32 %v4584_v38, %v4592_v57  ;;  %v6412_v19 = vadd.f32 %v2185_v2, %v6363_v33  ;;  %v6415_v58 = vadd.f32 %v2186_v3, %v6366_v21  ;;  %v6418_v24 = vadd.f32 %v2187_v0, %v6369_v35  ;;  %v4600_v38 = vld [vmem:[%s5439_s26 + $0x248] sm:$0xff]  ;;  %v4607_v60 = vld [vmem:[%s5445_s20 + $0x240] sm:$0xff] }
 0x1af   : > { %v6421_v18 = vadd.f32 %v2188_v4, %v6372_v54  ;;  %v6424_v43 = vadd.f32 %v2189_v7, %v6375_v20  ;;  %v2220_v6 = vsub.f32 %v4585_v61, %v4593_v8  ;;  %v2221_v29 = vsub.f32 %v4586_v55, %v4594_v9  ;;  %v4601_v61 = vld [vmem:[%s5439_s26 + $0x250] sm:$0xff]  ;;  %v4602_v55 = vld [vmem:[%s5439_s26 + $0x258] sm:$0xff]  ;;  %v4608_v57 = vld [vmem:[%s5445_s20 + $0x248] sm:$0xff] }
 0x1b0   : > { %v2222_v53 = vsub.f32 %v4587_v62, %v4595_v5  ;;  %v2223_v31 = vsub.f32 %v4588_v48, %v4596_v49  ;;  %v2224_v22 = vsub.f32 %v4589_v44, %v4597_v11  ;;  %v2225_v50 = vsub.f32 %v4590_v63, %v4598_v26  ;;  %v4603_v62 = vld [vmem:[%s5439_s26 + $0x260] sm:$0xff]  ;;  %v4604_v48 = vld [vmem:[%s5439_s26 + $0x268] sm:$0xff]  ;;  %v4605_v44 = vld [vmem:[%s5439_s26 + $0x270] sm:$0xff] }
 0x1b1   : > { %v2226_v33 = vand.u32 2147483647, %v2218_v10  ;;  %v6427_v30 = vadd.f32 %v2190_v12, %v6378_v45  ;;  %v2227_v21 = vand.u32 2147483647, %v2219_v27  ;;  %v2228_v35 = vand.u32 2147483647, %v2220_v6 }
 0x1b2   : > { %v2229_v25 = vand.u32 2147483647, %v2221_v29  ;;  %v6430_v54 = vadd.f32 %v2191_v13, %v6381_v39  ;;  %v2230_v15 = vand.u32 2147483647, %v2222_v53  ;;  %v2231_v20 = vand.u32 2147483647, %v2223_v31 }
 0x1b3   : > { %v2232_v32 = vand.u32 2147483647, %v2224_v22  ;;  %v2233_v28 = vand.u32 2147483647, %v2225_v50  ;;  %v2235_v23 = vadd.s32 512, %v6029_v34  ;;  %v2236_v16 = vadd.s32 512, %v6031_v36 }
 0x1b4   : > { %v2237_v45 = vadd.s32 512, %v6033_v37  ;;  %v2238_v17 = vadd.s32 512, %v6035_v42  ;;  %v2239_v41 = vadd.s32 512, %v6040_v46  ;;  %v2240_v39 = vadd.s32 512, %v6042_v51  ;;  %v4606_v63 = vld [vmem:[%s5439_s26 + $0x278] sm:$0xff]  ;;  %v4609_v8 = vld [vmem:[%s5445_s20 + $0x250] sm:$0xff] }
 0x1b5   : > { %v2241_v56 = vadd.s32 512, %v6044_v40  ;;  %v2242_v59 = vadd.s32 512, %v6050_v47  ;;  %vm2243_vm0 = vcmp.lt.s32.totalorder %v2235_v23, 2592  ;;  %vm2244_vm1 = vcmp.lt.s32.totalorder %v2236_v16, 2592  ;;  %v4610_v9 = vld [vmem:[%s5445_s20 + $0x258] sm:$0xff]  ;;  %v4611_v5 = vld [vmem:[%s5445_s20 + $0x260] sm:$0xff] }
 0x1b6   : > { %vm2245_vm2 = vcmp.lt.s32.totalorder %v2237_v45, 2592  ;;  %vm2246_vm3 = vcmp.lt.s32.totalorder %v2238_v17, 2592  ;;  %vm2247_vm4 = vcmp.lt.s32.totalorder %v2239_v41, 2592  ;;  %vm2248_vm5 = vcmp.lt.s32.totalorder %v2240_v39, 2592  ;;  %v4612_v11 = vld [vmem:[%s5445_s20 + $0x268] sm:$0xff]  ;;  %v4613_v26 = vld [vmem:[%s5445_s20 + $0x270] sm:$0xff] }
 0x1b7   : > { %vm2249_vm6 = vcmp.lt.s32.totalorder %v2241_v56, 2592  ;;  %vm2250_vm7 = vcmp.lt.s32.totalorder %v2242_v59, 2592  ;;  %v2251_v1 = vsel %vm2243_vm0, %v2226_v33, 0.0  ;;  %v2252_v2 = vsel %vm2244_vm1, %v2227_v21, 0.0  ;;  %v4614_v27 = vld [vmem:[%s5445_s20 + $0x278] sm:$0xff] }
 0x1b8   : > { %v2253_v3 = vsel %vm2245_vm2, %v2228_v35, 0.0  ;;  %v2254_v0 = vsel %vm2246_vm3, %v2229_v25, 0.0  ;;  %v2255_v4 = vsel %vm2247_vm4, %v2230_v15, 0.0  ;;  %v2256_v7 = vsel %vm2248_vm5, %v2231_v20, 0.0 }
 0x1b9   : > { %v2285_v10 = vsub.f32 %v4599_v52, %v4607_v60  ;;  %v2257_v12 = vsel %vm2249_vm6, %v2232_v32, 0.0  ;;  %v2258_v13 = vsel %vm2250_vm7, %v2233_v28, 0.0  ;;  %v6455_v49 = vadd.f32 %v2251_v1, %v6406_v14  ;;  %v4615_v52 = vld [vmem:[%s5439_s26 + $0x280] sm:$0xff] }
 0x1ba   : > { %v2286_v6 = vsub.f32 %v4600_v38, %v4608_v57  ;;  %v6461_v29 = vadd.f32 %v2252_v2, %v6412_v19  ;;  %v6464_v53 = vadd.f32 %v2253_v3, %v6415_v58  ;;  %v6467_v31 = vadd.f32 %v2254_v0, %v6418_v24  ;;  %v4616_v38 = vld [vmem:[%s5439_s26 + $0x288] sm:$0xff]  ;;  %v4623_v60 = vld [vmem:[%s5445_s20 + $0x280] sm:$0xff] }
 0x1bb   : > { %v6470_v22 = vadd.f32 %v2255_v4, %v6421_v18  ;;  %v6473_v50 = vadd.f32 %v2256_v7, %v6424_v43  ;;  %v2287_v14 = vsub.f32 %v4601_v61, %v4609_v8  ;;  %v2288_v33 = vsub.f32 %v4602_v55, %v4610_v9  ;;  %v4617_v61 = vld [vmem:[%s5439_s26 + $0x290] sm:$0xff]  ;;  %v4618_v55 = vld [vmem:[%s5439_s26 + $0x298] sm:$0xff]  ;;  %v4624_v57 = vld [vmem:[%s5445_s20 + $0x288] sm:$0xff] }
 0x1bc   : > { %v2289_v21 = vsub.f32 %v4603_v62, %v4611_v5  ;;  %v2290_v35 = vsub.f32 %v4604_v48, %v4612_v11  ;;  %v2291_v25 = vsub.f32 %v4605_v44, %v4613_v26  ;;  %v2292_v15 = vsub.f32 %v4606_v63, %v4614_v27  ;;  %v4619_v62 = vld [vmem:[%s5439_s26 + $0x2a0] sm:$0xff]  ;;  %v4620_v48 = vld [vmem:[%s5439_s26 + $0x2a8] sm:$0xff]  ;;  %v4621_v44 = vld [vmem:[%s5439_s26 + $0x2b0] sm:$0xff] }
 0x1bd   : > { %v2293_v19 = vand.u32 2147483647, %v2285_v10  ;;  %v6476_v20 = vadd.f32 %v2257_v12, %v6427_v30  ;;  %v2294_v58 = vand.u32 2147483647, %v2286_v6  ;;  %v2295_v24 = vand.u32 2147483647, %v2287_v14 }
 0x1be   : > { %v2296_v32 = vand.u32 2147483647, %v2288_v33  ;;  %v6479_v18 = vadd.f32 %v2258_v13, %v6430_v54  ;;  %v2297_v28 = vand.u32 2147483647, %v2289_v21  ;;  %v2298_v43 = vand.u32 2147483647, %v2290_v35 }
 0x1bf   : > { %v2299_v23 = vand.u32 2147483647, %v2291_v25  ;;  %v2300_v16 = vand.u32 2147483647, %v2292_v15  ;;  %v2302_v45 = vadd.s32 576, %v6029_v34  ;;  %v2303_v17 = vadd.s32 576, %v6031_v36 }
 0x1c0   : > { %v2304_v30 = vadd.s32 576, %v6033_v37  ;;  %v2305_v41 = vadd.s32 576, %v6035_v42  ;;  %v2306_v39 = vadd.s32 576, %v6040_v46  ;;  %v2307_v54 = vadd.s32 576, %v6042_v51  ;;  %v4622_v63 = vld [vmem:[%s5439_s26 + $0x2b8] sm:$0xff]  ;;  %v4625_v8 = vld [vmem:[%s5445_s20 + $0x290] sm:$0xff] }
 0x1c1   : > { %v2308_v56 = vadd.s32 576, %v6044_v40  ;;  %v2309_v59 = vadd.s32 576, %v6050_v47  ;;  %vm2310_vm8 = vcmp.lt.s32.totalorder %v2302_v45, 2592  ;;  %vm2311_vm9 = vcmp.lt.s32.totalorder %v2303_v17, 2592  ;;  %v4626_v9 = vld [vmem:[%s5445_s20 + $0x298] sm:$0xff]  ;;  %v4627_v5 = vld [vmem:[%s5445_s20 + $0x2a0] sm:$0xff] }
 0x1c2   : > { %vm2312_vm10 = vcmp.lt.s32.totalorder %v2304_v30, 2592  ;;  %vm2313_vm11 = vcmp.lt.s32.totalorder %v2305_v41, 2592  ;;  %vm2314_vm12 = vcmp.lt.s32.totalorder %v2306_v39, 2592  ;;  %vm2315_vm13 = vcmp.lt.s32.totalorder %v2307_v54, 2592  ;;  %v4628_v26 = vld [vmem:[%s5445_s20 + $0x2a8] sm:$0xff]  ;;  %v4629_v27 = vld [vmem:[%s5445_s20 + $0x2b0] sm:$0xff] }
 0x1c3   : > { %vm2316_vm14 = vcmp.lt.s32.totalorder %v2308_v56, 2592  ;;  %vm2317_vm15 = vcmp.lt.s32.totalorder %v2309_v59, 2592  ;;  %v2318_v1 = vsel %vm2310_vm8, %v2293_v19, 0.0  ;;  %v2319_v2 = vsel %vm2311_vm9, %v2294_v58, 0.0  ;;  %v4630_v6 = vld [vmem:[%s5445_s20 + $0x2b8] sm:$0xff] }
 0x1c4   : > { %v2320_v3 = vsel %vm2312_vm10, %v2295_v24, 0.0  ;;  %v2321_v0 = vsel %vm2313_vm11, %v2296_v32, 0.0  ;;  %v2322_v4 = vsel %vm2314_vm12, %v2297_v28, 0.0  ;;  %v2323_v7 = vsel %vm2315_vm13, %v2298_v43, 0.0 }
 0x1c5   : > { %v2352_v10 = vsub.f32 %v4615_v52, %v4623_v60  ;;  %v2324_v12 = vsel %vm2316_vm14, %v2299_v23, 0.0  ;;  %v2325_v13 = vsel %vm2317_vm15, %v2300_v16, 0.0  ;;  %v6504_v11 = vadd.f32 %v2318_v1, %v6455_v49  ;;  %v4631_v52 = vld [vmem:[%s5439_s26 + $0x2c0] sm:$0xff] }
 0x1c6   : > { %v2353_v14 = vsub.f32 %v4616_v38, %v4624_v57  ;;  %v6510_v33 = vadd.f32 %v2319_v2, %v6461_v29  ;;  %v6513_v21 = vadd.f32 %v2320_v3, %v6464_v53  ;;  %v6516_v35 = vadd.f32 %v2321_v0, %v6467_v31  ;;  %v4632_v38 = vld [vmem:[%s5439_s26 + $0x2c8] sm:$0xff]  ;;  %v4639_v60 = vld [vmem:[%s5445_s20 + $0x2c0] sm:$0xff] }
 0x1c7   : > { %v6519_v25 = vadd.f32 %v2322_v4, %v6470_v22  ;;  %v6522_v15 = vadd.f32 %v2323_v7, %v6473_v50  ;;  %v2354_v49 = vsub.f32 %v4617_v61, %v4625_v8  ;;  %v2355_v19 = vsub.f32 %v4618_v55, %v4626_v9  ;;  %v4633_v61 = vld [vmem:[%s5439_s26 + $0x2d0] sm:$0xff]  ;;  %v4634_v55 = vld [vmem:[%s5439_s26 + $0x2d8] sm:$0xff]  ;;  %v4640_v57 = vld [vmem:[%s5445_s20 + $0x2c8] sm:$0xff] }
 0x1c8   : > { %v2356_v58 = vsub.f32 %v4619_v62, %v4627_v5  ;;  %v2357_v24 = vsub.f32 %v4620_v48, %v4628_v26  ;;  %v2358_v32 = vsub.f32 %v4621_v44, %v4629_v27  ;;  %v2359_v28 = vsub.f32 %v4622_v63, %v4630_v6  ;;  %v4635_v62 = vld [vmem:[%s5439_s26 + $0x2e0] sm:$0xff]  ;;  %v4636_v48 = vld [vmem:[%s5439_s26 + $0x2e8] sm:$0xff]  ;;  %v4637_v44 = vld [vmem:[%s5439_s26 + $0x2f0] sm:$0xff] }
 0x1c9   : > { %v2360_v29 = vand.u32 2147483647, %v2352_v10  ;;  %v6525_v43 = vadd.f32 %v2324_v12, %v6476_v20  ;;  %v2361_v53 = vand.u32 2147483647, %v2353_v14  ;;  %v2362_v31 = vand.u32 2147483647, %v2354_v49 }
 0x1ca   : > { %v2363_v23 = vand.u32 2147483647, %v2355_v19  ;;  %v6528_v22 = vadd.f32 %v2325_v13, %v6479_v18  ;;  %v2364_v16 = vand.u32 2147483647, %v2356_v58  ;;  %v2365_v50 = vand.u32 2147483647, %v2357_v24 }
 0x1cb   : > { %v2366_v45 = vand.u32 2147483647, %v2358_v32  ;;  %v2367_v17 = vand.u32 2147483647, %v2359_v28  ;;  %v2369_v30 = vadd.s32 640, %v6029_v34  ;;  %v2370_v41 = vadd.s32 640, %v6031_v36 }
 0x1cc   : > { %v2371_v20 = vadd.s32 640, %v6033_v37  ;;  %v2372_v39 = vadd.s32 640, %v6035_v42  ;;  %v2373_v54 = vadd.s32 640, %v6040_v46  ;;  %v2374_v18 = vadd.s32 640, %v6042_v51  ;;  %v4638_v63 = vld [vmem:[%s5439_s26 + $0x2f8] sm:$0xff]  ;;  %v4641_v8 = vld [vmem:[%s5445_s20 + $0x2d0] sm:$0xff] }
 0x1cd   : > { %v2375_v56 = vadd.s32 640, %v6044_v40  ;;  %v2376_v59 = vadd.s32 640, %v6050_v47  ;;  %vm2377_vm0 = vcmp.lt.s32.totalorder %v2369_v30, 2592  ;;  %vm2378_vm1 = vcmp.lt.s32.totalorder %v2370_v41, 2592  ;;  %v4642_v9 = vld [vmem:[%s5445_s20 + $0x2d8] sm:$0xff]  ;;  %v4643_v5 = vld [vmem:[%s5445_s20 + $0x2e0] sm:$0xff] }
 0x1ce   : > { %vm2379_vm2 = vcmp.lt.s32.totalorder %v2371_v20, 2592  ;;  %vm2380_vm3 = vcmp.lt.s32.totalorder %v2372_v39, 2592  ;;  %vm2381_vm4 = vcmp.lt.s32.totalorder %v2373_v54, 2592  ;;  %vm2382_vm5 = vcmp.lt.s32.totalorder %v2374_v18, 2592  ;;  %v4644_v27 = vld [vmem:[%s5445_s20 + $0x2e8] sm:$0xff]  ;;  %v4645_v6 = vld [vmem:[%s5445_s20 + $0x2f0] sm:$0xff] }
 0x1cf   : > { %vm2383_vm6 = vcmp.lt.s32.totalorder %v2375_v56, 2592  ;;  %vm2384_vm7 = vcmp.lt.s32.totalorder %v2376_v59, 2592  ;;  %v2385_v1 = vsel %vm2377_vm0, %v2360_v29, 0.0  ;;  %v2386_v2 = vsel %vm2378_vm1, %v2361_v53, 0.0  ;;  %v4646_v14 = vld [vmem:[%s5445_s20 + $0x2f8] sm:$0xff] }
 0x1d0   : > { %v2387_v3 = vsel %vm2379_vm2, %v2362_v31, 0.0  ;;  %v2388_v0 = vsel %vm2380_vm3, %v2363_v23, 0.0  ;;  %v2389_v4 = vsel %vm2381_vm4, %v2364_v16, 0.0  ;;  %v2390_v7 = vsel %vm2382_vm5, %v2365_v50, 0.0 }
 0x1d1   : > { %v2419_v10 = vsub.f32 %v4631_v52, %v4639_v60  ;;  %v2391_v12 = vsel %vm2383_vm6, %v2366_v45, 0.0  ;;  %v2392_v13 = vsel %vm2384_vm7, %v2367_v17, 0.0  ;;  %v6553_v26 = vadd.f32 %v2385_v1, %v6504_v11  ;;  %v4647_v52 = vld [vmem:[%s5439_s26 + $0x300] sm:$0xff] }
 0x1d2   : > { %v2420_v49 = vsub.f32 %v4632_v38, %v4640_v57  ;;  %v6559_v19 = vadd.f32 %v2386_v2, %v6510_v33  ;;  %v6562_v58 = vadd.f32 %v2387_v3, %v6513_v21  ;;  %v6565_v24 = vadd.f32 %v2388_v0, %v6516_v35  ;;  %v4648_v38 = vld [vmem:[%s5439_s26 + $0x308] sm:$0xff]  ;;  %v4655_v60 = vld [vmem:[%s5445_s20 + $0x300] sm:$0xff] }
 0x1d3   : > { %v6568_v32 = vadd.f32 %v2389_v4, %v6519_v25  ;;  %v6571_v28 = vadd.f32 %v2390_v7, %v6522_v15  ;;  %v2421_v11 = vsub.f32 %v4633_v61, %v4641_v8  ;;  %v2422_v29 = vsub.f32 %v4634_v55, %v4642_v9  ;;  %v4649_v61 = vld [vmem:[%s5439_s26 + $0x310] sm:$0xff]  ;;  %v4650_v55 = vld [vmem:[%s5439_s26 + $0x318] sm:$0xff]  ;;  %v4656_v57 = vld [vmem:[%s5445_s20 + $0x308] sm:$0xff] }
 0x1d4   : > { %v2423_v53 = vsub.f32 %v4635_v62, %v4643_v5  ;;  %v2424_v31 = vsub.f32 %v4636_v48, %v4644_v27  ;;  %v2425_v23 = vsub.f32 %v4637_v44, %v4645_v6  ;;  %v2426_v16 = vsub.f32 %v4638_v63, %v4646_v14  ;;  %v4651_v62 = vld [vmem:[%s5439_s26 + $0x320] sm:$0xff]  ;;  %v4652_v48 = vld [vmem:[%s5439_s26 + $0x328] sm:$0xff]  ;;  %v4653_v44 = vld [vmem:[%s5439_s26 + $0x330] sm:$0xff] }
 0x1d5   : > { %v2427_v33 = vand.u32 2147483647, %v2419_v10  ;;  %v6574_v50 = vadd.f32 %v2391_v12, %v6525_v43  ;;  %v2428_v21 = vand.u32 2147483647, %v2420_v49  ;;  %v2429_v35 = vand.u32 2147483647, %v2421_v11 }
 0x1d6   : > { %v2430_v45 = vand.u32 2147483647, %v2422_v29  ;;  %v6577_v25 = vadd.f32 %v2392_v13, %v6528_v22  ;;  %v2431_v17 = vand.u32 2147483647, %v2423_v53  ;;  %v2432_v15 = vand.u32 2147483647, %v2424_v31 }
 0x1d7   : > { %v2433_v30 = vand.u32 2147483647, %v2425_v23  ;;  %v2434_v41 = vand.u32 2147483647, %v2426_v16  ;;  %v2436_v20 = vadd.s32 704, %v6029_v34  ;;  %v2437_v39 = vadd.s32 704, %v6031_v36 }
 0x1d8   : > { %v2438_v43 = vadd.s32 704, %v6033_v37  ;;  %v2439_v54 = vadd.s32 704, %v6035_v42  ;;  %v2440_v18 = vadd.s32 704, %v6040_v46  ;;  %v2441_v22 = vadd.s32 704, %v6042_v51  ;;  %v4654_v63 = vld [vmem:[%s5439_s26 + $0x338] sm:$0xff]  ;;  %v4657_v8 = vld [vmem:[%s5445_s20 + $0x310] sm:$0xff] }
 0x1d9   : > { %v2442_v56 = vadd.s32 704, %v6044_v40  ;;  %v2443_v59 = vadd.s32 704, %v6050_v47  ;;  %vm2444_vm8 = vcmp.lt.s32.totalorder %v2436_v20, 2592  ;;  %vm2445_vm9 = vcmp.lt.s32.totalorder %v2437_v39, 2592  ;;  %v4658_v9 = vld [vmem:[%s5445_s20 + $0x318] sm:$0xff]  ;;  %v4659_v5 = vld [vmem:[%s5445_s20 + $0x320] sm:$0xff] }
 0x1da   : > { %vm2446_vm10 = vcmp.lt.s32.totalorder %v2438_v43, 2592  ;;  %vm2447_vm11 = vcmp.lt.s32.totalorder %v2439_v54, 2592  ;;  %vm2448_vm12 = vcmp.lt.s32.totalorder %v2440_v18, 2592  ;;  %vm2449_vm13 = vcmp.lt.s32.totalorder %v2441_v22, 2592  ;;  %v4660_v6 = vld [vmem:[%s5445_s20 + $0x328] sm:$0xff]  ;;  %v4661_v14 = vld [vmem:[%s5445_s20 + $0x330] sm:$0xff] }
 0x1db   : > { %vm2450_vm14 = vcmp.lt.s32.totalorder %v2442_v56, 2592  ;;  %vm2451_vm15 = vcmp.lt.s32.totalorder %v2443_v59, 2592  ;;  %v2452_v1 = vsel %vm2444_vm8, %v2427_v33, 0.0  ;;  %v2453_v2 = vsel %vm2445_vm9, %v2428_v21, 0.0  ;;  %v4662_v49 = vld [vmem:[%s5445_s20 + $0x338] sm:$0xff] }
 0x1dc   : > { %v2454_v3 = vsel %vm2446_vm10, %v2429_v35, 0.0  ;;  %v2455_v0 = vsel %vm2447_vm11, %v2430_v45, 0.0  ;;  %v2456_v4 = vsel %vm2448_vm12, %v2431_v17, 0.0  ;;  %v2457_v7 = vsel %vm2449_vm13, %v2432_v15, 0.0 }
 0x1dd   : > { %v2486_v10 = vsub.f32 %v4647_v52, %v4655_v60  ;;  %v2458_v12 = vsel %vm2450_vm14, %v2433_v30, 0.0  ;;  %v2459_v13 = vsel %vm2451_vm15, %v2434_v41, 0.0  ;;  %v6602_v27 = vadd.f32 %v2452_v1, %v6553_v26  ;;  %v4663_v52 = vld [vmem:[%s5439_s26 + $0x340] sm:$0xff] }
 0x1de   : > { %v2487_v11 = vsub.f32 %v4648_v38, %v4656_v57  ;;  %v6608_v29 = vadd.f32 %v2453_v2, %v6559_v19  ;;  %v6611_v53 = vadd.f32 %v2454_v3, %v6562_v58  ;;  %v6614_v31 = vadd.f32 %v2455_v0, %v6565_v24  ;;  %v4664_v38 = vld [vmem:[%s5439_s26 + $0x348] sm:$0xff]  ;;  %v4671_v60 = vld [vmem:[%s5445_s20 + $0x340] sm:$0xff] }
 0x1df   : > { %v6617_v23 = vadd.f32 %v2456_v4, %v6568_v32  ;;  %v6620_v16 = vadd.f32 %v2457_v7, %v6571_v28  ;;  %v2488_v26 = vsub.f32 %v4649_v61, %v4657_v8  ;;  %v2489_v33 = vsub.f32 %v4650_v55, %v4658_v9  ;;  %v4665_v61 = vld [vmem:[%s5439_s26 + $0x350] sm:$0xff]  ;;  %v4666_v55 = vld [vmem:[%s5439_s26 + $0x358] sm:$0xff]  ;;  %v4672_v57 = vld [vmem:[%s5445_s20 + $0x348] sm:$0xff] }
 0x1e0   : > { %v2490_v21 = vsub.f32 %v4651_v62, %v4659_v5  ;;  %v2491_v35 = vsub.f32 %v4652_v48, %v4660_v6  ;;  %v2492_v45 = vsub.f32 %v4653_v44, %v4661_v14  ;;  %v2493_v17 = vsub.f32 %v4654_v63, %v4662_v49  ;;  %v4667_v62 = vld [vmem:[%s5439_s26 + $0x360] sm:$0xff]  ;;  %v4668_v48 = vld [vmem:[%s5439_s26 + $0x368] sm:$0xff]  ;;  %v4669_v44 = vld [vmem:[%s5439_s26 + $0x370] sm:$0xff] }
 0x1e1   : > { %v2494_v19 = vand.u32 2147483647, %v2486_v10  ;;  %v6623_v15 = vadd.f32 %v2458_v12, %v6574_v50  ;;  %v2495_v58 = vand.u32 2147483647, %v2487_v11  ;;  %v2496_v24 = vand.u32 2147483647, %v2488_v26 }
 0x1e2   : > { %v2497_v30 = vand.u32 2147483647, %v2489_v33  ;;  %v6626_v32 = vadd.f32 %v2459_v13, %v6577_v25  ;;  %v2498_v41 = vand.u32 2147483647, %v2490_v21  ;;  %v2499_v28 = vand.u32 2147483647, %v2491_v35 }
 0x1e3   : > { %v2500_v20 = vand.u32 2147483647, %v2492_v45  ;;  %v2501_v39 = vand.u32 2147483647, %v2493_v17  ;;  %v2503_v43 = vadd.s32 768, %v6029_v34  ;;  %v2504_v54 = vadd.s32 768, %v6031_v36 }
 0x1e4   : > { %v2505_v50 = vadd.s32 768, %v6033_v37  ;;  %v2506_v18 = vadd.s32 768, %v6035_v42  ;;  %v2507_v22 = vadd.s32 768, %v6040_v46  ;;  %v2508_v25 = vadd.s32 768, %v6042_v51  ;;  %v4670_v63 = vld [vmem:[%s5439_s26 + $0x378] sm:$0xff]  ;;  %v4673_v8 = vld [vmem:[%s5445_s20 + $0x350] sm:$0xff] }
 0x1e5   : > { %v2509_v56 = vadd.s32 768, %v6044_v40  ;;  %v2510_v59 = vadd.s32 768, %v6050_v47  ;;  %vm2511_vm0 = vcmp.lt.s32.totalorder %v2503_v43, 2592  ;;  %vm2512_vm1 = vcmp.lt.s32.totalorder %v2504_v54, 2592  ;;  %v4674_v9 = vld [vmem:[%s5445_s20 + $0x358] sm:$0xff]  ;;  %v4675_v5 = vld [vmem:[%s5445_s20 + $0x360] sm:$0xff] }
 0x1e6   : > { %vm2513_vm2 = vcmp.lt.s32.totalorder %v2505_v50, 2592  ;;  %vm2514_vm3 = vcmp.lt.s32.totalorder %v2506_v18, 2592  ;;  %vm2515_vm4 = vcmp.lt.s32.totalorder %v2507_v22, 2592  ;;  %vm2516_vm5 = vcmp.lt.s32.totalorder %v2508_v25, 2592  ;;  %v4676_v14 = vld [vmem:[%s5445_s20 + $0x368] sm:$0xff]  ;;  %v4677_v49 = vld [vmem:[%s5445_s20 + $0x370] sm:$0xff] }
 0x1e7   : > { %vm2517_vm6 = vcmp.lt.s32.totalorder %v2509_v56, 2592  ;;  %vm2518_vm7 = vcmp.lt.s32.totalorder %v2510_v59, 2592  ;;  %v2519_v1 = vsel %vm2511_vm0, %v2494_v19, 0.0  ;;  %v2520_v2 = vsel %vm2512_vm1, %v2495_v58, 0.0  ;;  %v4678_v11 = vld [vmem:[%s5445_s20 + $0x378] sm:$0xff] }
 0x1e8   : > { %v2521_v3 = vsel %vm2513_vm2, %v2496_v24, 0.0  ;;  %v2522_v0 = vsel %vm2514_vm3, %v2497_v30, 0.0  ;;  %v2523_v4 = vsel %vm2515_vm4, %v2498_v41, 0.0  ;;  %v2524_v7 = vsel %vm2516_vm5, %v2499_v28, 0.0 }
 0x1e9   : > { %v2553_v10 = vsub.f32 %v4663_v52, %v4671_v60  ;;  %v2525_v12 = vsel %vm2517_vm6, %v2500_v20, 0.0  ;;  %v2526_v13 = vsel %vm2518_vm7, %v2501_v39, 0.0  ;;  %v6651_v6 = vadd.f32 %v2519_v1, %v6602_v27  ;;  %v4679_v52 = vld [vmem:[%s5439_s26 + $0x380] sm:$0xff] }
 0x1ea   : > { %v2554_v26 = vsub.f32 %v4664_v38, %v4672_v57  ;;  %v6657_v33 = vadd.f32 %v2520_v2, %v6608_v29  ;;  %v6660_v21 = vadd.f32 %v2521_v3, %v6611_v53  ;;  %v6663_v35 = vadd.f32 %v2522_v0, %v6614_v31  ;;  %v4680_v38 = vld [vmem:[%s5439_s26 + $0x388] sm:$0xff]  ;;  %v4687_v60 = vld [vmem:[%s5445_s20 + $0x380] sm:$0xff] }
 0x1eb   : > { %v6666_v45 = vadd.f32 %v2523_v4, %v6617_v23  ;;  %v6669_v17 = vadd.f32 %v2524_v7, %v6620_v16  ;;  %v2555_v27 = vsub.f32 %v4665_v61, %v4673_v8  ;;  %v2556_v19 = vsub.f32 %v4666_v55, %v4674_v9  ;;  %v4681_v61 = vld [vmem:[%s5439_s26 + $0x390] sm:$0xff]  ;;  %v4682_v55 = vld [vmem:[%s5439_s26 + $0x398] sm:$0xff]  ;;  %v4688_v57 = vld [vmem:[%s5445_s20 + $0x388] sm:$0xff] }
 0x1ec   : > { %v2557_v58 = vsub.f32 %v4667_v62, %v4675_v5  ;;  %v2558_v24 = vsub.f32 %v4668_v48, %v4676_v14  ;;  %v2559_v30 = vsub.f32 %v4669_v44, %v4677_v49  ;;  %v2560_v41 = vsub.f32 %v4670_v63, %v4678_v11  ;;  %v4683_v62 = vld [vmem:[%s5439_s26 + $0x3a0] sm:$0xff]  ;;  %v4684_v48 = vld [vmem:[%s5439_s26 + $0x3a8] sm:$0xff]  ;;  %v4685_v44 = vld [vmem:[%s5439_s26 + $0x3b0] sm:$0xff] }
 0x1ed   : > { %v2561_v29 = vand.u32 2147483647, %v2553_v10  ;;  %v6672_v28 = vadd.f32 %v2525_v12, %v6623_v15  ;;  %v2562_v53 = vand.u32 2147483647, %v2554_v26  ;;  %v2563_v31 = vand.u32 2147483647, %v2555_v27 }
 0x1ee   : > { %v2564_v20 = vand.u32 2147483647, %v2556_v19  ;;  %v6675_v23 = vadd.f32 %v2526_v13, %v6626_v32  ;;  %v2565_v39 = vand.u32 2147483647, %v2557_v58  ;;  %v2566_v16 = vand.u32 2147483647, %v2558_v24 }
 0x1ef   : > { %v2567_v43 = vand.u32 2147483647, %v2559_v30  ;;  %v2568_v54 = vand.u32 2147483647, %v2560_v41  ;;  %v2570_v50 = vadd.s32 832, %v6029_v34  ;;  %v2571_v18 = vadd.s32 832, %v6031_v36 }
 0x1f0   : > { %v2572_v15 = vadd.s32 832, %v6033_v37  ;;  %v2573_v22 = vadd.s32 832, %v6035_v42  ;;  %v2574_v25 = vadd.s32 832, %v6040_v46  ;;  %v2575_v32 = vadd.s32 832, %v6042_v51  ;;  %v4686_v63 = vld [vmem:[%s5439_s26 + $0x3b8] sm:$0xff]  ;;  %v4689_v8 = vld [vmem:[%s5445_s20 + $0x390] sm:$0xff] }
 0x1f1   : > { %v2576_v56 = vadd.s32 832, %v6044_v40  ;;  %v2577_v59 = vadd.s32 832, %v6050_v47  ;;  %vm2578_vm8 = vcmp.lt.s32.totalorder %v2570_v50, 2592  ;;  %vm2579_vm9 = vcmp.lt.s32.totalorder %v2571_v18, 2592  ;;  %v4690_v9 = vld [vmem:[%s5445_s20 + $0x398] sm:$0xff]  ;;  %v4691_v5 = vld [vmem:[%s5445_s20 + $0x3a0] sm:$0xff] }
 0x1f2   : > { %vm2580_vm10 = vcmp.lt.s32.totalorder %v2572_v15, 2592  ;;  %vm2581_vm11 = vcmp.lt.s32.totalorder %v2573_v22, 2592  ;;  %vm2582_vm12 = vcmp.lt.s32.totalorder %v2574_v25, 2592  ;;  %vm2583_vm13 = vcmp.lt.s32.totalorder %v2575_v32, 2592  ;;  %v4692_v49 = vld [vmem:[%s5445_s20 + $0x3a8] sm:$0xff]  ;;  %v4693_v11 = vld [vmem:[%s5445_s20 + $0x3b0] sm:$0xff] }
 0x1f3   : > { %vm2584_vm14 = vcmp.lt.s32.totalorder %v2576_v56, 2592  ;;  %vm2585_vm15 = vcmp.lt.s32.totalorder %v2577_v59, 2592  ;;  %v2586_v1 = vsel %vm2578_vm8, %v2561_v29, 0.0  ;;  %v2587_v2 = vsel %vm2579_vm9, %v2562_v53, 0.0  ;;  %v4694_v26 = vld [vmem:[%s5445_s20 + $0x3b8] sm:$0xff] }
 0x1f4   : > { %v2588_v3 = vsel %vm2580_vm10, %v2563_v31, 0.0  ;;  %v2589_v0 = vsel %vm2581_vm11, %v2564_v20, 0.0  ;;  %v2590_v4 = vsel %vm2582_vm12, %v2565_v39, 0.0  ;;  %v2591_v7 = vsel %vm2583_vm13, %v2566_v16, 0.0 }
 0x1f5   : > { %v2620_v10 = vsub.f32 %v4679_v52, %v4687_v60  ;;  %v2592_v12 = vsel %vm2584_vm14, %v2567_v43, 0.0  ;;  %v2593_v13 = vsel %vm2585_vm15, %v2568_v54, 0.0  ;;  %v6700_v14 = vadd.f32 %v2586_v1, %v6651_v6  ;;  %v4695_v52 = vld [vmem:[%s5439_s26 + $0x3c0] sm:$0xff] }
 0x1f6   : > { %v2621_v27 = vsub.f32 %v4680_v38, %v4688_v57  ;;  %v6706_v19 = vadd.f32 %v2587_v2, %v6657_v33  ;;  %v6709_v58 = vadd.f32 %v2588_v3, %v6660_v21  ;;  %v6712_v24 = vadd.f32 %v2589_v0, %v6663_v35  ;;  %v4696_v38 = vld [vmem:[%s5439_s26 + $0x3c8] sm:$0xff]  ;;  %v4703_v60 = vld [vmem:[%s5445_s20 + $0x3c0] sm:$0xff] }
 0x1f7   : > { %v6715_v30 = vadd.f32 %v2590_v4, %v6666_v45  ;;  %v6718_v41 = vadd.f32 %v2591_v7, %v6669_v17  ;;  %v2622_v6 = vsub.f32 %v4681_v61, %v4689_v8  ;;  %v2623_v29 = vsub.f32 %v4682_v55, %v4690_v9  ;;  %v4697_v61 = vld [vmem:[%s5439_s26 + $0x3d0] sm:$0xff]  ;;  %v4698_v55 = vld [vmem:[%s5439_s26 + $0x3d8] sm:$0xff]  ;;  %v4704_v57 = vld [vmem:[%s5445_s20 + $0x3c8] sm:$0xff] }
 0x1f8   : > { %v2624_v53 = vsub.f32 %v4683_v62, %v4691_v5  ;;  %v2625_v31 = vsub.f32 %v4684_v48, %v4692_v49  ;;  %v2626_v20 = vsub.f32 %v4685_v44, %v4693_v11  ;;  %v2627_v39 = vsub.f32 %v4686_v63, %v4694_v26  ;;  %v4699_v62 = vld [vmem:[%s5439_s26 + $0x3e0] sm:$0xff]  ;;  %v4700_v48 = vld [vmem:[%s5439_s26 + $0x3e8] sm:$0xff]  ;;  %v4701_v44 = vld [vmem:[%s5439_s26 + $0x3f0] sm:$0xff] }
 0x1f9   : > { %v2628_v33 = vand.u32 2147483647, %v2620_v10  ;;  %v6721_v16 = vadd.f32 %v2592_v12, %v6672_v28  ;;  %v2629_v21 = vand.u32 2147483647, %v2621_v27  ;;  %v2630_v35 = vand.u32 2147483647, %v2622_v6 }
 0x1fa   : > { %v2631_v43 = vand.u32 2147483647, %v2623_v29  ;;  %v6724_v45 = vadd.f32 %v2593_v13, %v6675_v23  ;;  %v2632_v54 = vand.u32 2147483647, %v2624_v53  ;;  %v2633_v17 = vand.u32 2147483647, %v2625_v31 }
 0x1fb   : > { %v2634_v50 = vand.u32 2147483647, %v2626_v20  ;;  %v2635_v18 = vand.u32 2147483647, %v2627_v39  ;;  %v2637_v15 = vadd.s32 896, %v6029_v34  ;;  %v2638_v22 = vadd.s32 896, %v6031_v36 }
 0x1fc   : > { %v2639_v28 = vadd.s32 896, %v6033_v37  ;;  %v2640_v25 = vadd.s32 896, %v6035_v42  ;;  %v2641_v32 = vadd.s32 896, %v6040_v46  ;;  %v2642_v23 = vadd.s32 896, %v6042_v51  ;;  %v4702_v63 = vld [vmem:[%s5439_s26 + $0x3f8] sm:$0xff]  ;;  %v4705_v8 = vld [vmem:[%s5445_s20 + $0x3d0] sm:$0xff] }
 0x1fd   : > { %v2643_v56 = vadd.s32 896, %v6044_v40  ;;  %v2644_v59 = vadd.s32 896, %v6050_v47  ;;  %vm2645_vm0 = vcmp.lt.s32.totalorder %v2637_v15, 2592  ;;  %vm2646_vm1 = vcmp.lt.s32.totalorder %v2638_v22, 2592  ;;  %v4706_v9 = vld [vmem:[%s5445_s20 + $0x3d8] sm:$0xff]  ;;  %v4707_v5 = vld [vmem:[%s5445_s20 + $0x3e0] sm:$0xff] }
 0x1fe   : > { %vm2647_vm2 = vcmp.lt.s32.totalorder %v2639_v28, 2592  ;;  %vm2648_vm3 = vcmp.lt.s32.totalorder %v2640_v25, 2592  ;;  %vm2649_vm4 = vcmp.lt.s32.totalorder %v2641_v32, 2592  ;;  %vm2650_vm5 = vcmp.lt.s32.totalorder %v2642_v23, 2592  ;;  %v4708_v11 = vld [vmem:[%s5445_s20 + $0x3e8] sm:$0xff]  ;;  %v4709_v26 = vld [vmem:[%s5445_s20 + $0x3f0] sm:$0xff] }
 0x1ff   : > { %vm2651_vm6 = vcmp.lt.s32.totalorder %v2643_v56, 2592  ;;  %vm2652_vm7 = vcmp.lt.s32.totalorder %v2644_v59, 2592  ;;  %v2653_v1 = vsel %vm2645_vm0, %v2628_v33, 0.0  ;;  %v2654_v2 = vsel %vm2646_vm1, %v2629_v21, 0.0  ;;  %v4710_v27 = vld [vmem:[%s5445_s20 + $0x3f8] sm:$0xff] }
 0x200   : > { %v2655_v3 = vsel %vm2647_vm2, %v2630_v35, 0.0  ;;  %v2656_v0 = vsel %vm2648_vm3, %v2631_v43, 0.0  ;;  %v2657_v4 = vsel %vm2649_vm4, %v2632_v54, 0.0  ;;  %v2658_v7 = vsel %vm2650_vm5, %v2633_v17, 0.0 }
 0x201   : > { %v2687_v10 = vsub.f32 %v4695_v52, %v4703_v60  ;;  %v2659_v12 = vsel %vm2651_vm6, %v2634_v50, 0.0  ;;  %v2660_v13 = vsel %vm2652_vm7, %v2635_v18, 0.0  ;;  %v6749_v49 = vadd.f32 %v2653_v1, %v6700_v14  ;;  %v4711_v52 = vld [vmem:[%s5439_s26 + $0x400] sm:$0xff] }
 0x202   : > { %v2688_v6 = vsub.f32 %v4696_v38, %v4704_v57  ;;  %v6755_v29 = vadd.f32 %v2654_v2, %v6706_v19  ;;  %v6758_v53 = vadd.f32 %v2655_v3, %v6709_v58  ;;  %v6761_v31 = vadd.f32 %v2656_v0, %v6712_v24  ;;  %v4712_v38 = vld [vmem:[%s5439_s26 + $0x408] sm:$0xff]  ;;  %v4719_v60 = vld [vmem:[%s5445_s20 + $0x400] sm:$0xff] }
 0x203   : > { %v6764_v20 = vadd.f32 %v2657_v4, %v6715_v30  ;;  %v6767_v39 = vadd.f32 %v2658_v7, %v6718_v41  ;;  %v2689_v14 = vsub.f32 %v4697_v61, %v4705_v8  ;;  %v2690_v33 = vsub.f32 %v4698_v55, %v4706_v9  ;;  %v4713_v61 = vld [vmem:[%s5439_s26 + $0x410] sm:$0xff]  ;;  %v4714_v55 = vld [vmem:[%s5439_s26 + $0x418] sm:$0xff]  ;;  %v4720_v57 = vld [vmem:[%s5445_s20 + $0x408] sm:$0xff] }
 0x204   : > { %v2691_v21 = vsub.f32 %v4699_v62, %v4707_v5  ;;  %v2692_v35 = vsub.f32 %v4700_v48, %v4708_v11  ;;  %v2693_v43 = vsub.f32 %v4701_v44, %v4709_v26  ;;  %v2694_v54 = vsub.f32 %v4702_v63, %v4710_v27  ;;  %v4715_v62 = vld [vmem:[%s5439_s26 + $0x420] sm:$0xff]  ;;  %v4716_v48 = vld [vmem:[%s5439_s26 + $0x428] sm:$0xff]  ;;  %v4717_v44 = vld [vmem:[%s5439_s26 + $0x430] sm:$0xff] }
 0x205   : > { %v2695_v19 = vand.u32 2147483647, %v2687_v10  ;;  %v6770_v17 = vadd.f32 %v2659_v12, %v6721_v16  ;;  %v2696_v58 = vand.u32 2147483647, %v2688_v6  ;;  %v2697_v24 = vand.u32 2147483647, %v2689_v14 }
 0x206   : > { %v2698_v50 = vand.u32 2147483647, %v2690_v33  ;;  %v6773_v30 = vadd.f32 %v2660_v13, %v6724_v45  ;;  %v2699_v18 = vand.u32 2147483647, %v2691_v21  ;;  %v2700_v41 = vand.u32 2147483647, %v2692_v35 }
 0x207   : > { %v2701_v15 = vand.u32 2147483647, %v2693_v43  ;;  %v2702_v22 = vand.u32 2147483647, %v2694_v54  ;;  %v2704_v28 = vadd.s32 960, %v6029_v34  ;;  %v2705_v25 = vadd.s32 960, %v6031_v36 }
 0x208   : > { %v2706_v16 = vadd.s32 960, %v6033_v37  ;;  %v2707_v32 = vadd.s32 960, %v6035_v42  ;;  %v2708_v23 = vadd.s32 960, %v6040_v46  ;;  %v2709_v45 = vadd.s32 960, %v6042_v51  ;;  %v4718_v63 = vld [vmem:[%s5439_s26 + $0x438] sm:$0xff]  ;;  %v4721_v8 = vld [vmem:[%s5445_s20 + $0x410] sm:$0xff] }
 0x209   : > { %v2710_v56 = vadd.s32 960, %v6044_v40  ;;  %v2711_v59 = vadd.s32 960, %v6050_v47  ;;  %vm2712_vm8 = vcmp.lt.s32.totalorder %v2704_v28, 2592  ;;  %vm2713_vm9 = vcmp.lt.s32.totalorder %v2705_v25, 2592  ;;  %v4722_v9 = vld [vmem:[%s5445_s20 + $0x418] sm:$0xff]  ;;  %v4723_v5 = vld [vmem:[%s5445_s20 + $0x420] sm:$0xff] }
 0x20a   : > { %vm2714_vm10 = vcmp.lt.s32.totalorder %v2706_v16, 2592  ;;  %vm2715_vm11 = vcmp.lt.s32.totalorder %v2707_v32, 2592  ;;  %vm2716_vm12 = vcmp.lt.s32.totalorder %v2708_v23, 2592  ;;  %vm2717_vm13 = vcmp.lt.s32.totalorder %v2709_v45, 2592  ;;  %v4724_v26 = vld [vmem:[%s5445_s20 + $0x428] sm:$0xff]  ;;  %v4725_v27 = vld [vmem:[%s5445_s20 + $0x430] sm:$0xff] }
 0x20b   : > { %vm2718_vm14 = vcmp.lt.s32.totalorder %v2710_v56, 2592  ;;  %vm2719_vm15 = vcmp.lt.s32.totalorder %v2711_v59, 2592  ;;  %v2720_v1 = vsel %vm2712_vm8, %v2695_v19, 0.0  ;;  %v2721_v2 = vsel %vm2713_vm9, %v2696_v58, 0.0  ;;  %v4726_v6 = vld [vmem:[%s5445_s20 + $0x438] sm:$0xff] }
 0x20c   : > { %v2722_v3 = vsel %vm2714_vm10, %v2697_v24, 0.0  ;;  %v2723_v0 = vsel %vm2715_vm11, %v2698_v50, 0.0  ;;  %v2724_v4 = vsel %vm2716_vm12, %v2699_v18, 0.0  ;;  %v2725_v7 = vsel %vm2717_vm13, %v2700_v41, 0.0 }
 0x20d   : > { %v2754_v10 = vsub.f32 %v4711_v52, %v4719_v60  ;;  %v2726_v12 = vsel %vm2718_vm14, %v2701_v15, 0.0  ;;  %v2727_v13 = vsel %vm2719_vm15, %v2702_v22, 0.0  ;;  %v6798_v11 = vadd.f32 %v2720_v1, %v6749_v49  ;;  %v4727_v52 = vld [vmem:[%s5439_s26 + $0x440] sm:$0xff] }
 0x20e   : > { %v2755_v14 = vsub.f32 %v4712_v38, %v4720_v57  ;;  %v6804_v33 = vadd.f32 %v2721_v2, %v6755_v29  ;;  %v6807_v21 = vadd.f32 %v2722_v3, %v6758_v53  ;;  %v6810_v35 = vadd.f32 %v2723_v0, %v6761_v31  ;;  %v4728_v38 = vld [vmem:[%s5439_s26 + $0x448] sm:$0xff]  ;;  %v4735_v60 = vld [vmem:[%s5445_s20 + $0x440] sm:$0xff] }
 0x20f   : > { %v6813_v43 = vadd.f32 %v2724_v4, %v6764_v20  ;;  %v6816_v54 = vadd.f32 %v2725_v7, %v6767_v39  ;;  %v2756_v49 = vsub.f32 %v4713_v61, %v4721_v8  ;;  %v2757_v19 = vsub.f32 %v4714_v55, %v4722_v9  ;;  %v4729_v61 = vld [vmem:[%s5439_s26 + $0x450] sm:$0xff]  ;;  %v4730_v55 = vld [vmem:[%s5439_s26 + $0x458] sm:$0xff]  ;;  %v4736_v57 = vld [vmem:[%s5445_s20 + $0x448] sm:$0xff] }
 0x210   : > { %v2758_v58 = vsub.f32 %v4715_v62, %v4723_v5  ;;  %v2759_v24 = vsub.f32 %v4716_v48, %v4724_v26  ;;  %v2760_v50 = vsub.f32 %v4717_v44, %v4725_v27  ;;  %v2761_v18 = vsub.f32 %v4718_v63, %v4726_v6  ;;  %v4731_v62 = vld [vmem:[%s5439_s26 + $0x460] sm:$0xff]  ;;  %v4732_v48 = vld [vmem:[%s5439_s26 + $0x468] sm:$0xff]  ;;  %v4733_v44 = vld [vmem:[%s5439_s26 + $0x470] sm:$0xff] }
 0x211   : > { %v2762_v29 = vand.u32 2147483647, %v2754_v10  ;;  %v6819_v41 = vadd.f32 %v2726_v12, %v6770_v17  ;;  %v2763_v53 = vand.u32 2147483647, %v2755_v14  ;;  %v2764_v31 = vand.u32 2147483647, %v2756_v49 }
 0x212   : > { %v2765_v15 = vand.u32 2147483647, %v2757_v19  ;;  %v6822_v20 = vadd.f32 %v2727_v13, %v6773_v30  ;;  %v2766_v22 = vand.u32 2147483647, %v2758_v58  ;;  %v2767_v39 = vand.u32 2147483647, %v2759_v24 }
 0x213   : > { %v2768_v28 = vand.u32 2147483647, %v2760_v50  ;;  %v2769_v25 = vand.u32 2147483647, %v2761_v18  ;;  %v2771_v16 = vadd.s32 1024, %v6029_v34  ;;  %v2772_v32 = vadd.s32 1024, %v6031_v36 }
 0x214   : > { %v2773_v17 = vadd.s32 1024, %v6033_v37  ;;  %v2774_v23 = vadd.s32 1024, %v6035_v42  ;;  %v2775_v45 = vadd.s32 1024, %v6040_v46  ;;  %v2776_v30 = vadd.s32 1024, %v6042_v51  ;;  %v4734_v63 = vld [vmem:[%s5439_s26 + $0x478] sm:$0xff]  ;;  %v4737_v8 = vld [vmem:[%s5445_s20 + $0x450] sm:$0xff] }
 0x215   : > { %v2777_v56 = vadd.s32 1024, %v6044_v40  ;;  %v2778_v59 = vadd.s32 1024, %v6050_v47  ;;  %vm2779_vm0 = vcmp.lt.s32.totalorder %v2771_v16, 2592  ;;  %vm2780_vm1 = vcmp.lt.s32.totalorder %v2772_v32, 2592  ;;  %v4738_v9 = vld [vmem:[%s5445_s20 + $0x458] sm:$0xff]  ;;  %v4739_v5 = vld [vmem:[%s5445_s20 + $0x460] sm:$0xff] }
 0x216   : > { %vm2781_vm2 = vcmp.lt.s32.totalorder %v2773_v17, 2592  ;;  %vm2782_vm3 = vcmp.lt.s32.totalorder %v2774_v23, 2592  ;;  %vm2783_vm4 = vcmp.lt.s32.totalorder %v2775_v45, 2592  ;;  %vm2784_vm5 = vcmp.lt.s32.totalorder %v2776_v30, 2592  ;;  %v4740_v27 = vld [vmem:[%s5445_s20 + $0x468] sm:$0xff]  ;;  %v4741_v6 = vld [vmem:[%s5445_s20 + $0x470] sm:$0xff] }
 0x217   : > { %vm2785_vm6 = vcmp.lt.s32.totalorder %v2777_v56, 2592  ;;  %vm2786_vm7 = vcmp.lt.s32.totalorder %v2778_v59, 2592  ;;  %v2787_v1 = vsel %vm2779_vm0, %v2762_v29, 0.0  ;;  %v2788_v2 = vsel %vm2780_vm1, %v2763_v53, 0.0  ;;  %v4742_v14 = vld [vmem:[%s5445_s20 + $0x478] sm:$0xff] }
 0x218   : > { %v2789_v3 = vsel %vm2781_vm2, %v2764_v31, 0.0  ;;  %v2790_v0 = vsel %vm2782_vm3, %v2765_v15, 0.0  ;;  %v2791_v4 = vsel %vm2783_vm4, %v2766_v22, 0.0  ;;  %v2792_v7 = vsel %vm2784_vm5, %v2767_v39, 0.0 }
 0x219   : > { %v2821_v10 = vsub.f32 %v4727_v52, %v4735_v60  ;;  %v2793_v12 = vsel %vm2785_vm6, %v2768_v28, 0.0  ;;  %v2794_v13 = vsel %vm2786_vm7, %v2769_v25, 0.0  ;;  %v6847_v26 = vadd.f32 %v2787_v1, %v6798_v11  ;;  %v4743_v52 = vld [vmem:[%s5439_s26 + $0x480] sm:$0xff] }
 0x21a   : > { %v2822_v49 = vsub.f32 %v4728_v38, %v4736_v57  ;;  %v6853_v19 = vadd.f32 %v2788_v2, %v6804_v33  ;;  %v6856_v58 = vadd.f32 %v2789_v3, %v6807_v21  ;;  %v6859_v24 = vadd.f32 %v2790_v0, %v6810_v35  ;;  %v4744_v38 = vld [vmem:[%s5439_s26 + $0x488] sm:$0xff]  ;;  %v4751_v60 = vld [vmem:[%s5445_s20 + $0x480] sm:$0xff] }
 0x21b   : > { %v6862_v50 = vadd.f32 %v2791_v4, %v6813_v43  ;;  %v6865_v18 = vadd.f32 %v2792_v7, %v6816_v54  ;;  %v2823_v11 = vsub.f32 %v4729_v61, %v4737_v8  ;;  %v2824_v29 = vsub.f32 %v4730_v55, %v4738_v9  ;;  %v4745_v61 = vld [vmem:[%s5439_s26 + $0x490] sm:$0xff]  ;;  %v4746_v55 = vld [vmem:[%s5439_s26 + $0x498] sm:$0xff]  ;;  %v4752_v57 = vld [vmem:[%s5445_s20 + $0x488] sm:$0xff] }
 0x21c   : > { %v2825_v53 = vsub.f32 %v4731_v62, %v4739_v5  ;;  %v2826_v31 = vsub.f32 %v4732_v48, %v4740_v27  ;;  %v2827_v15 = vsub.f32 %v4733_v44, %v4741_v6  ;;  %v2828_v22 = vsub.f32 %v4734_v63, %v4742_v14  ;;  %v4747_v62 = vld [vmem:[%s5439_s26 + $0x4a0] sm:$0xff]  ;;  %v4748_v48 = vld [vmem:[%s5439_s26 + $0x4a8] sm:$0xff]  ;;  %v4749_v44 = vld [vmem:[%s5439_s26 + $0x4b0] sm:$0xff] }
 0x21d   : > { %v2829_v33 = vand.u32 2147483647, %v2821_v10  ;;  %v6868_v39 = vadd.f32 %v2793_v12, %v6819_v41  ;;  %v2830_v21 = vand.u32 2147483647, %v2822_v49  ;;  %v2831_v35 = vand.u32 2147483647, %v2823_v11 }
 0x21e   : > { %v2832_v28 = vand.u32 2147483647, %v2824_v29  ;;  %v6871_v43 = vadd.f32 %v2794_v13, %v6822_v20  ;;  %v2833_v25 = vand.u32 2147483647, %v2825_v53  ;;  %v2834_v54 = vand.u32 2147483647, %v2826_v31 }
 0x21f   : > { %v2835_v16 = vand.u32 2147483647, %v2827_v15  ;;  %v2836_v32 = vand.u32 2147483647, %v2828_v22  ;;  %v2838_v17 = vadd.s32 1088, %v6029_v34  ;;  %v2839_v23 = vadd.s32 1088, %v6031_v36 }
 0x220   : > { %v2840_v41 = vadd.s32 1088, %v6033_v37  ;;  %v2841_v45 = vadd.s32 1088, %v6035_v42  ;;  %v2842_v30 = vadd.s32 1088, %v6040_v46  ;;  %v2843_v20 = vadd.s32 1088, %v6042_v51  ;;  %v4750_v63 = vld [vmem:[%s5439_s26 + $0x4b8] sm:$0xff]  ;;  %v4753_v8 = vld [vmem:[%s5445_s20 + $0x490] sm:$0xff] }
 0x221   : > { %v2844_v56 = vadd.s32 1088, %v6044_v40  ;;  %v2845_v59 = vadd.s32 1088, %v6050_v47  ;;  %vm2846_vm8 = vcmp.lt.s32.totalorder %v2838_v17, 2592  ;;  %vm2847_vm9 = vcmp.lt.s32.totalorder %v2839_v23, 2592  ;;  %v4754_v9 = vld [vmem:[%s5445_s20 + $0x498] sm:$0xff]  ;;  %v4755_v5 = vld [vmem:[%s5445_s20 + $0x4a0] sm:$0xff] }
 0x222   : > { %vm2848_vm10 = vcmp.lt.s32.totalorder %v2840_v41, 2592  ;;  %vm2849_vm11 = vcmp.lt.s32.totalorder %v2841_v45, 2592  ;;  %vm2850_vm12 = vcmp.lt.s32.totalorder %v2842_v30, 2592  ;;  %vm2851_vm13 = vcmp.lt.s32.totalorder %v2843_v20, 2592  ;;  %v4756_v6 = vld [vmem:[%s5445_s20 + $0x4a8] sm:$0xff]  ;;  %v4757_v14 = vld [vmem:[%s5445_s20 + $0x4b0] sm:$0xff] }
 0x223   : > { %vm2852_vm14 = vcmp.lt.s32.totalorder %v2844_v56, 2592  ;;  %vm2853_vm15 = vcmp.lt.s32.totalorder %v2845_v59, 2592  ;;  %v2854_v1 = vsel %vm2846_vm8, %v2829_v33, 0.0  ;;  %v2855_v2 = vsel %vm2847_vm9, %v2830_v21, 0.0  ;;  %v4758_v49 = vld [vmem:[%s5445_s20 + $0x4b8] sm:$0xff] }
 0x224   : > { %v2856_v3 = vsel %vm2848_vm10, %v2831_v35, 0.0  ;;  %v2857_v0 = vsel %vm2849_vm11, %v2832_v28, 0.0  ;;  %v2858_v4 = vsel %vm2850_vm12, %v2833_v25, 0.0  ;;  %v2859_v7 = vsel %vm2851_vm13, %v2834_v54, 0.0 }
 0x225   : > { %v2888_v10 = vsub.f32 %v4743_v52, %v4751_v60  ;;  %v2860_v12 = vsel %vm2852_vm14, %v2835_v16, 0.0  ;;  %v2861_v13 = vsel %vm2853_vm15, %v2836_v32, 0.0  ;;  %v6896_v27 = vadd.f32 %v2854_v1, %v6847_v26  ;;  %v4759_v52 = vld [vmem:[%s5439_s26 + $0x4c0] sm:$0xff] }
 0x226   : > { %v2889_v11 = vsub.f32 %v4744_v38, %v4752_v57  ;;  %v6902_v29 = vadd.f32 %v2855_v2, %v6853_v19  ;;  %v6905_v53 = vadd.f32 %v2856_v3, %v6856_v58  ;;  %v6908_v31 = vadd.f32 %v2857_v0, %v6859_v24  ;;  %v4760_v38 = vld [vmem:[%s5439_s26 + $0x4c8] sm:$0xff]  ;;  %v4767_v60 = vld [vmem:[%s5445_s20 + $0x4c0] sm:$0xff] }
 0x227   : > { %v6911_v15 = vadd.f32 %v2858_v4, %v6862_v50  ;;  %v6914_v22 = vadd.f32 %v2859_v7, %v6865_v18  ;;  %v2890_v26 = vsub.f32 %v4745_v61, %v4753_v8  ;;  %v2891_v33 = vsub.f32 %v4746_v55, %v4754_v9  ;;  %v4761_v61 = vld [vmem:[%s5439_s26 + $0x4d0] sm:$0xff]  ;;  %v4762_v55 = vld [vmem:[%s5439_s26 + $0x4d8] sm:$0xff]  ;;  %v4768_v57 = vld [vmem:[%s5445_s20 + $0x4c8] sm:$0xff] }
 0x228   : > { %v2892_v21 = vsub.f32 %v4747_v62, %v4755_v5  ;;  %v2893_v35 = vsub.f32 %v4748_v48, %v4756_v6  ;;  %v2894_v28 = vsub.f32 %v4749_v44, %v4757_v14  ;;  %v2895_v25 = vsub.f32 %v4750_v63, %v4758_v49  ;;  %v4763_v62 = vld [vmem:[%s5439_s26 + $0x4e0] sm:$0xff]  ;;  %v4764_v48 = vld [vmem:[%s5439_s26 + $0x4e8] sm:$0xff]  ;;  %v4765_v44 = vld [vmem:[%s5439_s26 + $0x4f0] sm:$0xff] }
 0x229   : > { %v2896_v19 = vand.u32 2147483647, %v2888_v10  ;;  %v6917_v54 = vadd.f32 %v2860_v12, %v6868_v39  ;;  %v2897_v58 = vand.u32 2147483647, %v2889_v11  ;;  %v2898_v24 = vand.u32 2147483647, %v2890_v26 }
 0x22a   : > { %v2899_v16 = vand.u32 2147483647, %v2891_v33  ;;  %v6920_v50 = vadd.f32 %v2861_v13, %v6871_v43  ;;  %v2900_v32 = vand.u32 2147483647, %v2892_v21  ;;  %v2901_v18 = vand.u32 2147483647, %v2893_v35 }
 0x22b   : > { %v2902_v17 = vand.u32 2147483647, %v2894_v28  ;;  %v2903_v23 = vand.u32 2147483647, %v2895_v25  ;;  %v2905_v41 = vadd.s32 1152, %v6029_v34  ;;  %v2906_v45 = vadd.s32 1152, %v6031_v36 }
 0x22c   : > { %v2907_v39 = vadd.s32 1152, %v6033_v37  ;;  %v2908_v30 = vadd.s32 1152, %v6035_v42  ;;  %v2909_v20 = vadd.s32 1152, %v6040_v46  ;;  %v2910_v43 = vadd.s32 1152, %v6042_v51  ;;  %v4766_v63 = vld [vmem:[%s5439_s26 + $0x4f8] sm:$0xff]  ;;  %v4769_v8 = vld [vmem:[%s5445_s20 + $0x4d0] sm:$0xff] }
 0x22d   : > { %v2911_v56 = vadd.s32 1152, %v6044_v40  ;;  %v2912_v59 = vadd.s32 1152, %v6050_v47  ;;  %vm2913_vm0 = vcmp.lt.s32.totalorder %v2905_v41, 2592  ;;  %vm2914_vm1 = vcmp.lt.s32.totalorder %v2906_v45, 2592  ;;  %v4770_v9 = vld [vmem:[%s5445_s20 + $0x4d8] sm:$0xff]  ;;  %v4771_v5 = vld [vmem:[%s5445_s20 + $0x4e0] sm:$0xff] }
 0x22e   : > { %vm2915_vm2 = vcmp.lt.s32.totalorder %v2907_v39, 2592  ;;  %vm2916_vm3 = vcmp.lt.s32.totalorder %v2908_v30, 2592  ;;  %vm2917_vm4 = vcmp.lt.s32.totalorder %v2909_v20, 2592  ;;  %vm2918_vm5 = vcmp.lt.s32.totalorder %v2910_v43, 2592  ;;  %v4772_v14 = vld [vmem:[%s5445_s20 + $0x4e8] sm:$0xff]  ;;  %v4773_v49 = vld [vmem:[%s5445_s20 + $0x4f0] sm:$0xff] }
 0x22f   : > { %vm2919_vm6 = vcmp.lt.s32.totalorder %v2911_v56, 2592  ;;  %vm2920_vm7 = vcmp.lt.s32.totalorder %v2912_v59, 2592  ;;  %v2921_v1 = vsel %vm2913_vm0, %v2896_v19, 0.0  ;;  %v2922_v2 = vsel %vm2914_vm1, %v2897_v58, 0.0  ;;  %v4774_v11 = vld [vmem:[%s5445_s20 + $0x4f8] sm:$0xff] }
 0x230   : > { %v2923_v3 = vsel %vm2915_vm2, %v2898_v24, 0.0  ;;  %v2924_v0 = vsel %vm2916_vm3, %v2899_v16, 0.0  ;;  %v2925_v4 = vsel %vm2917_vm4, %v2900_v32, 0.0  ;;  %v2926_v7 = vsel %vm2918_vm5, %v2901_v18, 0.0 }
 0x231   : > { %v2955_v10 = vsub.f32 %v4759_v52, %v4767_v60  ;;  %v2927_v12 = vsel %vm2919_vm6, %v2902_v17, 0.0  ;;  %v2928_v13 = vsel %vm2920_vm7, %v2903_v23, 0.0  ;;  %v6945_v6 = vadd.f32 %v2921_v1, %v6896_v27  ;;  %v4775_v52 = vld [vmem:[%s5439_s26 + $0x500] sm:$0xff] }
 0x232   : > { %v2956_v26 = vsub.f32 %v4760_v38, %v4768_v57  ;;  %v6951_v33 = vadd.f32 %v2922_v2, %v6902_v29  ;;  %v6954_v21 = vadd.f32 %v2923_v3, %v6905_v53  ;;  %v6957_v35 = vadd.f32 %v2924_v0, %v6908_v31  ;;  %v4776_v38 = vld [vmem:[%s5439_s26 + $0x508] sm:$0xff]  ;;  %v4783_v60 = vld [vmem:[%s5445_s20 + $0x500] sm:$0xff] }
 0x233   : > { %v6960_v28 = vadd.f32 %v2925_v4, %v6911_v15  ;;  %v6963_v25 = vadd.f32 %v2926_v7, %v6914_v22  ;;  %v2957_v27 = vsub.f32 %v4761_v61, %v4769_v8  ;;  %v2958_v19 = vsub.f32 %v4762_v55, %v4770_v9  ;;  %v4777_v61 = vld [vmem:[%s5439_s26 + $0x510] sm:$0xff]  ;;  %v4778_v55 = vld [vmem:[%s5439_s26 + $0x518] sm:$0xff]  ;;  %v4784_v57 = vld [vmem:[%s5445_s20 + $0x508] sm:$0xff] }
 0x234   : > { %v2959_v58 = vsub.f32 %v4763_v62, %v4771_v5  ;;  %v2960_v24 = vsub.f32 %v4764_v48, %v4772_v14  ;;  %v2961_v16 = vsub.f32 %v4765_v44, %v4773_v49  ;;  %v2962_v32 = vsub.f32 %v4766_v63, %v4774_v11  ;;  %v4779_v62 = vld [vmem:[%s5439_s26 + $0x520] sm:$0xff]  ;;  %v4780_v48 = vld [vmem:[%s5439_s26 + $0x528] sm:$0xff]  ;;  %v4781_v44 = vld [vmem:[%s5439_s26 + $0x530] sm:$0xff] }
 0x235   : > { %v2963_v29 = vand.u32 2147483647, %v2955_v10  ;;  %v6966_v18 = vadd.f32 %v2927_v12, %v6917_v54  ;;  %v2964_v53 = vand.u32 2147483647, %v2956_v26  ;;  %v2965_v31 = vand.u32 2147483647, %v2957_v27 }
 0x236   : > { %v2966_v17 = vand.u32 2147483647, %v2958_v19  ;;  %v6969_v15 = vadd.f32 %v2928_v13, %v6920_v50  ;;  %v2967_v23 = vand.u32 2147483647, %v2959_v58  ;;  %v2968_v22 = vand.u32 2147483647, %v2960_v24 }
 0x237   : > { %v2969_v41 = vand.u32 2147483647, %v2961_v16  ;;  %v2970_v45 = vand.u32 2147483647, %v2962_v32  ;;  %v2972_v39 = vadd.s32 1216, %v6029_v34  ;;  %v2973_v30 = vadd.s32 1216, %v6031_v36 }
 0x238   : > { %v2974_v54 = vadd.s32 1216, %v6033_v37  ;;  %v2975_v20 = vadd.s32 1216, %v6035_v42  ;;  %v2976_v43 = vadd.s32 1216, %v6040_v46  ;;  %v2977_v50 = vadd.s32 1216, %v6042_v51  ;;  %v4782_v63 = vld [vmem:[%s5439_s26 + $0x538] sm:$0xff]  ;;  %v4785_v8 = vld [vmem:[%s5445_s20 + $0x510] sm:$0xff] }
 0x239   : > { %v2978_v56 = vadd.s32 1216, %v6044_v40  ;;  %v2979_v59 = vadd.s32 1216, %v6050_v47  ;;  %vm2980_vm8 = vcmp.lt.s32.totalorder %v2972_v39, 2592  ;;  %vm2981_vm9 = vcmp.lt.s32.totalorder %v2973_v30, 2592  ;;  %v4786_v9 = vld [vmem:[%s5445_s20 + $0x518] sm:$0xff]  ;;  %v4787_v5 = vld [vmem:[%s5445_s20 + $0x520] sm:$0xff] }
 0x23a   : > { %vm2982_vm10 = vcmp.lt.s32.totalorder %v2974_v54, 2592  ;;  %vm2983_vm11 = vcmp.lt.s32.totalorder %v2975_v20, 2592  ;;  %vm2984_vm12 = vcmp.lt.s32.totalorder %v2976_v43, 2592  ;;  %vm2985_vm13 = vcmp.lt.s32.totalorder %v2977_v50, 2592  ;;  %v4788_v49 = vld [vmem:[%s5445_s20 + $0x528] sm:$0xff]  ;;  %v4789_v11 = vld [vmem:[%s5445_s20 + $0x530] sm:$0xff] }
 0x23b   : > { %vm2986_vm14 = vcmp.lt.s32.totalorder %v2978_v56, 2592  ;;  %vm2987_vm15 = vcmp.lt.s32.totalorder %v2979_v59, 2592  ;;  %v2988_v1 = vsel %vm2980_vm8, %v2963_v29, 0.0  ;;  %v2989_v2 = vsel %vm2981_vm9, %v2964_v53, 0.0  ;;  %v4790_v26 = vld [vmem:[%s5445_s20 + $0x538] sm:$0xff] }
 0x23c   : > { %v2990_v3 = vsel %vm2982_vm10, %v2965_v31, 0.0  ;;  %v2991_v0 = vsel %vm2983_vm11, %v2966_v17, 0.0  ;;  %v2992_v4 = vsel %vm2984_vm12, %v2967_v23, 0.0  ;;  %v2993_v7 = vsel %vm2985_vm13, %v2968_v22, 0.0 }
 0x23d   : > { %v3022_v10 = vsub.f32 %v4775_v52, %v4783_v60  ;;  %v2994_v12 = vsel %vm2986_vm14, %v2969_v41, 0.0  ;;  %v2995_v13 = vsel %vm2987_vm15, %v2970_v45, 0.0  ;;  %v6994_v14 = vadd.f32 %v2988_v1, %v6945_v6  ;;  %v4791_v52 = vld [vmem:[%s5439_s26 + $0x540] sm:$0xff] }
 0x23e   : > { %v3023_v27 = vsub.f32 %v4776_v38, %v4784_v57  ;;  %v7000_v19 = vadd.f32 %v2989_v2, %v6951_v33  ;;  %v7003_v58 = vadd.f32 %v2990_v3, %v6954_v21  ;;  %v7006_v24 = vadd.f32 %v2991_v0, %v6957_v35  ;;  %v4792_v38 = vld [vmem:[%s5439_s26 + $0x548] sm:$0xff]  ;;  %v4799_v60 = vld [vmem:[%s5445_s20 + $0x540] sm:$0xff] }
 0x23f   : > { %v7009_v16 = vadd.f32 %v2992_v4, %v6960_v28  ;;  %v7012_v32 = vadd.f32 %v2993_v7, %v6963_v25  ;;  %v3024_v6 = vsub.f32 %v4777_v61, %v4785_v8  ;;  %v3025_v29 = vsub.f32 %v4778_v55, %v4786_v9  ;;  %v4793_v61 = vld [vmem:[%s5439_s26 + $0x550] sm:$0xff]  ;;  %v4794_v55 = vld [vmem:[%s5439_s26 + $0x558] sm:$0xff]  ;;  %v4800_v57 = vld [vmem:[%s5445_s20 + $0x548] sm:$0xff] }
 0x240   : > { %v3026_v53 = vsub.f32 %v4779_v62, %v4787_v5  ;;  %v3027_v31 = vsub.f32 %v4780_v48, %v4788_v49  ;;  %v3028_v17 = vsub.f32 %v4781_v44, %v4789_v11  ;;  %v3029_v23 = vsub.f32 %v4782_v63, %v4790_v26  ;;  %v4795_v62 = vld [vmem:[%s5439_s26 + $0x560] sm:$0xff]  ;;  %v4796_v48 = vld [vmem:[%s5439_s26 + $0x568] sm:$0xff]  ;;  %v4797_v44 = vld [vmem:[%s5439_s26 + $0x570] sm:$0xff] }
 0x241   : > { %v3030_v33 = vand.u32 2147483647, %v3022_v10  ;;  %v7015_v22 = vadd.f32 %v2994_v12, %v6966_v18  ;;  %v3031_v21 = vand.u32 2147483647, %v3023_v27  ;;  %v3032_v35 = vand.u32 2147483647, %v3024_v6 }
 0x242   : > { %v3033_v41 = vand.u32 2147483647, %v3025_v29  ;;  %v7018_v28 = vadd.f32 %v2995_v13, %v6969_v15  ;;  %v3034_v45 = vand.u32 2147483647, %v3026_v53  ;;  %v3035_v25 = vand.u32 2147483647, %v3027_v31 }
 0x243   : > { %v3036_v39 = vand.u32 2147483647, %v3028_v17  ;;  %v3037_v30 = vand.u32 2147483647, %v3029_v23  ;;  %v3039_v54 = vadd.s32 1280, %v6029_v34  ;;  %v3040_v20 = vadd.s32 1280, %v6031_v36 }
 0x244   : > { %v3041_v18 = vadd.s32 1280, %v6033_v37  ;;  %v3042_v43 = vadd.s32 1280, %v6035_v42  ;;  %v3043_v50 = vadd.s32 1280, %v6040_v46  ;;  %v3044_v15 = vadd.s32 1280, %v6042_v51  ;;  %v4798_v63 = vld [vmem:[%s5439_s26 + $0x578] sm:$0xff]  ;;  %v4801_v8 = vld [vmem:[%s5445_s20 + $0x550] sm:$0xff] }
 0x245   : > { %v3045_v56 = vadd.s32 1280, %v6044_v40  ;;  %v3046_v59 = vadd.s32 1280, %v6050_v47  ;;  %vm3047_vm0 = vcmp.lt.s32.totalorder %v3039_v54, 2592  ;;  %vm3048_vm1 = vcmp.lt.s32.totalorder %v3040_v20, 2592  ;;  %v4802_v9 = vld [vmem:[%s5445_s20 + $0x558] sm:$0xff]  ;;  %v4803_v5 = vld [vmem:[%s5445_s20 + $0x560] sm:$0xff] }
 0x246   : > { %vm3049_vm2 = vcmp.lt.s32.totalorder %v3041_v18, 2592  ;;  %vm3050_vm3 = vcmp.lt.s32.totalorder %v3042_v43, 2592  ;;  %vm3051_vm4 = vcmp.lt.s32.totalorder %v3043_v50, 2592  ;;  %vm3052_vm5 = vcmp.lt.s32.totalorder %v3044_v15, 2592  ;;  %v4804_v11 = vld [vmem:[%s5445_s20 + $0x568] sm:$0xff]  ;;  %v4805_v26 = vld [vmem:[%s5445_s20 + $0x570] sm:$0xff] }
 0x247   : > { %vm3053_vm6 = vcmp.lt.s32.totalorder %v3045_v56, 2592  ;;  %vm3054_vm7 = vcmp.lt.s32.totalorder %v3046_v59, 2592  ;;  %v3055_v1 = vsel %vm3047_vm0, %v3030_v33, 0.0  ;;  %v3056_v2 = vsel %vm3048_vm1, %v3031_v21, 0.0  ;;  %v4806_v27 = vld [vmem:[%s5445_s20 + $0x578] sm:$0xff] }
 0x248   : > { %v3057_v3 = vsel %vm3049_vm2, %v3032_v35, 0.0  ;;  %v3058_v0 = vsel %vm3050_vm3, %v3033_v41, 0.0  ;;  %v3059_v4 = vsel %vm3051_vm4, %v3034_v45, 0.0  ;;  %v3060_v7 = vsel %vm3052_vm5, %v3035_v25, 0.0 }
 0x249   : > { %v3089_v10 = vsub.f32 %v4791_v52, %v4799_v60  ;;  %v3061_v12 = vsel %vm3053_vm6, %v3036_v39, 0.0  ;;  %v3062_v13 = vsel %vm3054_vm7, %v3037_v30, 0.0  ;;  %v7043_v49 = vadd.f32 %v3055_v1, %v6994_v14  ;;  %v4807_v52 = vld [vmem:[%s5439_s26 + $0x580] sm:$0xff] }
 0x24a   : > { %v3090_v6 = vsub.f32 %v4792_v38, %v4800_v57  ;;  %v7049_v29 = vadd.f32 %v3056_v2, %v7000_v19  ;;  %v7052_v53 = vadd.f32 %v3057_v3, %v7003_v58  ;;  %v7055_v31 = vadd.f32 %v3058_v0, %v7006_v24  ;;  %v4808_v38 = vld [vmem:[%s5439_s26 + $0x588] sm:$0xff]  ;;  %v4815_v60 = vld [vmem:[%s5445_s20 + $0x580] sm:$0xff] }
 0x24b   : > { %v7058_v17 = vadd.f32 %v3059_v4, %v7009_v16  ;;  %v7061_v23 = vadd.f32 %v3060_v7, %v7012_v32  ;;  %v3091_v14 = vsub.f32 %v4793_v61, %v4801_v8  ;;  %v3092_v33 = vsub.f32 %v4794_v55, %v4802_v9  ;;  %v4809_v61 = vld [vmem:[%s5439_s26 + $0x590] sm:$0xff]  ;;  %v4810_v55 = vld [vmem:[%s5439_s26 + $0x598] sm:$0xff]  ;;  %v4816_v57 = vld [vmem:[%s5445_s20 + $0x588] sm:$0xff] }
 0x24c   : > { %v3093_v21 = vsub.f32 %v4795_v62, %v4803_v5  ;;  %v3094_v35 = vsub.f32 %v4796_v48, %v4804_v11  ;;  %v3095_v41 = vsub.f32 %v4797_v44, %v4805_v26  ;;  %v3096_v45 = vsub.f32 %v4798_v63, %v4806_v27  ;;  %v4811_v62 = vld [vmem:[%s5439_s26 + $0x5a0] sm:$0xff]  ;;  %v4812_v48 = vld [vmem:[%s5439_s26 + $0x5a8] sm:$0xff]  ;;  %v4813_v44 = vld [vmem:[%s5439_s26 + $0x5b0] sm:$0xff] }
 0x24d   : > { %v3097_v19 = vand.u32 2147483647, %v3089_v10  ;;  %v7064_v25 = vadd.f32 %v3061_v12, %v7015_v22  ;;  %v3098_v58 = vand.u32 2147483647, %v3090_v6  ;;  %v3099_v24 = vand.u32 2147483647, %v3091_v14 }
 0x24e   : > { %v3100_v39 = vand.u32 2147483647, %v3092_v33  ;;  %v7067_v16 = vadd.f32 %v3062_v13, %v7018_v28  ;;  %v3101_v30 = vand.u32 2147483647, %v3093_v21  ;;  %v3102_v32 = vand.u32 2147483647, %v3094_v35 }
 0x24f   : > { %v3103_v54 = vand.u32 2147483647, %v3095_v41  ;;  %v3104_v20 = vand.u32 2147483647, %v3096_v45  ;;  %v3106_v18 = vadd.s32 1344, %v6029_v34  ;;  %v3107_v43 = vadd.s32 1344, %v6031_v36 }
 0x250   : > { %v3108_v22 = vadd.s32 1344, %v6033_v37  ;;  %v3109_v50 = vadd.s32 1344, %v6035_v42  ;;  %v3110_v15 = vadd.s32 1344, %v6040_v46  ;;  %v3111_v28 = vadd.s32 1344, %v6042_v51  ;;  %v4814_v63 = vld [vmem:[%s5439_s26 + $0x5b8] sm:$0xff]  ;;  %v4817_v8 = vld [vmem:[%s5445_s20 + $0x590] sm:$0xff] }
 0x251   : > { %v3112_v56 = vadd.s32 1344, %v6044_v40  ;;  %v3113_v59 = vadd.s32 1344, %v6050_v47  ;;  %vm3114_vm8 = vcmp.lt.s32.totalorder %v3106_v18, 2592  ;;  %vm3115_vm9 = vcmp.lt.s32.totalorder %v3107_v43, 2592  ;;  %v4818_v9 = vld [vmem:[%s5445_s20 + $0x598] sm:$0xff]  ;;  %v4819_v5 = vld [vmem:[%s5445_s20 + $0x5a0] sm:$0xff] }
 0x252   : > { %vm3116_vm10 = vcmp.lt.s32.totalorder %v3108_v22, 2592  ;;  %vm3117_vm11 = vcmp.lt.s32.totalorder %v3109_v50, 2592  ;;  %vm3118_vm12 = vcmp.lt.s32.totalorder %v3110_v15, 2592  ;;  %vm3119_vm13 = vcmp.lt.s32.totalorder %v3111_v28, 2592  ;;  %v4820_v26 = vld [vmem:[%s5445_s20 + $0x5a8] sm:$0xff]  ;;  %v4821_v27 = vld [vmem:[%s5445_s20 + $0x5b0] sm:$0xff] }
 0x253   : > { %vm3120_vm14 = vcmp.lt.s32.totalorder %v3112_v56, 2592  ;;  %vm3121_vm15 = vcmp.lt.s32.totalorder %v3113_v59, 2592  ;;  %v3122_v1 = vsel %vm3114_vm8, %v3097_v19, 0.0  ;;  %v3123_v2 = vsel %vm3115_vm9, %v3098_v58, 0.0  ;;  %v4822_v6 = vld [vmem:[%s5445_s20 + $0x5b8] sm:$0xff] }
 0x254   : > { %v3124_v3 = vsel %vm3116_vm10, %v3099_v24, 0.0  ;;  %v3125_v0 = vsel %vm3117_vm11, %v3100_v39, 0.0  ;;  %v3126_v4 = vsel %vm3118_vm12, %v3101_v30, 0.0  ;;  %v3127_v7 = vsel %vm3119_vm13, %v3102_v32, 0.0 }
 0x255   : > { %v3156_v10 = vsub.f32 %v4807_v52, %v4815_v60  ;;  %v3128_v12 = vsel %vm3120_vm14, %v3103_v54, 0.0  ;;  %v3129_v13 = vsel %vm3121_vm15, %v3104_v20, 0.0  ;;  %v7092_v11 = vadd.f32 %v3122_v1, %v7043_v49  ;;  %v4823_v52 = vld [vmem:[%s5439_s26 + $0x5c0] sm:$0xff] }
 0x256   : > { %v3157_v14 = vsub.f32 %v4808_v38, %v4816_v57  ;;  %v7098_v33 = vadd.f32 %v3123_v2, %v7049_v29  ;;  %v7101_v21 = vadd.f32 %v3124_v3, %v7052_v53  ;;  %v7104_v35 = vadd.f32 %v3125_v0, %v7055_v31  ;;  %v4824_v38 = vld [vmem:[%s5439_s26 + $0x5c8] sm:$0xff]  ;;  %v4831_v60 = vld [vmem:[%s5445_s20 + $0x5c0] sm:$0xff] }
 0x257   : > { %v7107_v41 = vadd.f32 %v3126_v4, %v7058_v17  ;;  %v7110_v45 = vadd.f32 %v3127_v7, %v7061_v23  ;;  %v3158_v49 = vsub.f32 %v4809_v61, %v4817_v8  ;;  %v3159_v19 = vsub.f32 %v4810_v55, %v4818_v9  ;;  %v4825_v61 = vld [vmem:[%s5439_s26 + $0x5d0] sm:$0xff]  ;;  %v4826_v55 = vld [vmem:[%s5439_s26 + $0x5d8] sm:$0xff]  ;;  %v4832_v57 = vld [vmem:[%s5445_s20 + $0x5c8] sm:$0xff] }
 0x258   : > { %v3160_v58 = vsub.f32 %v4811_v62, %v4819_v5  ;;  %v3161_v24 = vsub.f32 %v4812_v48, %v4820_v26  ;;  %v3162_v39 = vsub.f32 %v4813_v44, %v4821_v27  ;;  %v3163_v30 = vsub.f32 %v4814_v63, %v4822_v6  ;;  %v4827_v62 = vld [vmem:[%s5439_s26 + $0x5e0] sm:$0xff]  ;;  %v4828_v48 = vld [vmem:[%s5439_s26 + $0x5e8] sm:$0xff]  ;;  %v4829_v44 = vld [vmem:[%s5439_s26 + $0x5f0] sm:$0xff] }
 0x259   : > { %v3164_v29 = vand.u32 2147483647, %v3156_v10  ;;  %v7113_v32 = vadd.f32 %v3128_v12, %v7064_v25  ;;  %v3165_v53 = vand.u32 2147483647, %v3157_v14  ;;  %v3166_v31 = vand.u32 2147483647, %v3158_v49 }
 0x25a   : > { %v3167_v54 = vand.u32 2147483647, %v3159_v19  ;;  %v7116_v17 = vadd.f32 %v3129_v13, %v7067_v16  ;;  %v3168_v20 = vand.u32 2147483647, %v3160_v58  ;;  %v3169_v23 = vand.u32 2147483647, %v3161_v24 }
 0x25b   : > { %v3170_v18 = vand.u32 2147483647, %v3162_v39  ;;  %v3171_v43 = vand.u32 2147483647, %v3163_v30  ;;  %v3173_v22 = vadd.s32 1408, %v6029_v34  ;;  %v3174_v50 = vadd.s32 1408, %v6031_v36 }
 0x25c   : > { %v3175_v25 = vadd.s32 1408, %v6033_v37  ;;  %v3176_v15 = vadd.s32 1408, %v6035_v42  ;;  %v3177_v28 = vadd.s32 1408, %v6040_v46  ;;  %v3178_v16 = vadd.s32 1408, %v6042_v51  ;;  %v4830_v63 = vld [vmem:[%s5439_s26 + $0x5f8] sm:$0xff]  ;;  %v4833_v8 = vld [vmem:[%s5445_s20 + $0x5d0] sm:$0xff] }
 0x25d   : > { %v3179_v56 = vadd.s32 1408, %v6044_v40  ;;  %v3180_v59 = vadd.s32 1408, %v6050_v47  ;;  %vm3181_vm0 = vcmp.lt.s32.totalorder %v3173_v22, 2592  ;;  %vm3182_vm1 = vcmp.lt.s32.totalorder %v3174_v50, 2592  ;;  %v4834_v9 = vld [vmem:[%s5445_s20 + $0x5d8] sm:$0xff]  ;;  %v4835_v5 = vld [vmem:[%s5445_s20 + $0x5e0] sm:$0xff] }
 0x25e   : > { %vm3183_vm2 = vcmp.lt.s32.totalorder %v3175_v25, 2592  ;;  %vm3184_vm3 = vcmp.lt.s32.totalorder %v3176_v15, 2592  ;;  %vm3185_vm4 = vcmp.lt.s32.totalorder %v3177_v28, 2592  ;;  %vm3186_vm5 = vcmp.lt.s32.totalorder %v3178_v16, 2592  ;;  %v4836_v27 = vld [vmem:[%s5445_s20 + $0x5e8] sm:$0xff]  ;;  %v4837_v6 = vld [vmem:[%s5445_s20 + $0x5f0] sm:$0xff] }
 0x25f   : > { %vm3187_vm6 = vcmp.lt.s32.totalorder %v3179_v56, 2592  ;;  %vm3188_vm7 = vcmp.lt.s32.totalorder %v3180_v59, 2592  ;;  %v3189_v1 = vsel %vm3181_vm0, %v3164_v29, 0.0  ;;  %v3190_v2 = vsel %vm3182_vm1, %v3165_v53, 0.0  ;;  %v4838_v14 = vld [vmem:[%s5445_s20 + $0x5f8] sm:$0xff] }
 0x260   : > { %v3191_v3 = vsel %vm3183_vm2, %v3166_v31, 0.0  ;;  %v3192_v0 = vsel %vm3184_vm3, %v3167_v54, 0.0  ;;  %v3193_v4 = vsel %vm3185_vm4, %v3168_v20, 0.0  ;;  %v3194_v7 = vsel %vm3186_vm5, %v3169_v23, 0.0 }
 0x261   : > { %v3223_v10 = vsub.f32 %v4823_v52, %v4831_v60  ;;  %v3195_v12 = vsel %vm3187_vm6, %v3170_v18, 0.0  ;;  %v3196_v13 = vsel %vm3188_vm7, %v3171_v43, 0.0  ;;  %v7141_v26 = vadd.f32 %v3189_v1, %v7092_v11  ;;  %v4839_v52 = vld [vmem:[%s5439_s26 + $0x600] sm:$0xff] }
 0x262   : > { %v3224_v49 = vsub.f32 %v4824_v38, %v4832_v57  ;;  %v7147_v19 = vadd.f32 %v3190_v2, %v7098_v33  ;;  %v7150_v58 = vadd.f32 %v3191_v3, %v7101_v21  ;;  %v7153_v24 = vadd.f32 %v3192_v0, %v7104_v35  ;;  %v4840_v38 = vld [vmem:[%s5439_s26 + $0x608] sm:$0xff]  ;;  %v4847_v60 = vld [vmem:[%s5445_s20 + $0x600] sm:$0xff] }
 0x263   : > { %v7156_v39 = vadd.f32 %v3193_v4, %v7107_v41  ;;  %v7159_v30 = vadd.f32 %v3194_v7, %v7110_v45  ;;  %v3225_v11 = vsub.f32 %v4825_v61, %v4833_v8  ;;  %v3226_v29 = vsub.f32 %v4826_v55, %v4834_v9  ;;  %v4841_v61 = vld [vmem:[%s5439_s26 + $0x610] sm:$0xff]  ;;  %v4842_v55 = vld [vmem:[%s5439_s26 + $0x618] sm:$0xff]  ;;  %v4848_v57 = vld [vmem:[%s5445_s20 + $0x608] sm:$0xff] }
 0x264   : > { %v3227_v53 = vsub.f32 %v4827_v62, %v4835_v5  ;;  %v3228_v31 = vsub.f32 %v4828_v48, %v4836_v27  ;;  %v3229_v54 = vsub.f32 %v4829_v44, %v4837_v6  ;;  %v3230_v20 = vsub.f32 %v4830_v63, %v4838_v14  ;;  %v4843_v62 = vld [vmem:[%s5439_s26 + $0x620] sm:$0xff]  ;;  %v4844_v48 = vld [vmem:[%s5439_s26 + $0x628] sm:$0xff]  ;;  %v4845_v44 = vld [vmem:[%s5439_s26 + $0x630] sm:$0xff] }
 0x265   : > { %v3231_v33 = vand.u32 2147483647, %v3223_v10  ;;  %v7162_v23 = vadd.f32 %v3195_v12, %v7113_v32  ;;  %v3232_v21 = vand.u32 2147483647, %v3224_v49  ;;  %v3233_v35 = vand.u32 2147483647, %v3225_v11 }
 0x266   : > { %v3234_v18 = vand.u32 2147483647, %v3226_v29  ;;  %v7165_v41 = vadd.f32 %v3196_v13, %v7116_v17  ;;  %v3235_v43 = vand.u32 2147483647, %v3227_v53  ;;  %v3236_v45 = vand.u32 2147483647, %v3228_v31 }
 0x267   : > { %v3237_v22 = vand.u32 2147483647, %v3229_v54  ;;  %v3238_v50 = vand.u32 2147483647, %v3230_v20  ;;  %v3240_v25 = vadd.s32 1472, %v6029_v34  ;;  %v3241_v15 = vadd.s32 1472, %v6031_v36 }
 0x268   : > { %v3242_v32 = vadd.s32 1472, %v6033_v37  ;;  %v3243_v28 = vadd.s32 1472, %v6035_v42  ;;  %v3244_v16 = vadd.s32 1472, %v6040_v46  ;;  %v3245_v17 = vadd.s32 1472, %v6042_v51  ;;  %v4846_v63 = vld [vmem:[%s5439_s26 + $0x638] sm:$0xff]  ;;  %v4849_v8 = vld [vmem:[%s5445_s20 + $0x610] sm:$0xff] }
 0x269   : > { %v3246_v56 = vadd.s32 1472, %v6044_v40  ;;  %v3247_v59 = vadd.s32 1472, %v6050_v47  ;;  %vm3248_vm8 = vcmp.lt.s32.totalorder %v3240_v25, 2592  ;;  %vm3249_vm9 = vcmp.lt.s32.totalorder %v3241_v15, 2592  ;;  %v4850_v9 = vld [vmem:[%s5445_s20 + $0x618] sm:$0xff]  ;;  %v4851_v5 = vld [vmem:[%s5445_s20 + $0x620] sm:$0xff] }
 0x26a   : > { %vm3250_vm10 = vcmp.lt.s32.totalorder %v3242_v32, 2592  ;;  %vm3251_vm11 = vcmp.lt.s32.totalorder %v3243_v28, 2592  ;;  %vm3252_vm12 = vcmp.lt.s32.totalorder %v3244_v16, 2592  ;;  %vm3253_vm13 = vcmp.lt.s32.totalorder %v3245_v17, 2592  ;;  %v4852_v6 = vld [vmem:[%s5445_s20 + $0x628] sm:$0xff]  ;;  %v4853_v14 = vld [vmem:[%s5445_s20 + $0x630] sm:$0xff] }
 0x26b   : > { %vm3254_vm14 = vcmp.lt.s32.totalorder %v3246_v56, 2592  ;;  %vm3255_vm15 = vcmp.lt.s32.totalorder %v3247_v59, 2592  ;;  %v3256_v1 = vsel %vm3248_vm8, %v3231_v33, 0.0  ;;  %v3257_v2 = vsel %vm3249_vm9, %v3232_v21, 0.0  ;;  %v4854_v49 = vld [vmem:[%s5445_s20 + $0x638] sm:$0xff] }
 0x26c   : > { %v3258_v3 = vsel %vm3250_vm10, %v3233_v35, 0.0  ;;  %v3259_v0 = vsel %vm3251_vm11, %v3234_v18, 0.0  ;;  %v3260_v4 = vsel %vm3252_vm12, %v3235_v43, 0.0  ;;  %v3261_v7 = vsel %vm3253_vm13, %v3236_v45, 0.0 }
 0x26d   : > { %v3290_v10 = vsub.f32 %v4839_v52, %v4847_v60  ;;  %v3262_v12 = vsel %vm3254_vm14, %v3237_v22, 0.0  ;;  %v3263_v13 = vsel %vm3255_vm15, %v3238_v50, 0.0  ;;  %v7190_v27 = vadd.f32 %v3256_v1, %v7141_v26  ;;  %v4855_v52 = vld [vmem:[%s5439_s26 + $0x640] sm:$0xff] }
 0x26e   : > { %v3291_v11 = vsub.f32 %v4840_v38, %v4848_v57  ;;  %v7196_v29 = vadd.f32 %v3257_v2, %v7147_v19  ;;  %v7199_v53 = vadd.f32 %v3258_v3, %v7150_v58  ;;  %v7202_v31 = vadd.f32 %v3259_v0, %v7153_v24  ;;  %v4856_v38 = vld [vmem:[%s5439_s26 + $0x648] sm:$0xff]  ;;  %v4863_v60 = vld [vmem:[%s5445_s20 + $0x640] sm:$0xff] }
 0x26f   : > { %v7205_v54 = vadd.f32 %v3260_v4, %v7156_v39  ;;  %v7208_v20 = vadd.f32 %v3261_v7, %v7159_v30  ;;  %v3292_v26 = vsub.f32 %v4841_v61, %v4849_v8  ;;  %v3293_v33 = vsub.f32 %v4842_v55, %v4850_v9  ;;  %v4857_v61 = vld [vmem:[%s5439_s26 + $0x650] sm:$0xff]  ;;  %v4858_v55 = vld [vmem:[%s5439_s26 + $0x658] sm:$0xff]  ;;  %v4864_v57 = vld [vmem:[%s5445_s20 + $0x648] sm:$0xff] }
 0x270   : > { %v3294_v21 = vsub.f32 %v4843_v62, %v4851_v5  ;;  %v3295_v35 = vsub.f32 %v4844_v48, %v4852_v6  ;;  %v3296_v18 = vsub.f32 %v4845_v44, %v4853_v14  ;;  %v3297_v43 = vsub.f32 %v4846_v63, %v4854_v49  ;;  %v4859_v62 = vld [vmem:[%s5439_s26 + $0x660] sm:$0xff]  ;;  %v4860_v48 = vld [vmem:[%s5439_s26 + $0x668] sm:$0xff]  ;;  %v4861_v44 = vld [vmem:[%s5439_s26 + $0x670] sm:$0xff] }
 0x271   : > { %v3298_v19 = vand.u32 2147483647, %v3290_v10  ;;  %v7211_v45 = vadd.f32 %v3262_v12, %v7162_v23  ;;  %v3299_v58 = vand.u32 2147483647, %v3291_v11  ;;  %v3300_v24 = vand.u32 2147483647, %v3292_v26 }
 0x272   : > { %v3301_v22 = vand.u32 2147483647, %v3293_v33  ;;  %v7214_v39 = vadd.f32 %v3263_v13, %v7165_v41  ;;  %v3302_v50 = vand.u32 2147483647, %v3294_v21  ;;  %v3303_v30 = vand.u32 2147483647, %v3295_v35 }
 0x273   : > { %v3304_v25 = vand.u32 2147483647, %v3296_v18  ;;  %v3305_v15 = vand.u32 2147483647, %v3297_v43  ;;  %v3307_v32 = vadd.s32 1536, %v6029_v34  ;;  %v3308_v28 = vadd.s32 1536, %v6031_v36 }
 0x274   : > { %v3309_v23 = vadd.s32 1536, %v6033_v37  ;;  %v3310_v16 = vadd.s32 1536, %v6035_v42  ;;  %v3311_v17 = vadd.s32 1536, %v6040_v46  ;;  %v3312_v41 = vadd.s32 1536, %v6042_v51  ;;  %v4862_v63 = vld [vmem:[%s5439_s26 + $0x678] sm:$0xff]  ;;  %v4865_v8 = vld [vmem:[%s5445_s20 + $0x650] sm:$0xff] }
 0x275   : > { %v3313_v56 = vadd.s32 1536, %v6044_v40  ;;  %v3314_v59 = vadd.s32 1536, %v6050_v47  ;;  %vm3315_vm0 = vcmp.lt.s32.totalorder %v3307_v32, 2592  ;;  %vm3316_vm1 = vcmp.lt.s32.totalorder %v3308_v28, 2592  ;;  %v4866_v9 = vld [vmem:[%s5445_s20 + $0x658] sm:$0xff]  ;;  %v4867_v5 = vld [vmem:[%s5445_s20 + $0x660] sm:$0xff] }
 0x276   : > { %vm3317_vm2 = vcmp.lt.s32.totalorder %v3309_v23, 2592  ;;  %vm3318_vm3 = vcmp.lt.s32.totalorder %v3310_v16, 2592  ;;  %vm3319_vm4 = vcmp.lt.s32.totalorder %v3311_v17, 2592  ;;  %vm3320_vm5 = vcmp.lt.s32.totalorder %v3312_v41, 2592  ;;  %v4868_v14 = vld [vmem:[%s5445_s20 + $0x668] sm:$0xff]  ;;  %v4869_v49 = vld [vmem:[%s5445_s20 + $0x670] sm:$0xff] }
 0x277   : > { %vm3321_vm6 = vcmp.lt.s32.totalorder %v3313_v56, 2592  ;;  %vm3322_vm7 = vcmp.lt.s32.totalorder %v3314_v59, 2592  ;;  %v3323_v1 = vsel %vm3315_vm0, %v3298_v19, 0.0  ;;  %v3324_v2 = vsel %vm3316_vm1, %v3299_v58, 0.0  ;;  %v4870_v11 = vld [vmem:[%s5445_s20 + $0x678] sm:$0xff] }
 0x278   : > { %v3325_v3 = vsel %vm3317_vm2, %v3300_v24, 0.0  ;;  %v3326_v0 = vsel %vm3318_vm3, %v3301_v22, 0.0  ;;  %v3327_v4 = vsel %vm3319_vm4, %v3302_v50, 0.0  ;;  %v3328_v7 = vsel %vm3320_vm5, %v3303_v30, 0.0 }
 0x279   : > { %v3357_v10 = vsub.f32 %v4855_v52, %v4863_v60  ;;  %v3329_v12 = vsel %vm3321_vm6, %v3304_v25, 0.0  ;;  %v3330_v13 = vsel %vm3322_vm7, %v3305_v15, 0.0  ;;  %v7239_v6 = vadd.f32 %v3323_v1, %v7190_v27  ;;  %v4871_v52 = vld [vmem:[%s5439_s26 + $0x680] sm:$0xff] }
 0x27a   : > { %v3358_v26 = vsub.f32 %v4856_v38, %v4864_v57  ;;  %v7245_v33 = vadd.f32 %v3324_v2, %v7196_v29  ;;  %v7248_v21 = vadd.f32 %v3325_v3, %v7199_v53  ;;  %v7251_v35 = vadd.f32 %v3326_v0, %v7202_v31  ;;  %v4872_v38 = vld [vmem:[%s5439_s26 + $0x688] sm:$0xff]  ;;  %v4879_v60 = vld [vmem:[%s5445_s20 + $0x680] sm:$0xff] }
 0x27b   : > { %v7254_v18 = vadd.f32 %v3327_v4, %v7205_v54  ;;  %v7257_v43 = vadd.f32 %v3328_v7, %v7208_v20  ;;  %v3359_v27 = vsub.f32 %v4857_v61, %v4865_v8  ;;  %v3360_v19 = vsub.f32 %v4858_v55, %v4866_v9  ;;  %v4873_v61 = vld [vmem:[%s5439_s26 + $0x690] sm:$0xff]  ;;  %v4874_v55 = vld [vmem:[%s5439_s26 + $0x698] sm:$0xff]  ;;  %v4880_v57 = vld [vmem:[%s5445_s20 + $0x688] sm:$0xff] }
 0x27c   : > { %v3361_v58 = vsub.f32 %v4859_v62, %v4867_v5  ;;  %v3362_v24 = vsub.f32 %v4860_v48, %v4868_v14  ;;  %v3363_v22 = vsub.f32 %v4861_v44, %v4869_v49  ;;  %v3364_v50 = vsub.f32 %v4862_v63, %v4870_v11  ;;  %v4875_v62 = vld [vmem:[%s5439_s26 + $0x6a0] sm:$0xff]  ;;  %v4876_v48 = vld [vmem:[%s5439_s26 + $0x6a8] sm:$0xff]  ;;  %v4877_v44 = vld [vmem:[%s5439_s26 + $0x6b0] sm:$0xff] }
 0x27d   : > { %v3365_v29 = vand.u32 2147483647, %v3357_v10  ;;  %v7260_v30 = vadd.f32 %v3329_v12, %v7211_v45  ;;  %v3366_v53 = vand.u32 2147483647, %v3358_v26  ;;  %v3367_v31 = vand.u32 2147483647, %v3359_v27 }
 0x27e   : > { %v3368_v25 = vand.u32 2147483647, %v3360_v19  ;;  %v7263_v54 = vadd.f32 %v3330_v13, %v7214_v39  ;;  %v3369_v15 = vand.u32 2147483647, %v3361_v58  ;;  %v3370_v20 = vand.u32 2147483647, %v3362_v24 }
 0x27f   : > { %v3371_v32 = vand.u32 2147483647, %v3363_v22  ;;  %v3372_v28 = vand.u32 2147483647, %v3364_v50  ;;  %v3374_v23 = vadd.s32 1600, %v6029_v34  ;;  %v3375_v16 = vadd.s32 1600, %v6031_v36 }
 0x280   : > { %v3376_v45 = vadd.s32 1600, %v6033_v37  ;;  %v3377_v17 = vadd.s32 1600, %v6035_v42  ;;  %v3378_v41 = vadd.s32 1600, %v6040_v46  ;;  %v3379_v39 = vadd.s32 1600, %v6042_v51  ;;  %v4878_v63 = vld [vmem:[%s5439_s26 + $0x6b8] sm:$0xff]  ;;  %v4881_v8 = vld [vmem:[%s5445_s20 + $0x690] sm:$0xff] }
 0x281   : > { %v3380_v56 = vadd.s32 1600, %v6044_v40  ;;  %v3381_v59 = vadd.s32 1600, %v6050_v47  ;;  %vm3382_vm8 = vcmp.lt.s32.totalorder %v3374_v23, 2592  ;;  %vm3383_vm9 = vcmp.lt.s32.totalorder %v3375_v16, 2592  ;;  %v4882_v9 = vld [vmem:[%s5445_s20 + $0x698] sm:$0xff]  ;;  %v4883_v5 = vld [vmem:[%s5445_s20 + $0x6a0] sm:$0xff] }
 0x282   : > { %vm3384_vm10 = vcmp.lt.s32.totalorder %v3376_v45, 2592  ;;  %vm3385_vm11 = vcmp.lt.s32.totalorder %v3377_v17, 2592  ;;  %vm3386_vm12 = vcmp.lt.s32.totalorder %v3378_v41, 2592  ;;  %vm3387_vm13 = vcmp.lt.s32.totalorder %v3379_v39, 2592  ;;  %v4884_v49 = vld [vmem:[%s5445_s20 + $0x6a8] sm:$0xff]  ;;  %v4885_v11 = vld [vmem:[%s5445_s20 + $0x6b0] sm:$0xff] }
 0x283   : > { %vm3388_vm14 = vcmp.lt.s32.totalorder %v3380_v56, 2592  ;;  %vm3389_vm15 = vcmp.lt.s32.totalorder %v3381_v59, 2592  ;;  %v3390_v1 = vsel %vm3382_vm8, %v3365_v29, 0.0  ;;  %v3391_v2 = vsel %vm3383_vm9, %v3366_v53, 0.0  ;;  %v4886_v26 = vld [vmem:[%s5445_s20 + $0x6b8] sm:$0xff] }
 0x284   : > { %v3392_v3 = vsel %vm3384_vm10, %v3367_v31, 0.0  ;;  %v3393_v0 = vsel %vm3385_vm11, %v3368_v25, 0.0  ;;  %v3394_v4 = vsel %vm3386_vm12, %v3369_v15, 0.0  ;;  %v3395_v7 = vsel %vm3387_vm13, %v3370_v20, 0.0 }
 0x285   : > { %v3424_v10 = vsub.f32 %v4871_v52, %v4879_v60  ;;  %v3396_v12 = vsel %vm3388_vm14, %v3371_v32, 0.0  ;;  %v3397_v13 = vsel %vm3389_vm15, %v3372_v28, 0.0  ;;  %v7288_v14 = vadd.f32 %v3390_v1, %v7239_v6  ;;  %v4887_v52 = vld [vmem:[%s5439_s26 + $0x6c0] sm:$0xff] }
 0x286   : > { %v3425_v27 = vsub.f32 %v4872_v38, %v4880_v57  ;;  %v7294_v19 = vadd.f32 %v3391_v2, %v7245_v33  ;;  %v7297_v58 = vadd.f32 %v3392_v3, %v7248_v21  ;;  %v7300_v24 = vadd.f32 %v3393_v0, %v7251_v35  ;;  %v4888_v38 = vld [vmem:[%s5439_s26 + $0x6c8] sm:$0xff]  ;;  %v4895_v60 = vld [vmem:[%s5445_s20 + $0x6c0] sm:$0xff] }
 0x287   : > { %v7303_v22 = vadd.f32 %v3394_v4, %v7254_v18  ;;  %v7306_v50 = vadd.f32 %v3395_v7, %v7257_v43  ;;  %v3426_v6 = vsub.f32 %v4873_v61, %v4881_v8  ;;  %v3427_v29 = vsub.f32 %v4874_v55, %v4882_v9  ;;  %v4889_v61 = vld [vmem:[%s5439_s26 + $0x6d0] sm:$0xff]  ;;  %v4890_v55 = vld [vmem:[%s5439_s26 + $0x6d8] sm:$0xff]  ;;  %v4896_v57 = vld [vmem:[%s5445_s20 + $0x6c8] sm:$0xff] }
 0x288   : > { %v3428_v53 = vsub.f32 %v4875_v62, %v4883_v5  ;;  %v3429_v31 = vsub.f32 %v4876_v48, %v4884_v49  ;;  %v3430_v25 = vsub.f32 %v4877_v44, %v4885_v11  ;;  %v3431_v15 = vsub.f32 %v4878_v63, %v4886_v26  ;;  %v4891_v62 = vld [vmem:[%s5439_s26 + $0x6e0] sm:$0xff]  ;;  %v4892_v48 = vld [vmem:[%s5439_s26 + $0x6e8] sm:$0xff]  ;;  %v4893_v44 = vld [vmem:[%s5439_s26 + $0x6f0] sm:$0xff] }
 0x289   : > { %v3432_v33 = vand.u32 2147483647, %v3424_v10  ;;  %v7309_v20 = vadd.f32 %v3396_v12, %v7260_v30  ;;  %v3433_v21 = vand.u32 2147483647, %v3425_v27  ;;  %v3434_v35 = vand.u32 2147483647, %v3426_v6 }
 0x28a   : > { %v3435_v32 = vand.u32 2147483647, %v3427_v29  ;;  %v7312_v18 = vadd.f32 %v3397_v13, %v7263_v54  ;;  %v3436_v28 = vand.u32 2147483647, %v3428_v53  ;;  %v3437_v43 = vand.u32 2147483647, %v3429_v31 }
 0x28b   : > { %v3438_v23 = vand.u32 2147483647, %v3430_v25  ;;  %v3439_v16 = vand.u32 2147483647, %v3431_v15  ;;  %v3441_v45 = vadd.s32 1664, %v6029_v34  ;;  %v3442_v17 = vadd.s32 1664, %v6031_v36 }
 0x28c   : > { %v3443_v30 = vadd.s32 1664, %v6033_v37  ;;  %v3444_v41 = vadd.s32 1664, %v6035_v42  ;;  %v3445_v39 = vadd.s32 1664, %v6040_v46  ;;  %v3446_v54 = vadd.s32 1664, %v6042_v51  ;;  %v4894_v63 = vld [vmem:[%s5439_s26 + $0x6f8] sm:$0xff]  ;;  %v4897_v8 = vld [vmem:[%s5445_s20 + $0x6d0] sm:$0xff] }
 0x28d   : > { %v3447_v56 = vadd.s32 1664, %v6044_v40  ;;  %v3448_v59 = vadd.s32 1664, %v6050_v47  ;;  %vm3449_vm0 = vcmp.lt.s32.totalorder %v3441_v45, 2592  ;;  %vm3450_vm1 = vcmp.lt.s32.totalorder %v3442_v17, 2592  ;;  %v4898_v9 = vld [vmem:[%s5445_s20 + $0x6d8] sm:$0xff]  ;;  %v4899_v5 = vld [vmem:[%s5445_s20 + $0x6e0] sm:$0xff] }
 0x28e   : > { %vm3451_vm2 = vcmp.lt.s32.totalorder %v3443_v30, 2592  ;;  %vm3452_vm3 = vcmp.lt.s32.totalorder %v3444_v41, 2592  ;;  %vm3453_vm4 = vcmp.lt.s32.totalorder %v3445_v39, 2592  ;;  %vm3454_vm5 = vcmp.lt.s32.totalorder %v3446_v54, 2592  ;;  %v4900_v11 = vld [vmem:[%s5445_s20 + $0x6e8] sm:$0xff]  ;;  %v4901_v26 = vld [vmem:[%s5445_s20 + $0x6f0] sm:$0xff] }
 0x28f   : > { %vm3455_vm6 = vcmp.lt.s32.totalorder %v3447_v56, 2592  ;;  %vm3456_vm7 = vcmp.lt.s32.totalorder %v3448_v59, 2592  ;;  %v3457_v1 = vsel %vm3449_vm0, %v3432_v33, 0.0  ;;  %v3458_v2 = vsel %vm3450_vm1, %v3433_v21, 0.0  ;;  %v4902_v27 = vld [vmem:[%s5445_s20 + $0x6f8] sm:$0xff] }
 0x290   : > { %v3459_v3 = vsel %vm3451_vm2, %v3434_v35, 0.0  ;;  %v3460_v0 = vsel %vm3452_vm3, %v3435_v32, 0.0  ;;  %v3461_v4 = vsel %vm3453_vm4, %v3436_v28, 0.0  ;;  %v3462_v7 = vsel %vm3454_vm5, %v3437_v43, 0.0 }
 0x291   : > { %v3491_v10 = vsub.f32 %v4887_v52, %v4895_v60  ;;  %v3463_v12 = vsel %vm3455_vm6, %v3438_v23, 0.0  ;;  %v3464_v13 = vsel %vm3456_vm7, %v3439_v16, 0.0  ;;  %v7337_v49 = vadd.f32 %v3457_v1, %v7288_v14  ;;  %v4903_v52 = vld [vmem:[%s5439_s26 + $0x700] sm:$0xff] }
 0x292   : > { %v3492_v6 = vsub.f32 %v4888_v38, %v4896_v57  ;;  %v7343_v29 = vadd.f32 %v3458_v2, %v7294_v19  ;;  %v7346_v53 = vadd.f32 %v3459_v3, %v7297_v58  ;;  %v7349_v31 = vadd.f32 %v3460_v0, %v7300_v24  ;;  %v4904_v38 = vld [vmem:[%s5439_s26 + $0x708] sm:$0xff]  ;;  %v4911_v60 = vld [vmem:[%s5445_s20 + $0x700] sm:$0xff] }
 0x293   : > { %v7352_v25 = vadd.f32 %v3461_v4, %v7303_v22  ;;  %v7355_v15 = vadd.f32 %v3462_v7, %v7306_v50  ;;  %v3493_v14 = vsub.f32 %v4889_v61, %v4897_v8  ;;  %v3494_v33 = vsub.f32 %v4890_v55, %v4898_v9  ;;  %v4905_v61 = vld [vmem:[%s5439_s26 + $0x710] sm:$0xff]  ;;  %v4906_v55 = vld [vmem:[%s5439_s26 + $0x718] sm:$0xff]  ;;  %v4912_v57 = vld [vmem:[%s5445_s20 + $0x708] sm:$0xff] }
 0x294   : > { %v3495_v21 = vsub.f32 %v4891_v62, %v4899_v5  ;;  %v3496_v35 = vsub.f32 %v4892_v48, %v4900_v11  ;;  %v3497_v32 = vsub.f32 %v4893_v44, %v4901_v26  ;;  %v3498_v28 = vsub.f32 %v4894_v63, %v4902_v27  ;;  %v4907_v62 = vld [vmem:[%s5439_s26 + $0x720] sm:$0xff]  ;;  %v4908_v48 = vld [vmem:[%s5439_s26 + $0x728] sm:$0xff]  ;;  %v4909_v44 = vld [vmem:[%s5439_s26 + $0x730] sm:$0xff] }
 0x295   : > { %v3499_v19 = vand.u32 2147483647, %v3491_v10  ;;  %v7358_v43 = vadd.f32 %v3463_v12, %v7309_v20  ;;  %v3500_v58 = vand.u32 2147483647, %v3492_v6  ;;  %v3501_v24 = vand.u32 2147483647, %v3493_v14 }
 0x296   : > { %v3502_v23 = vand.u32 2147483647, %v3494_v33  ;;  %v7361_v22 = vadd.f32 %v3464_v13, %v7312_v18  ;;  %v3503_v16 = vand.u32 2147483647, %v3495_v21  ;;  %v3504_v50 = vand.u32 2147483647, %v3496_v35 }
 0x297   : > { %v3505_v45 = vand.u32 2147483647, %v3497_v32  ;;  %v3506_v17 = vand.u32 2147483647, %v3498_v28  ;;  %v3508_v30 = vadd.s32 1728, %v6029_v34  ;;  %v3509_v41 = vadd.s32 1728, %v6031_v36 }
 0x298   : > { %v3510_v20 = vadd.s32 1728, %v6033_v37  ;;  %v3511_v39 = vadd.s32 1728, %v6035_v42  ;;  %v3512_v54 = vadd.s32 1728, %v6040_v46  ;;  %v3513_v18 = vadd.s32 1728, %v6042_v51  ;;  %v4910_v63 = vld [vmem:[%s5439_s26 + $0x738] sm:$0xff]  ;;  %v4913_v8 = vld [vmem:[%s5445_s20 + $0x710] sm:$0xff] }
 0x299   : > { %v3514_v56 = vadd.s32 1728, %v6044_v40  ;;  %v3515_v59 = vadd.s32 1728, %v6050_v47  ;;  %vm3516_vm8 = vcmp.lt.s32.totalorder %v3508_v30, 2592  ;;  %vm3517_vm9 = vcmp.lt.s32.totalorder %v3509_v41, 2592  ;;  %v4914_v9 = vld [vmem:[%s5445_s20 + $0x718] sm:$0xff]  ;;  %v4915_v5 = vld [vmem:[%s5445_s20 + $0x720] sm:$0xff] }
 0x29a   : > { %vm3518_vm10 = vcmp.lt.s32.totalorder %v3510_v20, 2592  ;;  %vm3519_vm11 = vcmp.lt.s32.totalorder %v3511_v39, 2592  ;;  %vm3520_vm12 = vcmp.lt.s32.totalorder %v3512_v54, 2592  ;;  %vm3521_vm13 = vcmp.lt.s32.totalorder %v3513_v18, 2592  ;;  %v4916_v26 = vld [vmem:[%s5445_s20 + $0x728] sm:$0xff]  ;;  %v4917_v27 = vld [vmem:[%s5445_s20 + $0x730] sm:$0xff] }
 0x29b   : > { %vm3522_vm14 = vcmp.lt.s32.totalorder %v3514_v56, 2592  ;;  %vm3523_vm15 = vcmp.lt.s32.totalorder %v3515_v59, 2592  ;;  %v3524_v1 = vsel %vm3516_vm8, %v3499_v19, 0.0  ;;  %v3525_v2 = vsel %vm3517_vm9, %v3500_v58, 0.0  ;;  %v4918_v6 = vld [vmem:[%s5445_s20 + $0x738] sm:$0xff] }
 0x29c   : > { %v3526_v3 = vsel %vm3518_vm10, %v3501_v24, 0.0  ;;  %v3527_v0 = vsel %vm3519_vm11, %v3502_v23, 0.0  ;;  %v3528_v4 = vsel %vm3520_vm12, %v3503_v16, 0.0  ;;  %v3529_v7 = vsel %vm3521_vm13, %v3504_v50, 0.0 }
 0x29d   : > { %v3558_v10 = vsub.f32 %v4903_v52, %v4911_v60  ;;  %v3530_v12 = vsel %vm3522_vm14, %v3505_v45, 0.0  ;;  %v3531_v13 = vsel %vm3523_vm15, %v3506_v17, 0.0  ;;  %v7386_v11 = vadd.f32 %v3524_v1, %v7337_v49  ;;  %v4919_v52 = vld [vmem:[%s5439_s26 + $0x740] sm:$0xff] }
 0x29e   : > { %v3559_v14 = vsub.f32 %v4904_v38, %v4912_v57  ;;  %v7392_v33 = vadd.f32 %v3525_v2, %v7343_v29  ;;  %v7395_v21 = vadd.f32 %v3526_v3, %v7346_v53  ;;  %v7398_v35 = vadd.f32 %v3527_v0, %v7349_v31  ;;  %v4920_v38 = vld [vmem:[%s5439_s26 + $0x748] sm:$0xff]  ;;  %v4927_v60 = vld [vmem:[%s5445_s20 + $0x740] sm:$0xff] }
 0x29f   : > { %v7401_v32 = vadd.f32 %v3528_v4, %v7352_v25  ;;  %v7404_v28 = vadd.f32 %v3529_v7, %v7355_v15  ;;  %v3560_v49 = vsub.f32 %v4905_v61, %v4913_v8  ;;  %v3561_v19 = vsub.f32 %v4906_v55, %v4914_v9  ;;  %v4921_v61 = vld [vmem:[%s5439_s26 + $0x750] sm:$0xff]  ;;  %v4922_v55 = vld [vmem:[%s5439_s26 + $0x758] sm:$0xff]  ;;  %v4928_v57 = vld [vmem:[%s5445_s20 + $0x748] sm:$0xff] }
 0x2a0   : > { %v3562_v58 = vsub.f32 %v4907_v62, %v4915_v5  ;;  %v3563_v24 = vsub.f32 %v4908_v48, %v4916_v26  ;;  %v3564_v23 = vsub.f32 %v4909_v44, %v4917_v27  ;;  %v3565_v16 = vsub.f32 %v4910_v63, %v4918_v6  ;;  %v4923_v62 = vld [vmem:[%s5439_s26 + $0x760] sm:$0xff]  ;;  %v4924_v48 = vld [vmem:[%s5439_s26 + $0x768] sm:$0xff]  ;;  %v4925_v44 = vld [vmem:[%s5439_s26 + $0x770] sm:$0xff] }
 0x2a1   : > { %v3566_v29 = vand.u32 2147483647, %v3558_v10  ;;  %v7407_v50 = vadd.f32 %v3530_v12, %v7358_v43  ;;  %v3567_v53 = vand.u32 2147483647, %v3559_v14  ;;  %v3568_v31 = vand.u32 2147483647, %v3560_v49 }
 0x2a2   : > { %v3569_v45 = vand.u32 2147483647, %v3561_v19  ;;  %v7410_v25 = vadd.f32 %v3531_v13, %v7361_v22  ;;  %v3570_v17 = vand.u32 2147483647, %v3562_v58  ;;  %v3571_v15 = vand.u32 2147483647, %v3563_v24 }
 0x2a3   : > { %v3572_v30 = vand.u32 2147483647, %v3564_v23  ;;  %v3573_v41 = vand.u32 2147483647, %v3565_v16  ;;  %v3575_v20 = vadd.s32 1792, %v6029_v34  ;;  %v3576_v39 = vadd.s32 1792, %v6031_v36 }
 0x2a4   : > { %v3577_v43 = vadd.s32 1792, %v6033_v37  ;;  %v3578_v54 = vadd.s32 1792, %v6035_v42  ;;  %v3579_v18 = vadd.s32 1792, %v6040_v46  ;;  %v3580_v22 = vadd.s32 1792, %v6042_v51  ;;  %v4926_v63 = vld [vmem:[%s5439_s26 + $0x778] sm:$0xff]  ;;  %v4929_v8 = vld [vmem:[%s5445_s20 + $0x750] sm:$0xff] }
 0x2a5   : > { %v3581_v56 = vadd.s32 1792, %v6044_v40  ;;  %v3582_v59 = vadd.s32 1792, %v6050_v47  ;;  %vm3583_vm0 = vcmp.lt.s32.totalorder %v3575_v20, 2592  ;;  %vm3584_vm1 = vcmp.lt.s32.totalorder %v3576_v39, 2592  ;;  %v4930_v9 = vld [vmem:[%s5445_s20 + $0x758] sm:$0xff]  ;;  %v4931_v5 = vld [vmem:[%s5445_s20 + $0x760] sm:$0xff] }
 0x2a6   : > { %vm3585_vm2 = vcmp.lt.s32.totalorder %v3577_v43, 2592  ;;  %vm3586_vm3 = vcmp.lt.s32.totalorder %v3578_v54, 2592  ;;  %vm3587_vm4 = vcmp.lt.s32.totalorder %v3579_v18, 2592  ;;  %vm3588_vm5 = vcmp.lt.s32.totalorder %v3580_v22, 2592  ;;  %v4932_v27 = vld [vmem:[%s5445_s20 + $0x768] sm:$0xff]  ;;  %v4933_v6 = vld [vmem:[%s5445_s20 + $0x770] sm:$0xff] }
 0x2a7   : > { %vm3589_vm6 = vcmp.lt.s32.totalorder %v3581_v56, 2592  ;;  %vm3590_vm7 = vcmp.lt.s32.totalorder %v3582_v59, 2592  ;;  %v3591_v1 = vsel %vm3583_vm0, %v3566_v29, 0.0  ;;  %v3592_v2 = vsel %vm3584_vm1, %v3567_v53, 0.0  ;;  %v4934_v14 = vld [vmem:[%s5445_s20 + $0x778] sm:$0xff] }
 0x2a8   : > { %v3593_v3 = vsel %vm3585_vm2, %v3568_v31, 0.0  ;;  %v3594_v0 = vsel %vm3586_vm3, %v3569_v45, 0.0  ;;  %v3595_v4 = vsel %vm3587_vm4, %v3570_v17, 0.0  ;;  %v3596_v7 = vsel %vm3588_vm5, %v3571_v15, 0.0 }
 0x2a9   : > { %v3625_v10 = vsub.f32 %v4919_v52, %v4927_v60  ;;  %v3597_v12 = vsel %vm3589_vm6, %v3572_v30, 0.0  ;;  %v3598_v13 = vsel %vm3590_vm7, %v3573_v41, 0.0  ;;  %v7435_v26 = vadd.f32 %v3591_v1, %v7386_v11  ;;  %v4935_v52 = vld [vmem:[%s5439_s26 + $0x780] sm:$0xff] }
 0x2aa   : > { %v3626_v49 = vsub.f32 %v4920_v38, %v4928_v57  ;;  %v7441_v19 = vadd.f32 %v3592_v2, %v7392_v33  ;;  %v7444_v58 = vadd.f32 %v3593_v3, %v7395_v21  ;;  %v7447_v24 = vadd.f32 %v3594_v0, %v7398_v35  ;;  %v4936_v38 = vld [vmem:[%s5439_s26 + $0x788] sm:$0xff]  ;;  %v4943_v60 = vld [vmem:[%s5445_s20 + $0x780] sm:$0xff] }
 0x2ab   : > { %v7450_v23 = vadd.f32 %v3595_v4, %v7401_v32  ;;  %v7453_v16 = vadd.f32 %v3596_v7, %v7404_v28  ;;  %v3627_v11 = vsub.f32 %v4921_v61, %v4929_v8  ;;  %v3628_v29 = vsub.f32 %v4922_v55, %v4930_v9  ;;  %v4937_v61 = vld [vmem:[%s5439_s26 + $0x790] sm:$0xff]  ;;  %v4938_v55 = vld [vmem:[%s5439_s26 + $0x798] sm:$0xff]  ;;  %v4944_v57 = vld [vmem:[%s5445_s20 + $0x788] sm:$0xff] }
 0x2ac   : > { %v3629_v53 = vsub.f32 %v4923_v62, %v4931_v5  ;;  %v3630_v31 = vsub.f32 %v4924_v48, %v4932_v27  ;;  %v3631_v45 = vsub.f32 %v4925_v44, %v4933_v6  ;;  %v3632_v17 = vsub.f32 %v4926_v63, %v4934_v14  ;;  %v4939_v62 = vld [vmem:[%s5439_s26 + $0x7a0] sm:$0xff]  ;;  %v4940_v48 = vld [vmem:[%s5439_s26 + $0x7a8] sm:$0xff]  ;;  %v4941_v44 = vld [vmem:[%s5439_s26 + $0x7b0] sm:$0xff] }
 0x2ad   : > { %v3633_v33 = vand.u32 2147483647, %v3625_v10  ;;  %v7456_v15 = vadd.f32 %v3597_v12, %v7407_v50  ;;  %v3634_v21 = vand.u32 2147483647, %v3626_v49  ;;  %v3635_v35 = vand.u32 2147483647, %v3627_v11 }
 0x2ae   : > { %v3636_v30 = vand.u32 2147483647, %v3628_v29  ;;  %v7459_v32 = vadd.f32 %v3598_v13, %v7410_v25  ;;  %v3637_v41 = vand.u32 2147483647, %v3629_v53  ;;  %v3638_v28 = vand.u32 2147483647, %v3630_v31 }
 0x2af   : > { %v3639_v20 = vand.u32 2147483647, %v3631_v45  ;;  %v3640_v39 = vand.u32 2147483647, %v3632_v17  ;;  %v3642_v43 = vadd.s32 1856, %v6029_v34  ;;  %v3643_v54 = vadd.s32 1856, %v6031_v36 }
 0x2b0   : > { %v3644_v50 = vadd.s32 1856, %v6033_v37  ;;  %v3645_v18 = vadd.s32 1856, %v6035_v42  ;;  %v3646_v22 = vadd.s32 1856, %v6040_v46  ;;  %v3647_v25 = vadd.s32 1856, %v6042_v51  ;;  %v4942_v63 = vld [vmem:[%s5439_s26 + $0x7b8] sm:$0xff]  ;;  %v4945_v8 = vld [vmem:[%s5445_s20 + $0x790] sm:$0xff] }
 0x2b1   : > { %v3648_v56 = vadd.s32 1856, %v6044_v40  ;;  %v3649_v59 = vadd.s32 1856, %v6050_v47  ;;  %vm3650_vm8 = vcmp.lt.s32.totalorder %v3642_v43, 2592  ;;  %vm3651_vm9 = vcmp.lt.s32.totalorder %v3643_v54, 2592  ;;  %v4946_v9 = vld [vmem:[%s5445_s20 + $0x798] sm:$0xff]  ;;  %v4947_v5 = vld [vmem:[%s5445_s20 + $0x7a0] sm:$0xff] }
 0x2b2   : > { %vm3652_vm10 = vcmp.lt.s32.totalorder %v3644_v50, 2592  ;;  %vm3653_vm11 = vcmp.lt.s32.totalorder %v3645_v18, 2592  ;;  %vm3654_vm12 = vcmp.lt.s32.totalorder %v3646_v22, 2592  ;;  %vm3655_vm13 = vcmp.lt.s32.totalorder %v3647_v25, 2592  ;;  %v4948_v6 = vld [vmem:[%s5445_s20 + $0x7a8] sm:$0xff]  ;;  %v4949_v14 = vld [vmem:[%s5445_s20 + $0x7b0] sm:$0xff] }
 0x2b3   : > { %vm3656_vm14 = vcmp.lt.s32.totalorder %v3648_v56, 2592  ;;  %vm3657_vm15 = vcmp.lt.s32.totalorder %v3649_v59, 2592  ;;  %v3658_v1 = vsel %vm3650_vm8, %v3633_v33, 0.0  ;;  %v3659_v2 = vsel %vm3651_vm9, %v3634_v21, 0.0  ;;  %v4950_v49 = vld [vmem:[%s5445_s20 + $0x7b8] sm:$0xff] }
 0x2b4   : > { %v3660_v3 = vsel %vm3652_vm10, %v3635_v35, 0.0  ;;  %v3661_v0 = vsel %vm3653_vm11, %v3636_v30, 0.0  ;;  %v3662_v4 = vsel %vm3654_vm12, %v3637_v41, 0.0  ;;  %v3663_v7 = vsel %vm3655_vm13, %v3638_v28, 0.0 }
 0x2b5   : > { %v3692_v10 = vsub.f32 %v4935_v52, %v4943_v60  ;;  %v3664_v12 = vsel %vm3656_vm14, %v3639_v20, 0.0  ;;  %v3665_v13 = vsel %vm3657_vm15, %v3640_v39, 0.0  ;;  %v7484_v27 = vadd.f32 %v3658_v1, %v7435_v26  ;;  %v4951_v52 = vld [vmem:[%s5439_s26 + $0x7c0] sm:$0xff] }
 0x2b6   : > { %v3693_v11 = vsub.f32 %v4936_v38, %v4944_v57  ;;  %v7490_v29 = vadd.f32 %v3659_v2, %v7441_v19  ;;  %v7493_v53 = vadd.f32 %v3660_v3, %v7444_v58  ;;  %v7496_v31 = vadd.f32 %v3661_v0, %v7447_v24  ;;  %v4952_v38 = vld [vmem:[%s5439_s26 + $0x7c8] sm:$0xff]  ;;  %v4959_v60 = vld [vmem:[%s5445_s20 + $0x7c0] sm:$0xff] }
 0x2b7   : > { %v7499_v45 = vadd.f32 %v3662_v4, %v7450_v23  ;;  %v7502_v17 = vadd.f32 %v3663_v7, %v7453_v16  ;;  %v3694_v26 = vsub.f32 %v4937_v61, %v4945_v8  ;;  %v3695_v33 = vsub.f32 %v4938_v55, %v4946_v9  ;;  %v4953_v61 = vld [vmem:[%s5439_s26 + $0x7d0] sm:$0xff]  ;;  %v4954_v55 = vld [vmem:[%s5439_s26 + $0x7d8] sm:$0xff]  ;;  %v4960_v57 = vld [vmem:[%s5445_s20 + $0x7c8] sm:$0xff] }
 0x2b8   : > { %v3696_v21 = vsub.f32 %v4939_v62, %v4947_v5  ;;  %v3697_v35 = vsub.f32 %v4940_v48, %v4948_v6  ;;  %v3698_v30 = vsub.f32 %v4941_v44, %v4949_v14  ;;  %v3699_v41 = vsub.f32 %v4942_v63, %v4950_v49  ;;  %v4955_v62 = vld [vmem:[%s5439_s26 + $0x7e0] sm:$0xff]  ;;  %v4956_v48 = vld [vmem:[%s5439_s26 + $0x7e8] sm:$0xff]  ;;  %v4957_v44 = vld [vmem:[%s5439_s26 + $0x7f0] sm:$0xff] }
 0x2b9   : > { %v3700_v19 = vand.u32 2147483647, %v3692_v10  ;;  %v7505_v28 = vadd.f32 %v3664_v12, %v7456_v15  ;;  %v3701_v58 = vand.u32 2147483647, %v3693_v11  ;;  %v3702_v24 = vand.u32 2147483647, %v3694_v26 }
 0x2ba   : > { %v3703_v20 = vand.u32 2147483647, %v3695_v33  ;;  %v7508_v23 = vadd.f32 %v3665_v13, %v7459_v32  ;;  %v3704_v39 = vand.u32 2147483647, %v3696_v21  ;;  %v3705_v16 = vand.u32 2147483647, %v3697_v35 }
 0x2bb   : > { %v3706_v43 = vand.u32 2147483647, %v3698_v30  ;;  %v3707_v54 = vand.u32 2147483647, %v3699_v41  ;;  %v3709_v50 = vadd.s32 1920, %v6029_v34  ;;  %v3710_v18 = vadd.s32 1920, %v6031_v36 }
 0x2bc   : > { %v3711_v15 = vadd.s32 1920, %v6033_v37  ;;  %v3712_v22 = vadd.s32 1920, %v6035_v42  ;;  %v3713_v25 = vadd.s32 1920, %v6040_v46  ;;  %v3714_v32 = vadd.s32 1920, %v6042_v51  ;;  %v4958_v63 = vld [vmem:[%s5439_s26 + $0x7f8] sm:$0xff]  ;;  %v4961_v8 = vld [vmem:[%s5445_s20 + $0x7d0] sm:$0xff] }
 0x2bd   : > { %v3715_v56 = vadd.s32 1920, %v6044_v40  ;;  %v3716_v59 = vadd.s32 1920, %v6050_v47  ;;  %vm3717_vm0 = vcmp.lt.s32.totalorder %v3709_v50, 2592  ;;  %vm3718_vm1 = vcmp.lt.s32.totalorder %v3710_v18, 2592  ;;  %v4962_v9 = vld [vmem:[%s5445_s20 + $0x7d8] sm:$0xff]  ;;  %v4963_v5 = vld [vmem:[%s5445_s20 + $0x7e0] sm:$0xff] }
 0x2be   : > { %vm3719_vm2 = vcmp.lt.s32.totalorder %v3711_v15, 2592  ;;  %vm3720_vm3 = vcmp.lt.s32.totalorder %v3712_v22, 2592  ;;  %vm3721_vm4 = vcmp.lt.s32.totalorder %v3713_v25, 2592  ;;  %vm3722_vm5 = vcmp.lt.s32.totalorder %v3714_v32, 2592  ;;  %v4964_v14 = vld [vmem:[%s5445_s20 + $0x7e8] sm:$0xff]  ;;  %v4965_v49 = vld [vmem:[%s5445_s20 + $0x7f0] sm:$0xff] }
 0x2bf   : > { %vm3723_vm6 = vcmp.lt.s32.totalorder %v3715_v56, 2592  ;;  %vm3724_vm7 = vcmp.lt.s32.totalorder %v3716_v59, 2592  ;;  %v3725_v1 = vsel %vm3717_vm0, %v3700_v19, 0.0  ;;  %v3726_v2 = vsel %vm3718_vm1, %v3701_v58, 0.0  ;;  %v4966_v11 = vld [vmem:[%s5445_s20 + $0x7f8] sm:$0xff] }
 0x2c0   : > { %v3727_v3 = vsel %vm3719_vm2, %v3702_v24, 0.0  ;;  %v3728_v0 = vsel %vm3720_vm3, %v3703_v20, 0.0  ;;  %v3729_v4 = vsel %vm3721_vm4, %v3704_v39, 0.0  ;;  %v3730_v7 = vsel %vm3722_vm5, %v3705_v16, 0.0 }
 0x2c1   : > { %v3759_v10 = vsub.f32 %v4951_v52, %v4959_v60  ;;  %v3731_v12 = vsel %vm3723_vm6, %v3706_v43, 0.0  ;;  %v3732_v13 = vsel %vm3724_vm7, %v3707_v54, 0.0  ;;  %v3733_v6 = vadd.f32 %v3725_v1, %v7484_v27  ;;  %v3811_v60 = vld [vmem:[%s5454_s21 + $0x18] sm:$0xff]  ;;  %v3812_v1 = vld [vmem:[%s5454_s21 + $0x20] sm:$0xff] }
 0x2c2   : > { %v3760_v26 = vsub.f32 %v4952_v38, %v4960_v57  ;;  %v3734_v33 = vadd.f32 %v3726_v2, %v7490_v29  ;;  %v3735_v21 = vadd.f32 %v3727_v3, %v7493_v53  ;;  %v3736_v35 = vadd.f32 %v3728_v0, %v7496_v31  ;;  %v3810_v38 = vld [vmem:[%s5454_s21 + $0x10] sm:$0xff]  ;;  %v3813_v2 = vld [vmem:[%s5454_s21 + $0x28] sm:$0xff] }
 0x2c3   : > { %v3737_v30 = vadd.f32 %v3729_v4, %v7499_v45  ;;  %v3738_v41 = vadd.f32 %v3730_v7, %v7502_v17  ;;  %v3761_v19 = vsub.f32 %v4953_v61, %v4961_v8  ;;  %v3762_v58 = vsub.f32 %v4954_v55, %v4962_v9  ;;  %v3814_v3 = vld [vmem:[%s5454_s21 + $0x30] sm:$0xff]  ;;  %v3815_v4 = vld [vmem:[%s5454_s21 + $0x38] sm:$0xff] }
 0x2c4   : > { %v3763_v24 = vsub.f32 %v4955_v62, %v4963_v5  ;;  %v3764_v20 = vsub.f32 %v4956_v48, %v4964_v14  ;;  %v3765_v39 = vsub.f32 %v4957_v44, %v4965_v49  ;;  %v3766_v27 = vsub.f32 %v4958_v63, %v4966_v11 }
 0x2c5   : > { %v3767_v16 = vand.u32 2147483647, %v3759_v10  ;;  %v3739_v43 = vadd.f32 %v3731_v12, %v7505_v28  ;;  %v3768_v54 = vand.u32 2147483647, %v3760_v26  ;;  %v3769_v50 = vand.u32 2147483647, %v3761_v19 }
 0x2c6   : > { %v3770_v29 = vand.u32 2147483647, %v3762_v58  ;;  %v3740_v53 = vadd.f32 %v3732_v13, %v7508_v23  ;;  %v3771_v18 = vand.u32 2147483647, %v3763_v24  ;;  %v3772_v31 = vand.u32 2147483647, %v3764_v20 }
 0x2c7   : > { %v3773_v15 = vand.u32 2147483647, %v3765_v39  ;;  %v3774_v45 = vand.u32 2147483647, %v3766_v27  ;;  %v3776_v17 = vadd.s32 1984, %v6029_v34  ;;  %v3777_v22 = vadd.s32 1984, %v6031_v36 }
 0x2c8   : > { %v3778_v25 = vadd.s32 1984, %v6033_v37  ;;  %v3779_v32 = vadd.s32 1984, %v6035_v42  ;;  %v3780_v28 = vadd.s32 1984, %v6040_v46  ;;  %v3781_v56 = vadd.s32 1984, %v6042_v51  ;;  %v3808_v42 = vld [vmem:[%s5454_s21] sm:$0xff]  ;;  %v3809_v46 = vld [vmem:[%s5454_s21 + $0x8] sm:$0xff] }
 0x2c9   : > { %v3782_v23 = vadd.s32 1984, %v6044_v40  ;;  %v3783_v52 = vadd.s32 1984, %v6050_v47  ;;  %vm3784_vm8 = vcmp.lt.s32.totalorder %v3776_v17, 2592  ;;  %vm3785_vm9 = vcmp.lt.s32.totalorder %v3777_v22, 2592 }
 0x2ca   : > { %vm3786_vm10 = vcmp.lt.s32.totalorder %v3778_v25, 2592  ;;  %vm3787_vm11 = vcmp.lt.s32.totalorder %v3779_v32, 2592  ;;  %vm3788_vm12 = vcmp.lt.s32.totalorder %v3780_v28, 2592  ;;  %vm3789_vm13 = vcmp.lt.s32.totalorder %v3781_v56, 2592 }
 0x2cb   : > { %vm3790_vm14 = vcmp.lt.s32.totalorder %v3782_v23, 2592  ;;  %vm3791_vm15 = vcmp.lt.s32.totalorder %v3783_v52, 2592  ;;  %v3792_v34 = vsel %vm3784_vm8, %v3767_v16, 0.0  ;;  %v3793_v36 = vsel %vm3785_vm9, %v3768_v54, 0.0 }
 0x2cc   : > { %v3794_v37 = vsel %vm3786_vm10, %v3769_v50, 0.0  ;;  %v3795_v51 = vsel %vm3787_vm11, %v3770_v29, 0.0  ;;  %v3796_v40 = vsel %vm3788_vm12, %v3771_v18, 0.0  ;;  %v3797_v47 = vsel %vm3789_vm13, %v3772_v31, 0.0 }
 0x2cd   : > { %v3798_v59 = vsel %vm3790_vm14, %v3773_v15, 0.0  ;;  %v3799_v61 = vsel %vm3791_vm15, %v3774_v45, 0.0  ;;  %v3800_v55 = vadd.f32 %v3792_v34, %v3733_v6  ;;  %v3801_v62 = vadd.f32 %v3793_v36, %v3734_v33 }
 0x2ce   : > { %v3802_v57 = vadd.f32 %v3794_v37, %v3735_v21  ;;  %v3803_v48 = vadd.f32 %v3795_v51, %v3736_v35  ;;  %v3804_v44 = vadd.f32 %v3796_v40, %v3737_v30  ;;  %v3805_v63 = vadd.f32 %v3797_v47, %v3738_v41 }
 0x2cf   : > { %v3806_v0 = vadd.f32 %v3798_v59, %v3739_v43  ;;  %v3807_v7 = vadd.f32 %v3799_v61, %v3740_v53  ;;  %v3816_v8 = vadd.f32 %v3808_v42, %v3800_v55  ;;  %v3817_v9 = vadd.f32 %v3809_v46, %v3801_v62 }
 0x2d0   : > { %v3818_v5 = vadd.f32 %v3810_v38, %v3802_v57  ;;  %v3819_v10 = vadd.f32 %v3811_v60, %v3803_v48  ;;  %v3820_v12 = vadd.f32 %v3812_v1, %v3804_v44  ;;  %v3821_v13 = vadd.f32 %v3813_v2, %v3805_v63 }
 0x2d1   : > { %v3822_v6 = vadd.f32 %v3814_v3, %v3806_v0  ;;  %v3823_v14 = vadd.f32 %v3815_v4, %v3807_v7  ;;  %3824 = vst [vmem:[%s5454_s21] sm:$0xff] %v3816_v8  ;;  %3825 = vst [vmem:[%s5454_s21 + $0x8] sm:$0xff] %v3817_v9 }
 0x2d2   : > { %3826 = vst [vmem:[%s5454_s21 + $0x10] sm:$0xff] %v3818_v5  ;;  %3827 = vst [vmem:[%s5454_s21 + $0x18] sm:$0xff] %v3819_v10 }
 0x2d3   : > { %3828 = vst [vmem:[%s5454_s21 + $0x20] sm:$0xff] %v3820_v12  ;;  %3829 = vst [vmem:[%s5454_s21 + $0x28] sm:$0xff] %v3821_v13 }
 0x2d4   : > { %3830 = vst [vmem:[%s5454_s21 + $0x30] sm:$0xff] %v3822_v6  ;;  %3831 = vst [vmem:[%s5454_s21 + $0x38] sm:$0xff] %v3823_v14 }
 0x2d5 PF: > { %s4974_s27 = sshll.u32 %s5221_s15, 10  ;;  %s3846_s28 = sshll.u32 %s5454_s21, 4  ;;  %s7574_s28 = int_to_ptr.vmem [resolvable:$true] %s3846_s28 }
 0x2d6   : > { %s7571_s19 = scalar_lea.hbm %s7636_s2, %s4974_s27  ;;  %s7578_s7 = scalar_lea.sflag [#allocation4], %s241_s5 }
 0x2d7   : > { %s5119_s8 = scalar_lea.vmem %s7574_s28, 1024  ;;  %p7645_p11 = scmp.ne.s32.totalorder %s7643_s3, 0 }
 0x2d8   : > { %p5120_p9 = scmp.ne.s32.totalorder %s7574_s28, %s5119_s8  ;;  %s5238_s15 = smov [#allocation7]  }
 0x2d9   : > { %s5123_s18 = sshll.u32 %s5238_s15, 4  ;;  %s5124_s18 = int_to_ptr.vmem [resolvable:$false] %s5123_s18 }
 0x2da   : > { %p5121_p12 = pnand %p5120_p9, %p7645_p11  ;;  %s5125_s22 = scalar_lea.vmem %s5124_s18, 2048 }
 0x2db   : > { %p5126_p1 = scmp.lt.s32.totalorder %s7574_s28, %s5124_s18  ;;  %p5127_p2 = scmp.lt.s32.totalorder %s5125_s22, %s5119_s8 }
 0x2dc   : > { %p5122_p13 = pneg %p5121_p12 }
 0x2dd   : > { %p5128_p3 = por %p5127_p2, %p5126_p1 }
 0x2df   : > { %p5129_p10 = pnand %p5128_p3, %p5122_p13 }
 0x2e1   : > { %5132 = shalt.err (!%p5129_p10)
}
 0x2e2   : > { %s5133_s26 = scalar_lea.hbm %s7571_s19, 1024  ;;  %s5137_s5 = scalar_lea.hbm %s7636_s2, 2048 }
 0x2e3   : > { %p5134_p0 = scmp.ne.s32.totalorder %s7571_s19, %s5133_s26  ;;  %p5138_p7 = scmp.lt.u32.totalorder %s7571_s19, %s7636_s2 }
 0x2e4   : > { %p5139_p8 = scmp.lt.u32.totalorder %s5137_s5, %s5133_s26  ;;  %p5141_p9 = scmp.lt.u32.totalorder %s5133_s26, %s7571_s19 }
 0x2e5   : > { %p5135_p5 = pnand %p5134_p0, %p7645_p11 }
 0x2e6   : > { %p5140_p6 = por %p5139_p8, %p5138_p7 }
 0x2e7   : > { %p5136_p4 = pneg %p5135_p5 }
 0x2e8   : > { %p5142_p12 = por %p5141_p9, %p5140_p6 }
 0x2ea   : > { %p5143_p13 = pnand %p5142_p12, %p5136_p4 }
 0x2ec   : > { %5146 = shalt.err (!%p5143_p13)
}
 0x2ed   : > { %s5239_s25 = smov 128   ;;  %s5240_s27 = smov 8  }
 0x2ee   : > { %4977 = dma.vmem_to_hbm [thread:$0]  (%p7645_p11), %s7574_s28, 1024, %s7571_s19, %s7578_s7, %s5239_s25, %s5239_s25, %s5240_s27  }
 0x2ef PF: > { %s3861_s12 = sand.u32 1, %s5197_s9   ;;  %p7646_p1 = scmp.ne.s32.totalorder %s7644_s4, 0 }
 0x2f0   : > { %p7647_p2 = scmp.ge.s32.totalorder %s5229_s17, 2  ;;  %s3862_s23 = scalar_lea.sflag [#allocation4], %s3861_s12 }
 0x2f2   : > { %p4980_p3 = pnand %p7647_p2, %p7646_p1 }
 0x2f4   : > { %5192 = dma.done.wait (!%p4980_p3), %s3862_s23, 1024  }
 0x2f5   : > { %5194 = vsyncadd (!%p4980_p3), %s3862_s23, 4294966272  ;;  %s21_s17 = sadd.s32 1, %s5229_s17   ;;  %s7648_s3 = sld [smem:[#allocation11_spill]] }
 0x2f6   : > { %p18_p10 = scmp.ge.s32.totalorder %s21_s17, 4   ;;  %s7649_s9 = smov %s5201_s10 }
 0x2f7   : > { %s7650_s10 = smov %s5205_s11  ;;  %s7651_s11 = smov %s5328_s29 }
 0x2f8   : > { %s7652_s12 = smov %s5213_s13  ;;  %s7653_s13 = smov %s5217_s14 }
 0x2f9   : > { %s7654_s14 = smov %s5331_s30  ;;  %s7655_s15 = smov %s5225_s16 }
 0x2fa   :  { %20 = sbr.rel (!%p18_p10) target bundleno = 10 (0xa), region = 222 }
 0x2fb   : > { %s7656_s16 = smov %s7648_s3 }
 0x301   :  { %3867 = vsyncpa [#allocation3], 1 }
 0x302   :  { %3869 = vsyncpa [#allocation3 + $0x1], 1 }
 0x303   :  { %3870 = vsyncpa [#allocation6], 1 }
 0x304   :  { %3872 = vsyncpa [#allocation6 + $0x1], 1 }
 0x305   :  { %3873 = vsyncpa [#allocation4], 1 }
 0x306   :  { %3875 = vsyncpa [#allocation4 + $0x1], 1 }

</bundles_post_ra>
